<compile_context>
chip_gen: v5e
topology: v5e:2x2
jax: 0.10.0
libtpu: 0.0.40
codegen_flags: <defaults>
</compile_context>

<pallas_src>
import jax
import jax.numpy as jnp
from jax.experimental import pallas as pl
from jax.experimental.pallas import tpu as pltpu

C_DIM = 512
HIDDEN = 256
NUM_BRANCH = 6
NUM_HEAD = NUM_BRANCH + 1          # 6 control branches + 1 vel_out head
DIM = 1
OUT_WIDTH = 128                    # lane-dense output tile width
MAX_THROTTLE = 0.75                # stands in for config.max_throttle

# vec_pack (1, VEC_W) f32 column layout; every offset/width is a multiple of 128 lanes.
_VIN_W1_OFF = 0                               # (1, 256)  vel_in layer-1 weight (in_dim == 1)
_VIN_B1_OFF = _VIN_W1_OFF + HIDDEN            # (1, 256)  vel_in layer-1 bias
_VIN_B2_OFF = _VIN_B1_OFF + HIDDEN            # (1, 512)  vel_in layer-2 bias
_S_VIN2_OFF = _VIN_B2_OFF + C_DIM             # (1, 512)  vel_in layer-2 dequant scale
_B1_OFF     = _S_VIN2_OFF + C_DIM             # (1, 1792) fused layer-1 bias (7 heads)
_S_W1_OFF   = _B1_OFF + NUM_HEAD * HIDDEN     # (1, 1792) fused layer-1 dequant scale
_OSCALE_OFF = _S_W1_OFF + NUM_HEAD * HIDDEN   # (1, 128)  output scale [2, max_throttle, 1, 1, 0..]
_OSHIFT_OFF = _OSCALE_OFF + OUT_WIDTH         # (1, 128)  output shift [-1, 0, 0, 0, 0..]
VEC_W       = _OSHIFT_OFF + OUT_WIDTH         # 5376


def _as_bf16(x):
    """Weight dequant/cast to bf16 for the MXU.  int8 goes through f32 (guaranteed-legal
    lowering); exact for |v| <= 127, so post-dot per-channel scaling is lossless."""
    if x.dtype == jnp.bfloat16:
        return x
    return x.astype(jnp.float32).astype(jnp.bfloat16)


def _cilrs_kernel(vel_ref, cmd_ref, c_ref, vec_ref, hb_ref,
                  vin_w2_ref, w1_ref, w2_ref, w3_ref, out_ref):
    f32, bf16 = jnp.float32, jnp.bfloat16
    b_pad = vel_ref.shape[0]

    vel = vel_ref[...]                                   # (Bp, 1)  f32
    cmd = cmd_ref[...]                                   # (Bp, 1)  int32

    # c = sum(c_list) folded into the kernel (single stacked DMA).
    c = jnp.sum(c_ref[...], axis=0)                      # (Bp, 512) f32

    # One packed DMA of all small f32 vectors; static, 128-lane-aligned slices.
    vin_w1 = vec_ref[:, _VIN_W1_OFF:_VIN_W1_OFF + HIDDEN]
    vin_b1 = vec_ref[:, _VIN_B1_OFF:_VIN_B1_OFF + HIDDEN]
    vin_b2 = vec_ref[:, _VIN_B2_OFF:_VIN_B2_OFF + C_DIM]
    s_vin2 = vec_ref[:, _S_VIN2_OFF:_S_VIN2_OFF + C_DIM]
    b1     = vec_ref[:, _B1_OFF:_B1_OFF + NUM_HEAD * HIDDEN]
    s_w1   = vec_ref[:, _S_W1_OFF:_S_W1_OFF + NUM_HEAD * HIDDEN]
    oscale = vec_ref[:, _OSCALE_OFF:_OSCALE_OFF + OUT_WIDTH]
    oshift = vec_ref[:, _OSHIFT_OFF:_OSHIFT_OFF + OUT_WIDTH]

    # One packed per-head DMA: rows = [layer-2 bias, layer-3 bias (lane-padded), layer-2 scale].
    b2 = hb_ref[:, 0:1, :]                               # (7, 1, 256)
    b3 = hb_ref[:, 1:2, 0:4]                             # (7, 1, 4)
    s2 = hb_ref[:, 2:3, :]                               # (7, 1, 256)

    # vel_in: Linear(1->256) -> ReLU -> Linear(256->512).  Layer 1 has in_dim == 1, so it
    # is a broadcast outer product (VPU only); layer 2 is an MXU matmul with post-dot dequant.
    h = jnp.maximum(vel * vin_w1 + vin_b1, 0.0)                                   # (Bp, 256)
    vin = (jnp.dot(h.astype(bf16), _as_bf16(vin_w2_ref[...]),
                   preferred_element_type=f32) * s_vin2 + vin_b2)                 # (Bp, 512)

    # PyTorch `encoding += vel_in(...)` aliases c in-place, so the command branches
    # AND vel_out all see (c + vel_in(velocity)).
    enc = (c + vin).astype(bf16)                                                  # (Bp, 512)

    # Fused layer 1 for all 7 heads (6 branches + vel_out): one wide matmul + dequant + bias.
    h1w = jnp.maximum(
        jnp.dot(enc, _as_bf16(w1_ref[...]), preferred_element_type=f32) * s_w1 + b1,
        0.0)                                                                      # (Bp, 1792)
    # Lane-aligned (multiples of 256) split into heads -> (7, Bp, 256).
    h1 = jnp.stack([h1w[:, n * HIDDEN:(n + 1) * HIDDEN] for n in range(NUM_HEAD)],
                   axis=0)

    # Layers 2 and 3, batched over the head axis (canonical leading-batch einsum).
    h2 = jnp.maximum(
        jnp.einsum('nbh,nhk->nbk', h1.astype(bf16), _as_bf16(w2_ref[...]),
                   preferred_element_type=f32) * s2 + b2,
        0.0)                                                                      # (7, Bp, 256)
    logits = jnp.einsum('nbh,nhk->nbk', h2.astype(bf16), w3_ref[...],
                        preferred_element_type=f32) + b3                          # (7, Bp, 4)

    # Command one-hot over the 6 branches (branch i fires iff cmd == i + 1).
    ids = jax.lax.broadcasted_iota(jnp.int32, (NUM_BRANCH, b_pad, 1), 0)
    mask = (cmd[None, :, :] == ids + 1).astype(f32)                               # (6, Bp, 1)
    ctrl = jnp.sum(jax.nn.sigmoid(logits[:NUM_BRANCH]) * mask, axis=0)            # (Bp, 4)
    vpred = logits[NUM_BRANCH, :, 0:1]                                            # (Bp, 1)

    # Single lane-dense output tile with the output scaling folded in:
    #   raw = [ctrl0, ctrl1, ctrl2, vel_pred, 0...]; out = raw * scale + shift.
    # (raw column 3 holds vel_pred, never the padded-branch sigmoid(0) channel.)
    pad = jnp.zeros((b_pad, OUT_WIDTH - 4), f32)
    raw = jnp.concatenate([ctrl[:, :3], vpred, pad], axis=1)
    out_ref[...] = raw * oscale + oshift


def _select_quant_dtype():
    """int8 weight storage on v5e/v6e (halves HBM bytes on this mem-bound kernel, int8 is
    MXU-native there); bf16 elsewhere.
    # TODO(synk): on v7x use fp8 (e4m3) weight storage instead of int8 (no integer MXU path)."""
    try:
        kind = jax.devices()[0].device_kind.lower()
    except Exception:
        return jnp.bfloat16
    if 'v5' in kind or 'v6' in kind:
        return jnp.int8
    return jnp.bfloat16


def _quantize_cols(w, qdtype):
    """Symmetric per-output-channel (last-dim) quantization over the contraction (-2) axis.
    Returns (q, scale); dequant is applied post-dot, so dot(x, q)*scale == dot(x, q*scale)."""
    if qdtype == jnp.int8:
        amax = jnp.max(jnp.abs(w), axis=-2, keepdims=True)
        scale = jnp.maximum(amax, 1e-12) / 127.0
        q = jnp.clip(jnp.round(w / scale), -127, 127).astype(jnp.int8)
        return q, scale
    return w.astype(qdtype), jnp.ones_like(w[..., :1, :])


def pack_params(params, qdtype=jnp.bfloat16):
    """PyTorch-style per-layer params -> packed kernel inputs.

    Returns (vec_pack, hb_pack, vin_w2_q, w1_q, w2_q, w3_b):
      vec_pack (1, 5376) f32 : vel_in layer-1 w/b, vel_in layer-2 bias+scale,
                               fused layer-1 bias+scale, output scale/shift.
      hb_pack  (7, 3, 256) f32: per-head [layer-2 bias, layer-3 bias (lane-padded),
                               layer-2 dequant scale].
      vin_w2_q (256, 512), w1_q (512, 1792), w2_q (7, 256, 256): qdtype weights.
      w3_b     (7, 256, 4) bf16 (tiny; kept bf16, output-padded to 4 lanes).
    """
    (vin_w1, vin_b1, vin_w2, vin_b2,
     vout_w1, vout_b1, vout_w2, vout_b2, vout_w3, vout_b3,
     bw1, bb1, bw2, bb2, bw3, bb3) = params
    f32 = jnp.float32

    # Fuse 6 branch heads + the vel_out head.
    w1_all = jnp.concatenate([bw1[i] for i in range(NUM_BRANCH)] + [vout_w1], axis=1)  # (512,1792)
    b1_all = jnp.concatenate([bb1[i] for i in range(NUM_BRANCH)] + [vout_b1], axis=1)  # (1,1792)
    w2_all = jnp.concatenate([bw2, vout_w2[None]], axis=0)                             # (7,256,256)
    b2_all = jnp.concatenate([bb2, vout_b2[None]], axis=0)                             # (7,1,256)
    w3_all = jnp.concatenate([jnp.pad(bw3, ((0, 0), (0, 0), (0, 1))),
                              jnp.pad(vout_w3, ((0, 0), (0, 3)))[None]], axis=0)       # (7,256,4)
    b3_all = jnp.concatenate([jnp.pad(bb3, ((0, 0), (0, 0), (0, 1))),
                              jnp.pad(vout_b3, ((0, 0), (0, 3)))[None]], axis=0)       # (7,1,4)

    # Per-output-channel weight quantization (scales consumed post-dot in the kernel).
    w1_q, s_w1 = _quantize_cols(w1_all, qdtype)          # (512,1792), (1,1792)
    vin_w2_q, s_vin2 = _quantize_cols(vin_w2, qdtype)    # (256,512),  (1,512)
    w2_q, s_w2 = _quantize_cols(w2_all, qdtype)          # (7,256,256),(7,1,256)
    w3_b = w3_all.astype(jnp.bfloat16)

    # Output scale/shift: steer = c0*2 - 1, throttle = c1*max_throttle, brake = c2, vel = col3.
    out_scale = (jnp.zeros((OUT_WIDTH,), f32)
                 .at[0].set(2.0).at[1].set(MAX_THROTTLE).at[2].set(1.0).at[3].set(1.0))
    out_shift = jnp.zeros((OUT_WIDTH,), f32).at[0].set(-1.0)

    vec_pack = jnp.concatenate([
        vin_w1.reshape(-1).astype(f32),
        vin_b1.reshape(-1).astype(f32),
        vin_b2.reshape(-1).astype(f32),
        s_vin2.reshape(-1).astype(f32),
        b1_all.reshape(-1).astype(f32),
        s_w1.reshape(-1).astype(f32),
        out_scale, out_shift])[None, :]                  # (1, VEC_W)
    assert vec_pack.shape == (1, VEC_W)

    hb_pack = jnp.stack([
        b2_all[:, 0, :].astype(f32),
        jnp.pad(b3_all[:, 0, :], ((0, 0), (0, HIDDEN - 4))).astype(f32),
        s_w2[:, 0, :].astype(f32)], axis=1)              # (7, 3, 256)

    return (vec_pack, hb_pack, vin_w2_q, w1_q, w2_q, w3_b)


def cilrs_forward(c_list, velocity, command, packed_params):
    """CILRS.forward: c = sum(c); controller(c, velocity, command); scaled outputs."""
    B = c_list[0].shape[0]
    Bp = ((B + 7) // 8) * 8                      # pad batch to a full sublane tile

    def pad_rows(x):
        if Bp == B:
            return x
        return jnp.pad(x, ((0, Bp - B),) + ((0, 0),) * (x.ndim - 1))

    c_stack = jnp.stack([pad_rows(c.astype(jnp.float32)) for c in c_list], axis=0)
    vel = pad_rows(velocity.reshape(B, 1).astype(jnp.float32))
    cmd = pad_rows(command.reshape(B, 1).astype(jnp.int32))  # padded rows: cmd=0 -> no branch fires

    inputs = (vel, cmd, c_stack) + tuple(packed_params)
    vmem = pl.BlockSpec(memory_space=pltpu.MemorySpace.VMEM)

    # VMEM budget: ~1.5 MiB (int8) / ~3 MiB (bf16) resident weights + <6 MiB dequant temps
    # and activations -- far under the 32 MiB scoped limit and every generation's physical
    # VMEM (64 MiB v7x, 128 MiB v5e/v6e).  No tiling needed unless B grows past ~256, at
    # which point add a "parallel" batch grid axis.
    # TODO(synk): P10 cross-pallas_call weight prefetch -- a tiny start-kernel issues
    # pltpu.make_async_copy of the packed weight bundle into SEMAPHORE/VMEM-space outputs
    # while the upstream image CNN runs, and this call just waits the semaphore; omitted
    # because this standalone harness has no upstream work to hide the DMA behind.
    # TODO(synk): on v7x, split the (7 padded to 8) heads across the two TensorCores with a
    # size-2 "parallel" grid axis and per-group weight BlockSpecs; skipped on 1-TC v5e/v6e
    # where extra grid steps only add overhead.
    out = pl.pallas_call(
        _cilrs_kernel,
        out_shape=jax.ShapeDtypeStruct((Bp, OUT_WIDTH), jnp.float32),
        in_specs=[vmem] * len(inputs),
        out_specs=vmem,
        compiler_params=pltpu.CompilerParams(vmem_limit_bytes=32 * 1024 * 1024),
    )(*inputs)

    steer = out[:B, 0]
    throttle = out[:B, 1]
    brake = out[:B, 2]
    velocity_pred = out[:B, 3:4]
    return steer, throttle, brake, velocity_pred


def _linear_init(key, fan_in, fan_out):
    k1, k2 = jax.random.split(key)
    bound = 1.0 / (fan_in ** 0.5)
    w = jax.random.uniform(k1, (fan_in, fan_out), jnp.float32, -bound, bound)
    b = jax.random.uniform(k2, (1, fan_out), jnp.float32, -bound, bound)
    return w, b


def init_params(key):
    keys = jax.random.split(key, 5 + 3 * NUM_BRANCH)
    vin_w1, vin_b1 = _linear_init(keys[0], DIM, HIDDEN)
    vin_w2, vin_b2 = _linear_init(keys[1], HIDDEN, C_DIM)
    vout_w1, vout_b1 = _linear_init(keys[2], C_DIM, HIDDEN)
    vout_w2, vout_b2 = _linear_init(keys[3], HIDDEN, HIDDEN)
    vout_w3, vout_b3 = _linear_init(keys[4], HIDDEN, DIM)
    bw1, bb1, bw2, bb2, bw3, bb3 = [], [], [], [], [], []
    for i in range(NUM_BRANCH):
        w1, b1 = _linear_init(keys[5 + 3 * i + 0], C_DIM, HIDDEN)
        w2, b2 = _linear_init(keys[5 + 3 * i + 1], HIDDEN, HIDDEN)
        w3, b3 = _linear_init(keys[5 + 3 * i + 2], HIDDEN, 3)
        bw1.append(w1); bb1.append(b1); bw2.append(w2)
        bb2.append(b2); bw3.append(w3); bb3.append(b3)
    return (
        vin_w1, vin_b1, vin_w2, vin_b2,
        vout_w1, vout_b1, vout_w2, vout_b2, vout_w3, vout_b3,
        jnp.stack(bw1), jnp.stack(bb1), jnp.stack(bw2),
        jnp.stack(bb2), jnp.stack(bw3), jnp.stack(bb3),
    )


def reference_forward(c_list, velocity, command, params, qdtype):
    """Pure-JAX reference mirroring the PyTorch module at the kernel's precision
    (same per-channel weight quantization, bf16 matmul inputs, f32 accumulation)."""
    (vin_w1, vin_b1, vin_w2, vin_b2,
     vw1, vb1, vw2, vb2, vw3, vb3,
     bw1, bb1, bw2, bb2, bw3, bb3) = params
    f32, bf16 = jnp.float32, jnp.bfloat16

    def mmq(x, w):
        q, s = _quantize_cols(w, qdtype)
        return jnp.dot(x.astype(bf16), q.astype(bf16), preferred_element_type=f32) * s

    def mm_bf(x, w):
        return jnp.dot(x.astype(bf16), w.astype(bf16), preferred_element_type=f32)

    c = sum(c_list).astype(f32)
    B = c.shape[0]
    v = velocity.reshape(B, 1).astype(f32)
    h = jax.nn.relu(v * vin_w1 + vin_b1)
    enc = c + (mmq(h, vin_w2) + vin_b2)     # in-place aliasing: vel_out sees enc too
    ctrl = jnp.zeros((B, 3), f32)
    for i in range(NUM_BRANCH):
        h1 = jax.nn.relu(mmq(enc, bw1[i]) + bb1[i])
        h2 = jax.nn.relu(mmq(h1, bw2[i]) + bb2[i])
        out = jax.nn.sigmoid(mm_bf(h2, bw3[i]) + bb3[i])
        mask = (command.reshape(B, 1) == (i + 1)).astype(f32)
        ctrl = ctrl + out * mask
    g1 = jax.nn.relu(mmq(enc, vw1) + vb1)
    g2 = jax.nn.relu(mmq(g1, vw2) + vb2)
    vpred = mm_bf(g2, vw3) + vb3
    steer = ctrl[:, 0] * 2.0 - 1.0
    throttle = ctrl[:, 1] * MAX_THROTTLE
    brake = ctrl[:, 2]
    return steer, throttle, brake, vpred


if __name__ == "__main__":
    key = jax.random.PRNGKey(0)
    kc1, kc2, kv, kcmd, kp = jax.random.split(key, 5)
    B = 4
    # `c` arrives as a list of latent codes (one per camera) that CILRS.forward sums.
    c_list = [
        jax.random.normal(kc1, (B, C_DIM), jnp.float32) * 0.1,
        jax.random.normal(kc2, (B, C_DIM), jnp.float32) * 0.1,
    ]
    velocity = jax.random.uniform(kv, (B,), jnp.float32, 0.0, 10.0)
    command = jax.random.randint(kcmd, (B,), 1, NUM_BRANCH + 1)  # values in [1, 6]
    params = init_params(kp)

    qdtype = _select_quant_dtype()           # int8 on v5e/v6e, bf16 otherwise
    packed = pack_params(params, qdtype)

    out = cilrs_forward(c_list, velocity, command, packed)
    out = jax.block_until_ready(out)

    # Reference uses the identical quantized weights, so the check validates the kernel
    # (packing/fusion/aliasing), not the quantization error itself.
    ref = reference_forward(c_list, velocity, command, params, qdtype)
    for got, want in zip(out, ref):
        assert got.shape == want.shape, (got.shape, want.shape)
        assert jnp.allclose(got, want, atol=5e-3, rtol=5e-3), (
            float(jnp.max(jnp.abs(got - want))))

    print("KERNEL_OK")
</pallas_src>

<mosaic_0001>
module attributes {stable_mosaic.version = 11 : i64} {
  func.func @_cilrs_kernel(%arg0: memref<8x1xf32, #tpu.memory_space<vmem>>, %arg1: memref<8x1xi32, #tpu.memory_space<vmem>>, %arg2: memref<2x8x512xf32, #tpu.memory_space<vmem>>, %arg3: memref<1x5376xf32, #tpu.memory_space<vmem>>, %arg4: memref<7x3x256xf32, #tpu.memory_space<vmem>>, %arg5: memref<256x512xbf16, #tpu.memory_space<vmem>>, %arg6: memref<512x1792xbf16, #tpu.memory_space<vmem>>, %arg7: memref<7x256x256xbf16, #tpu.memory_space<vmem>>, %arg8: memref<7x256x4xbf16, #tpu.memory_space<vmem>>, %arg9: memref<8x128xf32, #tpu.memory_space<vmem>>) attributes {dimension_semantics = [], scalar_prefetch = 0 : i64, scratch_operands = 0 : i64, tpu.core_type = #tpu.core_type<tc>} {
    %c0 = arith.constant 0 : index
    %c0_0 = arith.constant 0 : index
    %0 = vector.load %arg0[%c0, %c0_0] : memref<8x1xf32, #tpu.memory_space<vmem>>, vector<8x1xf32>
    %c0_1 = arith.constant 0 : index
    %c0_2 = arith.constant 0 : index
    %1 = vector.load %arg1[%c0_1, %c0_2] : memref<8x1xi32, #tpu.memory_space<vmem>>, vector<8x1xi32>
    %c0_3 = arith.constant 0 : index
    %c0_4 = arith.constant 0 : index
    %c0_5 = arith.constant 0 : index
    %2 = vector.load %arg2[%c0_3, %c0_4, %c0_5] : memref<2x8x512xf32, #tpu.memory_space<vmem>>, vector<2x8x512xf32>
    %cst = arith.constant dense<0.000000e+00> : vector<8x512xf32>
    %3 = vector.multi_reduction <add>, %2, %cst [0] : vector<2x8x512xf32> to vector<8x512xf32>
    %c0_6 = arith.constant 0 : index
    %c0_7 = arith.constant 0 : index
    %4 = vector.load %arg3[%c0_6, %c0_7] : memref<1x5376xf32, #tpu.memory_space<vmem>>, vector<1x256xf32>
    %c0_8 = arith.constant 0 : index
    %c256 = arith.constant 256 : index
    %5 = vector.load %arg3[%c0_8, %c256] : memref<1x5376xf32, #tpu.memory_space<vmem>>, vector<1x256xf32>
    %c0_9 = arith.constant 0 : index
    %c512 = arith.constant 512 : index
    %6 = vector.load %arg3[%c0_9, %c512] : memref<1x5376xf32, #tpu.memory_space<vmem>>, vector<1x512xf32>
    %c0_10 = arith.constant 0 : index
    %c1024 = arith.constant 1024 : index
    %7 = vector.load %arg3[%c0_10, %c1024] : memref<1x5376xf32, #tpu.memory_space<vmem>>, vector<1x512xf32>
    %c0_11 = arith.constant 0 : index
    %c1536 = arith.constant 1536 : index
    %8 = vector.load %arg3[%c0_11, %c1536] : memref<1x5376xf32, #tpu.memory_space<vmem>>, vector<1x1792xf32>
    %c0_12 = arith.constant 0 : index
    %c3328 = arith.constant 3328 : index
    %9 = vector.load %arg3[%c0_12, %c3328] : memref<1x5376xf32, #tpu.memory_space<vmem>>, vector<1x1792xf32>
    %c0_13 = arith.constant 0 : index
    %c5120 = arith.constant 5120 : index
    %10 = vector.load %arg3[%c0_13, %c5120] : memref<1x5376xf32, #tpu.memory_space<vmem>>, vector<1x128xf32>
    %c0_14 = arith.constant 0 : index
    %c5248 = arith.constant 5248 : index
    %11 = vector.load %arg3[%c0_14, %c5248] : memref<1x5376xf32, #tpu.memory_space<vmem>>, vector<1x128xf32>
    %c0_15 = arith.constant 0 : index
    %c0_16 = arith.constant 0 : index
    %c0_17 = arith.constant 0 : index
    %12 = vector.load %arg4[%c0_15, %c0_16, %c0_17] : memref<7x3x256xf32, #tpu.memory_space<vmem>>, vector<7x1x256xf32>
    %c0_18 = arith.constant 0 : index
    %c1 = arith.constant 1 : index
    %c0_19 = arith.constant 0 : index
    %13 = vector.load %arg4[%c0_18, %c1, %c0_19] : memref<7x3x256xf32, #tpu.memory_space<vmem>>, vector<7x1x4xf32>
    %c0_20 = arith.constant 0 : index
    %c2 = arith.constant 2 : index
    %c0_21 = arith.constant 0 : index
    %14 = vector.load %arg4[%c0_20, %c2, %c0_21] : memref<7x3x256xf32, #tpu.memory_space<vmem>>, vector<7x1x256xf32>
    %15 = vector.broadcast %0 : vector<8x1xf32> to vector<8x256xf32>
    %16 = vector.broadcast %4 : vector<1x256xf32> to vector<8x256xf32>
    %17 = arith.mulf %15, %16 : vector<8x256xf32>
    %18 = vector.broadcast %5 : vector<1x256xf32> to vector<8x256xf32>
    %19 = arith.addf %17, %18 : vector<8x256xf32>
    %cst_22 = arith.constant 0.000000e+00 : f32
    %20 = vector.broadcast %cst_22 : f32 to vector<8x256xf32>
    %21 = arith.maximumf %19, %20 : vector<8x256xf32>
    %22 = arith.truncf %21 : vector<8x256xf32> to vector<8x256xbf16>
    %c0_23 = arith.constant 0 : index
    %c0_24 = arith.constant 0 : index
    %23 = vector.load %arg5[%c0_23, %c0_24] : memref<256x512xbf16, #tpu.memory_space<vmem>>, vector<256x512xbf16>
    %cst_25 = arith.constant dense<0.000000e+00> : vector<8x512xf32>
    %24 = tpu.matmul %22, %23, %cst_25 {dimension_numbers = #tpu.dot_dimension_numbers<[1], [0], [0], [1], [0, 0, 1, 1], [], []>} : vector<8x256xbf16>, vector<256x512xbf16>, vector<8x512xf32> -> vector<8x512xf32>
    %25 = vector.broadcast %7 : vector<1x512xf32> to vector<8x512xf32>
    %26 = arith.mulf %24, %25 : vector<8x512xf32>
    %27 = vector.broadcast %6 : vector<1x512xf32> to vector<8x512xf32>
    %28 = arith.addf %26, %27 : vector<8x512xf32>
    %29 = arith.addf %3, %28 : vector<8x512xf32>
    %30 = arith.truncf %29 : vector<8x512xf32> to vector<8x512xbf16>
    %c0_26 = arith.constant 0 : index
    %c0_27 = arith.constant 0 : index
    %31 = vector.load %arg6[%c0_26, %c0_27] : memref<512x1792xbf16, #tpu.memory_space<vmem>>, vector<512x1792xbf16>
    %cst_28 = arith.constant dense<0.000000e+00> : vector<8x1792xf32>
    %32 = tpu.matmul %30, %31, %cst_28 {dimension_numbers = #tpu.dot_dimension_numbers<[1], [0], [0], [1], [0, 0, 1, 1], [], []>} : vector<8x512xbf16>, vector<512x1792xbf16>, vector<8x1792xf32> -> vector<8x1792xf32>
    %33 = vector.broadcast %9 : vector<1x1792xf32> to vector<8x1792xf32>
    %34 = arith.mulf %32, %33 : vector<8x1792xf32>
    %35 = vector.broadcast %8 : vector<1x1792xf32> to vector<8x1792xf32>
    %36 = arith.addf %34, %35 : vector<8x1792xf32>
    %cst_29 = arith.constant 0.000000e+00 : f32
    %37 = vector.broadcast %cst_29 : f32 to vector<8x1792xf32>
    %38 = arith.maximumf %36, %37 : vector<8x1792xf32>
    %39 = vector.extract_strided_slice %38 {offsets = [0, 0], sizes = [8, 256], strides = [1, 1]} : vector<8x1792xf32> to vector<8x256xf32>
    %40 = vector.extract_strided_slice %38 {offsets = [0, 256], sizes = [8, 256], strides = [1, 1]} : vector<8x1792xf32> to vector<8x256xf32>
    %41 = vector.extract_strided_slice %38 {offsets = [0, 512], sizes = [8, 256], strides = [1, 1]} : vector<8x1792xf32> to vector<8x256xf32>
    %42 = vector.extract_strided_slice %38 {offsets = [0, 768], sizes = [8, 256], strides = [1, 1]} : vector<8x1792xf32> to vector<8x256xf32>
    %43 = vector.extract_strided_slice %38 {offsets = [0, 1024], sizes = [8, 256], strides = [1, 1]} : vector<8x1792xf32> to vector<8x256xf32>
    %44 = vector.extract_strided_slice %38 {offsets = [0, 1280], sizes = [8, 256], strides = [1, 1]} : vector<8x1792xf32> to vector<8x256xf32>
    %45 = vector.extract_strided_slice %38 {offsets = [0, 1536], sizes = [8, 256], strides = [1, 1]} : vector<8x1792xf32> to vector<8x256xf32>
    %46 = vector.shape_cast %39 : vector<8x256xf32> to vector<1x8x256xf32>
    %47 = vector.shape_cast %40 : vector<8x256xf32> to vector<1x8x256xf32>
    %48 = vector.shape_cast %41 : vector<8x256xf32> to vector<1x8x256xf32>
    %49 = vector.shape_cast %42 : vector<8x256xf32> to vector<1x8x256xf32>
    %50 = vector.shape_cast %43 : vector<8x256xf32> to vector<1x8x256xf32>
    %51 = vector.shape_cast %44 : vector<8x256xf32> to vector<1x8x256xf32>
    %52 = vector.shape_cast %45 : vector<8x256xf32> to vector<1x8x256xf32>
    %53 = tpu.concatenate %46, %47, %48, %49, %50, %51, %52 in 0 : vector<1x8x256xf32>, vector<1x8x256xf32>, vector<1x8x256xf32>, vector<1x8x256xf32>, vector<1x8x256xf32>, vector<1x8x256xf32>, vector<1x8x256xf32> -> vector<7x8x256xf32>
    %54 = arith.truncf %53 : vector<7x8x256xf32> to vector<7x8x256xbf16>
    %c0_30 = arith.constant 0 : index
    %c0_31 = arith.constant 0 : index
    %c0_32 = arith.constant 0 : index
    %55 = vector.load %arg7[%c0_30, %c0_31, %c0_32] : memref<7x256x256xbf16, #tpu.memory_space<vmem>>, vector<7x256x256xbf16>
    "tpu.trace_start"() <{level = 10 : i32, message = "nbh,nhk->nbk"}> : () -> ()
    %cst_33 = arith.constant dense<0.000000e+00> : vector<7x8x256xf32>
    %56 = tpu.matmul %54, %55, %cst_33 {dimension_numbers = #tpu.dot_dimension_numbers<[2], [1], [1], [2], [0, 0, 0, 1, 1, 2], [0], [0]>} : vector<7x8x256xbf16>, vector<7x256x256xbf16>, vector<7x8x256xf32> -> vector<7x8x256xf32>
    "tpu.trace_stop"() : () -> ()
    %57 = vector.broadcast %14 : vector<7x1x256xf32> to vector<7x8x256xf32>
    %58 = arith.mulf %56, %57 : vector<7x8x256xf32>
    %59 = vector.broadcast %12 : vector<7x1x256xf32> to vector<7x8x256xf32>
    %60 = arith.addf %58, %59 : vector<7x8x256xf32>
    %cst_34 = arith.constant 0.000000e+00 : f32
    %61 = vector.broadcast %cst_34 : f32 to vector<7x8x256xf32>
    %62 = arith.maximumf %60, %61 : vector<7x8x256xf32>
    %63 = arith.truncf %62 : vector<7x8x256xf32> to vector<7x8x256xbf16>
    %c0_35 = arith.constant 0 : index
    %c0_36 = arith.constant 0 : index
    %c0_37 = arith.constant 0 : index
    %64 = vector.load %arg8[%c0_35, %c0_36, %c0_37] : memref<7x256x4xbf16, #tpu.memory_space<vmem>>, vector<7x256x4xbf16>
    "tpu.trace_start"() <{level = 10 : i32, message = "nbh,nhk->nbk"}> : () -> ()
    %cst_38 = arith.constant dense<0.000000e+00> : vector<7x8x4xf32>
    %65 = tpu.matmul %63, %64, %cst_38 {dimension_numbers = #tpu.dot_dimension_numbers<[2], [1], [1], [2], [0, 0, 0, 1, 1, 2], [0], [0]>} : vector<7x8x256xbf16>, vector<7x256x4xbf16>, vector<7x8x4xf32> -> vector<7x8x4xf32>
    "tpu.trace_stop"() : () -> ()
    %66 = vector.broadcast %13 : vector<7x1x4xf32> to vector<7x8x4xf32>
    %67 = arith.addf %65, %66 : vector<7x8x4xf32>
    %68 = tpu.iota {dimensions = array<i32: 0>} : vector<6x8x1xi32>
    %69 = vector.shape_cast %1 : vector<8x1xi32> to vector<1x8x1xi32>
    %c1_i32 = arith.constant 1 : i32
    %70 = vector.broadcast %c1_i32 : i32 to vector<6x8x1xi32>
    %71 = arith.addi %68, %70 : vector<6x8x1xi32>
    %72 = vector.broadcast %69 : vector<1x8x1xi32> to vector<6x8x1xi32>
    %73 = arith.cmpi eq, %72, %71 : vector<6x8x1xi32>
    %74 = arith.extui %73 : vector<6x8x1xi1> to vector<6x8x1xi32>
    %75 = arith.sitofp %74 : vector<6x8x1xi32> to vector<6x8x1xf32>
    %76 = vector.extract_strided_slice %67 {offsets = [0, 0, 0], sizes = [6, 8, 4], strides = [1, 1, 1]} : vector<7x8x4xf32> to vector<6x8x4xf32>
    %77 = arith.negf %76 : vector<6x8x4xf32>
    %78 = math.exp %77 : vector<6x8x4xf32>
    %cst_39 = arith.constant 1.000000e+00 : f32
    %79 = vector.broadcast %cst_39 : f32 to vector<6x8x4xf32>
    %80 = arith.addf %79, %78 : vector<6x8x4xf32>
    %81 = arith.divf %79, %80 : vector<6x8x4xf32>
    %82 = vector.broadcast %75 : vector<6x8x1xf32> to vector<6x8x4xf32>
    %83 = arith.mulf %81, %82 : vector<6x8x4xf32>
    %cst_40 = arith.constant dense<0.000000e+00> : vector<8x4xf32>
    %84 = vector.multi_reduction <add>, %83, %cst_40 [0] : vector<6x8x4xf32> to vector<8x4xf32>
    %85 = vector.extract_strided_slice %67 {offsets = [6, 0, 0], sizes = [1, 8, 1], strides = [1, 1, 1]} : vector<7x8x4xf32> to vector<1x8x1xf32>
    %86 = vector.shape_cast %85 : vector<1x8x1xf32> to vector<8x1xf32>
    %cst_41 = arith.constant 0.000000e+00 : f32
    %87 = vector.broadcast %cst_41 : f32 to vector<8x124xf32>
    %88 = vector.extract_strided_slice %84 {offsets = [0, 0], sizes = [8, 3], strides = [1, 1]} : vector<8x4xf32> to vector<8x3xf32>
    %89 = tpu.concatenate %88, %86, %87 in 1 : vector<8x3xf32>, vector<8x1xf32>, vector<8x124xf32> -> vector<8x128xf32>
    %90 = vector.broadcast %10 : vector<1x128xf32> to vector<8x128xf32>
    %91 = arith.mulf %89, %90 : vector<8x128xf32>
    %92 = vector.broadcast %11 : vector<1x128xf32> to vector<8x128xf32>
    %93 = arith.addf %91, %92 : vector<8x128xf32>
    %c0_42 = arith.constant 0 : index
    %c0_43 = arith.constant 0 : index
    %94 = vector.load %arg9[%c0_42, %c0_43] : memref<8x128xf32, #tpu.memory_space<vmem>>, vector<8x128xf32>
    tpu.vector_store %arg9[%c0_42, %c0_43], %93 {strides = array<i32>} : memref<8x128xf32, #tpu.memory_space<vmem>>, vector<8x128xf32>,
    return
  }
}

</mosaic_0001>

<bundles_post_ra>
// kernel: tpu_custom_call.1
= control target key start
LH: loop header
LB: loop body
LE: loop exit
PB: predicated region body
PF: predicated region fallthrough
CT: control target
= control target key end

     0   :  { %14 = vsyncpa [#allocation3], 0  ;;  %s12770_s0 = inlined_call_operand.vmem [shape: f32[8,1], index: 0, kind: input, shape index: {}]   ;;  %s12771_s1 = inlined_call_operand.vmem [shape: s32[8,1], index: 1, kind: input, shape index: {}]   ;;  %s12772_s2 = inlined_call_operand.hbm [shape: f32[2,8,512], index: 2, kind: input, shape index: {}]   ;;  %s12773_s3 = inlined_call_operand.hbm [shape: f32[1,5376], index: 3, kind: input, shape index: {}]   ;;  %s12774_s4 = inlined_call_operand.vmem [shape: f32[7,3,256], index: 4, kind: input, shape index: {}]   ;;  %s12775_s5 = inlined_call_operand.hbm [shape: bf16[256,512], index: 5, kind: input, shape index: {}]   ;;  %s12776_s6 = inlined_call_operand.hbm [shape: bf16[512,1792], index: 6, kind: input, shape index: {}]   ;;  %s12777_s7 = inlined_call_operand.hbm [shape: bf16[7,256,256], index: 7, kind: input, shape index: {}]   ;;  %s12778_s8 = inlined_call_operand.vmem [shape: bf16[7,256,4], index: 8, kind: input, shape index: {}]   ;;  %s12779_s9 = inlined_call_operand.hbm [shape: f32[8,128], index: 9, kind: output, shape index: {}]  }
   0x1   :  { %15 = vsyncpa [#allocation6], 0 }
   0x2   :  { %16 = vsyncpa [#allocation9], 0  ;;  %s40_s11 = sshll.u32 %s12773_s3, 4  ;;  %s41_s11 = int_to_ptr.hbm [resolvable:$true] %s40_s11 }
   0x3   :  { %17 = vsyncpa [#allocation4], 0  ;;  %s11951_s12 = smov [#allocation5]   ;;  %s65_s16 = sshll.u32 %s12776_s6, 4  ;;  %s66_s16 = int_to_ptr.hbm [resolvable:$true] %s65_s16 }
   0x4   :  { %s42_s13 = sshll.u32 %s11951_s12, 4  ;;  %s11952_s17 = smov [#allocation8]   ;;  %s43_s13 = int_to_ptr.vmem [resolvable:$true] %s42_s13 }
   0x5   :  { %45 = dma.hbm_to_vmem [thread:$0]  %s41_s11, 672, %s43_s13, [#allocation6]  }
   0x6   :  { %s67_s18 = sshll.u32 %s11952_s17, 4  ;;  %s11953_s19 = smov 896   ;;  %s68_s18 = int_to_ptr.vmem [resolvable:$true] %s67_s18 }
   0x7   :  { %s11954_s20 = smov 56   ;;  %s26_s3 = sshll.u32 %s12772_s2, 4  ;;  %s27_s3 = int_to_ptr.hbm [resolvable:$true] %s26_s3 }
   0x8   :  { %73 = dma.hbm_to_vmem [thread:$0]  %s66_s16, 57344, %s68_s18, [#allocation9], %s11953_s19, %s11953_s19, %s11954_s20  }
   0x9   :  { %s11955_s23 = smov [#allocation2]   ;;  %s52_s6 = sshll.u32 %s12775_s5, 4  ;;  %s53_s6 = int_to_ptr.hbm [resolvable:$true] %s52_s6 }
   0xa   :  { %s28_s24 = sshll.u32 %s11955_s23, 4  ;;  %s11956_s27 = smov 512   ;;  %s29_s24 = int_to_ptr.vmem [resolvable:$true] %s28_s24 }
   0xb   :  { %s11957_s28 = smov 32   ;;  %s11958_s29 = smov [#allocation7]  }
   0xc   :  { %34 = dma.hbm_to_vmem [thread:$0]  %s27_s3, 1024, %s29_s24, [#allocation3], %s11956_s27, %s11956_s27, %s11957_s28  }
   0xd   :  { %s54_s30 = sshll.u32 %s11958_s29, 4  ;;  %s11959_s10 = smov 256   ;;  %s55_s30 = int_to_ptr.vmem [resolvable:$true] %s54_s30 }
   0xe   :  { %s11960_s11 = smov 16   ;;  %s78_s13 = sshll.u32 %s12777_s7, 4  ;;  %s79_s13 = int_to_ptr.hbm [resolvable:$true] %s78_s13 }
   0xf   :  { %60 = dma.hbm_to_vmem [thread:$0]  %s53_s6, 8192, %s55_s30, [#allocation6], %s11959_s10, %s11959_s10, %s11960_s11  }
  0x10   :  { %s11961_s14 = smov [#allocation10]   ;;  %s11962_s16 = smov 128  }
  0x11   :  { %s80_s15 = sshll.u32 %s11961_s14, 4  ;;  %s11963_s5 = smov 8   ;;  %s81_s15 = int_to_ptr.vmem [resolvable:$true] %s80_s15 }
  0x12   :  { %86 = dma.hbm_to_vmem [thread:$0]  %s79_s13, 28672, %s81_s15, [#allocation9], %s11962_s16, %s11962_s16, %s11963_s5  }
  0x13   :  { %11943 = dma.done.wait [#allocation3], 1024  }
  0x14   :  { %11944 = vsyncadd [#allocation3], 4294966272 }
  0x15   :  { %11945 = dma.done.wait [#allocation6], 8864  }
  0x16   :  { %11946 = vsyncadd [#allocation6], 4294958432 }
  0x17   :  { %11947 = dma.done.wait [#allocation9], 86016  }
  0x18   :  { %11948 = vsyncadd [#allocation9], 4294881280  ;;  %v11964_v0 = vmov 0   ;;  %v109_v1 = vld [vmem:[%s12770_s0] sm:$0xff]  ;;  %v7589_v3 = vld [vmem:[#allocation7 + $0xe0] sm:$0xf] }
  0x19   :  { %11744 = vset.pattern.permute.xlu0 %v11964_v0  ;;  %11750 = vset.pattern.permute.xlu1 %v11964_v0  ;;  %v110_v2 = vld [vmem:[%s12771_s1] sm:$0xff]  ;;  %v10909_v4 = vld [vmem:[#allocation7 + $0xec] sm:$0xf0]  ;;  %v7717_v5 = vld [vmem:[#allocation7 + $0x1e0] sm:$0xf]  ;;  %v11965_v6 = vmov 0.0  }
  0x1a   :  { %169 = vperm.xlu0 %11744, %v109_v1   ;;  %vm7247_vm0 = vcmp.eq.s32.totalorder %v110_v2, 1  ;;  %vm7248_vm1 = vcmp.eq.s32.totalorder %v110_v2, 2  ;;  %v7590_v9 = vor.u32 %v10909_v4, %v7589_v3  ;;  %v10941_v10 = vld [vmem:[#allocation7 + $0x1ec] sm:$0xf0]  ;;  %v10907_v11 = vld [vmem:[#allocation7 + $0xe4] sm:$0xf] }
  0x1b   :  { %v10867_v7 = vsel %vm7247_vm0, 1.0, %v11965_v6  ;;  %v10868_v8 = vsel %vm7248_vm1, 1.0, %v11965_v6  ;;  %v7718_v12 = vor.u32 %v10941_v10, %v7717_v5  ;;  %v7591_v13 = vld [vmem:[#allocation7 + $0xf0] sm:$0xf0]  ;;  %v10939_v14 = vld [vmem:[#allocation7 + $0x1e4] sm:$0xf] }
  0x1c   :  { %v7719_v15 = vld [vmem:[#allocation7 + $0x1f0] sm:$0xf0]  ;;  %574 = vmatpush.bf16.msra.mxu0 %v7590_v9  ;;  %v7594_v16 = vor.u32 %v10907_v11, %v7591_v13  ;;  %v7573_v18 = vld [vmem:[#allocation7 + $0xc0] sm:$0xf]  ;;  %v10905_v19 = vld [vmem:[#allocation7 + $0xcc] sm:$0xf0]  ;;  %v11745_v21 = vpack.i.bf16 %v10868_v8, %v10867_v7 }
  0x1d   :  { %v7722_v17 = vor.u32 %v10939_v14, %v7719_v15  ;;  %v7701_v20 = vld [vmem:[#allocation7 + $0x1c0] sm:$0xf]  ;;  %587 = vmatpush.bf16.msra.mxu1 %v7718_v12  ;;  %v7574_v22 = vor.u32 %v10905_v19, %v7573_v18  ;;  %v10937_v23 = vld [vmem:[#allocation7 + $0x1cc] sm:$0xf0]  ;;  %v10903_v24 = vld [vmem:[#allocation7 + $0xc4] sm:$0xf] }
  0x1e   :  { %v7575_v25 = vld [vmem:[#allocation7 + $0xd0] sm:$0xf0]  ;;  %600 = vmatpush.bf16.msra.mxu2 %v7594_v16  ;;  %v7702_v26 = vor.u32 %v10937_v23, %v7701_v20  ;;  %v10935_v28 = vld [vmem:[#allocation7 + $0x1c4] sm:$0xf]  ;;  %v7557_v30 = vld [vmem:[#allocation7 + $0xa0] sm:$0xf] }
  0x1f   :  { %613 = vmatpush.bf16.msra.mxu3 %v7722_v17  ;;  %v7578_v27 = vor.u32 %v10903_v24, %v7575_v25  ;;  %v7703_v29 = vld [vmem:[#allocation7 + $0x1d0] sm:$0xf0]  ;;  %v10901_v32 = vld [vmem:[#allocation7 + $0xac] sm:$0xf0]  ;;  %v7685_v33 = vld [vmem:[#allocation7 + $0x1a0] sm:$0xf] }
  0x20   :  { %v7706_v31 = vor.u32 %v10935_v28, %v7703_v29  ;;  %v10933_v34 = vld [vmem:[#allocation7 + $0x1ac] sm:$0xf0]  ;;  %575 = vmatpush.bf16.msra.mxu0 %v7574_v22  ;;  %v7558_v35 = vor.u32 %v10901_v32, %v7557_v30  ;;  %v10899_v36 = vld [vmem:[#allocation7 + $0xa4] sm:$0xf]  ;;  %v7559_v37 = vld [vmem:[#allocation7 + $0xb0] sm:$0xf0] }
  0x21   :  { %v10931_v38 = vld [vmem:[#allocation7 + $0x1a4] sm:$0xf]  ;;  %588 = vmatpush.bf16.msra.mxu1 %v7702_v26  ;;  %v7686_v39 = vor.u32 %v10933_v34, %v7685_v33  ;;  %v7687_v40 = vld [vmem:[#allocation7 + $0x1b0] sm:$0xf0]  ;;  %v7541_v41 = vld [vmem:[#allocation7 + $0x80] sm:$0xf]  ;;  %v7562_v43 = vor.u32 %v10899_v36, %v7559_v37 }
  0x22   :  { %11746 = vperm.xlu0 %11744, %v11745_v21   ;;  %v10897_v42 = vld [vmem:[#allocation7 + $0x8c] sm:$0xf0]  ;;  %601 = vmatpush.bf16.msra.mxu2 %v7578_v27  ;;  %v7690_v44 = vor.u32 %v10931_v38, %v7687_v40  ;;  %v7669_v45 = vld [vmem:[#allocation7 + $0x180] sm:$0xf]  ;;  %v10895_v47 = vld [vmem:[#allocation7 + $0x84] sm:$0xf] }
  0x23   :  { %614 = vmatpush.bf16.msra.mxu3 %v7706_v31  ;;  %v10929_v46 = vld [vmem:[#allocation7 + $0x18c] sm:$0xf0]  ;;  %v7543_v48 = vld [vmem:[#allocation7 + $0x90] sm:$0xf0]  ;;  %v10927_v49 = vld [vmem:[#allocation7 + $0x184] sm:$0xf]  ;;  %v7542_v51 = vor.u32 %v10897_v42, %v7541_v41 }
  0x24   :  { %v7671_v50 = vld [vmem:[#allocation7 + $0x190] sm:$0xf0]  ;;  %576 = vmatpush.bf16.msra.mxu0 %v7558_v35  ;;  %v7670_v52 = vor.u32 %v10929_v46, %v7669_v45  ;;  %v7525_v53 = vld [vmem:[#allocation7 + $0x60] sm:$0xf]  ;;  %v10893_v54 = vld [vmem:[#allocation7 + $0x6c] sm:$0xf0]  ;;  %v7546_v55 = vor.u32 %v10895_v47, %v7543_v48 }
  0x25   :  { %589 = vmatpush.bf16.msra.mxu1 %v7686_v39  ;;  %v7674_v56 = vor.u32 %v10927_v49, %v7671_v50  ;;  %v7653_v57 = vld [vmem:[#allocation7 + $0x160] sm:$0xf]  ;;  %v10925_v58 = vld [vmem:[#allocation7 + $0x16c] sm:$0xf0]  ;;  %v10891_v59 = vld [vmem:[#allocation7 + $0x64] sm:$0xf]  ;;  %v7526_v63 = vor.u32 %v10893_v54, %v7525_v53 }
  0x26   :  { %602 = vmatpush.bf16.msra.mxu2 %v7562_v43  ;;  %v7527_v60 = vld [vmem:[#allocation7 + $0x70] sm:$0xf0]  ;;  %v10923_v61 = vld [vmem:[#allocation7 + $0x164] sm:$0xf]  ;;  %v7654_v0 = vor.u32 %v10925_v58, %v7653_v57  ;;  %v7509_v1 = vld [vmem:[#allocation7 + $0x40] sm:$0xf] }
  0x27   :  { %615 = vmatpush.bf16.msra.mxu3 %v7690_v44  ;;  %v7655_v62 = vld [vmem:[#allocation7 + $0x170] sm:$0xf0]  ;;  %v10889_v2 = vld [vmem:[#allocation7 + $0x4c] sm:$0xf0]  ;;  %v7530_v3 = vor.u32 %v10891_v59, %v7527_v60  ;;  %v7637_v5 = vld [vmem:[#allocation7 + $0x140] sm:$0xf] }
  0x28   :  { %577 = vmatpush.bf16.msra.mxu0 %v7542_v51  ;;  %v7658_v4 = vor.u32 %v10923_v61, %v7655_v62  ;;  %v10921_v7 = vld [vmem:[#allocation7 + $0x14c] sm:$0xf0]  ;;  %v10887_v8 = vld [vmem:[#allocation7 + $0x44] sm:$0xf]  ;;  %v7511_v9 = vld [vmem:[#allocation7 + $0x50] sm:$0xf0]  ;;  %v7510_v12 = vor.u32 %v10889_v2, %v7509_v1 }
  0x29   :  { %590 = vmatpush.bf16.msra.mxu1 %v7670_v52  ;;  %v10919_v10 = vld [vmem:[#allocation7 + $0x144] sm:$0xf]  ;;  %v7639_v11 = vld [vmem:[#allocation7 + $0x150] sm:$0xf0]  ;;  %v7638_v13 = vor.u32 %v10921_v7, %v7637_v5  ;;  %v7493_v14 = vld [vmem:[#allocation7 + $0x20] sm:$0xf]  ;;  %v7514_v17 = vor.u32 %v10887_v8, %v7511_v9 }
  0x2a   :  { %603 = vmatpush.bf16.msra.mxu2 %v7546_v55  ;;  %v10885_v15 = vld [vmem:[#allocation7 + $0x2c] sm:$0xf0]  ;;  %v7621_v16 = vld [vmem:[#allocation7 + $0x120] sm:$0xf]  ;;  %v7642_v18 = vor.u32 %v10919_v10, %v7639_v11  ;;  %v10883_v20 = vld [vmem:[#allocation7 + $0x24] sm:$0xf] }
  0x2b   :  { %616 = vmatpush.bf16.msra.mxu3 %v7674_v56  ;;  %v10917_v19 = vld [vmem:[#allocation7 + $0x12c] sm:$0xf0]  ;;  %v7495_v21 = vld [vmem:[#allocation7 + $0x30] sm:$0xf0]  ;;  %v10915_v22 = vld [vmem:[#allocation7 + $0x124] sm:$0xf]  ;;  %v7494_v25 = vor.u32 %v10885_v15, %v7493_v14 }
  0x2c   :  { %578 = vmatpush.bf16.msra.mxu0 %v7526_v63  ;;  %v7623_v23 = vld [vmem:[#allocation7 + $0x130] sm:$0xf0]  ;;  %v7477_v24 = vld [vmem:[#allocation7] sm:$0xf]  ;;  %v10881_v26 = vld [vmem:[#allocation7 + $0xc] sm:$0xf0]  ;;  %v7622_v29 = vor.u32 %v10917_v19, %v7621_v16  ;;  %v7498_v34 = vor.u32 %v10883_v20, %v7495_v21 }
  0x2d   :  { %591 = vmatpush.bf16.msra.mxu1 %v7654_v0  ;;  %v7605_v27 = vld [vmem:[#allocation7 + $0x100] sm:$0xf]  ;;  %v10913_v28 = vld [vmem:[#allocation7 + $0x10c] sm:$0xf0]  ;;  %v10879_v30 = vld [vmem:[#allocation7 + $0x4] sm:$0xf]  ;;  %v7626_v35 = vor.u32 %v10915_v22, %v7623_v23  ;;  %v7478_v42 = vor.u32 %v10881_v26, %v7477_v24 }
  0x2e   :  { %604 = vmatpush.bf16.msra.mxu2 %v7530_v3  ;;  %v7479_v31 = vld [vmem:[#allocation7 + $0x10] sm:$0xf0]  ;;  %v10911_v32 = vld [vmem:[#allocation7 + $0x104] sm:$0xf]  ;;  %v7597_v36 = vld [vmem:[#allocation7 + $0xe8] sm:$0xf]  ;;  %v7606_v45 = vor.u32 %v10913_v28, %v7605_v27 }
  0x2f   :  { %617 = vmatpush.bf16.msra.mxu3 %v7658_v4  ;;  %v7607_v33 = vld [vmem:[#allocation7 + $0x110] sm:$0xf0]  ;;  %v10910_v37 = vld [vmem:[#allocation7 + $0xf4] sm:$0xf0]  ;;  %v7725_v38 = vld [vmem:[#allocation7 + $0x1e8] sm:$0xf]  ;;  %v7482_v49 = vor.u32 %v10879_v30, %v7479_v31 }
  0x30   :  { %579 = vmatpush.bf16.msra.mxu0 %v7510_v12  ;;  %v10942_v39 = vld [vmem:[#allocation7 + $0x1f4] sm:$0xf0]  ;;  %v10908_v40 = vld [vmem:[#allocation7 + $0xec] sm:$0xf]  ;;  %v7599_v41 = vld [vmem:[#allocation7 + $0xf8] sm:$0xf0]  ;;  %v7598_v46 = vor.u32 %v10910_v37, %v7597_v36  ;;  %v7610_v50 = vor.u32 %v10911_v32, %v7607_v33 }
  0x31   :  { %592 = vmatpush.bf16.msra.mxu1 %v7638_v13  ;;  %v10940_v43 = vld [vmem:[#allocation7 + $0x1ec] sm:$0xf]  ;;  %v7727_v44 = vld [vmem:[#allocation7 + $0x1f8] sm:$0xf0]  ;;  %v7581_v47 = vld [vmem:[#allocation7 + $0xc8] sm:$0xf]  ;;  %v7726_v53 = vor.u32 %v10942_v39, %v7725_v38  ;;  %v7602_v54 = vor.u32 %v10908_v40, %v7599_v41 }
  0x32   :  { %605 = vmatpush.bf16.msra.mxu2 %v7514_v17  ;;  %v10906_v48 = vld [vmem:[#allocation7 + $0xd4] sm:$0xf0]  ;;  %v7709_v51 = vld [vmem:[#allocation7 + $0x1c8] sm:$0xf]  ;;  %v7730_v55 = vor.u32 %v10940_v43, %v7727_v44  ;;  %v10904_v56 = vld [vmem:[#allocation7 + $0xcc] sm:$0xf] }
  0x33   :  { %618 = vmatpush.bf16.msra.mxu3 %v7642_v18  ;;  %v10938_v52 = vld [vmem:[#allocation7 + $0x1d4] sm:$0xf0]  ;;  %v7583_v57 = vld [vmem:[#allocation7 + $0xd8] sm:$0xf0]  ;;  %v7582_v58 = vor.u32 %v10906_v48, %v7581_v47  ;;  %v10936_v59 = vld [vmem:[#allocation7 + $0x1cc] sm:$0xf] }
  0x34   :  { %580 = vmatpush.bf16.msra.mxu0 %v7494_v25  ;;  %v7711_v60 = vld [vmem:[#allocation7 + $0x1d8] sm:$0xf0]  ;;  %v7710_v61 = vor.u32 %v10938_v52, %v7709_v51  ;;  %v7586_v62 = vor.u32 %v10904_v56, %v7583_v57  ;;  %v7565_v0 = vld [vmem:[#allocation7 + $0xa8] sm:$0xf]  ;;  %v10902_v1 = vld [vmem:[#allocation7 + $0xb4] sm:$0xf0] }
  0x35   :  { %593 = vmatpush.bf16.msra.mxu1 %v7622_v29  ;;  %v7714_v63 = vor.u32 %v10936_v59, %v7711_v60  ;;  %v7693_v2 = vld [vmem:[#allocation7 + $0x1a8] sm:$0xf]  ;;  %v7566_v3 = vor.u32 %v10902_v1, %v7565_v0  ;;  %v10934_v4 = vld [vmem:[#allocation7 + $0x1b4] sm:$0xf0]  ;;  %v10900_v5 = vld [vmem:[#allocation7 + $0xac] sm:$0xf] }
  0x36   :  { %606 = vmatpush.bf16.msra.mxu2 %v7498_v34  ;;  %v7567_v7 = vld [vmem:[#allocation7 + $0xb8] sm:$0xf0]  ;;  %v7694_v8 = vor.u32 %v10934_v4, %v7693_v2  ;;  %v10932_v10 = vld [vmem:[#allocation7 + $0x1ac] sm:$0xf]  ;;  %v7549_v13 = vld [vmem:[#allocation7 + $0x88] sm:$0xf] }
  0x37   :  { %619 = vmatpush.bf16.msra.mxu3 %v7626_v35  ;;  %v7570_v9 = vor.u32 %v10900_v5, %v7567_v7  ;;  %v7695_v11 = vld [vmem:[#allocation7 + $0x1b8] sm:$0xf0]  ;;  %v10898_v14 = vld [vmem:[#allocation7 + $0x94] sm:$0xf0]  ;;  %v7677_v15 = vld [vmem:[#allocation7 + $0x188] sm:$0xf] }
  0x38   :  { %581 = vmatpush.bf16.msra.mxu0 %v7478_v42  ;;  %v7698_v12 = vor.u32 %v10932_v10, %v7695_v11  ;;  %v7550_v16 = vor.u32 %v10898_v14, %v7549_v13  ;;  %v10930_v17 = vld [vmem:[#allocation7 + $0x194] sm:$0xf0]  ;;  %v10896_v18 = vld [vmem:[#allocation7 + $0x8c] sm:$0xf]  ;;  %v7551_v19 = vld [vmem:[#allocation7 + $0x98] sm:$0xf0] }
  0x39   :  { %594 = vmatpush.bf16.msra.mxu1 %v7606_v45  ;;  %v7678_v20 = vor.u32 %v10930_v17, %v7677_v15  ;;  %v7554_v21 = vor.u32 %v10896_v18, %v7551_v19  ;;  %v10928_v22 = vld [vmem:[#allocation7 + $0x18c] sm:$0xf]  ;;  %v7679_v23 = vld [vmem:[#allocation7 + $0x198] sm:$0xf0]  ;;  %v7533_v25 = vld [vmem:[#allocation7 + $0x68] sm:$0xf] }
  0x3a   :  { %607 = vmatpush.bf16.msra.mxu2 %v7482_v49  ;;  %v7682_v24 = vor.u32 %v10928_v22, %v7679_v23  ;;  %v10894_v26 = vld [vmem:[#allocation7 + $0x74] sm:$0xf0]  ;;  %v7661_v27 = vld [vmem:[#allocation7 + $0x168] sm:$0xf]  ;;  %v10892_v30 = vld [vmem:[#allocation7 + $0x6c] sm:$0xf] }
  0x3b   :  { %620 = vmatpush.bf16.msra.mxu3 %v7610_v50  ;;  %v7534_v28 = vor.u32 %v10894_v26, %v7533_v25  ;;  %v10926_v29 = vld [vmem:[#allocation7 + $0x174] sm:$0xf0]  ;;  %v7535_v31 = vld [vmem:[#allocation7 + $0x78] sm:$0xf0]  ;;  %v10924_v34 = vld [vmem:[#allocation7 + $0x16c] sm:$0xf] }
  0x3c   :  { %626 = vmatpush.bf16.msrb.mxu0 %v7598_v46  ;;  %v7662_v32 = vor.u32 %v10926_v29, %v7661_v27  ;;  %v7538_v33 = vor.u32 %v10892_v30, %v7535_v31  ;;  %v7663_v35 = vld [vmem:[#allocation7 + $0x178] sm:$0xf0]  ;;  %v7517_v36 = vld [vmem:[#allocation7 + $0x48] sm:$0xf]  ;;  %v10890_v38 = vld [vmem:[#allocation7 + $0x54] sm:$0xf0] }
  0x3d   :  { %639 = vmatpush.bf16.msrb.mxu1 %v7726_v53  ;;  %v7666_v37 = vor.u32 %v10924_v34, %v7663_v35  ;;  %v7645_v39 = vld [vmem:[#allocation7 + $0x148] sm:$0xf]  ;;  %v10922_v40 = vld [vmem:[#allocation7 + $0x154] sm:$0xf0]  ;;  %v7518_v41 = vor.u32 %v10890_v38, %v7517_v36  ;;  %v10888_v43 = vld [vmem:[#allocation7 + $0x4c] sm:$0xf] }
  0x3e   :  { %652 = vmatpush.bf16.msrb.mxu2 %v7602_v54  ;;  %v7646_v42 = vor.u32 %v10922_v40, %v7645_v39  ;;  %v7519_v44 = vld [vmem:[#allocation7 + $0x58] sm:$0xf0]  ;;  %v10920_v45 = vld [vmem:[#allocation7 + $0x14c] sm:$0xf]  ;;  %v7501_v48 = vld [vmem:[#allocation7 + $0x28] sm:$0xf] }
  0x3f   :  { %665 = vmatpush.bf16.msrb.mxu3 %v7730_v55  ;;  %v7522_v46 = vor.u32 %v10888_v43, %v7519_v44  ;;  %v7647_v47 = vld [vmem:[#allocation7 + $0x158] sm:$0xf0]  ;;  %v10886_v49 = vld [vmem:[#allocation7 + $0x34] sm:$0xf0]  ;;  %v7629_v51 = vld [vmem:[#allocation7 + $0x128] sm:$0xf] }
  0x40   :  { %627 = vmatpush.bf16.msrb.mxu0 %v7582_v58  ;;  %v7650_v50 = vor.u32 %v10920_v45, %v7647_v47  ;;  %v10918_v52 = vld [vmem:[#allocation7 + $0x134] sm:$0xf0]  ;;  %v10884_v53 = vld [vmem:[#allocation7 + $0x2c] sm:$0xf]  ;;  %v7502_v54 = vor.u32 %v10886_v49, %v7501_v48  ;;  %v7503_v55 = vld [vmem:[#allocation7 + $0x38] sm:$0xf0] }
  0x41   :  { %640 = vmatpush.bf16.msrb.mxu1 %v7710_v61  ;;  %v10916_v56 = vld [vmem:[#allocation7 + $0x12c] sm:$0xf]  ;;  %v7631_v57 = vld [vmem:[#allocation7 + $0x138] sm:$0xf0]  ;;  %v7630_v58 = vor.u32 %v10918_v52, %v7629_v51  ;;  %v7506_v59 = vor.u32 %v10884_v53, %v7503_v55  ;;  %v7485_v60 = vld [vmem:[#allocation7 + $0x8] sm:$0xf] }
  0x42   :  { %653 = vmatpush.bf16.msrb.mxu2 %v7586_v62  ;;  %v10882_v61 = vld [vmem:[#allocation7 + $0x14] sm:$0xf0]  ;;  %v7613_v62 = vld [vmem:[#allocation7 + $0x108] sm:$0xf]  ;;  %v10880_v1 = vld [vmem:[#allocation7 + $0xc] sm:$0xf] }
  0x43   :  { %666 = vmatpush.bf16.msrb.mxu3 %v7714_v63  ;;  %v7634_v63 = vor.u32 %v10916_v56, %v7631_v57  ;;  %v10914_v0 = vld [vmem:[#allocation7 + $0x114] sm:$0xf0]  ;;  %v7487_v2 = vld [vmem:[#allocation7 + $0x18] sm:$0xf0]  ;;  %v7486_v5 = vor.u32 %v10882_v61, %v7485_v60  ;;  %v123_v10 = vld [vmem:[#allocation5] sm:$0x3] }
  0x44   :  { %628 = vmatpush.bf16.msrb.mxu0 %v7566_v3  ;;  %v10912_v3 = vld [vmem:[#allocation7 + $0x10c] sm:$0xf]  ;;  %v7615_v4 = vld [vmem:[#allocation7 + $0x118] sm:$0xf0]  ;;  %v7614_v7 = vor.u32 %v10914_v0, %v7613_v62  ;;  %v124_v11 = vld [vmem:[#allocation5 + $0x2] sm:$0x3] }
  0x45   :  { %641 = vmatpush.bf16.msrb.mxu1 %v7694_v8  ;;  %v7490_v8 = vor.u32 %v10880_v1, %v7487_v2  ;;  %v174_v13 = vperm.slane %v123_v10, 1  ;;  %v180_v14 = vperm.slane %v124_v11, 0  ;;  %v181_v15 = vperm.slane %v124_v11, 1  ;;  %v11048_v22 = vld [vmem:[#allocation8 + $0x344] sm:$0xf0]  ;;  %s11966_s15 = smov 3  }
  0x46   :  { %654 = vmatpush.bf16.msrb.mxu2 %v7570_v9  ;;  %v7618_v9 = vor.u32 %v10912_v3, %v7615_v4  ;;  %v8573_v23 = vld [vmem:[#allocation8 + $0x690] sm:$0xf]  ;;  %v11272_v26 = vld [vmem:[#allocation8 + $0xa44] sm:$0xf0]  ;;  %v8069_v34 = vld [vmem:[#allocation8 + $0x2a0] sm:$0xf] }
  0x47   :  { %667 = vmatpush.bf16.msrb.mxu3 %v7698_v12  ;;  %v173_v12 = vperm.slane %v123_v10, 0  ;;  %v9021_v25 = vld [vmem:[#allocation8 + $0xa10] sm:$0xf]  ;;  %v11384_v30 = vld [vmem:[#allocation8 + $0xdc4] sm:$0xf0]  ;;  %vm7415_vm14 = vcmask 31744  }
  0x48   :  { %629 = vmatpush.bf16.msrb.mxu0 %v7550_v16  ;;  %v9469_v29 = vld [vmem:[#allocation8 + $0xd90] sm:$0xf]  ;;  %v11034_v35 = vld [vmem:[#allocation8 + $0x2d4] sm:$0xf0]  ;;  %v9022_v39 = vor.u32 %v11272_v26, %v9021_v25  ;;  %v8965_v40 = vld [vmem:[#allocation8 + $0x9a0] sm:$0xf] }
  0x49   :  { %642 = vmatpush.bf16.msrb.mxu1 %v7678_v20  ;;  %v11146_v38 = vld [vmem:[#allocation8 + $0x654] sm:$0xf0]  ;;  %v9413_v43 = vld [vmem:[#allocation8 + $0xd20] sm:$0xf]  ;;  %v8070_v45 = vor.u32 %v11034_v35, %v8069_v34  ;;  %v11020_v47 = vld [vmem:[#allocation8 + $0x264] sm:$0xf0] }
  0x4a   :  { %655 = vmatpush.bf16.msrb.mxu2 %v7554_v21  ;;  %v8125_v21 = vld [vmem:[#allocation8 + $0x310] sm:$0xf]  ;;  %v11370_v44 = vld [vmem:[#allocation8 + $0xd54] sm:$0xf0]  ;;  %v11356_v56 = vld [vmem:[#allocation8 + $0xce4] sm:$0xf0] }
  0x4b   :  { %668 = vmatpush.bf16.msrb.mxu3 %v7682_v24  ;;  %v11160_v24 = vld [vmem:[#allocation8 + $0x6c4] sm:$0xf0]  ;;  %v8461_v49 = vld [vmem:[#allocation8 + $0x5b0] sm:$0xf]  ;;  %v9414_v53 = vor.u32 %v11370_v44, %v9413_v43  ;;  %v8405_v61 = vld [vmem:[#allocation8 + $0x540] sm:$0xf] }
  0x4c   :  { %630 = vmatpush.bf16.msrb.mxu0 %v7534_v28  ;;  %v8574_v36 = vor.u32 %v11160_v24, %v8573_v23  ;;  %v8909_v52 = vld [vmem:[#allocation8 + $0x930] sm:$0xf]  ;;  %v11118_v62 = vld [vmem:[#allocation8 + $0x574] sm:$0xf0]  ;;  %v8853_v0 = vld [vmem:[#allocation8 + $0x8c0] sm:$0xf] }
  0x4d   :  { %643 = vmatpush.bf16.msrb.mxu1 %v7662_v32  ;;  %v9357_v55 = vld [vmem:[#allocation8 + $0xcb0] sm:$0xf]  ;;  %v11230_v2 = vld [vmem:[#allocation8 + $0x8f4] sm:$0xf0]  ;;  %v9301_v3 = vld [vmem:[#allocation8 + $0xc40] sm:$0xf] }
  0x4e   :  { %656 = vmatpush.bf16.msrb.mxu2 %v7538_v33  ;;  %v8126_v33 = vor.u32 %v11048_v22, %v8125_v21  ;;  %v9358_v1 = vor.u32 %v11356_v56, %v9357_v55  ;;  %v11342_v4 = vld [vmem:[#allocation8 + $0xc74] sm:$0xf0]  ;;  %v8349_v10 = vld [vmem:[#allocation8 + $0x4d0] sm:$0xf]  ;;  %v11104_v11 = vld [vmem:[#allocation8 + $0x504] sm:$0xf0] }
  0x4f   :  { %669 = vmatpush.bf16.msrb.mxu3 %v7666_v37  ;;  %v8517_v37 = vld [vmem:[#allocation8 + $0x620] sm:$0xf]  ;;  %v8350_v21 = vor.u32 %v11104_v11, %v8349_v10  ;;  %v11090_v23 = vld [vmem:[#allocation8 + $0x494] sm:$0xf0]  ;;  %v10964_v34 = vld [vmem:[#allocation8 + $0xa4] sm:$0xf0] }
  0x50   :  { %631 = vmatpush.bf16.msrb.mxu0 %v7518_v41  ;;  %v9470_v41 = vor.u32 %v11384_v30, %v9469_v29  ;;  %v8518_v48 = vor.u32 %v11146_v38, %v8517_v37  ;;  %v8293_v22 = vld [vmem:[#allocation8 + $0x460] sm:$0xf]  ;;  %v11314_v29 = vld [vmem:[#allocation8 + $0xb94] sm:$0xf0]  ;;  %v11076_v37 = vld [vmem:[#allocation8 + $0x424] sm:$0xf0] }
  0x51   :  { %644 = vmatpush.bf16.msrb.mxu1 %v7646_v42  ;;  %v11258_v42 = vld [vmem:[#allocation8 + $0x9d4] sm:$0xf0]  ;;  %v8741_v25 = vld [vmem:[#allocation8 + $0x7e0] sm:$0xf]  ;;  %v8294_v35 = vor.u32 %v11090_v23, %v8293_v22  ;;  %v11300_v43 = vld [vmem:[#allocation8 + $0xb24] sm:$0xf0] }
  0x52   :  { %657 = vmatpush.bf16.msrb.mxu2 %v7522_v46  ;;  %v8013_v46 = vld [vmem:[#allocation8 + $0x230] sm:$0xf]  ;;  %v8966_v51 = vor.u32 %v11258_v42, %v8965_v40  ;;  %v10950_v44 = vld [vmem:[#allocation8 + $0x34] sm:$0xf0]  ;;  %v8463_v10 = vld [vmem:[#allocation8 + $0x5e8] sm:$0xf0] }
  0x53   :  { %670 = vmatpush.bf16.msrb.mxu3 %v7650_v50  ;;  %v11132_v50 = vld [vmem:[#allocation8 + $0x5e4] sm:$0xf0]  ;;  %v8014_v57 = vor.u32 %v11020_v47, %v8013_v46  ;;  %v9133_v42 = vld [vmem:[#allocation8 + $0xaf0] sm:$0xf]  ;;  %v11041_v46 = vld [vmem:[#allocation8 + $0x314] sm:$0xf] }
  0x54   :  { %632 = vmatpush.bf16.msrb.mxu0 %v7502_v54  ;;  %v11244_v54 = vld [vmem:[#allocation8 + $0x964] sm:$0xf0]  ;;  %v8462_v60 = vor.u32 %v11132_v50, %v8461_v49  ;;  %v8181_v47 = vld [vmem:[#allocation8 + $0x380] sm:$0xf]  ;;  %v9134_v50 = vor.u32 %v11300_v43, %v9133_v42  ;;  %v11174_v55 = vld [vmem:[#allocation8 + $0x734] sm:$0xf0] }
  0x55   :  { %645 = vmatpush.bf16.msrb.mxu1 %v7630_v58  ;;  %v7957_v58 = vld [vmem:[#allocation8 + $0x1c0] sm:$0xf]  ;;  %v10971_v22 = vld [vmem:[#allocation8 + $0xe4] sm:$0xf]  ;;  %v7847_v23 = vld [vmem:[#allocation8 + $0x118] sm:$0xf0] }
  0x56   :  { %658 = vmatpush.bf16.msrb.mxu2 %v7506_v59  ;;  %v11006_v59 = vld [vmem:[#allocation8 + $0x1f4] sm:$0xf0]  ;;  %v11237_v42 = vld [vmem:[#allocation8 + $0x934] sm:$0xf]  ;;  %v8911_v43 = vld [vmem:[#allocation8 + $0x968] sm:$0xf0] }
  0x57   :  { %671 = vmatpush.bf16.msrb.mxu3 %v7634_v63  ;;  %v8910_v63 = vor.u32 %v11244_v54, %v8909_v52  ;;  %v11153_v52 = vld [vmem:[#allocation8 + $0x694] sm:$0xf]  ;;  %v8629_v54 = vld [vmem:[#allocation8 + $0x700] sm:$0xf]  ;;  %s7450_s17 = sshll.u32 %s12779_s9, 4  ;;  %s7451_s17 = int_to_ptr.hbm [resolvable:$true] %s7450_s17 }
  0x58   :  { %633 = vmatpush.bf16.msrb.mxu0 %v7486_v5  ;;  %v7958_v5 = vor.u32 %v11006_v59, %v7957_v58  ;;  %v11265_v58 = vld [vmem:[#allocation8 + $0xa14] sm:$0xf]  ;;  %v9023_v59 = vld [vmem:[#allocation8 + $0xa48] sm:$0xf0] }
  0x59   :  { %646 = vmatpush.bf16.msrb.mxu1 %v7614_v7  ;;  %v7901_v7 = vld [vmem:[#allocation8 + $0x150] sm:$0xf] }
  0x5a   :  { %659 = vmatpush.bf16.msrb.mxu2 %v7490_v8  ;;  %v10992_v8 = vld [vmem:[#allocation8 + $0x184] sm:$0xf0] }
  0x5b   :  { %672 = vmatpush.bf16.msrb.mxu3 %v7618_v9  ;;  %v8406_v9 = vor.u32 %v11118_v62, %v8405_v61  ;;  %v11027_v61 = vld [vmem:[#allocation8 + $0x2a4] sm:$0xf] }
  0x8c   :  { %v170_v16 = vpop.permute.xlu0 %169 }
  0x8d   :  { %v177_v17 = vmul.f32 %v173_v12, %v170_v16  ;;  %v178_v18 = vmul.f32 %v174_v13, %v170_v16  ;;  %v8854_v12 = vor.u32 %v11230_v2, %v8853_v0  ;;  %v8797_v13 = vld [vmem:[#allocation8 + $0x850] sm:$0xf]  ;;  %v11139_v0 = vld [vmem:[#allocation8 + $0x624] sm:$0xf]  ;;  %v8630_v2 = vor.u32 %v11174_v55, %v8629_v54  ;;  %v11069_v55 = vld [vmem:[#allocation8 + $0x3f4] sm:$0xf] }
  0x8e   :  { %v9245_v16 = vld [vmem:[#allocation8 + $0xbd0] sm:$0xf] }
  0x8f   :  { %v184_v19 = vadd.f32 %v180_v14, %v177_v17  ;;  %v185_v20 = vadd.f32 %v181_v15, %v178_v18  ;;  %v9302_v14 = vor.u32 %v11342_v4, %v9301_v3  ;;  %v11216_v15 = vld [vmem:[#allocation8 + $0x884] sm:$0xf0]  ;;  %v7902_v18 = vor.u32 %v10992_v8, %v7901_v7  ;;  %v8015_v8 = vld [vmem:[#allocation8 + $0x268] sm:$0xf0] }
  0x90   :  { %v11328_v17 = vld [vmem:[#allocation8 + $0xc04] sm:$0xf0]  ;;  %v8798_v24 = vor.u32 %v11216_v15, %v8797_v13  ;;  %v9026_v3 = vor.u32 %v11265_v58, %v9023_v59  ;;  %v10999_v13 = vld [vmem:[#allocation8 + $0x1c4] sm:$0xf]  ;;  %v11349_v58 = vld [vmem:[#allocation8 + $0xcb4] sm:$0xf] }
  0x91   :  { %v186_v27 = vmax.f32 %v184_v19, 0.0  ;;  %v187_v28 = vmax.f32 %v185_v20, 0.0  ;;  %v7845_v19 = vld [vmem:[#allocation8 + $0xe0] sm:$0xf]  ;;  %v10978_v20 = vld [vmem:[#allocation8 + $0x114] sm:$0xf0]  ;;  %v9246_v26 = vor.u32 %v11328_v17, %v9245_v16 }
  0x92   :  { %v7846_v30 = vor.u32 %v10978_v20, %v7845_v19  ;;  %v10985_v16 = vld [vmem:[#allocation8 + $0x154] sm:$0xf]  ;;  %v7903_v17 = vld [vmem:[#allocation8 + $0x188] sm:$0xf0]  ;;  %v11111_v19 = vld [vmem:[#allocation8 + $0x544] sm:$0xf] }
  0x93   :  { %v12041_v31 = vpack.c.bf16 %v186_v27, %v186_v27  ;;  %v12043_v32 = vpack.c.bf16 %v187_v28, %v187_v28  ;;  %v11202_v27 = vld [vmem:[#allocation8 + $0x814] sm:$0xf0]  ;;  %v9189_v28 = vld [vmem:[#allocation8 + $0xb60] sm:$0xf]  ;;  %v8407_v20 = vld [vmem:[#allocation8 + $0x578] sm:$0xf0] }
  0x94   :  { %v8742_v38 = vor.u32 %v11202_v27, %v8741_v25  ;;  %v9190_v40 = vor.u32 %v11314_v29, %v9189_v28  ;;  %v11251_v25 = vld [vmem:[#allocation8 + $0x9a4] sm:$0xf]  ;;  %v9077_v28 = vld [vmem:[#allocation8 + $0xa80] sm:$0xf]  ;;  %v11286_v29 = vld [vmem:[#allocation8 + $0xab4] sm:$0xf0] }
  0x95   :  { %582 = vmatmul.bf16.vlgmr.msra.gmra.mxu0 %v12041_v31  ;;  %595 = vmatmul.bf16.vlgmr.msra.gmra.mxu1 %v12043_v32  ;;  %v9359_v59 = vld [vmem:[#allocation8 + $0xce8] sm:$0xf0] }
  0x96   :  { %608 = vmatmul.bf16.vlgmr.msra.gmra.mxu2 %v12041_v31  ;;  %621 = vmatmul.bf16.vlgmr.msra.gmra.mxu3 %v12043_v32 }
  0x97   :  { %3400 = vmatpush.bf16.msra.mxu0 %v8126_v33  ;;  %3413 = vmatpush.bf16.msra.mxu1 %v8574_v36  ;;  %v7789_v33 = vld [vmem:[#allocation8 + $0x70] sm:$0xf] }
  0x98   :  { %3426 = vmatpush.bf16.msra.mxu2 %v9022_v39  ;;  %3439 = vmatpush.bf16.msra.mxu3 %v9470_v41  ;;  %v8237_v36 = vld [vmem:[#allocation8 + $0x3f0] sm:$0xf]  ;;  %v11188_v41 = vld [vmem:[#allocation8 + $0x7a4] sm:$0xf0] }
  0x99   :  { %v8685_v39 = vld [vmem:[#allocation8 + $0x770] sm:$0xf] }
  0x9a   :  { %v8686_v49 = vor.u32 %v11188_v41, %v8685_v39  ;;  %v7791_v39 = vld [vmem:[#allocation8 + $0xa8] sm:$0xf0] }
  0x9b   :  { %3401 = vmatpush.bf16.msra.mxu0 %v8070_v45  ;;  %3414 = vmatpush.bf16.msra.mxu1 %v8518_v48  ;;  %v8238_v45 = vor.u32 %v11076_v37, %v8237_v36  ;;  %v11062_v48 = vld [vmem:[#allocation8 + $0x3b4] sm:$0xf0]  ;;  %v9471_v37 = vld [vmem:[#allocation8 + $0xdc8] sm:$0xf0] }
  0x9c   :  { %3427 = vmatpush.bf16.msra.mxu2 %v8966_v51  ;;  %3440 = vmatpush.bf16.msra.mxu3 %v9414_v53  ;;  %v8127_v51 = vld [vmem:[#allocation8 + $0x348] sm:$0xf0] }
  0x9d   :  { %v8575_v53 = vld [vmem:[#allocation8 + $0x6c8] sm:$0xf0] }
  0x9e   :  { %v8578_v62 = vor.u32 %v11153_v52, %v8575_v53  ;;  %v11223_v52 = vld [vmem:[#allocation8 + $0x8c4] sm:$0xf]  ;;  %v8855_v53 = vld [vmem:[#allocation8 + $0x8f8] sm:$0xf0] }
  0x9f   :  { %3402 = vmatpush.bf16.msra.mxu0 %v8014_v57  ;;  %3415 = vmatpush.bf16.msra.mxu1 %v8462_v60  ;;  %v8182_v57 = vor.u32 %v11062_v48, %v8181_v47  ;;  %v8130_v60 = vor.u32 %v11041_v46, %v8127_v51  ;;  %v9415_v46 = vld [vmem:[#allocation8 + $0xd58] sm:$0xf0]  ;;  %v8858_v54 = vor.u32 %v11223_v52, %v8855_v53 }
  0xa0   :  { %3428 = vmatpush.bf16.msra.mxu2 %v8910_v63  ;;  %3441 = vmatpush.bf16.msra.mxu3 %v9358_v1  ;;  %v8071_v63 = vld [vmem:[#allocation8 + $0x2d8] sm:$0xf0] }
  0xa1   :  { %v8519_v1 = vld [vmem:[#allocation8 + $0x658] sm:$0xf0]  ;;  %v8074_v4 = vor.u32 %v11027_v61, %v8071_v63  ;;  %v9362_v61 = vor.u32 %v11349_v58, %v9359_v59 }
  0xa2   :  { %v8522_v7 = vor.u32 %v11139_v0, %v8519_v1  ;;  %v11055_v0 = vld [vmem:[#allocation8 + $0x384] sm:$0xf]  ;;  %v8183_v1 = vld [vmem:[#allocation8 + $0x3b8] sm:$0xf0] }
  0xa3   :  { %3403 = vmatpush.bf16.msra.mxu0 %v7958_v5  ;;  %3416 = vmatpush.bf16.msra.mxu1 %v8406_v9  ;;  %v11013_v5 = vld [vmem:[#allocation8 + $0x234] sm:$0xf] }
  0xa4   :  { %3429 = vmatpush.bf16.msra.mxu2 %v8854_v12  ;;  %3442 = vmatpush.bf16.msra.mxu3 %v9302_v14  ;;  %v11125_v9 = vld [vmem:[#allocation8 + $0x5b4] sm:$0xf]  ;;  %v8018_v11 = vor.u32 %v11013_v5, %v8015_v8  ;;  %v7959_v14 = vld [vmem:[#allocation8 + $0x1f8] sm:$0xf0] }
  0xa5   :  { %634 = vmatmul.bf16.vlgmr.msrb.gmra.mxu0 %v12041_v31  ;;  %647 = vmatmul.bf16.vlgmr.msrb.gmra.mxu1 %v12043_v32  ;;  %v8466_v12 = vor.u32 %v11125_v9, %v8463_v10  ;;  %v7962_v15 = vor.u32 %v10999_v13, %v7959_v14  ;;  %v8743_v8 = vld [vmem:[#allocation8 + $0x818] sm:$0xf0]  ;;  %v11321_v10 = vld [vmem:[#allocation8 + $0xbd4] sm:$0xf]  ;;  %v8687_v14 = vld [vmem:[#allocation8 + $0x7a8] sm:$0xf0] }
  0xa6   :  { %660 = vmatmul.bf16.vlgmr.msrb.gmra.mxu2 %v12041_v31  ;;  %673 = vmatmul.bf16.vlgmr.msrb.gmra.mxu3 %v12043_v32  ;;  %v7790_v31 = vor.u32 %v10964_v34, %v7789_v33  ;;  %v7733_v32 = vld [vmem:[#allocation8] sm:$0xf]  ;;  %v11097_v33 = vld [vmem:[#allocation8 + $0x4d4] sm:$0xf]  ;;  %v8351_v34 = vld [vmem:[#allocation8 + $0x508] sm:$0xf0] }
  0xa7   :  { %3404 = vmatpush.bf16.msra.mxu0 %v7902_v18  ;;  %3417 = vmatpush.bf16.msra.mxu1 %v8350_v21  ;;  %v7734_v56 = vor.u32 %v10950_v44, %v7733_v32  ;;  %v7906_v18 = vor.u32 %v10985_v16, %v7903_v17  ;;  %v8410_v21 = vor.u32 %v11111_v19, %v8407_v20  ;;  %v8295_v44 = vld [vmem:[#allocation8 + $0x498] sm:$0xf0]  ;;  %v11181_v13 = vld [vmem:[#allocation8 + $0x774] sm:$0xf]  ;;  %v11307_v16 = vld [vmem:[#allocation8 + $0xb64] sm:$0xf] }
  0xa8   :  { %3430 = vmatpush.bf16.msra.mxu2 %v8798_v24  ;;  %3443 = vmatpush.bf16.msra.mxu3 %v9246_v26  ;;  %v7850_v24 = vor.u32 %v10971_v22, %v7847_v23  ;;  %v8967_v26 = vld [vmem:[#allocation8 + $0x9d8] sm:$0xf0]  ;;  %v8354_v36 = vor.u32 %v11097_v33, %v8351_v34  ;;  %v8914_v32 = vor.u32 %v11237_v42, %v8911_v43  ;;  %v11167_v19 = vld [vmem:[#allocation8 + $0x704] sm:$0xf]  ;;  %v11293_v23 = vld [vmem:[#allocation8 + $0xaf4] sm:$0xf] }
  0xa9   :  { %v8970_v27 = vor.u32 %v11251_v25, %v8967_v26  ;;  %v9191_v17 = vld [vmem:[#allocation8 + $0xb98] sm:$0xf0]  ;;  %v8133_v42 = vld [vmem:[#allocation8 + $0x318] sm:$0xf]  ;;  %v11049_v43 = vld [vmem:[#allocation8 + $0x34c] sm:$0xf0] }
  0xaa   :  { %v8631_v20 = vld [vmem:[#allocation8 + $0x738] sm:$0xf0]  ;;  %v8134_v52 = vor.u32 %v11049_v43, %v8133_v42 }
  0xab   :  { %3405 = vmatpush.bf16.msra.mxu0 %v7846_v30  ;;  %3418 = vmatpush.bf16.msra.mxu1 %v8294_v35  ;;  %v9078_v30 = vor.u32 %v11286_v29, %v9077_v28  ;;  %v11377_v35 = vld [vmem:[#allocation8 + $0xd94] sm:$0xf]  ;;  %v12053_v22 = vld [vmem:[#allocation5 + $0x8] sm:$0xf]  ;;  %v12055_v26 = vld [vmem:[#allocation5 + $0x4] sm:$0xf] }
  0xac   :  { %3431 = vmatpush.bf16.msra.mxu2 %v8742_v38  ;;  %3444 = vmatpush.bf16.msra.mxu3 %v9190_v40  ;;  %v10957_v38 = vld [vmem:[#allocation8 + $0x74] sm:$0xf]  ;;  %v9474_v40 = vor.u32 %v11377_v35, %v9471_v37  ;;  %v11279_v28 = vld [vmem:[#allocation8 + $0xa84] sm:$0xf]  ;;  %v9079_v29 = vld [vmem:[#allocation8 + $0xab8] sm:$0xf0] }
  0xad   :  { %v7794_v41 = vor.u32 %v10957_v38, %v7791_v39  ;;  %v111_v33 = vld [vmem:[#allocation2] sm:$0xff]  ;;  %v692_v38 = vperm.slane %v12055_v26, 0 }
  0xae   :  { %v115_v34 = vld [vmem:[#allocation2 + $0x20] sm:$0xff] }
  0xaf   :  { %3406 = vmatpush.bf16.msra.mxu0 %v7790_v31  ;;  %3419 = vmatpush.bf16.msra.mxu1 %v8238_v45  ;;  %v11083_v31 = vld [vmem:[#allocation8 + $0x464] sm:$0xf]  ;;  %v119_v39 = vadd.f32 %v115_v34, %v111_v33  ;;  %v10993_v33 = vld [vmem:[#allocation8 + $0x18c] sm:$0xf0] }
  0xb0   :  { %3432 = vmatpush.bf16.msra.mxu2 %v8686_v49  ;;  %3445 = vmatpush.bf16.msra.mxu3 %v9134_v50  ;;  %v11363_v45 = vld [vmem:[#allocation8 + $0xd24] sm:$0xf]  ;;  %v8298_v47 = vor.u32 %v11083_v31, %v8295_v44  ;;  %v7735_v50 = vld [vmem:[#allocation8 + $0x38] sm:$0xf0]  ;;  %v680_v31 = vperm.slane %v12053_v22, 1 }
  0xb1   :  { %v9418_v48 = vor.u32 %v11363_v45, %v9415_v46  ;;  %v10943_v49 = vld [vmem:[#allocation8 + $0x4] sm:$0xf] }
  0xb2   :  { %v7738_v51 = vor.u32 %v10943_v49, %v7735_v50  ;;  %v112_v45 = vld [vmem:[#allocation2 + $0x8] sm:$0xff]  ;;  %v693_v49 = vperm.slane %v12055_v26, 1 }
  0xb3   :  { %3407 = vmatpush.bf16.msra.mxu0 %v7734_v56  ;;  %3420 = vmatpush.bf16.msra.mxu1 %v8182_v57  ;;  %v8239_v56 = vld [vmem:[#allocation8 + $0x428] sm:$0xf0]  ;;  %v116_v46 = vld [vmem:[#allocation2 + $0x28] sm:$0xff] }
  0xb4   :  { %3433 = vmatpush.bf16.msra.mxu2 %v8630_v2  ;;  %3446 = vmatpush.bf16.msra.mxu3 %v9078_v30  ;;  %v8242_v57 = vor.u32 %v11069_v55, %v8239_v56  ;;  %v11335_v2 = vld [vmem:[#allocation8 + $0xc44] sm:$0xf]  ;;  %v11035_v55 = vld [vmem:[#allocation8 + $0x2dc] sm:$0xf0]  ;;  %v120_v56 = vadd.f32 %v116_v46, %v112_v45  ;;  %v8973_v46 = vld [vmem:[#allocation8 + $0x9a8] sm:$0xf] }
  0xb7   :  { %3452 = vmatpush.bf16.msrb.mxu0 %v8130_v60  ;;  %3465 = vmatpush.bf16.msrb.mxu1 %v8578_v62  ;;  %v11209_v60 = vld [vmem:[#allocation8 + $0x854] sm:$0xf]  ;;  %v8799_v62 = vld [vmem:[#allocation8 + $0x888] sm:$0xf0] }
  0xb8   :  { %3478 = vmatpush.bf16.msrb.mxu2 %v9026_v3  ;;  %3491 = vmatpush.bf16.msrb.mxu3 %v9474_v40  ;;  %v8802_v63 = vor.u32 %v11209_v60, %v8799_v62  ;;  %v8186_v3 = vor.u32 %v11055_v0, %v8183_v1  ;;  %v8581_v60 = vld [vmem:[#allocation8 + $0x698] sm:$0xf] }
  0xb9   :  { %v8021_v62 = vld [vmem:[#allocation8 + $0x238] sm:$0xf] }
  0xbb   :  { %3453 = vmatpush.bf16.msrb.mxu0 %v8074_v4  ;;  %3466 = vmatpush.bf16.msrb.mxu1 %v8522_v7  ;;  %v9303_v4 = vld [vmem:[#allocation8 + $0xc78] sm:$0xf0]  ;;  %v11195_v7 = vld [vmem:[#allocation8 + $0x7e4] sm:$0xf] }
  0xbc   :  { %3479 = vmatpush.bf16.msrb.mxu2 %v8970_v27  ;;  %3492 = vmatpush.bf16.msrb.mxu3 %v9418_v48  ;;  %v9306_v5 = vor.u32 %v11335_v2, %v9303_v4  ;;  %v8746_v9 = vor.u32 %v11195_v7, %v8743_v8  ;;  %v679_v27 = vperm.slane %v12053_v22, 0  ;;  %v681_v4 = vperm.slane %v12053_v22, 2 }
  0xbf   :  { %3454 = vmatpush.bf16.msrb.mxu0 %v8018_v11  ;;  %3467 = vmatpush.bf16.msrb.mxu1 %v8466_v12  ;;  %v9247_v11 = vld [vmem:[#allocation8 + $0xc08] sm:$0xf0] }
  0xc0   :  { %3480 = vmatpush.bf16.msrb.mxu2 %v8914_v32  ;;  %3493 = vmatpush.bf16.msrb.mxu3 %v9362_v61  ;;  %v9250_v12 = vor.u32 %v11321_v10, %v9247_v11  ;;  %v11161_v61 = vld [vmem:[#allocation8 + $0x6cc] sm:$0xf0] }
  0xc3   :  { %3455 = vmatpush.bf16.msrb.mxu0 %v7962_v15  ;;  %3468 = vmatpush.bf16.msrb.mxu1 %v8410_v21  ;;  %v8690_v15 = vor.u32 %v11181_v13, %v8687_v14  ;;  %v8634_v21 = vor.u32 %v11167_v19, %v8631_v20  ;;  %v11147_v13 = vld [vmem:[#allocation8 + $0x65c] sm:$0xf0] }
  0xc4   :  { %3481 = vmatpush.bf16.msrb.mxu2 %v8858_v54  ;;  %3494 = vmatpush.bf16.msrb.mxu3 %v9306_v5  ;;  %v8077_v54 = vld [vmem:[#allocation8 + $0x2a8] sm:$0xf]  ;;  %v8582_v5 = vor.u32 %v11161_v61, %v8581_v60  ;;  %v8917_v60 = vld [vmem:[#allocation8 + $0x938] sm:$0xf]  ;;  %v11245_v61 = vld [vmem:[#allocation8 + $0x96c] sm:$0xf0] }
  0xc5   :  { %v8078_v59 = vor.u32 %v11035_v55, %v8077_v54 }
  0xc7   :  { %3456 = vmatpush.bf16.msrb.mxu0 %v7906_v18  ;;  %3469 = vmatpush.bf16.msrb.mxu1 %v8354_v36  ;;  %v9194_v18 = vor.u32 %v11307_v16, %v9191_v17  ;;  %v9082_v36 = vor.u32 %v11279_v28, %v9079_v29  ;;  %v7965_v16 = vld [vmem:[#allocation8 + $0x1c8] sm:$0xf]  ;;  %v11007_v17 = vld [vmem:[#allocation8 + $0x1fc] sm:$0xf0]  ;;  %v11273_v28 = vld [vmem:[#allocation8 + $0xa4c] sm:$0xf0] }
  0xc8   :  { %3482 = vmatpush.bf16.msrb.mxu2 %v8802_v63  ;;  %3495 = vmatpush.bf16.msrb.mxu3 %v9250_v12  ;;  %v11021_v63 = vld [vmem:[#allocation8 + $0x26c] sm:$0xf0]  ;;  %v8525_v12 = vld [vmem:[#allocation8 + $0x628] sm:$0xf]  ;;  %v682_v29 = vperm.slane %v12053_v22, 3 }
  0xc9   :  { %v8022_v11 = vor.u32 %v11021_v63, %v8021_v62  ;;  %v8526_v20 = vor.u32 %v11147_v13, %v8525_v12  ;;  %v7797_v63 = vld [vmem:[#allocation8 + $0x78] sm:$0xf]  ;;  %v11371_v12 = vld [vmem:[#allocation8 + $0xd5c] sm:$0xf0] }
  0xcb   :  { %3457 = vmatpush.bf16.msrb.mxu0 %v7850_v24  ;;  %3470 = vmatpush.bf16.msrb.mxu1 %v8298_v47  ;;  %v9135_v24 = vld [vmem:[#allocation8 + $0xb28] sm:$0xf0] }
  0xcc   :  { %3483 = vmatpush.bf16.msrb.mxu2 %v8746_v9  ;;  %3496 = vmatpush.bf16.msrb.mxu3 %v9194_v18  ;;  %v9138_v25 = vor.u32 %v11293_v23, %v9135_v24  ;;  %v117_v9 = vld [vmem:[#allocation2 + $0x30] sm:$0xff]  ;;  %v8469_v23 = vld [vmem:[#allocation8 + $0x5b8] sm:$0xf]  ;;  %v11133_v24 = vld [vmem:[#allocation8 + $0x5ec] sm:$0xf0] }
  0xcf   :  { %3458 = vmatpush.bf16.msrb.mxu0 %v7794_v41  ;;  %3471 = vmatpush.bf16.msrb.mxu1 %v8242_v57 }
  0xd0   :  { %3484 = vmatpush.bf16.msrb.mxu2 %v8690_v15  ;;  %3497 = vmatpush.bf16.msrb.mxu3 %v9138_v25  ;;  %v694_v15 = vperm.slane %v12055_v26, 2 }
  0xd3   :  { %3459 = vmatpush.bf16.msrb.mxu0 %v7738_v51  ;;  %3472 = vmatpush.bf16.msrb.mxu1 %v8186_v3  ;;  %v113_v3 = vld [vmem:[#allocation2 + $0x10] sm:$0xff] }
  0xd4   :  { %3485 = vmatpush.bf16.msrb.mxu2 %v8634_v21  ;;  %3498 = vmatpush.bf16.msrb.mxu3 %v9082_v36  ;;  %v121_v18 = vadd.f32 %v117_v9, %v113_v3  ;;  %v7966_v21 = vor.u32 %v11007_v17, %v7965_v16  ;;  %v114_v36 = vld [vmem:[#allocation2 + $0x18] sm:$0xff]  ;;  %v8918_v9 = vor.u32 %v11245_v61, %v8917_v60  ;;  %v7741_v16 = vld [vmem:[#allocation8 + $0x8] sm:$0xf]  ;;  %v10951_v17 = vld [vmem:[#allocation8 + $0x3c] sm:$0xf0] }
  0xd5   :  { %v11000_v61 = vld [vmem:[#allocation8 + $0x1cc] sm:$0xf] }
 0x112   :  { %v583_v30 = vpop.f32.mrf.mxu0  ;;  %v596_v35 = vpop.f32.mrf.mxu1 }
 0x113   :  { %v597_v37 = vadd.f32 %v596_v35, %v583_v30  ;;  %v7909_v30 = vld [vmem:[#allocation8 + $0x158] sm:$0xf] }
 0x114   :  { %v7910_v22 = vor.u32 %v10993_v33, %v7909_v30  ;;  %v8805_v33 = vld [vmem:[#allocation8 + $0x858] sm:$0xf] }
 0x115   :  { %v687_v40 = vmul.f32 %v679_v27, %v597_v37  ;;  %v9029_v27 = vld [vmem:[#allocation8 + $0xa18] sm:$0xf]  ;;  %v118_v37 = vld [vmem:[#allocation2 + $0x38] sm:$0xff] }
 0x117   :  { %v700_v41 = vadd.f32 %v692_v38, %v687_v40 }
 0x119   :  { %v704_v32 = vadd.f32 %v700_v41, %v119_v39  ;;  %v609_v44 = vpop.f32.mrf.mxu2  ;;  %v622_v47 = vpop.f32.mrf.mxu3  ;;  %v8470_v39 = vor.u32 %v11133_v24, %v8469_v23  ;;  %v695_v41 = vperm.slane %v12055_v26, 3  ;;  %v8357_v26 = vld [vmem:[#allocation8 + $0x4d8] sm:$0xf] }
 0x11a   :  { %v623_v48 = vadd.f32 %v622_v47, %v609_v44  ;;  %v585_v50 = vpop.f32.mrf.mxu0  ;;  %v598_v51 = vpop.f32.mrf.mxu1  ;;  %v11119_v44 = vld [vmem:[#allocation8 + $0x57c] sm:$0xf0]  ;;  %v8245_v23 = vld [vmem:[#allocation8 + $0x3f8] sm:$0xf] }
 0x11b   :  { %v12061_v53 = vpack.c.bf16 %v704_v32, %v704_v32  ;;  %v8413_v32 = vld [vmem:[#allocation8 + $0x548] sm:$0xf]  ;;  %v11259_v47 = vld [vmem:[#allocation8 + $0x9dc] sm:$0xf0] }
 0x11c   :  { %v688_v57 = vmul.f32 %v680_v31, %v623_v48  ;;  %v9030_v31 = vor.u32 %v11273_v28, %v9029_v27  ;;  %v122_v48 = vadd.f32 %v118_v37, %v114_v36  ;;  %v7853_v50 = vld [vmem:[#allocation8 + $0xe8] sm:$0xf]  ;;  %v10979_v51 = vld [vmem:[#allocation8 + $0x11c] sm:$0xf0]  ;;  %v8974_v55 = vor.u32 %v11259_v47, %v8973_v46  ;;  %v9365_v27 = vld [vmem:[#allocation8 + $0xcb8] sm:$0xf] }
 0x11d   :  { %3408 = vmatmul.bf16.vlgmr.msra.gmra.mxu0 %v12061_v53  ;;  %v11357_v28 = vld [vmem:[#allocation8 + $0xcec] sm:$0xf0]  ;;  %v11028_v37 = vld [vmem:[#allocation8 + $0x2ac] sm:$0xf]  ;;  %v11203_v46 = vld [vmem:[#allocation8 + $0x81c] sm:$0xf0] }
 0x11e   :  { %v701_v58 = vadd.f32 %v693_v49, %v688_v57  ;;  %3504 = vmatpush.bf16.msra.mxu0 %v8134_v52  ;;  %v8414_v52 = vor.u32 %v11119_v44, %v8413_v32  ;;  %v9477_v57 = vld [vmem:[#allocation8 + $0xd98] sm:$0xf]  ;;  %v9366_v36 = vor.u32 %v11357_v28, %v9365_v27  ;;  %v8583_v32 = vld [vmem:[#allocation8 + $0x6d0] sm:$0xf0]  ;;  %v7855_v28 = vld [vmem:[#allocation8 + $0x120] sm:$0xf0] }
 0x120   :  { %v705_v0 = vadd.f32 %v701_v58, %v120_v56  ;;  %v11105_v56 = vld [vmem:[#allocation8 + $0x50c] sm:$0xf0] }
 0x121   :  { %v611_v1 = vpop.f32.mrf.mxu2  ;;  %v624_v2 = vpop.f32.mrf.mxu3  ;;  %v11385_v58 = vld [vmem:[#allocation8 + $0xdcc] sm:$0xf0]  ;;  %v8358_v3 = vor.u32 %v11105_v56, %v8357_v26  ;;  %v8527_v56 = vld [vmem:[#allocation8 + $0x660] sm:$0xf0] }
 0x122   :  { %v12065_v7 = vpack.c.bf16 %v705_v0, %v705_v0  ;;  %3505 = vmatpush.bf16.msra.mxu0 %v8078_v59  ;;  %v635_v8 = vpop.f32.mrf.mxu0  ;;  %v648_v10 = vpop.f32.mrf.mxu1  ;;  %v7854_v59 = vor.u32 %v10979_v51, %v7853_v50  ;;  %v10965_v0 = vld [vmem:[#allocation8 + $0xac] sm:$0xf0]  ;;  %v8023_v50 = vld [vmem:[#allocation8 + $0x270] sm:$0xf0] }
 0x123   :  { %v649_v14 = vadd.f32 %v648_v10, %v635_v8  ;;  %v11091_v10 = vld [vmem:[#allocation8 + $0x49c] sm:$0xf0]  ;;  %v7798_v13 = vor.u32 %v10965_v0, %v7797_v63  ;;  %v11329_v26 = vld [vmem:[#allocation8 + $0xc0c] sm:$0xf0]  ;;  %v9197_v0 = vld [vmem:[#allocation8 + $0xb68] sm:$0xf] }
 0x124   :  { %3421 = vmatmul.bf16.vlgmr.msra.gmra.mxu1 %v12065_v7 }
 0x125   :  { %v689_v19 = vmul.f32 %v681_v4, %v649_v14  ;;  %3517 = vmatpush.bf16.msra.mxu1 %v8582_v5  ;;  %v9478_v4 = vor.u32 %v11385_v58, %v9477_v57  ;;  %v8301_v5 = vld [vmem:[#allocation8 + $0x468] sm:$0xf]  ;;  %v8693_v58 = vld [vmem:[#allocation8 + $0x778] sm:$0xf] }
 0x126   :  { %3506 = vmatpush.bf16.msra.mxu0 %v8022_v11  ;;  %v9421_v11 = vld [vmem:[#allocation8 + $0xd28] sm:$0xf] }
 0x127   :  { %v702_v25 = vadd.f32 %v694_v15, %v689_v19  ;;  %v8861_v14 = vld [vmem:[#allocation8 + $0x8c8] sm:$0xf]  ;;  %v11231_v15 = vld [vmem:[#allocation8 + $0x8fc] sm:$0xf0]  ;;  %v9422_v19 = vor.u32 %v11371_v12, %v9421_v11  ;;  %v10986_v11 = vld [vmem:[#allocation8 + $0x15c] sm:$0xf] }
 0x128   :  { %v8862_v24 = vor.u32 %v11231_v15, %v8861_v14  ;;  %v11266_v14 = vld [vmem:[#allocation8 + $0xa1c] sm:$0xf]  ;;  %v9031_v15 = vld [vmem:[#allocation8 + $0xa50] sm:$0xf0] }
 0x129   :  { %v706_v34 = vadd.f32 %v702_v25, %v121_v18  ;;  %3518 = vmatpush.bf16.msra.mxu1 %v8526_v20  ;;  %v661_v35 = vpop.f32.mrf.mxu2  ;;  %v674_v38 = vpop.f32.mrf.mxu3  ;;  %v8302_v18 = vor.u32 %v11091_v10, %v8301_v5  ;;  %v11042_v20 = vld [vmem:[#allocation8 + $0x31c] sm:$0xf]  ;;  %v11077_v25 = vld [vmem:[#allocation8 + $0x42c] sm:$0xf0]  ;;  %v11175_v10 = vld [vmem:[#allocation8 + $0x73c] sm:$0xf0] }
 0x12a   :  { %v675_v40 = vadd.f32 %v674_v38, %v661_v35  ;;  %3507 = vmatpush.bf16.msra.mxu0 %v7966_v21  ;;  %v637_v42 = vpop.f32.mrf.mxu0  ;;  %v650_v43 = vpop.f32.mrf.mxu1  ;;  %v8135_v21 = vld [vmem:[#allocation8 + $0x350] sm:$0xf0]  ;;  %v8246_v35 = vor.u32 %v11077_v25, %v8245_v23  ;;  %v8079_v38 = vld [vmem:[#allocation8 + $0x2e0] sm:$0xf0]  ;;  %v10972_v25 = vld [vmem:[#allocation8 + $0xec] sm:$0xf] }
 0x12b   :  { %v12071_v45 = vpack.c.bf16 %v706_v34, %v706_v34  ;;  %v8138_v30 = vor.u32 %v11042_v20, %v8135_v21  ;;  %v11217_v34 = vld [vmem:[#allocation8 + $0x88c] sm:$0xf0]  ;;  %v11343_v42 = vld [vmem:[#allocation8 + $0xc7c] sm:$0xf0]  ;;  %v8082_v44 = vor.u32 %v11028_v37, %v8079_v38  ;;  %v11112_v20 = vld [vmem:[#allocation8 + $0x54c] sm:$0xf] }
 0x12c   :  { %v690_v49 = vmul.f32 %v682_v29, %v675_v40  ;;  %v7742_v29 = vor.u32 %v10951_v17, %v7741_v16  ;;  %v11063_v40 = vld [vmem:[#allocation8 + $0x3bc] sm:$0xf0]  ;;  %v8806_v43 = vor.u32 %v11217_v34, %v8805_v33  ;;  %v9141_v17 = vld [vmem:[#allocation8 + $0xaf8] sm:$0xf]  ;;  %v8415_v21 = vld [vmem:[#allocation8 + $0x580] sm:$0xf0] }
 0x12d   :  { %3519 = vmatpush.bf16.msra.mxu1 %v8470_v39  ;;  %3434 = vmatmul.bf16.vlgmr.msra.gmra.mxu2 %v12071_v45  ;;  %v8189_v39 = vld [vmem:[#allocation8 + $0x388] sm:$0xf]  ;;  %v8418_v33 = vor.u32 %v11112_v20, %v8415_v21  ;;  %v8359_v37 = vld [vmem:[#allocation8 + $0x510] sm:$0xf0]  ;;  %v11378_v38 = vld [vmem:[#allocation8 + $0xd9c] sm:$0xf] }
 0x12e   :  { %v703_v54 = vadd.f32 %v695_v41, %v690_v49  ;;  %3460 = vmatmul.bf16.vlgmr.msrb.gmra.mxu0 %v12061_v53  ;;  %3530 = vmatpush.bf16.msra.mxu2 %v9030_v31  ;;  %v9309_v41 = vld [vmem:[#allocation8 + $0xc48] sm:$0xf]  ;;  %v11154_v31 = vld [vmem:[#allocation8 + $0x69c] sm:$0xf]  ;;  %v8190_v47 = vor.u32 %v11063_v40, %v8189_v39  ;;  %v9479_v39 = vld [vmem:[#allocation8 + $0xdd0] sm:$0xf0]  ;;  %v7858_v40 = vor.u32 %v10972_v25, %v7855_v28 }
 0x12f   :  { %3508 = vmatpush.bf16.msra.mxu0 %v7910_v22  ;;  %v8749_v22 = vld [vmem:[#allocation8 + $0x7e8] sm:$0xf]  ;;  %v11014_v49 = vld [vmem:[#allocation8 + $0x23c] sm:$0xf]  ;;  %v8586_v51 = vor.u32 %v11154_v31, %v8583_v32  ;;  %v7799_v31 = vld [vmem:[#allocation8 + $0xb0] sm:$0xf0] }
 0x130   :  { %v707_v62 = vadd.f32 %v703_v54, %v122_v48  ;;  %v9310_v48 = vor.u32 %v11343_v42, %v9309_v41  ;;  %v8750_v54 = vor.u32 %v11203_v46, %v8749_v22  ;;  %v8026_v57 = vor.u32 %v11014_v49, %v8023_v50  ;;  %v9085_v34 = vld [vmem:[#allocation8 + $0xa88] sm:$0xf]  ;;  %v10958_v42 = vld [vmem:[#allocation8 + $0x7c] sm:$0xf]  ;;  %v11364_v49 = vld [vmem:[#allocation8 + $0xd2c] sm:$0xf] }
 0x131   :  { %3520 = vmatpush.bf16.msra.mxu1 %v8414_v52  ;;  %v663_v1 = vpop.f32.mrf.mxu2  ;;  %v676_v2 = vpop.f32.mrf.mxu3  ;;  %v9253_v52 = vld [vmem:[#allocation8 + $0xbd8] sm:$0xf]  ;;  %v11238_v32 = vld [vmem:[#allocation8 + $0x93c] sm:$0xf]  ;;  %v9482_v46 = vor.u32 %v11378_v38, %v9479_v39  ;;  %v9423_v50 = vld [vmem:[#allocation8 + $0xd60] sm:$0xf0] }
 0x132   :  { %v12075_v8 = vpack.c.bf16 %v707_v62, %v707_v62  ;;  %3531 = vmatpush.bf16.msra.mxu2 %v8974_v55  ;;  %v11140_v55 = vld [vmem:[#allocation8 + $0x62c] sm:$0xf]  ;;  %v9254_v60 = vor.u32 %v11329_v26, %v9253_v52  ;;  %v7967_v62 = vld [vmem:[#allocation8 + $0x200] sm:$0xf0]  ;;  %v11315_v1 = vld [vmem:[#allocation8 + $0xb9c] sm:$0xf0] }
 0x133   :  { %3509 = vmatpush.bf16.msra.mxu0 %v7854_v59  ;;  %v11189_v59 = vld [vmem:[#allocation8 + $0x7ac] sm:$0xf0]  ;;  %v8530_v63 = vor.u32 %v11140_v55, %v8527_v56  ;;  %v7970_v5 = vor.u32 %v11000_v61, %v7967_v62  ;;  %v9198_v12 = vor.u32 %v11315_v1, %v9197_v0  ;;  %v10944_v26 = vld [vmem:[#allocation8 + $0xc] sm:$0xf]  ;;  %v8863_v56 = vld [vmem:[#allocation8 + $0x900] sm:$0xf0] }
 0x134   :  { %3447 = vmatmul.bf16.vlgmr.msra.gmra.mxu3 %v12075_v8  ;;  %3473 = vmatmul.bf16.vlgmr.msrb.gmra.mxu1 %v12065_v7  ;;  %v8694_v2 = vor.u32 %v11189_v59, %v8693_v58  ;;  %v11224_v55 = vld [vmem:[#allocation8 + $0x8cc] sm:$0xf]  ;;  %v9426_v58 = vor.u32 %v11364_v49, %v9423_v50  ;;  %v8141_v59 = vld [vmem:[#allocation8 + $0x320] sm:$0xf]  ;;  %v11070_v61 = vld [vmem:[#allocation8 + $0x3fc] sm:$0xf] }
 0x135   :  { %3521 = vmatpush.bf16.msra.mxu1 %v8358_v3  ;;  %3543 = vmatpush.bf16.msra.mxu3 %v9478_v4  ;;  %v11126_v3 = vld [vmem:[#allocation8 + $0x5bc] sm:$0xf]  ;;  %v8471_v4 = vld [vmem:[#allocation8 + $0x5f0] sm:$0xf0]  ;;  %v11196_v21 = vld [vmem:[#allocation8 + $0x7ec] sm:$0xf] }
 0x136   :  { %3532 = vmatpush.bf16.msra.mxu2 %v8918_v9  ;;  %v8637_v9 = vld [vmem:[#allocation8 + $0x708] sm:$0xf]  ;;  %v8474_v16 = vor.u32 %v11126_v3, %v8471_v4  ;;  %v8247_v62 = vld [vmem:[#allocation8 + $0x430] sm:$0xf0]  ;;  %v11210_v4 = vld [vmem:[#allocation8 + $0x85c] sm:$0xf] }
 0x137   :  { %3510 = vmatpush.bf16.msra.mxu0 %v7798_v13  ;;  %v7911_v13 = vld [vmem:[#allocation8 + $0x190] sm:$0xf0]  ;;  %v11022_v28 = vld [vmem:[#allocation8 + $0x274] sm:$0xf0]  ;;  %v11182_v38 = vld [vmem:[#allocation8 + $0x77c] sm:$0xf] }
 0x138   :  { %v7914_v23 = vor.u32 %v10986_v11, %v7911_v13  ;;  %v9367_v0 = vld [vmem:[#allocation8 + $0xcf0] sm:$0xf0]  ;;  %v8085_v11 = vld [vmem:[#allocation8 + $0x2b0] sm:$0xf]  ;;  %v11056_v13 = vld [vmem:[#allocation8 + $0x38c] sm:$0xf] }
 0x139   :  { %3522 = vmatpush.bf16.msra.mxu1 %v8302_v18  ;;  %3544 = vmatpush.bf16.msra.mxu3 %v9422_v19  ;;  %v11301_v18 = vld [vmem:[#allocation8 + $0xb2c] sm:$0xf0]  ;;  %v8638_v19 = vor.u32 %v11175_v10, %v8637_v9  ;;  %v8250_v9 = vor.u32 %v11070_v61, %v8247_v62  ;;  %v8695_v39 = vld [vmem:[#allocation8 + $0x7b0] sm:$0xf0]  ;;  %v8639_v49 = vld [vmem:[#allocation8 + $0x740] sm:$0xf0] }
 0x13a   :  { %3533 = vmatpush.bf16.msra.mxu2 %v8862_v24  ;;  %v9034_v24 = vor.u32 %v11266_v14, %v9031_v15  ;;  %v9142_v27 = vor.u32 %v11301_v18, %v9141_v17  ;;  %v8191_v14 = vld [vmem:[#allocation8 + $0x3c0] sm:$0xf0]  ;;  %v11336_v15 = vld [vmem:[#allocation8 + $0xc4c] sm:$0xf]  ;;  %v8589_v18 = vld [vmem:[#allocation8 + $0x6a0] sm:$0xf] }
 0x13b   :  { %3511 = vmatpush.bf16.msra.mxu0 %v7742_v29  ;;  %v11252_v29 = vld [vmem:[#allocation8 + $0x9ac] sm:$0xf]  ;;  %v7917_v50 = vld [vmem:[#allocation8 + $0x160] sm:$0xf] }
 0x13d   :  { %3523 = vmatpush.bf16.msra.mxu1 %v8246_v35  ;;  %3545 = vmatpush.bf16.msra.mxu3 %v9366_v36  ;;  %v11287_v35 = vld [vmem:[#allocation8 + $0xabc] sm:$0xf0]  ;;  %v11098_v36 = vld [vmem:[#allocation8 + $0x4dc] sm:$0xf] }
 0x13e   :  { %3486 = vmatmul.bf16.vlgmr.msrb.gmra.mxu2 %v12071_v45  ;;  %3512 = vmatmul.bf16.vlgmr.msra.gmra.mxu0 %v12061_v53  ;;  %v8362_v22 = vor.u32 %v11098_v36, %v8359_v37  ;;  %v11148_v36 = vld [vmem:[#allocation8 + $0x664] sm:$0xf0] }
 0x13f   :  { %3556 = vmatpush.bf16.msrb.mxu0 %v8138_v30  ;;  %3534 = vmatpush.bf16.msra.mxu2 %v8806_v43  ;;  %v8975_v30 = vld [vmem:[#allocation8 + $0x9e0] sm:$0xf0]  ;;  %v9086_v43 = vor.u32 %v11287_v35, %v9085_v34  ;;  %v8533_v35 = vld [vmem:[#allocation8 + $0x630] sm:$0xf] }
 0x140   :  { %v8978_v41 = vor.u32 %v11252_v29, %v8975_v30  ;;  %v11322_v30 = vld [vmem:[#allocation8 + $0xbdc] sm:$0xf] }
 0x141   :  { %3524 = vmatpush.bf16.msra.mxu1 %v8190_v47  ;;  %3546 = vmatpush.bf16.msra.mxu3 %v9310_v48  ;;  %v11084_v47 = vld [vmem:[#allocation8 + $0x46c] sm:$0xf]  ;;  %v8303_v48 = vld [vmem:[#allocation8 + $0x4a0] sm:$0xf0] }
 0x143   :  { %3557 = vmatpush.bf16.msrb.mxu0 %v8082_v44  ;;  %3535 = vmatpush.bf16.msra.mxu2 %v8750_v54  ;;  %v8919_v44 = vld [vmem:[#allocation8 + $0x970] sm:$0xf0]  ;;  %v7743_v54 = vld [vmem:[#allocation8 + $0x40] sm:$0xf0] }
 0x144   :  { %3499 = vmatmul.bf16.vlgmr.msrb.gmra.mxu3 %v12075_v8  ;;  %3525 = vmatmul.bf16.vlgmr.msra.gmra.mxu1 %v12065_v7  ;;  %v8922_v52 = vor.u32 %v11238_v32, %v8919_v44  ;;  %v7746_v1 = vor.u32 %v10944_v26, %v7743_v54  ;;  %v9199_v32 = vld [vmem:[#allocation8 + $0xba0] sm:$0xf0]  ;;  %v8698_v44 = vor.u32 %v11182_v38, %v8695_v39  ;;  %v9037_v26 = vld [vmem:[#allocation8 + $0xa20] sm:$0xf]  ;;  %v11274_v54 = vld [vmem:[#allocation8 + $0xa54] sm:$0xf0] }
 0x145   :  { %3569 = vmatpush.bf16.msrb.mxu1 %v8586_v51  ;;  %3547 = vmatpush.bf16.msra.mxu3 %v9254_v60  ;;  %v7802_v51 = vor.u32 %v10958_v42, %v7799_v31  ;;  %v11050_v60 = vld [vmem:[#allocation8 + $0x354] sm:$0xf0]  ;;  %v11008_v42 = vld [vmem:[#allocation8 + $0x204] sm:$0xf0]  ;;  %v11308_v31 = vld [vmem:[#allocation8 + $0xb6c] sm:$0xf]  ;;  %v9038_v62 = vor.u32 %v11274_v54, %v9037_v26 }
 0x146   :  { %v8142_v3 = vor.u32 %v11050_v60, %v8141_v59  ;;  %v8421_v59 = vld [vmem:[#allocation8 + $0x550] sm:$0xf]  ;;  %v11120_v60 = vld [vmem:[#allocation8 + $0x584] sm:$0xf0]  ;;  %v11043_v39 = vld [vmem:[#allocation8 + $0x324] sm:$0xf] }
 0x147   :  { %3558 = vmatpush.bf16.msrb.mxu0 %v8026_v57  ;;  %3536 = vmatpush.bf16.msra.mxu2 %v8694_v2  ;;  %v8306_v57 = vor.u32 %v11084_v47, %v8303_v48  ;;  %v8866_v2 = vor.u32 %v11224_v55, %v8863_v56  ;;  %v11168_v48 = vld [vmem:[#allocation8 + $0x70c] sm:$0xf]  ;;  %v11294_v56 = vld [vmem:[#allocation8 + $0xafc] sm:$0xf]  ;;  %v11064_v26 = vld [vmem:[#allocation8 + $0x3c4] sm:$0xf0] }
 0x148   :  { %v9317_v54 = vld [vmem:[#allocation8 + $0xc50] sm:$0xf] }
 0x149   :  { %3570 = vmatpush.bf16.msrb.mxu1 %v8530_v63  ;;  %3548 = vmatpush.bf16.msra.mxu3 %v9198_v12  ;;  %v11350_v63 = vld [vmem:[#allocation8 + $0xcbc] sm:$0xf]  ;;  %v11036_v12 = vld [vmem:[#allocation8 + $0x2e4] sm:$0xf0] }
 0x14a   :  { %v9370_v10 = vor.u32 %v11350_v63, %v9367_v0  ;;  %v8086_v20 = vor.u32 %v11036_v12, %v8085_v11  ;;  %v7861_v63 = vld [vmem:[#allocation8 + $0xf0] sm:$0xf]  ;;  %v11106_v11 = vld [vmem:[#allocation8 + $0x514] sm:$0xf0]  ;;  %v9485_v12 = vld [vmem:[#allocation8 + $0xda0] sm:$0xf] }
 0x14b   :  { %3559 = vmatpush.bf16.msrb.mxu0 %v7970_v5  ;;  %3537 = vmatpush.bf16.msra.mxu2 %v8638_v19  ;;  %v8807_v5 = vld [vmem:[#allocation8 + $0x890] sm:$0xf0]  ;;  %v11162_v19 = vld [vmem:[#allocation8 + $0x6d4] sm:$0xf0] }
 0x14c   :  { %v8810_v17 = vor.u32 %v11210_v4, %v8807_v5  ;;  %v8590_v29 = vor.u32 %v11162_v19, %v8589_v18  ;;  %v8422_v4 = vor.u32 %v11120_v60, %v8421_v59  ;;  %v11280_v5 = vld [vmem:[#allocation8 + $0xa8c] sm:$0xf]  ;;  %v10966_v18 = vld [vmem:[#allocation8 + $0xb4] sm:$0xf0] }
 0x14d   :  { %3571 = vmatpush.bf16.msrb.mxu1 %v8474_v16  ;;  %3549 = vmatpush.bf16.msra.mxu3 %v9142_v27  ;;  %v9311_v16 = vld [vmem:[#allocation8 + $0xc80] sm:$0xf0]  ;;  %v8029_v27 = vld [vmem:[#allocation8 + $0x240] sm:$0xf] }
 0x14e   :  { %3538 = vmatmul.bf16.vlgmr.msra.gmra.mxu2 %v12071_v45  ;;  %v9314_v25 = vor.u32 %v11336_v15, %v9311_v16  ;;  %v8030_v37 = vor.u32 %v11022_v28, %v8029_v27  ;;  %v9429_v27 = vld [vmem:[#allocation8 + $0xd30] sm:$0xf]  ;;  %v11372_v28 = vld [vmem:[#allocation8 + $0xd64] sm:$0xf0] }
 0x14f   :  { %3560 = vmatpush.bf16.msrb.mxu0 %v7914_v23  ;;  %3582 = vmatpush.bf16.msrb.mxu2 %v9034_v24  ;;  %v8751_v23 = vld [vmem:[#allocation8 + $0x820] sm:$0xf0]  ;;  %v8194_v24 = vor.u32 %v11056_v13, %v8191_v14  ;;  %v11386_v13 = vld [vmem:[#allocation8 + $0xdd4] sm:$0xf0]  ;;  %v9430_v38 = vor.u32 %v11372_v28, %v9429_v27  ;;  %v11176_v28 = vld [vmem:[#allocation8 + $0x744] sm:$0xf0] }
 0x150   :  { %v8754_v34 = vor.u32 %v11196_v21, %v8751_v23  ;;  %v8925_v21 = vld [vmem:[#allocation8 + $0x940] sm:$0xf]  ;;  %v11246_v23 = vld [vmem:[#allocation8 + $0x974] sm:$0xf0] }
 0x151   :  { %3572 = vmatpush.bf16.msrb.mxu1 %v8418_v33  ;;  %3550 = vmatpush.bf16.msra.mxu3 %v9086_v43  ;;  %v9255_v33 = vld [vmem:[#allocation8 + $0xc10] sm:$0xf0]  ;;  %v8534_v43 = vor.u32 %v11148_v36, %v8533_v35  ;;  %v8869_v35 = vld [vmem:[#allocation8 + $0x8d0] sm:$0xf]  ;;  %v11232_v36 = vld [vmem:[#allocation8 + $0x904] sm:$0xf0] }
 0x153   :  { %3561 = vmatpush.bf16.msrb.mxu0 %v7858_v40  ;;  %3583 = vmatpush.bf16.msrb.mxu2 %v8978_v41  ;;  %v9258_v40 = vor.u32 %v11322_v30, %v9255_v33  ;;  %v7973_v41 = vld [vmem:[#allocation8 + $0x1d0] sm:$0xf]  ;;  %v8926_v33 = vor.u32 %v11246_v23, %v8925_v21  ;;  %v8479_v21 = vld [vmem:[#allocation8 + $0x5f8] sm:$0xf0] }
 0x154   :  { %3551 = vmatmul.bf16.vlgmr.msra.gmra.mxu3 %v12075_v8  ;;  %v7974_v47 = vor.u32 %v11008_v42, %v7973_v41  ;;  %v7749_v30 = vld [vmem:[#allocation8 + $0x10] sm:$0xf]  ;;  %v8253_v41 = vld [vmem:[#allocation8 + $0x400] sm:$0xf]  ;;  %v11078_v42 = vld [vmem:[#allocation8 + $0x434] sm:$0xf0] }
 0x155   :  { %3573 = vmatpush.bf16.msrb.mxu1 %v8362_v22  ;;  %3595 = vmatpush.bf16.msrb.mxu3 %v9482_v46  ;;  %v8477_v22 = vld [vmem:[#allocation8 + $0x5c0] sm:$0xf]  ;;  %v11134_v46 = vld [vmem:[#allocation8 + $0x5f4] sm:$0xf0] }
 0x156   :  { %v8478_v55 = vor.u32 %v11134_v46, %v8477_v22  ;;  %v8813_v46 = vld [vmem:[#allocation8 + $0x860] sm:$0xf] }
 0x157   :  { %3562 = vmatpush.bf16.msrb.mxu0 %v7802_v51  ;;  %3584 = vmatpush.bf16.msrb.mxu2 %v8922_v52  ;;  %v9202_v51 = vor.u32 %v11308_v31, %v9199_v32  ;;  %v10994_v52 = vld [vmem:[#allocation8 + $0x194] sm:$0xf0] }
 0x158   :  { %v7918_v61 = vor.u32 %v10994_v52, %v7917_v50  ;;  %v11358_v31 = vld [vmem:[#allocation8 + $0xcf4] sm:$0xf0]  ;;  %v11029_v50 = vld [vmem:[#allocation8 + $0x2b4] sm:$0xf]  ;;  %v8197_v52 = vld [vmem:[#allocation8 + $0x390] sm:$0xf] }
 0x159   :  { %3574 = vmatpush.bf16.msrb.mxu1 %v8306_v57  ;;  %3596 = vmatpush.bf16.msrb.mxu3 %v9426_v58  ;;  %v9143_v57 = vld [vmem:[#allocation8 + $0xb30] sm:$0xf0]  ;;  %v8642_v58 = vor.u32 %v11168_v48, %v8639_v49  ;;  %v8254_v48 = vor.u32 %v11078_v42, %v8253_v41  ;;  %v8198_v60 = vor.u32 %v11064_v26, %v8197_v52  ;;  %v9487_v52 = vld [vmem:[#allocation8 + $0xdd8] sm:$0xf0] }
 0x15a   :  { %v9146_v0 = vor.u32 %v11294_v56, %v9143_v57  ;;  %v11155_v56 = vld [vmem:[#allocation8 + $0x6a4] sm:$0xf]  ;;  %v8591_v57 = vld [vmem:[#allocation8 + $0x6d8] sm:$0xf0] }
 0x15b   :  { %3563 = vmatpush.bf16.msrb.mxu0 %v7746_v1  ;;  %3585 = vmatpush.bf16.msrb.mxu2 %v8866_v2  ;;  %v10980_v1 = vld [vmem:[#allocation8 + $0x124] sm:$0xf0]  ;;  %v8981_v2 = vld [vmem:[#allocation8 + $0x9b0] sm:$0xf] }
 0x15c   :  { %v7862_v14 = vor.u32 %v10980_v1, %v7861_v63  ;;  %v11204_v63 = vld [vmem:[#allocation8 + $0x824] sm:$0xf0]  ;;  %v8594_v1 = vor.u32 %v11155_v56, %v8591_v57  ;;  %v10959_v57 = vld [vmem:[#allocation8 + $0x84] sm:$0xf] }
 0x15d   :  { %3575 = vmatpush.bf16.msrb.mxu1 %v8250_v9  ;;  %3597 = vmatpush.bf16.msrb.mxu3 %v9370_v10  ;;  %v9087_v9 = vld [vmem:[#allocation8 + $0xac0] sm:$0xf0]  ;;  %v8365_v10 = vld [vmem:[#allocation8 + $0x4e0] sm:$0xf] }
 0x15e   :  { %3564 = vmatmul.bf16.vlgmr.msrb.gmra.mxu0 %v12061_v53  ;;  %v9090_v16 = vor.u32 %v11280_v5, %v9087_v9  ;;  %v8366_v19 = vor.u32 %v11106_v11, %v8365_v10  ;;  %v11141_v5 = vld [vmem:[#allocation8 + $0x634] sm:$0xf]  ;;  %v8535_v9 = vld [vmem:[#allocation8 + $0x668] sm:$0xf0] }
 0x15f   :  { %3608 = vmatpush.bf16.msra.mxu0 %v8142_v3  ;;  %3586 = vmatpush.bf16.msrb.mxu2 %v8810_v17  ;;  %v11260_v3 = vld [vmem:[#allocation8 + $0x9e4] sm:$0xf0]  ;;  %v7805_v17 = vld [vmem:[#allocation8 + $0x80] sm:$0xf] }
 0x160   :  { %v8982_v15 = vor.u32 %v11260_v3, %v8981_v2  ;;  %v8031_v2 = vld [vmem:[#allocation8 + $0x278] sm:$0xf0]  ;;  %v9261_v3 = vld [vmem:[#allocation8 + $0xbe0] sm:$0xf] }
 0x161   :  { %3576 = vmatpush.bf16.msrb.mxu1 %v8194_v24  ;;  %3598 = vmatpush.bf16.msrb.mxu3 %v9314_v25  ;;  %v8309_v24 = vld [vmem:[#allocation8 + $0x470] sm:$0xf]  ;;  %v11092_v25 = vld [vmem:[#allocation8 + $0x4a4] sm:$0xf0] }
 0x163   :  { %3609 = vmatpush.bf16.msra.mxu0 %v8086_v20  ;;  %3587 = vmatpush.bf16.msrb.mxu2 %v8754_v34  ;;  %v9486_v20 = vor.u32 %v11386_v13, %v9485_v12  ;;  %v10952_v34 = vld [vmem:[#allocation8 + $0x44] sm:$0xf0]  ;;  %v8701_v13 = vld [vmem:[#allocation8 + $0x780] sm:$0xf] }
 0x164   :  { %3577 = vmatmul.bf16.vlgmr.msrb.gmra.mxu1 %v12065_v7  ;;  %v7750_v32 = vor.u32 %v10952_v34, %v7749_v30  ;;  %v7919_v30 = vld [vmem:[#allocation8 + $0x198] sm:$0xf0]  ;;  %v11267_v34 = vld [vmem:[#allocation8 + $0xa24] sm:$0xf] }
 0x165   :  { %3621 = vmatpush.bf16.msra.mxu1 %v8590_v29  ;;  %3599 = vmatpush.bf16.msrb.mxu3 %v9258_v40  ;;  %v7806_v29 = vor.u32 %v10966_v18, %v7805_v17  ;;  %v8143_v40 = vld [vmem:[#allocation8 + $0x358] sm:$0xf0]  ;;  %v7975_v17 = vld [vmem:[#allocation8 + $0x208] sm:$0xf0]  ;;  %v9205_v18 = vld [vmem:[#allocation8 + $0xb70] sm:$0xf] }
 0x166   :  { %v8146_v22 = vor.u32 %v11043_v39, %v8143_v40  ;;  %v8423_v39 = vld [vmem:[#allocation8 + $0x588] sm:$0xf0] }
 0x167   :  { %3610 = vmatpush.bf16.msra.mxu0 %v8030_v37  ;;  %3588 = vmatpush.bf16.msrb.mxu2 %v8698_v44  ;;  %v8310_v37 = vor.u32 %v11092_v25, %v8309_v24  ;;  %v8870_v44 = vor.u32 %v11232_v36, %v8869_v35  ;;  %v8645_v24 = vld [vmem:[#allocation8 + $0x710] sm:$0xf]  ;;  %v9039_v35 = vld [vmem:[#allocation8 + $0xa58] sm:$0xf0]  ;;  %v9149_v36 = vld [vmem:[#allocation8 + $0xb00] sm:$0xf] }
 0x168   :  { %v8646_v40 = vor.u32 %v11176_v28, %v8645_v24  ;;  %v9042_v42 = vor.u32 %v11267_v34, %v9039_v35  ;;  %v8815_v24 = vld [vmem:[#allocation8 + $0x898] sm:$0xf0]  ;;  %v8093_v28 = vld [vmem:[#allocation8 + $0x2b8] sm:$0xf]  ;;  %v11337_v34 = vld [vmem:[#allocation8 + $0xc54] sm:$0xf] }
 0x169   :  { %3622 = vmatpush.bf16.msra.mxu1 %v8534_v43  ;;  %3600 = vmatpush.bf16.msrb.mxu3 %v9202_v51  ;;  %v9373_v43 = vld [vmem:[#allocation8 + $0xcc0] sm:$0xf]  ;;  %v8087_v51 = vld [vmem:[#allocation8 + $0x2e8] sm:$0xf0] }
 0x16a   :  { %v9374_v49 = vor.u32 %v11358_v31, %v9373_v43  ;;  %v8090_v59 = vor.u32 %v11029_v50, %v8087_v51  ;;  %v10973_v43 = vld [vmem:[#allocation8 + $0xf4] sm:$0xf]  ;;  %v7863_v31 = vld [vmem:[#allocation8 + $0x128] sm:$0xf0]  ;;  %v8367_v50 = vld [vmem:[#allocation8 + $0x518] sm:$0xf0] }
 0x16b   :  { %3611 = vmatpush.bf16.msra.mxu0 %v7974_v47  ;;  %3589 = vmatpush.bf16.msrb.mxu2 %v8642_v58  ;;  %v11218_v47 = vld [vmem:[#allocation8 + $0x894] sm:$0xf0]  ;;  %v11379_v51 = vld [vmem:[#allocation8 + $0xda4] sm:$0xf]  ;;  %v7866_v26 = vor.u32 %v10973_v43, %v7863_v31  ;;  %v9319_v35 = vld [vmem:[#allocation8 + $0xc88] sm:$0xf0] }
 0x16c   :  { %v8814_v58 = vor.u32 %v11218_v47, %v8813_v46  ;;  %v8983_v46 = vld [vmem:[#allocation8 + $0x9e8] sm:$0xf0]  ;;  %v9093_v47 = vld [vmem:[#allocation8 + $0xa90] sm:$0xf]  ;;  %v8037_v31 = vld [vmem:[#allocation8 + $0x248] sm:$0xf] }
 0x16d   :  { %3623 = vmatpush.bf16.msra.mxu1 %v8478_v55  ;;  %3601 = vmatpush.bf16.msrb.mxu3 %v9146_v0  ;;  %v11344_v55 = vld [vmem:[#allocation8 + $0xc84] sm:$0xf0]  ;;  %v11015_v0 = vld [vmem:[#allocation8 + $0x244] sm:$0xf]  ;;  %v8759_v43 = vld [vmem:[#allocation8 + $0x828] sm:$0xf0] }
 0x16e   :  { %3590 = vmatmul.bf16.vlgmr.msrb.gmra.mxu2 %v12071_v45  ;;  %v8034_v11 = vor.u32 %v11015_v0, %v8031_v2  ;;  %v11365_v0 = vld [vmem:[#allocation8 + $0xd34] sm:$0xf] }
 0x16f   :  { %3612 = vmatpush.bf16.msra.mxu0 %v7918_v61  ;;  %3634 = vmatpush.bf16.msra.mxu2 %v9038_v62  ;;  %v9318_v61 = vor.u32 %v11344_v55, %v9317_v54  ;;  %v8757_v62 = vld [vmem:[#allocation8 + $0x7f0] sm:$0xf] }
 0x170   :  { %v8758_v10 = vor.u32 %v11204_v63, %v8757_v62  ;;  %v11085_v62 = vld [vmem:[#allocation8 + $0x474] sm:$0xf]  ;;  %v8311_v63 = vld [vmem:[#allocation8 + $0x4a8] sm:$0xf0] }
 0x171   :  { %3624 = vmatpush.bf16.msra.mxu1 %v8422_v4  ;;  %3602 = vmatpush.bf16.msrb.mxu3 %v9090_v16  ;;  %v11330_v4 = vld [vmem:[#allocation8 + $0xc14] sm:$0xf0]  ;;  %v8538_v16 = vor.u32 %v11141_v5, %v8535_v9  ;;  %v8314_v5 = vor.u32 %v11085_v62, %v8311_v63  ;;  %v7751_v9 = vld [vmem:[#allocation8 + $0x48] sm:$0xf0]  ;;  %v11169_v63 = vld [vmem:[#allocation8 + $0x714] sm:$0xf] }
 0x172   :  { %v9262_v12 = vor.u32 %v11330_v4, %v9261_v3  ;;  %v10945_v3 = vld [vmem:[#allocation8 + $0x14] sm:$0xf] }
 0x173   :  { %3613 = vmatpush.bf16.msra.mxu0 %v7862_v14  ;;  %3635 = vmatpush.bf16.msra.mxu2 %v8982_v15  ;;  %v11190_v14 = vld [vmem:[#allocation8 + $0x7b4] sm:$0xf0]  ;;  %v11001_v15 = vld [vmem:[#allocation8 + $0x1d4] sm:$0xf] }
 0x174   :  { %3603 = vmatmul.bf16.vlgmr.msrb.gmra.mxu3 %v12075_v8  ;;  %v8702_v23 = vor.u32 %v11190_v14, %v8701_v13  ;;  %v7978_v25 = vor.u32 %v11001_v15, %v7975_v17  ;;  %v8149_v13 = vld [vmem:[#allocation8 + $0x328] sm:$0xf]  ;;  %v11051_v14 = vld [vmem:[#allocation8 + $0x35c] sm:$0xf0]  ;;  %v11071_v15 = vld [vmem:[#allocation8 + $0x404] sm:$0xf] }
 0x175   :  { %3625 = vmatpush.bf16.msra.mxu1 %v8366_v19  ;;  %3647 = vmatpush.bf16.msra.mxu3 %v9486_v20  ;;  %v11316_v19 = vld [vmem:[#allocation8 + $0xba4] sm:$0xf0]  ;;  %v11127_v20 = vld [vmem:[#allocation8 + $0x5c4] sm:$0xf] }
 0x176   :  { %v9206_v27 = vor.u32 %v11316_v19, %v9205_v18  ;;  %v11351_v17 = vld [vmem:[#allocation8 + $0xcc4] sm:$0xf]  ;;  %v9375_v18 = vld [vmem:[#allocation8 + $0xcf8] sm:$0xf0]  ;;  %v7754_v19 = vor.u32 %v10945_v3, %v7751_v9  ;;  %v7925_v3 = vld [vmem:[#allocation8 + $0x168] sm:$0xf] }
 0x177   :  { %3614 = vmatpush.bf16.msra.mxu0 %v7806_v29  ;;  %3636 = vmatpush.bf16.msra.mxu2 %v8926_v33  ;;  %v10987_v29 = vld [vmem:[#allocation8 + $0x164] sm:$0xf]  ;;  %v8482_v33 = vor.u32 %v11127_v20, %v8479_v21  ;;  %v8150_v21 = vor.u32 %v11051_v14, %v8149_v13  ;;  %v9045_v9 = vld [vmem:[#allocation8 + $0xa28] sm:$0xf]  ;;  %v8429_v13 = vld [vmem:[#allocation8 + $0x558] sm:$0xf] }
 0x178   :  { %v7922_v41 = vor.u32 %v10987_v29, %v7919_v30  ;;  %v11037_v29 = vld [vmem:[#allocation8 + $0x2ec] sm:$0xf0]  ;;  %v11057_v30 = vld [vmem:[#allocation8 + $0x394] sm:$0xf] }
 0x179   :  { %3626 = vmatpush.bf16.msra.mxu1 %v8310_v37  ;;  %3648 = vmatpush.bf16.msra.mxu3 %v9430_v38  ;;  %v11302_v37 = vld [vmem:[#allocation8 + $0xb34] sm:$0xf0]  ;;  %v11113_v38 = vld [vmem:[#allocation8 + $0x554] sm:$0xf]  ;;  %v11121_v14 = vld [vmem:[#allocation8 + $0x58c] sm:$0xf0] }
 0x17b   :  { %3615 = vmatpush.bf16.msra.mxu0 %v7750_v32  ;;  %3637 = vmatpush.bf16.msra.mxu2 %v8870_v44  ;;  %v9150_v32 = vor.u32 %v11302_v37, %v9149_v36  ;;  %v8426_v44 = vor.u32 %v11113_v38, %v8423_v39  ;;  %v8597_v36 = vld [vmem:[#allocation8 + $0x6a8] sm:$0xf]  ;;  %v11163_v37 = vld [vmem:[#allocation8 + $0x6dc] sm:$0xf0]  ;;  %v8094_v39 = vor.u32 %v11037_v29, %v8093_v28  ;;  %v11261_v28 = vld [vmem:[#allocation8 + $0x9ec] sm:$0xf0] }
 0x17c   :  { %v11281_v29 = vld [vmem:[#allocation8 + $0xa94] sm:$0xf] }
 0x17d   :  { %3627 = vmatpush.bf16.msra.mxu1 %v8254_v48  ;;  %3649 = vmatpush.bf16.msra.mxu3 %v9374_v49  ;;  %v11288_v48 = vld [vmem:[#allocation8 + $0xac4] sm:$0xf0]  ;;  %v11099_v49 = vld [vmem:[#allocation8 + $0x4e4] sm:$0xf] }
 0x17e   :  { %3616 = vmatmul.bf16.vlgmr.msra.gmra.mxu0 %v12061_v53  ;;  %v9094_v55 = vor.u32 %v11288_v48, %v9093_v47  ;;  %v8370_v56 = vor.u32 %v11099_v49, %v8367_v50  ;;  %v8541_v47 = vld [vmem:[#allocation8 + $0x638] sm:$0xf]  ;;  %v11149_v48 = vld [vmem:[#allocation8 + $0x66c] sm:$0xf0] }
 0x17f   :  { %3660 = vmatpush.bf16.msrb.mxu0 %v8146_v22  ;;  %3638 = vmatpush.bf16.msra.mxu2 %v8814_v58  ;;  %v11253_v22 = vld [vmem:[#allocation8 + $0x9b4] sm:$0xf]  ;;  %v7807_v58 = vld [vmem:[#allocation8 + $0xb8] sm:$0xf0] }
 0x180   :  { %v8986_v54 = vor.u32 %v11253_v22, %v8983_v46  ;;  %v7810_v2 = vor.u32 %v10959_v57, %v7807_v58  ;;  %v11323_v22 = vld [vmem:[#allocation8 + $0xbe4] sm:$0xf]  ;;  %v9263_v46 = vld [vmem:[#allocation8 + $0xc18] sm:$0xf0]  ;;  %v11009_v57 = vld [vmem:[#allocation8 + $0x20c] sm:$0xf0] }
 0x181   :  { %3628 = vmatpush.bf16.msra.mxu1 %v8198_v60  ;;  %3650 = vmatpush.bf16.msra.mxu3 %v9318_v61  ;;  %v9490_v60 = vor.u32 %v11379_v51, %v9487_v52  ;;  %v8927_v61 = vld [vmem:[#allocation8 + $0x978] sm:$0xf0]  ;;  %v9266_v51 = vor.u32 %v11323_v22, %v9263_v46  ;;  %v11183_v52 = vld [vmem:[#allocation8 + $0x784] sm:$0xf]  ;;  %v11309_v58 = vld [vmem:[#allocation8 + $0xb74] sm:$0xf] }
 0x182   :  { %v11093_v22 = vld [vmem:[#allocation8 + $0x4ac] sm:$0xf0]  ;;  %v9437_v46 = vld [vmem:[#allocation8 + $0xd38] sm:$0xf] }
 0x183   :  { %3661 = vmatpush.bf16.msrb.mxu0 %v8090_v59  ;;  %3639 = vmatpush.bf16.msra.mxu2 %v8758_v10  ;;  %v11239_v59 = vld [vmem:[#allocation8 + $0x944] sm:$0xf]  ;;  %v11225_v10 = vld [vmem:[#allocation8 + $0x8d4] sm:$0xf] }
 0x184   :  { %3629 = vmatmul.bf16.vlgmr.msra.gmra.mxu1 %v12065_v7  ;;  %v8930_v4 = vor.u32 %v11239_v59, %v8927_v61  ;;  %v9207_v59 = vld [vmem:[#allocation8 + $0xba8] sm:$0xf0]  ;;  %v11135_v61 = vld [vmem:[#allocation8 + $0x5fc] sm:$0xf0] }
 0x185   :  { %3673 = vmatpush.bf16.msrb.mxu1 %v8594_v1  ;;  %3651 = vmatpush.bf16.msra.mxu3 %v9262_v12  ;;  %v9431_v1 = vld [vmem:[#allocation8 + $0xd68] sm:$0xf0] }
 0x186   :  { %v9434_v12 = vor.u32 %v11365_v0, %v9431_v1  ;;  %v9210_v1 = vor.u32 %v11309_v58, %v9207_v59  ;;  %v11044_v58 = vld [vmem:[#allocation8 + $0x32c] sm:$0xf]  ;;  %v8151_v59 = vld [vmem:[#allocation8 + $0x360] sm:$0xf0] }
 0x187   :  { %3662 = vmatpush.bf16.msrb.mxu0 %v8034_v11  ;;  %3640 = vmatpush.bf16.msra.mxu2 %v8702_v23  ;;  %v8871_v11 = vld [vmem:[#allocation8 + $0x908] sm:$0xf0]  ;;  %v11211_v23 = vld [vmem:[#allocation8 + $0x864] sm:$0xf] }
 0x188   :  { %v8874_v20 = vor.u32 %v11225_v10, %v8871_v11  ;;  %v8818_v38 = vor.u32 %v11211_v23, %v8815_v24  ;;  %v11275_v10 = vld [vmem:[#allocation8 + $0xa5c] sm:$0xf0]  ;;  %v11295_v11 = vld [vmem:[#allocation8 + $0xb04] sm:$0xf] }
 0x189   :  { %3674 = vmatpush.bf16.msrb.mxu1 %v8538_v16  ;;  %3652 = vmatpush.bf16.msra.mxu3 %v9206_v27  ;;  %v8255_v16 = vld [vmem:[#allocation8 + $0x438] sm:$0xf0]  ;;  %v9378_v27 = vor.u32 %v11351_v17, %v9375_v18  ;;  %v9046_v18 = vor.u32 %v11275_v10, %v9045_v9 }
 0x18a   :  { %v11030_v10 = vld [vmem:[#allocation8 + $0x2bc] sm:$0xf] }
 0x18b   :  { %3663 = vmatpush.bf16.msrb.mxu0 %v7978_v25  ;;  %3641 = vmatpush.bf16.msra.mxu2 %v8646_v40  ;;  %v8258_v25 = vor.u32 %v11071_v15, %v8255_v16 }
 0x18d   :  { %3675 = vmatpush.bf16.msrb.mxu1 %v8482_v33  ;;  %3653 = vmatpush.bf16.msra.mxu3 %v9150_v32  ;;  %v8199_v33 = vld [vmem:[#allocation8 + $0x3c8] sm:$0xf0]  ;;  %v8598_v32 = vor.u32 %v11163_v37, %v8597_v36  ;;  %v11387_v36 = vld [vmem:[#allocation8 + $0xddc] sm:$0xf0] }
 0x18e   :  { %3642 = vmatmul.bf16.vlgmr.msra.gmra.mxu2 %v12071_v45  ;;  %v8202_v40 = vor.u32 %v11057_v30, %v8199_v33  ;;  %v9095_v30 = vld [vmem:[#allocation8 + $0xac8] sm:$0xf0]  ;;  %v8373_v33 = vld [vmem:[#allocation8 + $0x4e8] sm:$0xf] }
 0x18f   :  { %3664 = vmatpush.bf16.msrb.mxu0 %v7922_v41  ;;  %3686 = vmatpush.bf16.msrb.mxu2 %v9042_v42  ;;  %v9322_v41 = vor.u32 %v11337_v34, %v9319_v35  ;;  %v11197_v42 = vld [vmem:[#allocation8 + $0x7f4] sm:$0xf]  ;;  %v11107_v34 = vld [vmem:[#allocation8 + $0x51c] sm:$0xf0]  ;;  %v9493_v35 = vld [vmem:[#allocation8 + $0xda8] sm:$0xf] }
 0x190   :  { %v8762_v49 = vor.u32 %v11197_v42, %v8759_v43  ;;  %v10967_v42 = vld [vmem:[#allocation8 + $0xbc] sm:$0xf0]  ;;  %v8933_v43 = vld [vmem:[#allocation8 + $0x948] sm:$0xf] }
 0x191   :  { %3676 = vmatpush.bf16.msrb.mxu1 %v8426_v44  ;;  %3654 = vmatpush.bf16.msra.mxu3 %v9094_v55  ;;  %v11023_v44 = vld [vmem:[#allocation8 + $0x27c] sm:$0xf0] }
 0x192   :  { %v8038_v50 = vor.u32 %v11023_v44, %v8037_v31  ;;  %v9494_v31 = vor.u32 %v11387_v36, %v9493_v35  ;;  %v8317_v44 = vld [vmem:[#allocation8 + $0x478] sm:$0xf]  ;;  %v8039_v35 = vld [vmem:[#allocation8 + $0x280] sm:$0xf0]  ;;  %v9269_v36 = vld [vmem:[#allocation8 + $0xbe8] sm:$0xf] }
 0x193   :  { %3665 = vmatpush.bf16.msrb.mxu0 %v7866_v26  ;;  %3687 = vmatpush.bf16.msrb.mxu2 %v8986_v54  ;;  %v8703_v26 = vld [vmem:[#allocation8 + $0x7b8] sm:$0xf0]  ;;  %v7981_v54 = vld [vmem:[#allocation8 + $0x1d8] sm:$0xf] }
 0x194   :  { %3655 = vmatmul.bf16.vlgmr.msra.gmra.mxu3 %v12075_v8  ;;  %v8706_v62 = vor.u32 %v11183_v52, %v8703_v26  ;;  %v7982_v0 = vor.u32 %v11009_v57, %v7981_v54  ;;  %v8318_v52 = vor.u32 %v11093_v22, %v8317_v44  ;;  %v10953_v26 = vld [vmem:[#allocation8 + $0x4c] sm:$0xf0]  ;;  %v8877_v54 = vld [vmem:[#allocation8 + $0x8d8] sm:$0xf]  ;;  %v11002_v44 = vld [vmem:[#allocation8 + $0x1dc] sm:$0xf] }
 0x195   :  { %3677 = vmatpush.bf16.msrb.mxu1 %v8370_v56  ;;  %3699 = vmatpush.bf16.msrb.mxu3 %v9490_v60  ;;  %v8542_v56 = vor.u32 %v11149_v48, %v8541_v47  ;;  %v8485_v60 = vld [vmem:[#allocation8 + $0x5c8] sm:$0xf]  ;;  %v11373_v47 = vld [vmem:[#allocation8 + $0xd6c] sm:$0xf0] }
 0x196   :  { %v9438_v57 = vor.u32 %v11373_v47, %v9437_v46 }
 0x197   :  { %3666 = vmatpush.bf16.msrb.mxu0 %v7810_v2  ;;  %3688 = vmatpush.bf16.msrb.mxu2 %v8930_v4  ;;  %v8647_v2 = vld [vmem:[#allocation8 + $0x748] sm:$0xf0]  ;;  %v10995_v4 = vld [vmem:[#allocation8 + $0x19c] sm:$0xf0] }
 0x198   :  { %v8650_v15 = vor.u32 %v11169_v63, %v8647_v2  ;;  %v7926_v17 = vor.u32 %v10995_v4, %v7925_v3  ;;  %v11359_v63 = vld [vmem:[#allocation8 + $0xcfc] sm:$0xf0]  ;;  %v8154_v2 = vor.u32 %v11044_v58, %v8151_v59  ;;  %v8821_v3 = vld [vmem:[#allocation8 + $0x868] sm:$0xf]  ;;  %v11177_v59 = vld [vmem:[#allocation8 + $0x74c] sm:$0xf0] }
 0x199   :  { %3678 = vmatpush.bf16.msrb.mxu1 %v8314_v5  ;;  %3700 = vmatpush.bf16.msrb.mxu3 %v9434_v12  ;;  %v8486_v5 = vor.u32 %v11135_v61, %v8485_v60  ;;  %v9151_v12 = vld [vmem:[#allocation8 + $0xb38] sm:$0xf0]  ;;  %v8261_v60 = vld [vmem:[#allocation8 + $0x408] sm:$0xf]  ;;  %v11079_v61 = vld [vmem:[#allocation8 + $0x43c] sm:$0xf0] }
 0x19a   :  { %v3409_v55 = vpop.f32.mrf.mxu0  ;;  %v9154_v24 = vor.u32 %v11295_v11, %v9151_v12  ;;  %v11219_v4 = vld [vmem:[#allocation8 + $0x89c] sm:$0xf0]  ;;  %v8095_v11 = vld [vmem:[#allocation8 + $0x2f0] sm:$0xf0]  ;;  %v8205_v12 = vld [vmem:[#allocation8 + $0x398] sm:$0xf] }
 0x19b   :  { %3667 = vmatpush.bf16.msrb.mxu0 %v7754_v19  ;;  %3689 = vmatpush.bf16.msrb.mxu2 %v8874_v20  ;;  %v7869_v19 = vld [vmem:[#allocation8 + $0xf8] sm:$0xf]  ;;  %v10981_v20 = vld [vmem:[#allocation8 + $0x12c] sm:$0xf0] }
 0x19c   :  { %v7870_v37 = vor.u32 %v10981_v20, %v7869_v19  ;;  %v11156_v19 = vld [vmem:[#allocation8 + $0x6ac] sm:$0xf]  ;;  %v8599_v20 = vld [vmem:[#allocation8 + $0x6e0] sm:$0xf0] }
 0x19d   :  { %3679 = vmatpush.bf16.msrb.mxu1 %v8258_v25  ;;  %3701 = vmatpush.bf16.msrb.mxu3 %v9378_v27  ;;  %v8430_v25 = vor.u32 %v11121_v14, %v8429_v13  ;;  %v8989_v27 = vld [vmem:[#allocation8 + $0x9b8] sm:$0xf]  ;;  %v11065_v14 = vld [vmem:[#allocation8 + $0x3cc] sm:$0xf0] }
 0x19e   :  { %3668 = vmatmul.bf16.vlgmr.msrb.gmra.mxu0 %v12061_v53 }
 0x19f   :  { %3712 = vmatpush.bf16.msra.mxu0 %v8150_v21  ;;  %3690 = vmatpush.bf16.msrb.mxu2 %v8818_v38  ;;  %v8990_v38 = vor.u32 %v11261_v28, %v8989_v27  ;;  %v8206_v28 = vor.u32 %v11065_v14, %v8205_v12  ;;  %v7871_v14 = vld [vmem:[#allocation8 + $0x130] sm:$0xf0] }
 0x1a1   :  { %3680 = vmatpush.bf16.msrb.mxu1 %v8202_v40  ;;  %3702 = vmatpush.bf16.msrb.mxu3 %v9322_v41  ;;  %v3422_v16 = vpop.f32.mrf.mxu1  ;;  %v8374_v40 = vor.u32 %v11107_v34, %v8373_v33  ;;  %v7813_v41 = vld [vmem:[#allocation8 + $0x88] sm:$0xf]  ;;  %v11205_v33 = vld [vmem:[#allocation8 + $0x82c] sm:$0xf0]  ;;  %v11016_v34 = vld [vmem:[#allocation8 + $0x24c] sm:$0xf] }
 0x1a2   :  { %v12095_v21 = vadd.f32 %v3422_v16, %v3409_v55  ;;  %v3411_v23 = vpop.f32.mrf.mxu0  ;;  %v11233_v55 = vld [vmem:[#allocation8 + $0x90c] sm:$0xf0] }
 0x1a3   :  { %3713 = vmatpush.bf16.msra.mxu0 %v8094_v39  ;;  %3691 = vmatpush.bf16.msrb.mxu2 %v8762_v49  ;;  %v9098_v39 = vor.u32 %v11281_v29, %v9095_v30  ;;  %v7814_v49 = vor.u32 %v10967_v42, %v7813_v41  ;;  %v11345_v16 = vld [vmem:[#allocation8 + $0xc8c] sm:$0xf0]  ;;  %v8765_v30 = vld [vmem:[#allocation8 + $0x7f8] sm:$0xf]  ;;  %v8042_v42 = vor.u32 %v11016_v34, %v8039_v35  ;;  %v9495_v34 = vld [vmem:[#allocation8 + $0xde0] sm:$0xf0] }
 0x1a4   :  { %3681 = vmatmul.bf16.vlgmr.msrb.gmra.mxu1 %v12065_v7 }
 0x1a5   :  { %3725 = vmatpush.bf16.msra.mxu1 %v8598_v32  ;;  %3703 = vmatpush.bf16.msrb.mxu3 %v9266_v51  ;;  %v11247_v32 = vld [vmem:[#allocation8 + $0x97c] sm:$0xf0] }
 0x1a6   :  { %v8934_v51 = vor.u32 %v11247_v32, %v8933_v43  ;;  %v11191_v32 = vld [vmem:[#allocation8 + $0x7bc] sm:$0xf0] }
 0x1a7   :  { %3714 = vmatpush.bf16.msra.mxu0 %v8038_v50  ;;  %3692 = vmatpush.bf16.msrb.mxu2 %v8706_v62  ;;  %v7757_v50 = vld [vmem:[#allocation8 + $0x18] sm:$0xf]  ;;  %v9381_v62 = vld [vmem:[#allocation8 + $0xcc8] sm:$0xf] }
 0x1a8   :  { %v9382_v9 = vor.u32 %v11359_v63, %v9381_v62  ;;  %v11268_v63 = vld [vmem:[#allocation8 + $0xa2c] sm:$0xf] }
 0x1a9   :  { %3726 = vmatpush.bf16.msra.mxu1 %v8542_v56  ;;  %3704 = vmatpush.bf16.msrb.mxu3 %v9210_v1  ;;  %v3424_v48 = vpop.f32.mrf.mxu1  ;;  %v8878_v1 = vor.u32 %v11233_v55, %v8877_v54  ;;  %v8653_v55 = vld [vmem:[#allocation8 + $0x718] sm:$0xf] }
 0x1aa   :  { %v7983_v48 = vld [vmem:[#allocation8 + $0x210] sm:$0xf0] }
 0x1ab   :  { %3715 = vmatpush.bf16.msra.mxu0 %v7982_v0  ;;  %3693 = vmatpush.bf16.msrb.mxu2 %v8650_v15  ;;  %v3461_v56 = vpop.f32.mrf.mxu0  ;;  %v7758_v0 = vor.u32 %v10953_v26, %v7757_v50  ;;  %v9325_v15 = vld [vmem:[#allocation8 + $0xc58] sm:$0xf]  ;;  %v11317_v50 = vld [vmem:[#allocation8 + $0xbac] sm:$0xf0]  ;;  %v8487_v26 = vld [vmem:[#allocation8 + $0x600] sm:$0xf0] }
 0x1ac   :  { %v9326_v29 = vor.u32 %v11345_v16, %v9325_v15 }
 0x1ad   :  { %3727 = vmatpush.bf16.msra.mxu1 %v8486_v5  ;;  %3705 = vmatpush.bf16.msrb.mxu3 %v9154_v24  ;;  %v8262_v5 = vor.u32 %v11079_v61, %v8261_v60  ;;  %v8822_v24 = vor.u32 %v11219_v4, %v8821_v3  ;;  %v10988_v60 = vld [vmem:[#allocation8 + $0x16c] sm:$0xf]  ;;  %v7927_v61 = vld [vmem:[#allocation8 + $0x1a0] sm:$0xf0]  ;;  %v11114_v3 = vld [vmem:[#allocation8 + $0x55c] sm:$0xf] }
 0x1ae   :  { %3694 = vmatmul.bf16.vlgmr.msrb.gmra.mxu2 %v12071_v45  ;;  %v8431_v4 = vld [vmem:[#allocation8 + $0x590] sm:$0xf0] }
 0x1af   :  { %3716 = vmatpush.bf16.msra.mxu0 %v7926_v17  ;;  %3738 = vmatpush.bf16.msra.mxu2 %v9046_v18  ;;  %v8434_v16 = vor.u32 %v11114_v3, %v8431_v4  ;;  %v8263_v4 = vld [vmem:[#allocation8 + $0x440] sm:$0xf0] }
 0x1b0   :  { %v3435_v13 = vpop.f32.mrf.mxu2 }
 0x1b1   :  { %3728 = vmatpush.bf16.msra.mxu1 %v8430_v25  ;;  %3706 = vmatpush.bf16.msrb.mxu3 %v9098_v39  ;;  %v3436_v17 = vadd.f32 %v3435_v13, %v12095_v21  ;;  %v3474_v18 = vpop.f32.mrf.mxu1  ;;  %v8098_v25 = vor.u32 %v11030_v10, %v8095_v11  ;;  %v8602_v21 = vor.u32 %v11156_v19, %v8599_v20  ;;  %v8543_v39 = vld [vmem:[#allocation8 + $0x670] sm:$0xf0]  ;;  %v10974_v13 = vld [vmem:[#allocation8 + $0xfc] sm:$0xf]  ;;  %v9101_v19 = vld [vmem:[#allocation8 + $0xa98] sm:$0xf] }
 0x1b2   :  { %v12100_v23 = vadd.f32 %v3474_v18, %v3461_v56  ;;  %v7930_v11 = vor.u32 %v10988_v60, %v7927_v61  ;;  %v8991_v18 = vld [vmem:[#allocation8 + $0x9f0] sm:$0xf0] }
 0x1b3   :  { %3717 = vmatpush.bf16.msra.mxu0 %v7870_v37  ;;  %3739 = vmatpush.bf16.msra.mxu2 %v8990_v38  ;;  %v3463_v27 = vpop.f32.mrf.mxu0  ;;  %v11331_v37 = vld [vmem:[#allocation8 + $0xc1c] sm:$0xf0]  ;;  %v11142_v38 = vld [vmem:[#allocation8 + $0x63c] sm:$0xf] }
 0x1b4   :  { %3707 = vmatmul.bf16.vlgmr.msrb.gmra.mxu3 %v12075_v8  ;;  %v9270_v43 = vor.u32 %v11331_v37, %v9269_v36  ;;  %v8546_v47 = vor.u32 %v11142_v38, %v8543_v39  ;;  %v8375_v27 = vld [vmem:[#allocation8 + $0x520] sm:$0xf0]  ;;  %v7874_v37 = vor.u32 %v10974_v13, %v7871_v14 }
 0x1b5   :  { %3729 = vmatpush.bf16.msra.mxu1 %v8374_v40  ;;  %3751 = vmatpush.bf16.msra.mxu3 %v9494_v31  ;;  %v8766_v40 = vor.u32 %v11205_v33, %v8765_v30  ;;  %v8709_v31 = vld [vmem:[#allocation8 + $0x788] sm:$0xf]  ;;  %v11380_v33 = vld [vmem:[#allocation8 + $0xdac] sm:$0xf] }
 0x1b6   :  { %v8710_v54 = vor.u32 %v11191_v32, %v8709_v31  ;;  %v8935_v31 = vld [vmem:[#allocation8 + $0x980] sm:$0xf0]  ;;  %v11086_v32 = vld [vmem:[#allocation8 + $0x47c] sm:$0xf] }
 0x1b7   :  { %3718 = vmatpush.bf16.msra.mxu0 %v7814_v49  ;;  %3740 = vmatpush.bf16.msra.mxu2 %v8934_v51  ;;  %v3448_v41 = vpop.f32.mrf.mxu3  ;;  %v9213_v49 = vld [vmem:[#allocation8 + $0xb78] sm:$0xf] }
 0x1b8   :  { %v12103_v22 = vadd.f32 %v3448_v41, %v3436_v17  ;;  %v3437_v46 = vpop.f32.mrf.mxu2  ;;  %v9214_v58 = vor.u32 %v11317_v50, %v9213_v49  ;;  %v11254_v17 = vld [vmem:[#allocation8 + $0x9bc] sm:$0xf]  ;;  %v10960_v41 = vld [vmem:[#allocation8 + $0x8c] sm:$0xf]  ;;  %v9439_v50 = vld [vmem:[#allocation8 + $0xd70] sm:$0xf0] }
 0x1b9   :  { %3730 = vmatpush.bf16.msra.mxu1 %v8318_v52  ;;  %3752 = vmatpush.bf16.msra.mxu3 %v9438_v57  ;;  %v3476_v51 = vpop.f32.mrf.mxu1  ;;  %v11128_v52 = vld [vmem:[#allocation8 + $0x5cc] sm:$0xf]  ;;  %v7986_v57 = vor.u32 %v11002_v44, %v7983_v48  ;;  %v8994_v38 = vor.u32 %v11254_v17, %v8991_v18  ;;  %v8319_v44 = vld [vmem:[#allocation8 + $0x4b0] sm:$0xf0]  ;;  %v11366_v49 = vld [vmem:[#allocation8 + $0xd3c] sm:$0xf] }
 0x1ba   :  { %v8490_v62 = vor.u32 %v11128_v52, %v8487_v26  ;;  %v9442_v61 = vor.u32 %v11366_v49, %v9439_v50  ;;  %v8101_v17 = vld [vmem:[#allocation8 + $0x2c0] sm:$0xf]  ;;  %v11150_v50 = vld [vmem:[#allocation8 + $0x674] sm:$0xf0] }
 0x1bb   :  { %3719 = vmatpush.bf16.msra.mxu0 %v7758_v0  ;;  %3741 = vmatpush.bf16.msra.mxu2 %v8878_v1  ;;  %v3513_v56 = vpop.f32.mrf.mxu0  ;;  %v9047_v0 = vld [vmem:[#allocation8 + $0xa60] sm:$0xf0]  ;;  %v9157_v1 = vld [vmem:[#allocation8 + $0xb08] sm:$0xf]  ;;  %v8549_v49 = vld [vmem:[#allocation8 + $0x640] sm:$0xf] }
 0x1bc   :  { %v9050_v12 = vor.u32 %v11268_v63, %v9047_v0  ;;  %v11052_v63 = vld [vmem:[#allocation8 + $0x364] sm:$0xf0]  ;;  %v11072_v0 = vld [vmem:[#allocation8 + $0x40c] sm:$0xf] }
 0x1bd   :  { %3731 = vmatpush.bf16.msra.mxu1 %v8262_v5  ;;  %3753 = vmatpush.bf16.msra.mxu3 %v9382_v9  ;;  %v8654_v5 = vor.u32 %v11177_v59, %v8653_v55  ;;  %v12106_v9 = vld [vmem:[#allocation5 + $0x1a] sm:$0xff]  ;;  %v8266_v18 = vor.u32 %v11072_v0, %v8263_v4  ;;  %v11170_v0 = vld [vmem:[#allocation8 + $0x71c] sm:$0xf] }
 0x1be   :  { %3720 = vmatmul.bf16.vlgmr.msra.gmra.mxu0 %v12061_v53  ;;  %v4131_v48 = vperm.slane %v12106_v9, 1  ;;  %v8879_v59 = vld [vmem:[#allocation8 + $0x910] sm:$0xf0] }
 0x1bf   :  { %3764 = vmatpush.bf16.msrb.mxu0 %v8154_v2  ;;  %3742 = vmatpush.bf16.msra.mxu2 %v8822_v24  ;;  %v11303_v2 = vld [vmem:[#allocation8 + $0xb3c] sm:$0xf0]  ;;  %v3450_v10 = vpop.f32.mrf.mxu3  ;;  %v11289_v24 = vld [vmem:[#allocation8 + $0xacc] sm:$0xf0] }
 0x1c0   :  { %v9158_v15 = vor.u32 %v11303_v2, %v9157_v1  ;;  %v9102_v39 = vor.u32 %v11289_v24, %v9101_v19  ;;  %v9383_v10 = vld [vmem:[#allocation8 + $0xd00] sm:$0xf0]  ;;  %v11058_v24 = vld [vmem:[#allocation8 + $0x39c] sm:$0xf] }
 0x1c1   :  { %3732 = vmatpush.bf16.msra.mxu1 %v8206_v28  ;;  %3754 = vmatpush.bf16.msra.mxu3 %v9326_v29  ;;  %v3487_v20 = vpop.f32.mrf.mxu2  ;;  %v4130_v28 = vperm.slane %v12106_v9, 0  ;;  %v3526_v30 = vpop.f32.mrf.mxu1 }
 0x1c2   :  { %v3488_v29 = vadd.f32 %v3487_v20, %v12100_v23  ;;  %v12112_v35 = vadd.f32 %v3526_v30, %v3513_v56  ;;  %v9498_v23 = vor.u32 %v11380_v33, %v9495_v34  ;;  %v11038_v20 = vld [vmem:[#allocation8 + $0x2f4] sm:$0xf0]  ;;  %v9327_v30 = vld [vmem:[#allocation8 + $0xc90] sm:$0xf0]  ;;  %v8605_v34 = vld [vmem:[#allocation8 + $0x6b0] sm:$0xf] }
 0x1c3   :  { %3765 = vmatpush.bf16.msrb.mxu0 %v8098_v25  ;;  %3743 = vmatpush.bf16.msra.mxu2 %v8766_v40  ;;  %v11100_v25 = vld [vmem:[#allocation8 + $0x4ec] sm:$0xf]  ;;  %v3515_v36 = vpop.f32.mrf.mxu0  ;;  %v4158_v46 = vmul.f32 %v4130_v28, %v12103_v22  ;;  %v11226_v22 = vld [vmem:[#allocation8 + $0x8dc] sm:$0xf] }
 0x1c4   :  { %3733 = vmatmul.bf16.vlgmr.msra.gmra.mxu1 %v12065_v7  ;;  %v8378_v40 = vor.u32 %v11100_v25, %v8375_v27  ;;  %v8882_v13 = vor.u32 %v11226_v22, %v8879_v59  ;;  %v8207_v25 = vld [vmem:[#allocation8 + $0x3d0] sm:$0xf0]  ;;  %v11164_v36 = vld [vmem:[#allocation8 + $0x6e4] sm:$0xf0]  ;;  %v8493_v59 = vld [vmem:[#allocation8 + $0x5d0] sm:$0xf] }
 0x1c5   :  { %3777 = vmatpush.bf16.msrb.mxu1 %v8602_v21  ;;  %3755 = vmatpush.bf16.msra.mxu3 %v9270_v43  ;;  %v12110_v21 = vld [vmem:[#allocation5 + $0xc] sm:$0xff]  ;;  %v11240_v43 = vld [vmem:[#allocation8 + $0x94c] sm:$0xf]  ;;  %v9215_v22 = vld [vmem:[#allocation8 + $0xbb0] sm:$0xf0] }
 0x1c6   :  { %v4175_v52 = vperm.slane %v12110_v21, 1  ;;  %v8938_v56 = vor.u32 %v11240_v43, %v8935_v31  ;;  %v11198_v43 = vld [vmem:[#allocation8 + $0x7fc] sm:$0xf]  ;;  %v8045_v31 = vld [vmem:[#allocation8 + $0x250] sm:$0xf] }
 0x1c7   :  { %3766 = vmatpush.bf16.msrb.mxu0 %v8042_v42  ;;  %3744 = vmatpush.bf16.msra.mxu2 %v8710_v54  ;;  %v7815_v42 = vld [vmem:[#allocation8 + $0xc0] sm:$0xf0]  ;;  %v3500_v51 = vpop.f32.mrf.mxu3  ;;  %v10946_v54 = vld [vmem:[#allocation8 + $0x1c] sm:$0xf] }
 0x1c8   :  { %v7818_v26 = vor.u32 %v10960_v41, %v7815_v42  ;;  %v3501_v55 = vadd.f32 %v3500_v51, %v3488_v29  ;;  %v11338_v29 = vld [vmem:[#allocation8 + $0xc5c] sm:$0xf]  ;;  %v8210_v41 = vor.u32 %v11058_v24, %v8207_v25  ;;  %v7877_v25 = vld [vmem:[#allocation8 + $0x100] sm:$0xf] }
 0x1c9   :  { %3778 = vmatpush.bf16.msrb.mxu1 %v8546_v47  ;;  %3756 = vmatpush.bf16.msra.mxu3 %v9214_v58  ;;  %v4174_v47 = vperm.slane %v12110_v21, 0  ;;  %v7759_v58 = vld [vmem:[#allocation8 + $0x50] sm:$0xf0]  ;;  %v3489_v60 = vpop.f32.mrf.mxu2  ;;  %v3528_v3 = vpop.f32.mrf.mxu1  ;;  %v9330_v42 = vor.u32 %v11338_v29, %v9327_v30 }
 0x1ca   :  { %v4159_v2 = vmul.f32 %v4131_v48, %v3501_v55  ;;  %v9271_v48 = vld [vmem:[#allocation8 + $0xc20] sm:$0xf0]  ;;  %v11136_v60 = vld [vmem:[#allocation8 + $0x604] sm:$0xf0] }
 0x1cb   :  { %3767 = vmatpush.bf16.msrb.mxu0 %v7986_v57  ;;  %3745 = vmatpush.bf16.msra.mxu2 %v8654_v5  ;;  %v8322_v57 = vor.u32 %v11086_v32, %v8319_v44  ;;  %v4202_v1 = vadd.f32 %v4174_v47, %v4158_v46  ;;  %v11352_v5 = vld [vmem:[#allocation8 + $0xccc] sm:$0xf]  ;;  %v8606_v44 = vor.u32 %v11164_v36, %v8605_v34  ;;  %v11024_v46 = vld [vmem:[#allocation8 + $0x284] sm:$0xf0]  ;;  %v8711_v55 = vld [vmem:[#allocation8 + $0x7c0] sm:$0xf0] }
 0x1cc   :  { %v9386_v19 = vor.u32 %v11352_v5, %v9383_v10  ;;  %v11324_v47 = vld [vmem:[#allocation8 + $0xbec] sm:$0xf]  ;;  %v8655_v5 = vld [vmem:[#allocation8 + $0x750] sm:$0xf0]  ;;  %v7933_v10 = vld [vmem:[#allocation8 + $0x170] sm:$0xf] }
 0x1cd   :  { %3779 = vmatpush.bf16.msrb.mxu1 %v8490_v62  ;;  %3757 = vmatpush.bf16.msra.mxu3 %v9158_v15  ;;  %v8157_v62 = vld [vmem:[#allocation8 + $0x330] sm:$0xf]  ;;  %v11212_v15 = vld [vmem:[#allocation8 + $0x86c] sm:$0xf]  ;;  %v4216_v27 = vmax.f32 %v4202_v1, 0.0 }
 0x1ce   :  { %3746 = vmatmul.bf16.vlgmr.msra.gmra.mxu2 %v12071_v45  ;;  %v8158_v14 = vor.u32 %v11052_v63, %v8157_v62  ;;  %v11262_v34 = vld [vmem:[#allocation8 + $0x9f4] sm:$0xf0]  ;;  %v11282_v36 = vld [vmem:[#allocation8 + $0xa9c] sm:$0xf] }
 0x1cf   :  { %3768 = vmatpush.bf16.msrb.mxu0 %v7930_v11  ;;  %3790 = vmatpush.bf16.msrb.mxu2 %v9050_v12  ;;  %v7762_v11 = vor.u32 %v10946_v54, %v7759_v58  ;;  %v4203_v12 = vadd.f32 %v4175_v52, %v4159_v2  ;;  %v3502_v33 = vpop.f32.mrf.mxu3  ;;  %v8046_v52 = vor.u32 %v11024_v46, %v8045_v31  ;;  %v11184_v54 = vld [vmem:[#allocation8 + $0x78c] sm:$0xf]  ;;  %v11010_v58 = vld [vmem:[#allocation8 + $0x214] sm:$0xf0]  ;;  %v11388_v31 = vld [vmem:[#allocation8 + $0xde4] sm:$0xf0] }
 0x1d0   :  { %v8714_v63 = vor.u32 %v11184_v54, %v8711_v55  ;;  %v8997_v33 = vld [vmem:[#allocation8 + $0x9c0] sm:$0xf]  ;;  %v11094_v54 = vld [vmem:[#allocation8 + $0x4b4] sm:$0xf0] }
 0x1d1   :  { %3780 = vmatpush.bf16.msrb.mxu1 %v8434_v16  ;;  %3758 = vmatpush.bf16.msra.mxu3 %v9102_v39  ;;  %v8823_v16 = vld [vmem:[#allocation8 + $0x8a0] sm:$0xf0]  ;;  %v4217_v28 = vmax.f32 %v4203_v12, 0.0  ;;  %v8102_v39 = vor.u32 %v11038_v20, %v8101_v17  ;;  %v8494_v12 = vor.u32 %v11136_v60, %v8493_v59  ;;  %v8437_v17 = vld [vmem:[#allocation8 + $0x560] sm:$0xf] }
 0x1d2   :  { %v9445_v55 = vld [vmem:[#allocation8 + $0xd40] sm:$0xf]  ;;  %v10954_v60 = vld [vmem:[#allocation8 + $0x54] sm:$0xf0] }
 0x1d3   :  { %3769 = vmatpush.bf16.msrb.mxu0 %v7874_v37  ;;  %3791 = vmatpush.bf16.msrb.mxu2 %v8994_v38  ;;  %v12120_v37 = vpack.c.bf16 %v4217_v28, %v4216_v27  ;;  %v8826_v38 = vor.u32 %v11212_v15, %v8823_v16  ;;  %v11296_v15 = vld [vmem:[#allocation8 + $0xb0c] sm:$0xf]  ;;  %v9159_v16 = vld [vmem:[#allocation8 + $0xb40] sm:$0xf0]  ;;  %v10982_v27 = vld [vmem:[#allocation8 + $0x134] sm:$0xf0] }
 0x1d4   :  { %3759 = vmatmul.bf16.vlgmr.msra.gmra.mxu3 %v12075_v8  ;;  %v9162_v29 = vor.u32 %v11296_v15, %v9159_v16  ;;  %v11220_v15 = vld [vmem:[#allocation8 + $0x8a4] sm:$0xf0] }
 0x1d5   :  { %3781 = vmatpush.bf16.msrb.mxu1 %v8378_v40  ;;  %3803 = vmatpush.bf16.msrb.mxu3 %v9498_v23  ;;  %v3539_v40 = vpop.f32.mrf.mxu2  ;;  %v8767_v23 = vld [vmem:[#allocation8 + $0x830] sm:$0xf0] }
 0x1d6   :  { %v3540_v32 = vadd.f32 %v3539_v40, %v12112_v35  ;;  %v8770_v51 = vor.u32 %v11198_v43, %v8767_v23  ;;  %v11310_v35 = vld [vmem:[#allocation8 + $0xb7c] sm:$0xf]  ;;  %v8381_v40 = vld [vmem:[#allocation8 + $0x4f0] sm:$0xf] }
 0x1d7   :  { %3770 = vmatpush.bf16.msrb.mxu0 %v7818_v26  ;;  %3792 = vmatpush.bf16.msrb.mxu2 %v8938_v56  ;;  %v9274_v26 = vor.u32 %v11324_v47, %v9271_v48  ;;  %v7989_v56 = vld [vmem:[#allocation8 + $0x1e0] sm:$0xf]  ;;  %v9218_v4 = vor.u32 %v11310_v35, %v9215_v22  ;;  %v9501_v23 = vld [vmem:[#allocation8 + $0xdb0] sm:$0xf] }
 0x1d8   :  { %v7990_v2 = vor.u32 %v11010_v58, %v7989_v56  ;;  %v7821_v48 = vld [vmem:[#allocation8 + $0x90] sm:$0xf]  ;;  %v11374_v56 = vld [vmem:[#allocation8 + $0xd74] sm:$0xf0]  ;;  %v7765_v58 = vld [vmem:[#allocation8 + $0x20] sm:$0xf] }
 0x1d9   :  { %3782 = vmatpush.bf16.msrb.mxu1 %v8322_v57  ;;  %3804 = vmatpush.bf16.msrb.mxu3 %v9442_v61  ;;  %v8550_v57 = vor.u32 %v11150_v50, %v8549_v49  ;;  %v3552_v61 = vpop.f32.mrf.mxu3  ;;  %v10968_v49 = vld [vmem:[#allocation8 + $0xc4] sm:$0xf0]  ;;  %v8941_v50 = vld [vmem:[#allocation8 + $0x950] sm:$0xf] }
 0x1da   :  { %v12125_v1 = vadd.f32 %v3552_v61, %v3540_v32  ;;  %v7878_v32 = vor.u32 %v10982_v27, %v7877_v25  ;;  %v8885_v61 = vld [vmem:[#allocation8 + $0x8e0] sm:$0xf]  ;;  %v11346_v27 = vld [vmem:[#allocation8 + $0xc94] sm:$0xf0] }
 0x1db   :  { %3771 = vmatpush.bf16.msrb.mxu0 %v7762_v11  ;;  %3793 = vmatpush.bf16.msrb.mxu2 %v8882_v13  ;;  %v3565_v62 = vpop.f32.mrf.mxu0  ;;  %v10996_v11 = vld [vmem:[#allocation8 + $0x1a4] sm:$0xf0]  ;;  %v9053_v13 = vld [vmem:[#allocation8 + $0xa30] sm:$0xf]  ;;  %v9333_v25 = vld [vmem:[#allocation8 + $0xc60] sm:$0xf] }
 0x1dc   :  { %v7934_v20 = vor.u32 %v10996_v11, %v7933_v10  ;;  %v11360_v10 = vld [vmem:[#allocation8 + $0xd04] sm:$0xf0]  ;;  %v7766_v11 = vor.u32 %v10954_v60, %v7765_v58 }
 0x1dd   :  { %3783 = vmatpush.bf16.msrb.mxu1 %v8266_v18  ;;  %3805 = vmatpush.bf16.msrb.mxu3 %v9386_v19  ;;  %v3541_v3 = vpop.f32.mrf.mxu2  ;;  %v11122_v18 = vld [vmem:[#allocation8 + $0x594] sm:$0xf0]  ;;  %v8658_v19 = vor.u32 %v11170_v0, %v8655_v5  ;;  %v11045_v0 = vld [vmem:[#allocation8 + $0x334] sm:$0xf]  ;;  %v9389_v5 = vld [vmem:[#allocation8 + $0xcd0] sm:$0xf] }
 0x1de   :  { %3772 = vmatmul.bf16.vlgmr.msrb.gmra.mxu0 %v12061_v53  ;;  %v8438_v30 = vor.u32 %v11122_v18, %v8437_v17  ;;  %v8269_v3 = vld [vmem:[#allocation8 + $0x410] sm:$0xf]  ;;  %v9390_v17 = vor.u32 %v11360_v10, %v9389_v5  ;;  %v11031_v18 = vld [vmem:[#allocation8 + $0x2c4] sm:$0xf] }
 0x1df   :  { %3816 = vmatpush.bf16.msra.mxu0 %v8158_v14  ;;  %3794 = vmatpush.bf16.msrb.mxu2 %v8826_v38  ;;  %v11276_v14 = vld [vmem:[#allocation8 + $0xa64] sm:$0xf0] }
 0x1e0   :  { %v9054_v24 = vor.u32 %v11276_v14, %v9053_v13  ;;  %v8829_v14 = vld [vmem:[#allocation8 + $0x870] sm:$0xf] }
 0x1e1   :  { %3784 = vmatpush.bf16.msrb.mxu1 %v8210_v41  ;;  %3806 = vmatpush.bf16.msrb.mxu3 %v9330_v42  ;;  %v3578_v28 = vpop.f32.mrf.mxu1  ;;  %v11108_v41 = vld [vmem:[#allocation8 + $0x524] sm:$0xf0]  ;;  %v3554_v42 = vpop.f32.mrf.mxu3 }
 0x1e2   :  { %v12127_v38 = vadd.f32 %v3578_v28, %v3565_v62  ;;  %v8382_v47 = vor.u32 %v11108_v41, %v8381_v40  ;;  %v11234_v62 = vld [vmem:[#allocation8 + $0x914] sm:$0xf0]  ;;  %v11157_v28 = vld [vmem:[#allocation8 + $0x6b4] sm:$0xf]  ;;  %v9334_v41 = vor.u32 %v11346_v27, %v9333_v25  ;;  %v8773_v42 = vld [vmem:[#allocation8 + $0x800] sm:$0xf] }
 0x1e3   :  { %3817 = vmatpush.bf16.msra.mxu0 %v8102_v39  ;;  %3795 = vmatpush.bf16.msrb.mxu2 %v8770_v51  ;;  %v9103_v39 = vld [vmem:[#allocation8 + $0xad0] sm:$0xf0]  ;;  %v3567_v43 = vpop.f32.mrf.mxu0  ;;  %v9502_v51 = vor.u32 %v11388_v31, %v9501_v23 }
 0x1e4   :  { %3785 = vmatmul.bf16.vlgmr.msrb.gmra.mxu1 %v12065_v7  ;;  %v9106_v46 = vor.u32 %v11282_v36, %v9103_v39  ;;  %v11206_v43 = vld [vmem:[#allocation8 + $0x834] sm:$0xf0]  ;;  %v11017_v23 = vld [vmem:[#allocation8 + $0x254] sm:$0xf] }
 0x1e5   :  { %3829 = vmatpush.bf16.msra.mxu1 %v8606_v44  ;;  %3807 = vmatpush.bf16.msrb.mxu3 %v9274_v26  ;;  %v8998_v44 = vor.u32 %v11262_v34, %v8997_v33  ;;  %v8325_v26 = vld [vmem:[#allocation8 + $0x480] sm:$0xf]  ;;  %v8830_v33 = vor.u32 %v11220_v15, %v8829_v14  ;;  %v11269_v14 = vld [vmem:[#allocation8 + $0xa34] sm:$0xf]  ;;  %v9055_v15 = vld [vmem:[#allocation8 + $0xa68] sm:$0xf0] }
 0x1e6   :  { %v8326_v59 = vor.u32 %v11094_v54, %v8325_v26 }
 0x1e7   :  { %3818 = vmatpush.bf16.msra.mxu0 %v8046_v52  ;;  %3796 = vmatpush.bf16.msrb.mxu2 %v8714_v63  ;;  %v11248_v52 = vld [vmem:[#allocation8 + $0x984] sm:$0xf0]  ;;  %v9446_v63 = vor.u32 %v11374_v56, %v9445_v55  ;;  %v11003_v56 = vld [vmem:[#allocation8 + $0x1e4] sm:$0xf] }
 0x1e8   :  { %v8942_v35 = vor.u32 %v11248_v52, %v8941_v50  ;;  %v8774_v50 = vor.u32 %v11206_v43, %v8773_v42  ;;  %v11192_v55 = vld [vmem:[#allocation8 + $0x7c4] sm:$0xf0]  ;;  %v11255_v42 = vld [vmem:[#allocation8 + $0x9c4] sm:$0xf]  ;;  %v8999_v43 = vld [vmem:[#allocation8 + $0x9f8] sm:$0xf0] }
 0x1e9   :  { %3830 = vmatpush.bf16.msra.mxu1 %v8550_v57  ;;  %3808 = vmatpush.bf16.msrb.mxu3 %v9218_v4  ;;  %v7822_v57 = vor.u32 %v10968_v49, %v7821_v48  ;;  %v3580_v22 = vpop.f32.mrf.mxu1  ;;  %v11080_v4 = vld [vmem:[#allocation8 + $0x444] sm:$0xf0]  ;;  %v8551_v48 = vld [vmem:[#allocation8 + $0x678] sm:$0xf0]  ;;  %v4176_v49 = vperm.slane %v12110_v21, 2 }
 0x1ea   :  { %v8270_v16 = vor.u32 %v11080_v4, %v8269_v3  ;;  %v9221_v22 = vld [vmem:[#allocation8 + $0xb80] sm:$0xf] }
 0x1eb   :  { %3819 = vmatpush.bf16.msra.mxu0 %v7990_v2  ;;  %3797 = vmatpush.bf16.msrb.mxu2 %v8658_v19  ;;  %v8159_v2 = vld [vmem:[#allocation8 + $0x368] sm:$0xf0]  ;;  %v8103_v19 = vld [vmem:[#allocation8 + $0x2f8] sm:$0xf0]  ;;  %v8661_v3 = vld [vmem:[#allocation8 + $0x720] sm:$0xf] }
 0x1ec   :  { %v8162_v13 = vor.u32 %v11045_v0, %v8159_v2  ;;  %v8106_v36 = vor.u32 %v11031_v18, %v8103_v19  ;;  %v11304_v18 = vld [vmem:[#allocation8 + $0xb44] sm:$0xf0]  ;;  %v11115_v19 = vld [vmem:[#allocation8 + $0x564] sm:$0xf] }
 0x1ed   :  { %3831 = vmatpush.bf16.msra.mxu1 %v8494_v12  ;;  %3809 = vmatpush.bf16.msrb.mxu3 %v9162_v29  ;;  %v8886_v12 = vor.u32 %v11234_v62, %v8885_v61  ;;  %v8607_v29 = vld [vmem:[#allocation8 + $0x6e8] sm:$0xf0]  ;;  %v4177_v61 = vperm.slane %v12110_v21, 3 }
 0x1ee   :  { %3798 = vmatmul.bf16.vlgmr.msrb.gmra.mxu2 %v12071_v45  ;;  %v8610_v31 = vor.u32 %v11157_v28, %v8607_v29  ;;  %v9058_v29 = vor.u32 %v11269_v14, %v9055_v15 }
 0x1ef   :  { %3820 = vmatpush.bf16.msra.mxu0 %v7934_v20  ;;  %3842 = vmatpush.bf16.msra.mxu2 %v9054_v24  ;;  %v8213_v20 = vld [vmem:[#allocation8 + $0x3a0] sm:$0xf]  ;;  %v11066_v24 = vld [vmem:[#allocation8 + $0x3d4] sm:$0xf0] }
 0x1f0   :  { %v8214_v40 = vor.u32 %v11066_v24, %v8213_v20  ;;  %v8439_v20 = vld [vmem:[#allocation8 + $0x598] sm:$0xf0] }
 0x1f1   :  { %3832 = vmatpush.bf16.msra.mxu1 %v8438_v30  ;;  %3810 = vmatpush.bf16.msrb.mxu3 %v9106_v46  ;;  %v4132_v30 = vperm.slane %v12106_v9, 2  ;;  %v3591_v34 = vpop.f32.mrf.mxu2  ;;  %v11332_v46 = vld [vmem:[#allocation8 + $0xc24] sm:$0xf0] }
 0x1f2   :  { %v3592_v39 = vadd.f32 %v3591_v34, %v12127_v38  ;;  %v4133_v38 = vperm.slane %v12106_v9, 3  ;;  %v11129_v9 = vld [vmem:[#allocation8 + $0x5d4] sm:$0xf]  ;;  %v7879_v34 = vld [vmem:[#allocation8 + $0x138] sm:$0xf0] }
 0x1f3   :  { %3821 = vmatpush.bf16.msra.mxu0 %v7878_v32  ;;  %3843 = vmatpush.bf16.msra.mxu2 %v8998_v44  ;;  %v8047_v32 = vld [vmem:[#allocation8 + $0x288] sm:$0xf0]  ;;  %v9277_v44 = vld [vmem:[#allocation8 + $0xbf0] sm:$0xf]  ;;  %v4160_v52 = vmul.f32 %v4132_v30, %v12125_v1 }
 0x1f4   :  { %3811 = vmatmul.bf16.vlgmr.msrb.gmra.mxu3 %v12075_v8  ;;  %v8050_v26 = vor.u32 %v11017_v23, %v8047_v32  ;;  %v9278_v54 = vor.u32 %v11332_v46, %v9277_v44  ;;  %v9109_v23 = vld [vmem:[#allocation8 + $0xaa0] sm:$0xf]  ;;  %v11290_v44 = vld [vmem:[#allocation8 + $0xad4] sm:$0xf0]  ;;  %v11101_v46 = vld [vmem:[#allocation8 + $0x4f4] sm:$0xf] }
 0x1f5   :  { %3833 = vmatpush.bf16.msra.mxu1 %v8382_v47  ;;  %3855 = vmatpush.bf16.msra.mxu3 %v9502_v51  ;;  %v11143_v47 = vld [vmem:[#allocation8 + $0x644] sm:$0xf]  ;;  %v8717_v51 = vld [vmem:[#allocation8 + $0x790] sm:$0xf]  ;;  %v4204_v4 = vadd.f32 %v4176_v49, %v4160_v52  ;;  %v9503_v49 = vld [vmem:[#allocation8 + $0xde8] sm:$0xf0] }
 0x1f6   :  { %v8718_v1 = vor.u32 %v11192_v55, %v8717_v51  ;;  %v9110_v51 = vor.u32 %v11290_v44, %v9109_v23  ;;  %v11241_v55 = vld [vmem:[#allocation8 + $0x954] sm:$0xf]  ;;  %v11199_v23 = vld [vmem:[#allocation8 + $0x804] sm:$0xf]  ;;  %v8053_v44 = vld [vmem:[#allocation8 + $0x258] sm:$0xf] }
 0x1f7   :  { %3822 = vmatpush.bf16.msra.mxu0 %v7822_v57  ;;  %3844 = vmatpush.bf16.msra.mxu2 %v8942_v35  ;;  %v7991_v57 = vld [vmem:[#allocation8 + $0x218] sm:$0xf0]  ;;  %v3604_v58 = vpop.f32.mrf.mxu3  ;;  %v8554_v35 = vor.u32 %v11143_v47, %v8551_v48  ;;  %v4218_v25 = vmax.f32 %v4204_v4, 0.0  ;;  %v8383_v47 = vld [vmem:[#allocation8 + $0x528] sm:$0xf0] }
 0x1f8   :  { %v3605_v60 = vadd.f32 %v3604_v58, %v3592_v39  ;;  %v7994_v2 = vor.u32 %v11003_v56, %v7991_v57  ;;  %v11381_v48 = vld [vmem:[#allocation8 + $0xdb4] sm:$0xf]  ;;  %v8386_v52 = vor.u32 %v11101_v46, %v8383_v47  ;;  %v8943_v57 = vld [vmem:[#allocation8 + $0x988] sm:$0xf0]  ;;  %v11087_v58 = vld [vmem:[#allocation8 + $0x484] sm:$0xf] }
 0x1f9   :  { %3834 = vmatpush.bf16.msra.mxu1 %v8326_v59  ;;  %3856 = vmatpush.bf16.msra.mxu3 %v9446_v63  ;;  %v11318_v59 = vld [vmem:[#allocation8 + $0xbb4] sm:$0xf0]  ;;  %v8495_v63 = vld [vmem:[#allocation8 + $0x608] sm:$0xf0]  ;;  %v3593_v0 = vpop.f32.mrf.mxu2  ;;  %v9506_v56 = vor.u32 %v11381_v48, %v9503_v49  ;;  %v11025_v47 = vld [vmem:[#allocation8 + $0x28c] sm:$0xf0] }
 0x1fa   :  { %v4161_v5 = vmul.f32 %v4133_v38, %v3605_v60  ;;  %v9222_v10 = vor.u32 %v11318_v59, %v9221_v22  ;;  %v8498_v21 = vor.u32 %v11129_v9, %v8495_v63  ;;  %v9002_v38 = vor.u32 %v11255_v42, %v8999_v43  ;;  %v11367_v22 = vld [vmem:[#allocation8 + $0xd44] sm:$0xf]  ;;  %v9447_v59 = vld [vmem:[#allocation8 + $0xd78] sm:$0xf0]  ;;  %v8165_v4 = vld [vmem:[#allocation8 + $0x338] sm:$0xf] }
 0x1fb   :  { %3823 = vmatpush.bf16.msra.mxu0 %v7766_v11  ;;  %3845 = vmatpush.bf16.msra.mxu2 %v8886_v12  ;;  %v3617_v62 = vpop.f32.mrf.mxu0  ;;  %v11178_v11 = vld [vmem:[#allocation8 + $0x754] sm:$0xf0]  ;;  %v10989_v12 = vld [vmem:[#allocation8 + $0x174] sm:$0xf]  ;;  %v8946_v9 = vor.u32 %v11241_v55, %v8943_v57  ;;  %v11227_v0 = vld [vmem:[#allocation8 + $0x8e4] sm:$0xf] }
 0x1fc   :  { %v8662_v24 = vor.u32 %v11178_v11, %v8661_v3  ;;  %v9450_v3 = vor.u32 %v11367_v22, %v9447_v59  ;;  %v8271_v11 = vld [vmem:[#allocation8 + $0x448] sm:$0xf0]  ;;  %v11325_v48 = vld [vmem:[#allocation8 + $0xbf4] sm:$0xf]  ;;  %v7997_v55 = vld [vmem:[#allocation8 + $0x1e8] sm:$0xf] }
 0x1fd   :  { %3835 = vmatpush.bf16.msra.mxu1 %v8270_v16  ;;  %3857 = vmatpush.bf16.msra.mxu3 %v9390_v17  ;;  %v9165_v16 = vld [vmem:[#allocation8 + $0xb10] sm:$0xf]  ;;  %v4205_v17 = vadd.f32 %v4177_v61, %v4161_v5  ;;  %v9279_v49 = vld [vmem:[#allocation8 + $0xc28] sm:$0xf0]  ;;  %v9223_v22 = vld [vmem:[#allocation8 + $0xbb8] sm:$0xf0] }
 0x1fe   :  { %3824 = vmatmul.bf16.vlgmr.msra.gmra.mxu0 %v12061_v53  ;;  %v9166_v39 = vor.u32 %v11304_v18, %v9165_v16  ;;  %v11053_v5 = vld [vmem:[#allocation8 + $0x36c] sm:$0xf0]  ;;  %v11213_v16 = vld [vmem:[#allocation8 + $0x874] sm:$0xf] }
 0x1ff   :  { %3868 = vmatpush.bf16.msrb.mxu0 %v8162_v13  ;;  %3846 = vmatpush.bf16.msra.mxu2 %v8830_v33  ;;  %v7935_v13 = vld [vmem:[#allocation8 + $0x1a8] sm:$0xf0]  ;;  %v4219_v27 = vmax.f32 %v4205_v17, 0.0  ;;  %v10975_v33 = vld [vmem:[#allocation8 + $0x104] sm:$0xf]  ;;  %v8166_v15 = vor.u32 %v11053_v5, %v8165_v4 }
 0x200   :  { %v7938_v28 = vor.u32 %v10989_v12, %v7935_v13  ;;  %v11353_v12 = vld [vmem:[#allocation8 + $0xcd4] sm:$0xf]  ;;  %v9391_v13 = vld [vmem:[#allocation8 + $0xd08] sm:$0xf0]  ;;  %v7941_v4 = vld [vmem:[#allocation8 + $0x178] sm:$0xf] }
 0x201   :  { %3836 = vmatpush.bf16.msra.mxu1 %v8214_v40  ;;  %3858 = vmatpush.bf16.msra.mxu3 %v9334_v41  ;;  %v3630_v30 = vpop.f32.mrf.mxu1  ;;  %v3606_v40 = vpop.f32.mrf.mxu3  ;;  %v8442_v41 = vor.u32 %v11115_v19, %v8439_v20  ;;  %v8831_v17 = vld [vmem:[#allocation8 + $0x8a8] sm:$0xf0]  ;;  %v9394_v19 = vor.u32 %v11353_v12, %v9391_v13  ;;  %v8109_v20 = vld [vmem:[#allocation8 + $0x2c8] sm:$0xf]  ;;  %v10997_v5 = vld [vmem:[#allocation8 + $0x1ac] sm:$0xf0] }
 0x202   :  { %v11277_v12 = vld [vmem:[#allocation8 + $0xa6c] sm:$0xf0]  ;;  %v11297_v13 = vld [vmem:[#allocation8 + $0xb14] sm:$0xf] }
 0x203   :  { %3869 = vmatpush.bf16.msrb.mxu0 %v8106_v36  ;;  %3847 = vmatpush.bf16.msra.mxu2 %v8774_v50  ;;  %v12139_v36 = vadd.f32 %v3630_v30, %v3617_v62  ;;  %v3619_v32 = vpop.f32.mrf.mxu0  ;;  %v7882_v50 = vor.u32 %v10975_v33, %v7879_v34  ;;  %v10947_v62 = vld [vmem:[#allocation8 + $0x24] sm:$0xf]  ;;  %v8613_v30 = vld [vmem:[#allocation8 + $0x6b8] sm:$0xf]  ;;  %v11165_v33 = vld [vmem:[#allocation8 + $0x6ec] sm:$0xf0]  ;;  %v8834_v34 = vor.u32 %v11213_v16, %v8831_v17 }
 0x204   :  { %3837 = vmatmul.bf16.vlgmr.msra.gmra.mxu1 %v12065_v7  ;;  %v8775_v32 = vld [vmem:[#allocation8 + $0x838] sm:$0xf0]  ;;  %v8614_v46 = vor.u32 %v11165_v33, %v8613_v30  ;;  %v7942_v17 = vor.u32 %v10997_v5, %v7941_v4  ;;  %v9005_v30 = vld [vmem:[#allocation8 + $0x9c8] sm:$0xf]  ;;  %v11263_v33 = vld [vmem:[#allocation8 + $0x9fc] sm:$0xf0] }
 0x205   :  { %3881 = vmatpush.bf16.msrb.mxu1 %v8610_v31  ;;  %3859 = vmatpush.bf16.msra.mxu3 %v9278_v54  ;;  %v12141_v31 = vpack.c.bf16 %v4219_v27, %v4218_v25  ;;  %v7823_v54 = vld [vmem:[#allocation8 + $0xc8] sm:$0xf0]  ;;  %v11059_v25 = vld [vmem:[#allocation8 + $0x3a4] sm:$0xf]  ;;  %v8215_v27 = vld [vmem:[#allocation8 + $0x3d8] sm:$0xf0] }
 0x206   :  { %v8218_v42 = vor.u32 %v11059_v25, %v8215_v27 }
 0x207   :  { %3870 = vmatpush.bf16.msrb.mxu0 %v8050_v26  ;;  %3848 = vmatpush.bf16.msra.mxu2 %v8718_v1  ;;  %v10961_v26 = vld [vmem:[#allocation8 + $0x94] sm:$0xf]  ;;  %v7767_v1 = vld [vmem:[#allocation8 + $0x58] sm:$0xf0] }
 0x208   :  { %v7826_v60 = vor.u32 %v10961_v26, %v7823_v54  ;;  %v11185_v26 = vld [vmem:[#allocation8 + $0x794] sm:$0xf]  ;;  %v8719_v54 = vld [vmem:[#allocation8 + $0x7c8] sm:$0xf0] }
 0x209   :  { %3882 = vmatpush.bf16.msrb.mxu1 %v8554_v35  ;;  %3860 = vmatpush.bf16.msra.mxu3 %v9222_v10  ;;  %v8327_v35 = vld [vmem:[#allocation8 + $0x4b8] sm:$0xf0]  ;;  %v3632_v61 = vpop.f32.mrf.mxu1  ;;  %v11073_v10 = vld [vmem:[#allocation8 + $0x414] sm:$0xf] }
 0x20a   :  { %v8330_v63 = vor.u32 %v11087_v58, %v8327_v35  ;;  %v8274_v18 = vor.u32 %v11073_v10, %v8271_v11  ;;  %v11011_v58 = vld [vmem:[#allocation8 + $0x21c] sm:$0xf0]  ;;  %v11311_v35 = vld [vmem:[#allocation8 + $0xb84] sm:$0xf]  ;;  %v8501_v61 = vld [vmem:[#allocation8 + $0x5d8] sm:$0xf] }
 0x20b   :  { %3871 = vmatpush.bf16.msrb.mxu0 %v7994_v2  ;;  %3849 = vmatpush.bf16.msra.mxu2 %v8662_v24  ;;  %v8887_v2 = vld [vmem:[#allocation8 + $0x918] sm:$0xf0]  ;;  %v11039_v24 = vld [vmem:[#allocation8 + $0x2fc] sm:$0xf0]  ;;  %v9061_v11 = vld [vmem:[#allocation8 + $0xa38] sm:$0xf] }
 0x20c   :  { %v8890_v14 = vor.u32 %v11227_v0, %v8887_v2  ;;  %v8110_v40 = vor.u32 %v11039_v24, %v8109_v20  ;;  %v7998_v0 = vor.u32 %v11011_v58, %v7997_v55  ;;  %v9226_v2 = vor.u32 %v11311_v35, %v9223_v22  ;;  %v7885_v20 = vld [vmem:[#allocation8 + $0x108] sm:$0xf]  ;;  %v10983_v24 = vld [vmem:[#allocation8 + $0x13c] sm:$0xf0] }
 0x20d   :  { %3883 = vmatpush.bf16.msrb.mxu1 %v8498_v21  ;;  %3861 = vmatpush.bf16.msra.mxu3 %v9166_v39  ;;  %v7770_v21 = vor.u32 %v10947_v62, %v7767_v1  ;;  %v11137_v62 = vld [vmem:[#allocation8 + $0x60c] sm:$0xf0]  ;;  %v11171_v1 = vld [vmem:[#allocation8 + $0x724] sm:$0xf]  ;;  %v10955_v22 = vld [vmem:[#allocation8 + $0x5c] sm:$0xf0] }
 0x20e   :  { %3850 = vmatmul.bf16.vlgmr.msra.gmra.mxu2 %v12071_v45  ;;  %v8502_v10 = vor.u32 %v11137_v62, %v8501_v61  ;;  %v11235_v61 = vld [vmem:[#allocation8 + $0x91c] sm:$0xf0] }
 0x20f   :  { %3872 = vmatpush.bf16.msrb.mxu0 %v7938_v28  ;;  %3894 = vmatpush.bf16.msrb.mxu2 %v9058_v29  ;;  %v11339_v28 = vld [vmem:[#allocation8 + $0xc64] sm:$0xf]  ;;  %v9335_v29 = vld [vmem:[#allocation8 + $0xc98] sm:$0xf0] }
 0x210   :  { %v9338_v43 = vor.u32 %v11339_v28, %v9335_v29 }
 0x211   :  { %3884 = vmatpush.bf16.msrb.mxu1 %v8442_v41  ;;  %3862 = vmatpush.bf16.msra.mxu3 %v9110_v51  ;;  %v3643_v39 = vpop.f32.mrf.mxu2  ;;  %v8778_v51 = vor.u32 %v11199_v23, %v8775_v32  ;;  %v11389_v23 = vld [vmem:[#allocation8 + $0xdec] sm:$0xf0]  ;;  %v7886_v32 = vor.u32 %v10983_v24, %v7885_v20  ;;  %v11158_v20 = vld [vmem:[#allocation8 + $0x6bc] sm:$0xf]  ;;  %v8615_v24 = vld [vmem:[#allocation8 + $0x6f0] sm:$0xf0] }
 0x212   :  { %v3644_v41 = vadd.f32 %v3643_v39, %v12139_v36  ;;  %v9282_v36 = vor.u32 %v11325_v48, %v9279_v49  ;;  %v7829_v48 = vld [vmem:[#allocation8 + $0x98] sm:$0xf]  ;;  %v10969_v49 = vld [vmem:[#allocation8 + $0xcc] sm:$0xf0] }
 0x213   :  { %3873 = vmatpush.bf16.msrb.mxu0 %v7882_v50  ;;  %3895 = vmatpush.bf16.msrb.mxu2 %v9002_v38  ;;  %v8557_v50 = vld [vmem:[#allocation8 + $0x648] sm:$0xf]  ;;  %v11151_v38 = vld [vmem:[#allocation8 + $0x67c] sm:$0xf0]  ;;  %v7830_v55 = vor.u32 %v10969_v49, %v7829_v48  ;;  %v8559_v48 = vld [vmem:[#allocation8 + $0x680] sm:$0xf0] }
 0x214   :  { %3863 = vmatmul.bf16.vlgmr.msra.gmra.mxu3 %v12075_v8  ;;  %v8558_v57 = vor.u32 %v11151_v38, %v8557_v50  ;;  %v8949_v50 = vld [vmem:[#allocation8 + $0x958] sm:$0xf]  ;;  %v12159_v49 = vld [vmem:[#allocation5 + $0xc] sm:$0xff] }
 0x215   :  { %3885 = vmatpush.bf16.msrb.mxu1 %v8386_v52  ;;  %3907 = vmatpush.bf16.msrb.mxu3 %v9506_v56  ;;  %v8054_v52 = vor.u32 %v11025_v47, %v8053_v44  ;;  %v9006_v44 = vor.u32 %v11263_v33, %v9005_v30 }
 0x217   :  { %3874 = vmatpush.bf16.msrb.mxu0 %v7826_v60  ;;  %3896 = vmatpush.bf16.msrb.mxu2 %v8946_v9  ;;  %v3656_v56 = vpop.f32.mrf.mxu3  ;;  %v8722_v9 = vor.u32 %v11185_v26, %v8719_v54  ;;  %v9453_v26 = vld [vmem:[#allocation8 + $0xd48] sm:$0xf]  ;;  %v11375_v54 = vld [vmem:[#allocation8 + $0xd7c] sm:$0xf0] }
 0x218   :  { %v12147_v59 = vadd.f32 %v3656_v56, %v3644_v41  ;;  %v8389_v41 = vld [vmem:[#allocation8 + $0x4f8] sm:$0xf]  ;;  %v9454_v62 = vor.u32 %v11375_v54, %v9453_v26  ;;  %v11193_v54 = vld [vmem:[#allocation8 + $0x7cc] sm:$0xf0] }
 0x219   :  { %3886 = vmatpush.bf16.msrb.mxu1 %v8330_v63  ;;  %3908 = vmatpush.bf16.msrb.mxu3 %v9450_v3  ;;  %v3645_v63 = vpop.f32.mrf.mxu2  ;;  %v8663_v3 = vld [vmem:[#allocation8 + $0x758] sm:$0xf0] }
 0x21a   :  { %v8666_v16 = vor.u32 %v11171_v1, %v8663_v3  ;;  %v8167_v63 = vld [vmem:[#allocation8 + $0x370] sm:$0xf0]  ;;  %v8277_v1 = vld [vmem:[#allocation8 + $0x418] sm:$0xf]  ;;  %v11361_v3 = vld [vmem:[#allocation8 + $0xd0c] sm:$0xf0] }
 0x21b   :  { %3875 = vmatpush.bf16.msrb.mxu0 %v7770_v21  ;;  %3897 = vmatpush.bf16.msrb.mxu2 %v8890_v14  ;;  %v3669_v60 = vpop.f32.mrf.mxu0  ;;  %v9167_v21 = vld [vmem:[#allocation8 + $0xb48] sm:$0xf0]  ;;  %v8445_v14 = vld [vmem:[#allocation8 + $0x568] sm:$0xf] }
 0x21c   :  { %v9170_v27 = vor.u32 %v11297_v13, %v9167_v21 }
 0x21d   :  { %3887 = vmatpush.bf16.msrb.mxu1 %v8274_v18  ;;  %3909 = vmatpush.bf16.msrb.mxu3 %v9394_v19  ;;  %v9062_v18 = vor.u32 %v11277_v12, %v9061_v11  ;;  %v8837_v11 = vld [vmem:[#allocation8 + $0x878] sm:$0xf]  ;;  %v11221_v12 = vld [vmem:[#allocation8 + $0x8ac] sm:$0xf0] }
 0x21e   :  { %3876 = vmatmul.bf16.vlgmr.msrb.gmra.mxu0 %v12061_v53 }
 0x21f   :  { %3920 = vmatpush.bf16.msra.mxu0 %v8166_v15  ;;  %3898 = vmatpush.bf16.msrb.mxu2 %v8834_v34  ;;  %v11123_v15 = vld [vmem:[#allocation8 + $0x59c] sm:$0xf0]  ;;  %v3658_v28 = vpop.f32.mrf.mxu3  ;;  %v11283_v34 = vld [vmem:[#allocation8 + $0xaa4] sm:$0xf] }
 0x220   :  { %v8446_v29 = vor.u32 %v11123_v15, %v8445_v14  ;;  %v11032_v14 = vld [vmem:[#allocation8 + $0x2cc] sm:$0xf]  ;;  %v8111_v15 = vld [vmem:[#allocation8 + $0x300] sm:$0xf0] }
 0x221   :  { %3888 = vmatpush.bf16.msrb.mxu1 %v8218_v42  ;;  %3910 = vmatpush.bf16.msrb.mxu3 %v9338_v43  ;;  %v3682_v19 = vpop.f32.mrf.mxu1  ;;  %v11109_v42 = vld [vmem:[#allocation8 + $0x52c] sm:$0xf0]  ;;  %v9509_v43 = vld [vmem:[#allocation8 + $0xdb8] sm:$0xf]  ;;  %v8114_v33 = vor.u32 %v11032_v14, %v8111_v15  ;;  %v9063_v14 = vld [vmem:[#allocation8 + $0xa70] sm:$0xf0] }
 0x222   :  { %v12150_v25 = vadd.f32 %v3682_v19, %v3669_v60  ;;  %v8390_v47 = vor.u32 %v11109_v42, %v8389_v41  ;;  %v9510_v38 = vor.u32 %v11389_v23, %v9509_v43  ;;  %v8893_v60 = vld [vmem:[#allocation8 + $0x8e8] sm:$0xf]  ;;  %v11347_v19 = vld [vmem:[#allocation8 + $0xc9c] sm:$0xf0]  ;;  %v11018_v43 = vld [vmem:[#allocation8 + $0x25c] sm:$0xf]  ;;  %v8618_v23 = vor.u32 %v11158_v20, %v8615_v24 }
 0x223   :  { %3921 = vmatpush.bf16.msra.mxu0 %v8110_v40  ;;  %3899 = vmatpush.bf16.msrb.mxu2 %v8778_v51  ;;  %v3671_v39 = vpop.f32.mrf.mxu0  ;;  %v9111_v40 = vld [vmem:[#allocation8 + $0xad8] sm:$0xf0]  ;;  %v11249_v51 = vld [vmem:[#allocation8 + $0x98c] sm:$0xf0]  ;;  %v8894_v5 = vor.u32 %v11235_v61, %v8893_v60  ;;  %v8781_v41 = vld [vmem:[#allocation8 + $0x808] sm:$0xf] }
 0x224   :  { %3889 = vmatmul.bf16.vlgmr.msrb.gmra.mxu1 %v12065_v7  ;;  %v8950_v58 = vor.u32 %v11249_v51, %v8949_v50  ;;  %v11207_v42 = vld [vmem:[#allocation8 + $0x83c] sm:$0xf0]  ;;  %v4178_v50 = vperm.slane %v12159_v49, 4  ;;  %v8725_v51 = vld [vmem:[#allocation8 + $0x798] sm:$0xf]  ;;  %v4179_v61 = vperm.slane %v12159_v49, 5 }
 0x225   :  { %3933 = vmatpush.bf16.msra.mxu1 %v8614_v46  ;;  %3911 = vmatpush.bf16.msrb.mxu3 %v9282_v36  ;;  %v9114_v46 = vor.u32 %v11283_v34, %v9111_v40  ;;  %v11095_v36 = vld [vmem:[#allocation8 + $0x4bc] sm:$0xf0]  ;;  %v9173_v15 = vld [vmem:[#allocation8 + $0xb18] sm:$0xf] }
 0x227   :  { %3922 = vmatpush.bf16.msra.mxu0 %v8054_v52  ;;  %3900 = vmatpush.bf16.msrb.mxu2 %v8722_v9  ;;  %v8333_v52 = vld [vmem:[#allocation8 + $0x488] sm:$0xf]  ;;  %v11046_v9 = vld [vmem:[#allocation8 + $0x33c] sm:$0xf] }
 0x228   :  { %v8334_v35 = vor.u32 %v11095_v36, %v8333_v52 }
 0x229   :  { %3934 = vmatpush.bf16.msra.mxu1 %v8558_v57  ;;  %3912 = vmatpush.bf16.msrb.mxu3 %v9226_v2  ;;  %v3684_v56 = vpop.f32.mrf.mxu1  ;;  %v7773_v57 = vld [vmem:[#allocation8 + $0x28] sm:$0xf]  ;;  %v9397_v2 = vld [vmem:[#allocation8 + $0xcd8] sm:$0xf] }
 0x22a   :  { %v7774_v4 = vor.u32 %v10955_v22, %v7773_v57  ;;  %v9398_v21 = vor.u32 %v11361_v3, %v9397_v2  ;;  %v7999_v56 = vld [vmem:[#allocation8 + $0x220] sm:$0xf0]  ;;  %v11319_v22 = vld [vmem:[#allocation8 + $0xbbc] sm:$0xf0]  ;;  %v8669_v2 = vld [vmem:[#allocation8 + $0x728] sm:$0xf] }
 0x22b   :  { %3923 = vmatpush.bf16.msra.mxu0 %v7998_v0  ;;  %3901 = vmatpush.bf16.msrb.mxu2 %v8666_v16  ;;  %v11081_v0 = vld [vmem:[#allocation8 + $0x44c] sm:$0xf0]  ;;  %v8221_v16 = vld [vmem:[#allocation8 + $0x3a8] sm:$0xf] }
 0x22c   :  { %v8278_v13 = vor.u32 %v11081_v0, %v8277_v1 }
 0x22d   :  { %3935 = vmatpush.bf16.msra.mxu1 %v8502_v10  ;;  %3913 = vmatpush.bf16.msrb.mxu3 %v9170_v27  ;;  %v8170_v10 = vor.u32 %v11046_v9, %v8167_v63  ;;  %v12154_v27 = vld [vmem:[#allocation5 + $0x1a] sm:$0xff]  ;;  %v11130_v9 = vld [vmem:[#allocation8 + $0x5dc] sm:$0xf] }
 0x22e   :  { %3902 = vmatmul.bf16.vlgmr.msrb.gmra.mxu2 %v12071_v45  ;;  %v4134_v28 = vperm.slane %v12154_v27, 4  ;;  %v8503_v63 = vld [vmem:[#allocation8 + $0x610] sm:$0xf0] }
 0x22f   :  { %3924 = vmatpush.bf16.msra.mxu0 %v7942_v17  ;;  %3946 = vmatpush.bf16.msra.mxu2 %v9062_v18  ;;  %v11067_v17 = vld [vmem:[#allocation8 + $0x3dc] sm:$0xf0]  ;;  %v9341_v18 = vld [vmem:[#allocation8 + $0xc68] sm:$0xf] }
 0x230   :  { %v8222_v39 = vor.u32 %v11067_v17, %v8221_v16  ;;  %v9342_v40 = vor.u32 %v11347_v19, %v9341_v18  ;;  %v4162_v52 = vmul.f32 %v4134_v28, %v12147_v59  ;;  %v8726_v59 = vor.u32 %v11193_v54, %v8725_v51  ;;  %v11305_v17 = vld [vmem:[#allocation8 + $0xb4c] sm:$0xf0]  ;;  %v11116_v18 = vld [vmem:[#allocation8 + $0x56c] sm:$0xf]  ;;  %v8447_v19 = vld [vmem:[#allocation8 + $0x5a0] sm:$0xf0] }
 0x231   :  { %3936 = vmatpush.bf16.msra.mxu1 %v8446_v29  ;;  %3914 = vmatpush.bf16.msrb.mxu3 %v9114_v46  ;;  %v8838_v29 = vor.u32 %v11221_v12, %v8837_v11  ;;  %v3695_v30 = vpop.f32.mrf.mxu2  ;;  %v11333_v46 = vld [vmem:[#allocation8 + $0xc2c] sm:$0xf0]  ;;  %v10990_v11 = vld [vmem:[#allocation8 + $0x17c] sm:$0xf]  ;;  %v7943_v12 = vld [vmem:[#allocation8 + $0x1b0] sm:$0xf0] }
 0x232   :  { %v3696_v34 = vadd.f32 %v3695_v30, %v12150_v25  ;;  %v8782_v25 = vor.u32 %v11207_v42, %v8781_v41  ;;  %v4206_v3 = vadd.f32 %v4178_v50, %v4162_v52  ;;  %v9174_v41 = vor.u32 %v11305_v17, %v9173_v15  ;;  %v11102_v50 = vld [vmem:[#allocation8 + $0x4fc] sm:$0xf]  ;;  %v9511_v51 = vld [vmem:[#allocation8 + $0xdf0] sm:$0xf0] }
 0x233   :  { %3925 = vmatpush.bf16.msra.mxu0 %v7886_v32  ;;  %3947 = vmatpush.bf16.msra.mxu2 %v9006_v44  ;;  %v8055_v32 = vld [vmem:[#allocation8 + $0x290] sm:$0xf0]  ;;  %v9285_v44 = vld [vmem:[#allocation8 + $0xbf8] sm:$0xf] }
 0x234   :  { %3915 = vmatmul.bf16.vlgmr.msrb.gmra.mxu3 %v12075_v8  ;;  %v8058_v36 = vor.u32 %v11018_v43, %v8055_v32  ;;  %v9286_v26 = vor.u32 %v11333_v46, %v9285_v44  ;;  %v4220_v24 = vmax.f32 %v4206_v3, 0.0  ;;  %v8450_v43 = vor.u32 %v11116_v18, %v8447_v19  ;;  %v9007_v32 = vld [vmem:[#allocation8 + $0xa00] sm:$0xf0]  ;;  %v9117_v44 = vld [vmem:[#allocation8 + $0xaa8] sm:$0xf] }
 0x235   :  { %3937 = vmatpush.bf16.msra.mxu1 %v8390_v47  ;;  %3959 = vmatpush.bf16.msra.mxu3 %v9510_v38  ;;  %v11144_v47 = vld [vmem:[#allocation8 + $0x64c] sm:$0xf]  ;;  %v4135_v38 = vperm.slane %v12154_v27, 5  ;;  %v11214_v18 = vld [vmem:[#allocation8 + $0x87c] sm:$0xf] }
 0x236   :  { %v11228_v3 = vld [vmem:[#allocation8 + $0x8ec] sm:$0xf]  ;;  %v8839_v19 = vld [vmem:[#allocation8 + $0x8b0] sm:$0xf0] }
 0x237   :  { %3926 = vmatpush.bf16.msra.mxu0 %v7830_v55  ;;  %3948 = vmatpush.bf16.msra.mxu2 %v8950_v58  ;;  %v11004_v55 = vld [vmem:[#allocation8 + $0x1ec] sm:$0xf]  ;;  %v3708_v57 = vpop.f32.mrf.mxu3  ;;  %v8562_v58 = vor.u32 %v11144_v47, %v8559_v48  ;;  %v11291_v48 = vld [vmem:[#allocation8 + $0xadc] sm:$0xf0] }
 0x238   :  { %v3709_v60 = vadd.f32 %v3708_v57, %v3696_v34  ;;  %v8002_v0 = vor.u32 %v11004_v55, %v7999_v56  ;;  %v10976_v34 = vld [vmem:[#allocation8 + $0x10c] sm:$0xf]  ;;  %v10962_v55 = vld [vmem:[#allocation8 + $0x9c] sm:$0xf]  ;;  %v7831_v56 = vld [vmem:[#allocation8 + $0xd0] sm:$0xf0] }
 0x239   :  { %3938 = vmatpush.bf16.msra.mxu1 %v8334_v35  ;;  %3960 = vmatpush.bf16.msra.mxu3 %v9454_v62  ;;  %v9229_v35 = vld [vmem:[#allocation8 + $0xb88] sm:$0xf]  ;;  %v3697_v1 = vpop.f32.mrf.mxu2  ;;  %v11242_v57 = vld [vmem:[#allocation8 + $0x95c] sm:$0xf] }
 0x23b   :  { %3927 = vmatpush.bf16.msra.mxu0 %v7774_v4  ;;  %3949 = vmatpush.bf16.msra.mxu2 %v8894_v5  ;;  %v3721_v62 = vpop.f32.mrf.mxu0  ;;  %v4163_v4 = vmul.f32 %v4135_v38, %v3709_v60  ;;  %v9230_v5 = vor.u32 %v11319_v22, %v9229_v35  ;;  %v11382_v38 = vld [vmem:[#allocation8 + $0xdbc] sm:$0xf]  ;;  %v8951_v35 = vld [vmem:[#allocation8 + $0x990] sm:$0xf0]  ;;  %v11088_v22 = vld [vmem:[#allocation8 + $0x48c] sm:$0xf] }
 0x23c   :  { %v8335_v60 = vld [vmem:[#allocation8 + $0x4c0] sm:$0xf0]  ;;  %v8954_v1 = vor.u32 %v11242_v57, %v8951_v35  ;;  %v8727_v35 = vld [vmem:[#allocation8 + $0x7d0] sm:$0xf0] }
 0x23d   :  { %3939 = vmatpush.bf16.msra.mxu1 %v8278_v13  ;;  %3961 = vmatpush.bf16.msra.mxu3 %v9398_v21  ;;  %v8506_v13 = vor.u32 %v11130_v9, %v8503_v63  ;;  %v11270_v21 = vld [vmem:[#allocation8 + $0xa3c] sm:$0xf]  ;;  %v4207_v16 = vadd.f32 %v4179_v61, %v4163_v4  ;;  %v11368_v61 = vld [vmem:[#allocation8 + $0xd4c] sm:$0xf]  ;;  %v7834_v9 = vor.u32 %v10962_v55, %v7831_v56  ;;  %v8895_v4 = vld [vmem:[#allocation8 + $0x920] sm:$0xf0] }
 0x23e   :  { %3928 = vmatmul.bf16.vlgmr.msra.gmra.mxu0 %v12061_v53  ;;  %v9066_v30 = vor.u32 %v11270_v21, %v9063_v14  ;;  %v11354_v21 = vld [vmem:[#allocation8 + $0xcdc] sm:$0xf]  ;;  %v9399_v14 = vld [vmem:[#allocation8 + $0xd10] sm:$0xf0]  ;;  %v11152_v55 = vld [vmem:[#allocation8 + $0x684] sm:$0xf0] }
 0x23f   :  { %3972 = vmatpush.bf16.msrb.mxu0 %v8170_v10  ;;  %3950 = vmatpush.bf16.msra.mxu2 %v8838_v29  ;;  %v11179_v10 = vld [vmem:[#allocation8 + $0x75c] sm:$0xf0]  ;;  %v4221_v28 = vmax.f32 %v4207_v16, 0.0  ;;  %v7946_v29 = vor.u32 %v10990_v11, %v7943_v12  ;;  %v3710_v42 = vpop.f32.mrf.mxu3  ;;  %v11054_v11 = vld [vmem:[#allocation8 + $0x374] sm:$0xf0]  ;;  %v8898_v16 = vor.u32 %v11228_v3, %v8895_v4 }
 0x240   :  { %v8670_v20 = vor.u32 %v11179_v10, %v8669_v2  ;;  %v7775_v2 = vld [vmem:[#allocation8 + $0x60] sm:$0xf0]  ;;  %v8173_v10 = vld [vmem:[#allocation8 + $0x340] sm:$0xf]  ;;  %v11074_v12 = vld [vmem:[#allocation8 + $0x41c] sm:$0xf] }
 0x241   :  { %3940 = vmatpush.bf16.msra.mxu1 %v8222_v39  ;;  %3962 = vmatpush.bf16.msra.mxu3 %v9342_v40  ;;  %v7887_v39 = vld [vmem:[#allocation8 + $0x140] sm:$0xf0]  ;;  %v12168_v46 = vpack.c.bf16 %v4221_v28, %v4220_v24  ;;  %v8174_v17 = vor.u32 %v11054_v11, %v8173_v10  ;;  %v9402_v24 = vor.u32 %v11354_v21, %v9399_v14  ;;  %v8117_v28 = vld [vmem:[#allocation8 + $0x2d0] sm:$0xf]  ;;  %v11166_v42 = vld [vmem:[#allocation8 + $0x6f4] sm:$0xf0] }
 0x242   :  { %v7890_v52 = vor.u32 %v10976_v34, %v7887_v39  ;;  %v11340_v34 = vld [vmem:[#allocation8 + $0xc6c] sm:$0xf]  ;;  %v9343_v39 = vld [vmem:[#allocation8 + $0xca0] sm:$0xf0]  ;;  %v10998_v21 = vld [vmem:[#allocation8 + $0x1b4] sm:$0xf0] }
 0x243   :  { %3973 = vmatpush.bf16.msrb.mxu0 %v8114_v33  ;;  %3951 = vmatpush.bf16.msra.mxu2 %v8782_v25  ;;  %v3734_v33 = vpop.f32.mrf.mxu1  ;;  %v3723_v47 = vpop.f32.mrf.mxu0  ;;  %v8391_v25 = vld [vmem:[#allocation8 + $0x530] sm:$0xf0] }
 0x244   :  { %3941 = vmatmul.bf16.vlgmr.msra.gmra.mxu1 %v12065_v7  ;;  %v12166_v40 = vadd.f32 %v3734_v33, %v3721_v62  ;;  %v8394_v54 = vor.u32 %v11102_v50, %v8391_v25  ;;  %v9455_v62 = vld [vmem:[#allocation8 + $0xd80] sm:$0xf0]  ;;  %v11200_v50 = vld [vmem:[#allocation8 + $0x80c] sm:$0xf] }
 0x245   :  { %3985 = vmatpush.bf16.msrb.mxu1 %v8618_v23  ;;  %3963 = vmatpush.bf16.msra.mxu3 %v9286_v26  ;;  %v11256_v23 = vld [vmem:[#allocation8 + $0x9cc] sm:$0xf]  ;;  %v9118_v26 = vor.u32 %v11291_v48, %v9117_v44  ;;  %v8223_v33 = vld [vmem:[#allocation8 + $0x3e0] sm:$0xf0]  ;;  %v9346_v48 = vor.u32 %v11340_v34, %v9343_v39  ;;  %v10984_v34 = vld [vmem:[#allocation8 + $0x144] sm:$0xf0] }
 0x246   :  { %v8783_v25 = vld [vmem:[#allocation8 + $0x840] sm:$0xf0] }
 0x247   :  { %3974 = vmatpush.bf16.msrb.mxu0 %v8058_v36  ;;  %3952 = vmatpush.bf16.msra.mxu2 %v8726_v59  ;;  %v9010_v36 = vor.u32 %v11256_v23, %v9007_v32  ;;  %v10948_v59 = vld [vmem:[#allocation8 + $0x2c] sm:$0xf]  ;;  %v8786_v56 = vor.u32 %v11200_v50, %v8783_v25  ;;  %v8397_v50 = vld [vmem:[#allocation8 + $0x500] sm:$0xf]  ;;  %v11110_v25 = vld [vmem:[#allocation8 + $0x534] sm:$0xf0] }
 0x248   :  { %v7778_v15 = vor.u32 %v10948_v59, %v7775_v2  ;;  %v11138_v2 = vld [vmem:[#allocation8 + $0x614] sm:$0xf0] }
 0x249   :  { %3986 = vmatpush.bf16.msrb.mxu1 %v8562_v58  ;;  %3964 = vmatpush.bf16.msra.mxu3 %v9230_v5  ;;  %v9514_v58 = vor.u32 %v11382_v38, %v9511_v51  ;;  %v9458_v5 = vor.u32 %v11368_v61, %v9455_v62  ;;  %v8061_v38 = vld [vmem:[#allocation8 + $0x260] sm:$0xf]  ;;  %v11012_v62 = vld [vmem:[#allocation8 + $0x224] sm:$0xf0] }
 0x24b   :  { %3975 = vmatpush.bf16.msrb.mxu0 %v8002_v0  ;;  %3953 = vmatpush.bf16.msra.mxu2 %v8670_v20  ;;  %v3736_v63 = vpop.f32.mrf.mxu1  ;;  %v8338_v0 = vor.u32 %v11088_v22, %v8335_v60  ;;  %v8005_v22 = vld [vmem:[#allocation8 + $0x1f0] sm:$0xf] }
 0x24c   :  { %v9231_v63 = vld [vmem:[#allocation8 + $0xbc0] sm:$0xf0]  ;;  %v8006_v10 = vor.u32 %v11012_v62, %v8005_v22  ;;  %v11096_v22 = vld [vmem:[#allocation8 + $0x4c4] sm:$0xf0] }
 0x24d   :  { %3987 = vmatpush.bf16.msrb.mxu1 %v8506_v13  ;;  %3965 = vmatpush.bf16.msra.mxu3 %v9174_v41  ;;  %v8279_v13 = vld [vmem:[#allocation8 + $0x450] sm:$0xf0]  ;;  %v8621_v41 = vld [vmem:[#allocation8 + $0x6c0] sm:$0xf] }
 0x24e   :  { %3954 = vmatmul.bf16.vlgmr.msra.gmra.mxu2 %v12071_v45  ;;  %v8282_v20 = vor.u32 %v11074_v12, %v8279_v13  ;;  %v8622_v51 = vor.u32 %v11166_v42, %v8621_v41  ;;  %v8671_v12 = vld [vmem:[#allocation8 + $0x760] sm:$0xf0]  ;;  %v7949_v13 = vld [vmem:[#allocation8 + $0x180] sm:$0xf] }
 0x24f   :  { %3976 = vmatpush.bf16.msrb.mxu0 %v7946_v29  ;;  %3998 = vmatpush.bf16.msrb.mxu2 %v9066_v30  ;;  %v11040_v29 = vld [vmem:[#allocation8 + $0x304] sm:$0xf0]  ;;  %v11060_v30 = vld [vmem:[#allocation8 + $0x3ac] sm:$0xf] }
 0x250   :  { %v8118_v32 = vor.u32 %v11040_v29, %v8117_v28  ;;  %v8226_v47 = vor.u32 %v11060_v30, %v8223_v33  ;;  %v7950_v28 = vor.u32 %v10998_v21, %v7949_v13  ;;  %v7893_v33 = vld [vmem:[#allocation8 + $0x110] sm:$0xf]  ;;  %v11082_v13 = vld [vmem:[#allocation8 + $0x454] sm:$0xf0]  ;;  %v9405_v21 = vld [vmem:[#allocation8 + $0xce0] sm:$0xf] }
 0x251   :  { %3988 = vmatpush.bf16.msrb.mxu1 %v8450_v43  ;;  %3966 = vmatpush.bf16.msra.mxu3 %v9118_v26  ;;  %v8842_v43 = vor.u32 %v11214_v18, %v8839_v19  ;;  %v3747_v23 = vpop.f32.mrf.mxu2  ;;  %v9287_v26 = vld [vmem:[#allocation8 + $0xc30] sm:$0xf0]  ;;  %v8453_v19 = vld [vmem:[#allocation8 + $0x570] sm:$0xf] }
 0x252   :  { %v3748_v44 = vadd.f32 %v3747_v23, %v12166_v40  ;;  %v9175_v18 = vld [vmem:[#allocation8 + $0xb50] sm:$0xf0]  ;;  %v9013_v23 = vld [vmem:[#allocation8 + $0x9d0] sm:$0xf] }
 0x253   :  { %3977 = vmatpush.bf16.msrb.mxu0 %v7890_v52  ;;  %3999 = vmatpush.bf16.msrb.mxu2 %v9010_v36  ;;  %v11026_v52 = vld [vmem:[#allocation8 + $0x294] sm:$0xf0]  ;;  %v11326_v36 = vld [vmem:[#allocation8 + $0xbfc] sm:$0xf] }
 0x254   :  { %3967 = vmatmul.bf16.vlgmr.msra.gmra.mxu3 %v12075_v8  ;;  %v8062_v57 = vor.u32 %v11026_v52, %v8061_v38  ;;  %v9290_v40 = vor.u32 %v11326_v36, %v9287_v26  ;;  %v9517_v38 = vld [vmem:[#allocation8 + $0xdc0] sm:$0xf]  ;;  %v7894_v52 = vor.u32 %v10984_v34, %v7893_v33  ;;  %v11068_v33 = vld [vmem:[#allocation8 + $0x3e4] sm:$0xf0]  ;;  %v9349_v34 = vld [vmem:[#allocation8 + $0xc70] sm:$0xf] }
 0x255   :  { %3989 = vmatpush.bf16.msrb.mxu1 %v8394_v54  ;;  %4011 = vmatpush.bf16.msrb.mxu3 %v9514_v58  ;;  %v8565_v54 = vld [vmem:[#allocation8 + $0x650] sm:$0xf]  ;;  %v11186_v58 = vld [vmem:[#allocation8 + $0x79c] sm:$0xf] }
 0x256   :  { %v8566_v61 = vor.u32 %v11152_v55, %v8565_v54  ;;  %v8730_v3 = vor.u32 %v11186_v58, %v8727_v35  ;;  %v8398_v54 = vor.u32 %v11110_v25, %v8397_v50  ;;  %v7837_v55 = vld [vmem:[#allocation8 + $0xa0] sm:$0xf]  ;;  %v11250_v58 = vld [vmem:[#allocation8 + $0x994] sm:$0xf0]  ;;  %v8341_v35 = vld [vmem:[#allocation8 + $0x490] sm:$0xf] }
 0x257   :  { %3978 = vmatpush.bf16.msrb.mxu0 %v7834_v9  ;;  %4000 = vmatpush.bf16.msrb.mxu2 %v8954_v1  ;;  %v3760_v60 = vpop.f32.mrf.mxu3  ;;  %v11312_v9 = vld [vmem:[#allocation8 + $0xb8c] sm:$0xf] }
 0x258   :  { %v12174_v59 = vadd.f32 %v3760_v60, %v3748_v44  ;;  %v9234_v11 = vor.u32 %v11312_v9, %v9231_v63  ;;  %v11284_v44 = vld [vmem:[#allocation8 + $0xaac] sm:$0xf]  ;;  %v9461_v60 = vld [vmem:[#allocation8 + $0xd50] sm:$0xf] }
 0x259   :  { %3990 = vmatpush.bf16.msrb.mxu1 %v8338_v0  ;;  %4012 = vmatpush.bf16.msrb.mxu3 %v9458_v5  ;;  %v8509_v0 = vld [vmem:[#allocation8 + $0x5e0] sm:$0xf]  ;;  %v3749_v4 = vpop.f32.mrf.mxu2  ;;  %v11172_v5 = vld [vmem:[#allocation8 + $0x72c] sm:$0xf]  ;;  %v7781_v63 = vld [vmem:[#allocation8 + $0x30] sm:$0xf] }
 0x25a   :  { %v8510_v14 = vor.u32 %v11138_v2, %v8509_v0  ;;  %v8342_v0 = vor.u32 %v11096_v22, %v8341_v35  ;;  %v10956_v2 = vld [vmem:[#allocation8 + $0x64] sm:$0xf0]  ;;  %v8733_v35 = vld [vmem:[#allocation8 + $0x7a0] sm:$0xf] }
 0x25b   :  { %3979 = vmatpush.bf16.msrb.mxu0 %v7778_v15  ;;  %4001 = vmatpush.bf16.msrb.mxu2 %v8898_v16  ;;  %v3773_v1 = vpop.f32.mrf.mxu0  ;;  %v9069_v15 = vld [vmem:[#allocation8 + $0xa40] sm:$0xf]  ;;  %v11278_v16 = vld [vmem:[#allocation8 + $0xa74] sm:$0xf0]  ;;  %v11236_v4 = vld [vmem:[#allocation8 + $0x924] sm:$0xf0] }
 0x25c   :  { %v9070_v29 = vor.u32 %v11278_v16, %v9069_v15  ;;  %v7782_v15 = vor.u32 %v10956_v2, %v7781_v63  ;;  %v8007_v63 = vld [vmem:[#allocation8 + $0x228] sm:$0xf0]  ;;  %v9237_v2 = vld [vmem:[#allocation8 + $0xb90] sm:$0xf] }
 0x25d   :  { %3991 = vmatpush.bf16.msrb.mxu1 %v8282_v20  ;;  %4013 = vmatpush.bf16.msrb.mxu3 %v9402_v24  ;;  %v11124_v20 = vld [vmem:[#allocation8 + $0x5a4] sm:$0xf0]  ;;  %v8674_v24 = vor.u32 %v11172_v5, %v8671_v12  ;;  %v8285_v12 = vld [vmem:[#allocation8 + $0x420] sm:$0xf] }
 0x25e   :  { %3980 = vmatmul.bf16.vlgmr.msrb.gmra.mxu0 %v12061_v53 }
 0x25f   :  { %4024 = vmatpush.bf16.msra.mxu0 %v8174_v17  ;;  %4002 = vmatpush.bf16.msrb.mxu2 %v8842_v43  ;;  %v11298_v17 = vld [vmem:[#allocation8 + $0xb1c] sm:$0xf]  ;;  %v3762_v42 = vpop.f32.mrf.mxu3  ;;  %v8454_v43 = vor.u32 %v11124_v20, %v8453_v19  ;;  %v11222_v19 = vld [vmem:[#allocation8 + $0x8b4] sm:$0xf0]  ;;  %v8286_v20 = vor.u32 %v11082_v13, %v8285_v12 }
 0x260   :  { %v9178_v41 = vor.u32 %v11298_v17, %v9175_v18  ;;  %v8845_v18 = vld [vmem:[#allocation8 + $0x880] sm:$0xf]  ;;  %v11159_v42 = vld [vmem:[#allocation8 + $0x6c4] sm:$0xf] }
 0x261   :  { %3992 = vmatpush.bf16.msrb.mxu1 %v8226_v47  ;;  %4014 = vmatpush.bf16.msrb.mxu3 %v9346_v48  ;;  %v3786_v30 = vpop.f32.mrf.mxu1  ;;  %v9119_v48 = vld [vmem:[#allocation8 + $0xae0] sm:$0xf0] }
 0x262   :  { %v12177_v39 = vadd.f32 %v3786_v30, %v3773_v1  ;;  %v9122_v26 = vor.u32 %v11284_v44, %v9119_v48  ;;  %v8229_v30 = vld [vmem:[#allocation8 + $0x3b0] sm:$0xf] }
 0x263   :  { %4025 = vmatpush.bf16.msra.mxu0 %v8118_v32  ;;  %4003 = vmatpush.bf16.msrb.mxu2 %v8786_v56  ;;  %v11264_v32 = vld [vmem:[#allocation8 + $0xa04] sm:$0xf0]  ;;  %v3775_v47 = vpop.f32.mrf.mxu0  ;;  %v10970_v56 = vld [vmem:[#allocation8 + $0xd4] sm:$0xf0]  ;;  %v8230_v50 = vor.u32 %v11068_v33, %v8229_v30  ;;  %v11117_v33 = vld [vmem:[#allocation8 + $0x574] sm:$0xf] }
 0x264   :  { %3993 = vmatmul.bf16.vlgmr.msrb.gmra.mxu1 %v12065_v7  ;;  %v9014_v36 = vor.u32 %v11264_v32, %v9013_v23  ;;  %v7838_v62 = vor.u32 %v10970_v56, %v7837_v55  ;;  %v4136_v23 = vperm.slane %v12154_v27, 6  ;;  %v8846_v32 = vor.u32 %v11222_v19, %v8845_v18  ;;  %v11334_v55 = vld [vmem:[#allocation8 + $0xc34] sm:$0xf0]  ;;  %v11145_v56 = vld [vmem:[#allocation8 + $0x654] sm:$0xf] }
 0x265   :  { %4037 = vmatpush.bf16.msra.mxu1 %v8622_v51  ;;  %4015 = vmatpush.bf16.msrb.mxu3 %v9290_v40  ;;  %v11390_v51 = vld [vmem:[#allocation8 + $0xdf4] sm:$0xf0]  ;;  %v10991_v18 = vld [vmem:[#allocation8 + $0x184] sm:$0xf]  ;;  %v7951_v19 = vld [vmem:[#allocation8 + $0x1b8] sm:$0xf0] }
 0x266   :  { %v9518_v40 = vor.u32 %v11390_v51, %v9517_v38  ;;  %v8789_v38 = vld [vmem:[#allocation8 + $0x810] sm:$0xf]  ;;  %v11208_v51 = vld [vmem:[#allocation8 + $0x844] sm:$0xf0]  ;;  %v4164_v22 = vmul.f32 %v4136_v23, %v12174_v59  ;;  %v11306_v30 = vld [vmem:[#allocation8 + $0xb54] sm:$0xf0]  ;;  %v7954_v23 = vor.u32 %v10991_v18, %v7951_v19 }
 0x267   :  { %4026 = vmatpush.bf16.msra.mxu0 %v8062_v57  ;;  %4004 = vmatpush.bf16.msrb.mxu2 %v8730_v3  ;;  %v8957_v57 = vld [vmem:[#allocation8 + $0x960] sm:$0xf]  ;;  %v8901_v3 = vld [vmem:[#allocation8 + $0x8f0] sm:$0xf]  ;;  %v11075_v18 = vld [vmem:[#allocation8 + $0x424] sm:$0xf] }
 0x268   :  { %v8958_v1 = vor.u32 %v11250_v58, %v8957_v57  ;;  %v8902_v16 = vor.u32 %v11236_v4, %v8901_v3  ;;  %v8567_v57 = vld [vmem:[#allocation8 + $0x688] sm:$0xf0]  ;;  %v8790_v58 = vor.u32 %v11208_v51, %v8789_v38  ;;  %v11320_v3 = vld [vmem:[#allocation8 + $0xbc4] sm:$0xf0]  ;;  %v8287_v19 = vld [vmem:[#allocation8 + $0x458] sm:$0xf0] }
 0x269   :  { %4038 = vmatpush.bf16.msra.mxu1 %v8566_v61  ;;  %4016 = vmatpush.bf16.msrb.mxu3 %v9234_v11  ;;  %v11376_v61 = vld [vmem:[#allocation8 + $0xd84] sm:$0xf0]  ;;  %v3788_v9 = vpop.f32.mrf.mxu1  ;;  %v8175_v11 = vld [vmem:[#allocation8 + $0x378] sm:$0xf0] }
 0x26a   :  { %v9462_v5 = vor.u32 %v11376_v61, %v9461_v60  ;;  %v11005_v9 = vld [vmem:[#allocation8 + $0x1f4] sm:$0xf] }
 0x26b   :  { %4027 = vmatpush.bf16.msra.mxu0 %v8006_v10  ;;  %4005 = vmatpush.bf16.msrb.mxu2 %v8674_v24  ;;  %v11047_v10 = vld [vmem:[#allocation8 + $0x344] sm:$0xf]  ;;  %v8010_v13 = vor.u32 %v11005_v9, %v8007_v63  ;;  %v7839_v9 = vld [vmem:[#allocation8 + $0xd8] sm:$0xf0] }
 0x26c   :  { %v8178_v17 = vor.u32 %v11047_v10, %v8175_v11  ;;  %v8511_v11 = vld [vmem:[#allocation8 + $0x618] sm:$0xf0]  ;;  %v11243_v63 = vld [vmem:[#allocation8 + $0x964] sm:$0xf] }
 0x26d   :  { %4039 = vmatpush.bf16.msra.mxu1 %v8510_v14  ;;  %4017 = vmatpush.bf16.msrb.mxu3 %v9178_v41  ;;  %v11362_v14 = vld [vmem:[#allocation8 + $0xd14] sm:$0xf0]  ;;  %v11348_v41 = vld [vmem:[#allocation8 + $0xca4] sm:$0xf0] }
 0x26e   :  { %4006 = vmatmul.bf16.vlgmr.msrb.gmra.mxu2 %v12071_v45  ;;  %v9406_v24 = vor.u32 %v11362_v14, %v9405_v21  ;;  %v9350_v25 = vor.u32 %v11348_v41, %v9349_v34  ;;  %v8677_v21 = vld [vmem:[#allocation8 + $0x730] sm:$0xf]  ;;  %v8455_v34 = vld [vmem:[#allocation8 + $0x5a8] sm:$0xf0] }
 0x26f   :  { %4028 = vmatpush.bf16.msra.mxu0 %v7950_v28  ;;  %4050 = vmatpush.bf16.msra.mxu2 %v9070_v29  ;;  %v11033_v28 = vld [vmem:[#allocation8 + $0x2d4] sm:$0xf]  ;;  %v8119_v29 = vld [vmem:[#allocation8 + $0x308] sm:$0xf0]  ;;  %v8458_v51 = vor.u32 %v11117_v33, %v8455_v34  ;;  %v8847_v33 = vld [vmem:[#allocation8 + $0x8b8] sm:$0xf0]  ;;  %v8290_v34 = vor.u32 %v11075_v18, %v8287_v19 }
 0x270   :  { %v8122_v47 = vor.u32 %v11033_v28, %v8119_v29  ;;  %v9181_v28 = vld [vmem:[#allocation8 + $0xb20] sm:$0xf]  ;;  %v11398_v18 = vld [vmem:[#allocation10 + $0x34] sm:$0xf0] }
 0x271   :  { %4040 = vmatpush.bf16.msra.mxu1 %v8454_v43  ;;  %4018 = vmatpush.bf16.msrb.mxu3 %v9122_v26  ;;  %v8623_v43 = vld [vmem:[#allocation8 + $0x6f8] sm:$0xf0]  ;;  %v3799_v44 = vpop.f32.mrf.mxu2 }
 0x272   :  { %v3800_v48 = vadd.f32 %v3799_v44, %v12177_v39  ;;  %v8063_v26 = vld [vmem:[#allocation8 + $0x298] sm:$0xf0]  ;;  %v4137_v39 = vperm.slane %v12154_v27, 7  ;;  %v11131_v27 = vld [vmem:[#allocation8 + $0x5e4] sm:$0xf] }
 0x273   :  { %4029 = vmatpush.bf16.msra.mxu0 %v7894_v52  ;;  %4051 = vmatpush.bf16.msra.mxu2 %v9014_v36  ;;  %v11019_v52 = vld [vmem:[#allocation8 + $0x264] sm:$0xf]  ;;  %v8626_v36 = vor.u32 %v11159_v42, %v8623_v43 }
 0x274   :  { %4019 = vmatmul.bf16.vlgmr.msrb.gmra.mxu3 %v12075_v8  ;;  %v8066_v60 = vor.u32 %v11019_v52, %v8063_v26  ;;  %v11257_v52 = vld [vmem:[#allocation8 + $0x9d4] sm:$0xf]  ;;  %v9125_v26 = vld [vmem:[#allocation8 + $0xab0] sm:$0xf] }
 0x275   :  { %4041 = vmatpush.bf16.msra.mxu1 %v8398_v54  ;;  %4063 = vmatpush.bf16.msra.mxu3 %v9518_v40  ;;  %v9293_v54 = vld [vmem:[#allocation8 + $0xc00] sm:$0xf]  ;;  %v4180_v40 = vperm.slane %v12159_v49, 6 }
 0x276   :  { %v9294_v61 = vor.u32 %v11334_v55, %v9293_v54 }
 0x277   :  { %4030 = vmatpush.bf16.msra.mxu0 %v7838_v62  ;;  %4052 = vmatpush.bf16.msra.mxu2 %v8958_v1  ;;  %v11194_v62 = vld [vmem:[#allocation8 + $0x7d4] sm:$0xf0]  ;;  %v3812_v1 = vpop.f32.mrf.mxu3  ;;  %v4208_v14 = vadd.f32 %v4180_v40, %v4164_v22  ;;  %v8399_v40 = vld [vmem:[#allocation8 + $0x538] sm:$0xf0] }
 0x278   :  { %v3813_v4 = vadd.f32 %v3812_v1, %v3800_v48  ;;  %v8734_v59 = vor.u32 %v11194_v62, %v8733_v35  ;;  %v7895_v48 = vld [vmem:[#allocation8 + $0x148] sm:$0xf0]  ;;  %v10963_v62 = vld [vmem:[#allocation8 + $0xa4] sm:$0xf] }
 0x279   :  { %4042 = vmatpush.bf16.msra.mxu1 %v8342_v0  ;;  %4064 = vmatpush.bf16.msra.mxu3 %v9462_v5  ;;  %v8570_v0 = vor.u32 %v11145_v56, %v8567_v57  ;;  %v4181_v5 = vperm.slane %v12159_v49, 7  ;;  %v3801_v12 = vpop.f32.mrf.mxu2  ;;  %v8514_v49 = vor.u32 %v11131_v27, %v8511_v11  ;;  %v4222_v42 = vmax.f32 %v4208_v14, 0.0  ;;  %v11292_v56 = vld [vmem:[#allocation8 + $0xae4] sm:$0xf0]  ;;  %v11103_v57 = vld [vmem:[#allocation8 + $0x504] sm:$0xf] }
 0x27a   :  { %v10949_v11 = vld [vmem:[#allocation8 + $0x34] sm:$0xf]  ;;  %v8903_v14 = vld [vmem:[#allocation8 + $0x928] sm:$0xf0] }
 0x27b   :  { %4031 = vmatpush.bf16.msra.mxu0 %v7782_v15  ;;  %4053 = vmatpush.bf16.msra.mxu2 %v8902_v16  ;;  %v3825_v10 = vpop.f32.mrf.mxu0  ;;  %v4165_v15 = vmul.f32 %v4137_v39, %v3813_v4  ;;  %v9238_v16 = vor.u32 %v11320_v3, %v9237_v2  ;;  %v9519_v39 = vld [vmem:[#allocation8 + $0xdf8] sm:$0xf0]  ;;  %v11089_v2 = vld [vmem:[#allocation8 + $0x494] sm:$0xf]  ;;  %v8343_v3 = vld [vmem:[#allocation8 + $0x4c8] sm:$0xf0] }
 0x27c   :  { %v11369_v4 = vld [vmem:[#allocation8 + $0xd54] sm:$0xf]  ;;  %v8346_v12 = vor.u32 %v11089_v2, %v8343_v3 }
 0x27d   :  { %4043 = vmatpush.bf16.msra.mxu1 %v8286_v20  ;;  %4065 = vmatpush.bf16.msra.mxu3 %v9406_v24  ;;  %v11271_v20 = vld [vmem:[#allocation8 + $0xa44] sm:$0xf]  ;;  %v9071_v24 = vld [vmem:[#allocation8 + $0xa78] sm:$0xf0]  ;;  %v4209_v29 = vadd.f32 %v4181_v5, %v4165_v15  ;;  %v9463_v5 = vld [vmem:[#allocation8 + $0xd88] sm:$0xf0] }
 0x27e   :  { %4032 = vmatmul.bf16.vlgmr.msra.gmra.mxu0 %v12061_v53  ;;  %v9466_v15 = vor.u32 %v11369_v4, %v9463_v5  ;;  %v11313_v4 = vld [vmem:[#allocation8 + $0xb94] sm:$0xf]  ;;  %v9239_v5 = vld [vmem:[#allocation8 + $0xbc8] sm:$0xf0] }
 0x27f   :  { %4076 = vmatpush.bf16.msrb.mxu0 %v8178_v17  ;;  %4054 = vmatpush.bf16.msra.mxu2 %v8846_v32  ;;  %v11180_v17 = vld [vmem:[#allocation8 + $0x764] sm:$0xf0]  ;;  %v4223_v43 = vmax.f32 %v4209_v29, 0.0  ;;  %v9074_v32 = vor.u32 %v11271_v20, %v9071_v24  ;;  %v3814_v38 = vpop.f32.mrf.mxu3  ;;  %v9407_v20 = vld [vmem:[#allocation8 + $0xd18] sm:$0xf0] }
 0x280   :  { %v8678_v41 = vor.u32 %v11180_v17, %v8677_v21  ;;  %v11229_v21 = vld [vmem:[#allocation8 + $0x8f4] sm:$0xf]  ;;  %v11406_v17 = vld [vmem:[#allocation10 + $0x74] sm:$0xf0] }
 0x281   :  { %4044 = vmatpush.bf16.msra.mxu1 %v8230_v50  ;;  %4066 = vmatpush.bf16.msra.mxu3 %v9350_v25  ;;  %v3838_v44 = vpop.f32.mrf.mxu1  ;;  %v9182_v25 = vor.u32 %v11306_v30, %v9181_v28  ;;  %v12191_v54 = vpack.c.bf16 %v4223_v43, %v4222_v42  ;;  %v8906_v28 = vor.u32 %v11229_v21, %v8903_v14  ;;  %v11215_v30 = vld [vmem:[#allocation8 + $0x884] sm:$0xf]  ;;  %v9573_v42 = vld [vmem:[#allocation10 + $0x60] sm:$0xf]  ;;  %v11404_v43 = vld [vmem:[#allocation10 + $0x64] sm:$0xf0] }
 0x282   :  { %v12189_v50 = vadd.f32 %v3838_v44, %v3825_v10  ;;  %v7842_v10 = vor.u32 %v10963_v62, %v7839_v9  ;;  %v11341_v44 = vld [vmem:[#allocation8 + $0xc74] sm:$0xf]  ;;  %v8850_v38 = vor.u32 %v11215_v30, %v8847_v33  ;;  %v11416_v30 = vld [vmem:[#allocation10 + $0xc4] sm:$0xf0] }
 0x283   :  { %4077 = vmatpush.bf16.msrb.mxu0 %v8122_v47  ;;  %4055 = vmatpush.bf16.msra.mxu2 %v8790_v58  ;;  %v10977_v47 = vld [vmem:[#allocation8 + $0x114] sm:$0xf]  ;;  %v3827_v55 = vpop.f32.mrf.mxu0  ;;  %v11383_v58 = vld [vmem:[#allocation8 + $0xdc4] sm:$0xf] }
 0x284   :  { %4045 = vmatmul.bf16.vlgmr.msra.gmra.mxu1 %v12065_v7  ;;  %v7898_v35 = vor.u32 %v10977_v47, %v7895_v48  ;;  %v9522_v1 = vor.u32 %v11383_v58, %v9519_v39  ;;  %v9351_v47 = vld [vmem:[#allocation8 + $0xca8] sm:$0xf0]  ;;  %v9645_v48 = vld [vmem:[#allocation10 + $0xf0] sm:$0xf]  ;;  %v11402_v39 = vld [vmem:[#allocation10 + $0x54] sm:$0xf0] }
 0x285   :  { %4089 = vmatpush.bf16.msrb.mxu1 %v8626_v36  ;;  %4067 = vmatpush.bf16.msra.mxu3 %v9294_v61  ;;  %v9015_v36 = vld [vmem:[#allocation8 + $0xa08] sm:$0xf0]  ;;  %v8402_v61 = vor.u32 %v11103_v57, %v8399_v40  ;;  %v9354_v55 = vor.u32 %v11341_v44, %v9351_v47  ;;  %v9565_v40 = vld [vmem:[#allocation10 + $0x50] sm:$0xf]  ;;  %v11173_v21 = vld [vmem:[#allocation8 + $0x734] sm:$0xf] }
 0x286   :  { %v9018_v22 = vor.u32 %v11257_v52, %v9015_v36  ;;  %v9574_v52 = vor.u32 %v11404_v43, %v9573_v42  ;;  %v8791_v57 = vld [vmem:[#allocation8 + $0x848] sm:$0xf0]  ;;  %v9566_v9 = vor.u32 %v11402_v39, %v9565_v40  ;;  %v9541_v42 = vld [vmem:[#allocation10 + $0x20] sm:$0xf]  ;;  %v11396_v43 = vld [vmem:[#allocation10 + $0x24] sm:$0xf0] }
 0x287   :  { %4078 = vmatpush.bf16.msrb.mxu0 %v8066_v60  ;;  %4056 = vmatpush.bf16.msra.mxu2 %v8734_v59  ;;  %v9126_v60 = vor.u32 %v11292_v56, %v9125_v26  ;;  %v11201_v56 = vld [vmem:[#allocation8 + $0x814] sm:$0xf] }
 0x288   :  { %v8794_v62 = vor.u32 %v11201_v56, %v8791_v57  ;;  %v9647_v56 = vld [vmem:[#allocation10 + $0xf8] sm:$0xf0]  ;;  %v9542_v57 = vor.u32 %v11396_v43, %v9541_v42  ;;  %v9773_v42 = vld [vmem:[#allocation10 + $0x1f0] sm:$0xf]  ;;  %v11454_v43 = vld [vmem:[#allocation10 + $0x1f4] sm:$0xf0] }
 0x289   :  { %4090 = vmatpush.bf16.msrb.mxu1 %v8570_v0  ;;  %4068 = vmatpush.bf16.msra.mxu3 %v9238_v16  ;;  %v8959_v0 = vld [vmem:[#allocation8 + $0x998] sm:$0xf0]  ;;  %v3840_v27 = vpop.f32.mrf.mxu1  ;;  %v9581_v16 = vld [vmem:[#allocation10 + $0x70] sm:$0xf] }
 0x28a   :  { %v8962_v59 = vor.u32 %v11243_v63, %v8959_v0  ;;  %v9582_v29 = vor.u32 %v11406_v17, %v9581_v16  ;;  %v11187_v63 = vld [vmem:[#allocation8 + $0x7a4] sm:$0xf]  ;;  %v9557_v0 = vld [vmem:[#allocation10 + $0x40] sm:$0xf]  ;;  %v8679_v16 = vld [vmem:[#allocation8 + $0x768] sm:$0xf0] }
 0x28b   :  { %4079 = vmatpush.bf16.msrb.mxu0 %v8010_v13  ;;  %4057 = vmatpush.bf16.msra.mxu2 %v8678_v41  ;;  %v7783_v13 = vld [vmem:[#allocation8 + $0x68] sm:$0xf0]  ;;  %v9549_v17 = vld [vmem:[#allocation10 + $0x30] sm:$0xf] }
 0x28c   :  { %v7786_v24 = vor.u32 %v10949_v11, %v7783_v13  ;;  %v9629_v11 = vld [vmem:[#allocation10 + $0xd0] sm:$0xf]  ;;  %v9550_v33 = vor.u32 %v11398_v18, %v9549_v17  ;;  %v4462_v17 = vunpack.c.l.b16 %v12120_v37  ;;  %v12205_v18 = vld [vmem:[#allocation5 + $0x22] sm:$0x3f] }
 0x28d   :  { %4091 = vmatpush.bf16.msrb.mxu1 %v8514_v49  ;;  %4069 = vmatpush.bf16.msra.mxu3 %v9182_v25  ;;  %v11355_v49 = vld [vmem:[#allocation8 + $0xce4] sm:$0xf]  ;;  %v11422_v25 = vld [vmem:[#allocation10 + $0xf4] sm:$0xf0] }
 0x28e   :  { %4058 = vmatmul.bf16.vlgmr.msra.gmra.mxu2 %v12071_v45  ;;  %v9410_v41 = vor.u32 %v11355_v49, %v9407_v20  ;;  %v9646_v58 = vor.u32 %v11422_v25, %v9645_v48  ;;  %v11405_v49 = vld [vmem:[#allocation10 + $0x74] sm:$0xf]  ;;  %v9583_v20 = vld [vmem:[#allocation10 + $0x78] sm:$0xf0]  ;;  %v11403_v48 = vld [vmem:[#allocation10 + $0x64] sm:$0xf] }
 0x28f   :  { %4080 = vmatpush.bf16.msrb.mxu0 %v7954_v23  ;;  %4102 = vmatpush.bf16.msrb.mxu2 %v9074_v32  ;;  %v11061_v23 = vld [vmem:[#allocation8 + $0x3b4] sm:$0xf]  ;;  %v8231_v32 = vld [vmem:[#allocation8 + $0x3e8] sm:$0xf0] }
 0x290   :  { %v8234_v26 = vor.u32 %v11061_v23, %v8231_v32  ;;  %v9575_v25 = vld [vmem:[#allocation10 + $0x68] sm:$0xf0] }
 0x291   :  { %4092 = vmatpush.bf16.msrb.mxu1 %v8458_v51  ;;  %4070 = vmatpush.bf16.msra.mxu3 %v9126_v60  ;;  %v3851_v51 = vpop.f32.mrf.mxu2  ;;  %v9637_v60 = vld [vmem:[#allocation10 + $0xe0] sm:$0xf]  ;;  %v9578_v40 = vor.u32 %v11403_v48, %v9575_v25 }
 0x292   :  { %v3852_v36 = vadd.f32 %v3851_v51, %v12189_v50 }
 0x293   :  { %4081 = vmatpush.bf16.msrb.mxu0 %v7898_v35  ;;  %4103 = vmatpush.bf16.msrb.mxu2 %v9018_v22  ;;  %v11327_v35 = vld [vmem:[#allocation8 + $0xc04] sm:$0xf]  ;;  %v9295_v22 = vld [vmem:[#allocation8 + $0xc38] sm:$0xf0] }
 0x294   :  { %4071 = vmatmul.bf16.vlgmr.msra.gmra.mxu3 %v12075_v8  ;;  %v9298_v50 = vor.u32 %v11327_v35, %v9295_v22  ;;  %v9533_v35 = vld [vmem:[#allocation10 + $0x10] sm:$0xf]  ;;  %v11394_v22 = vld [vmem:[#allocation10 + $0x14] sm:$0xf0] }
 0x295   :  { %4093 = vmatpush.bf16.msrb.mxu1 %v8402_v61  ;;  %4115 = vmatpush.bf16.msrb.mxu3 %v9522_v1  ;;  %v11420_v61 = vld [vmem:[#allocation10 + $0xe4] sm:$0xf0]  ;;  %v8735_v1 = vld [vmem:[#allocation8 + $0x7d8] sm:$0xf0] }
 0x296   :  { %v9638_v3 = vor.u32 %v11420_v61, %v9637_v60  ;;  %v11401_v60 = vld [vmem:[#allocation10 + $0x54] sm:$0xf] }
 0x297   :  { %4082 = vmatpush.bf16.msrb.mxu0 %v7842_v10  ;;  %4104 = vmatpush.bf16.msrb.mxu2 %v8962_v59  ;;  %v3864_v2 = vpop.f32.mrf.mxu3  ;;  %v11418_v59 = vld [vmem:[#allocation10 + $0xd4] sm:$0xf0] }
 0x298   :  { %v12197_v10 = vadd.f32 %v3864_v2, %v3852_v36  ;;  %v9630_v19 = vor.u32 %v11418_v59, %v9629_v11  ;;  %v9613_v36 = vld [vmem:[#allocation10 + $0xb0] sm:$0xf]  ;;  %v9559_v11 = vld [vmem:[#allocation10 + $0x48] sm:$0xf0] }
 0x299   :  { %4094 = vmatpush.bf16.msrb.mxu1 %v8346_v12  ;;  %4116 = vmatpush.bf16.msrb.mxu3 %v9466_v15  ;;  %v8738_v12 = vor.u32 %v11187_v63, %v8735_v1  ;;  %v3853_v13 = vpop.f32.mrf.mxu2  ;;  %v9242_v15 = vor.u32 %v11313_v4, %v9239_v5  ;;  %v11419_v63 = vld [vmem:[#allocation10 + $0xe4] sm:$0xf]  ;;  %v9639_v1 = vld [vmem:[#allocation10 + $0xe8] sm:$0xf0]  ;;  %v11392_v5 = vld [vmem:[#allocation10 + $0x4] sm:$0xf0] }
 0x29a   :  { %v9709_v59 = vld [vmem:[#allocation10 + $0x170] sm:$0xf] }
 0x29b   :  { %4083 = vmatpush.bf16.msrb.mxu0 %v7786_v24  ;;  %4105 = vmatpush.bf16.msrb.mxu2 %v8906_v28  ;;  %v3877_v27 = vpop.f32.mrf.mxu0  ;;  %v11299_v24 = vld [vmem:[#allocation8 + $0xb24] sm:$0xf]  ;;  %v9183_v28 = vld [vmem:[#allocation8 + $0xb58] sm:$0xf0]  ;;  %v9597_v13 = vld [vmem:[#allocation10 + $0x90] sm:$0xf] }
 0x29c   :  { %v9186_v32 = vor.u32 %v11299_v24, %v9183_v28  ;;  %v9551_v24 = vld [vmem:[#allocation10 + $0x38] sm:$0xf0] }
 0x29d   :  { %4095 = vmatpush.bf16.msrb.mxu1 %v8290_v34  ;;  %4117 = vmatpush.bf16.msrb.mxu3 %v9410_v41  ;;  %v9586_v34 = vor.u32 %v11405_v49, %v9583_v20  ;;  %v11397_v20 = vld [vmem:[#allocation10 + $0x34] sm:$0xf] }
 0x29e   :  { %4084 = vmatmul.bf16.vlgmr.msrb.gmra.mxu0 %v12061_v53  ;;  %v11400_v53 = vld [vmem:[#allocation10 + $0x44] sm:$0xf0]  ;;  %v9554_v48 = vor.u32 %v11397_v20, %v9551_v24  ;;  %v9677_v20 = vld [vmem:[#allocation10 + $0x130] sm:$0xf]  ;;  %v11430_v24 = vld [vmem:[#allocation10 + $0x134] sm:$0xf0] }
 0x29f   :  { %4628 = vmatpush.bf16.msra.mxu0 %v9582_v29  ;;  %4106 = vmatpush.bf16.msrb.mxu2 %v8850_v38  ;;  %v9558_v14 = vor.u32 %v11400_v53, %v9557_v0  ;;  %v9621_v29 = vld [vmem:[#allocation10 + $0xc0] sm:$0xf]  ;;  %v3866_v44 = vpop.f32.mrf.mxu3  ;;  %v11285_v38 = vld [vmem:[#allocation8 + $0xab4] sm:$0xf]  ;;  %v9534_v0 = vor.u32 %v11394_v22, %v9533_v35  ;;  %v9615_v35 = vld [vmem:[#allocation10 + $0xb8] sm:$0xf0] }
 0x2a0   :  { %v9622_v47 = vor.u32 %v11416_v30, %v9621_v29  ;;  %v9701_v30 = vld [vmem:[#allocation10 + $0x160] sm:$0xf]  ;;  %v12209_v44 = vld [vmem:[#allocation5 + $0x14] sm:$0x3f] }
 0x2a1   :  { %4096 = vmatpush.bf16.msrb.mxu1 %v8234_v26  ;;  %4118 = vmatpush.bf16.msrb.mxu3 %v9354_v55  ;;  %v3890_v41 = vpop.f32.mrf.mxu1  ;;  %v11414_v26 = vld [vmem:[#allocation10 + $0xb4] sm:$0xf0]  ;;  %v11421_v55 = vld [vmem:[#allocation10 + $0xf4] sm:$0xf]  ;;  %v9765_v22 = vld [vmem:[#allocation10 + $0x1e0] sm:$0xf] }
 0x2a2   :  { %v12200_v23 = vadd.f32 %v3890_v41, %v3877_v27  ;;  %v9614_v39 = vor.u32 %v11414_v26, %v9613_v36  ;;  %v9650_v61 = vor.u32 %v11421_v55, %v9647_v56  ;;  %v11399_v27 = vld [vmem:[#allocation10 + $0x44] sm:$0xf]  ;;  %v9623_v41 = vld [vmem:[#allocation10 + $0xc8] sm:$0xf0]  ;;  %v9693_v56 = vld [vmem:[#allocation10 + $0x150] sm:$0xf] }
 0x2a3   :  { %4629 = vmatpush.bf16.msra.mxu0 %v9574_v52  ;;  %4107 = vmatpush.bf16.msrb.mxu2 %v8794_v62  ;;  %v3879_v51 = vpop.f32.mrf.mxu0  ;;  %v9127_v52 = vld [vmem:[#allocation8 + $0xae8] sm:$0xf0]  ;;  %v9567_v62 = vld [vmem:[#allocation10 + $0x58] sm:$0xf0]  ;;  %v11395_v26 = vld [vmem:[#allocation10 + $0x24] sm:$0xf] }
 0x2a4   :  { %4097 = vmatmul.bf16.vlgmr.msrb.gmra.mxu1 %v12065_v7  ;;  %v8682_v7 = vor.u32 %v11173_v21, %v8679_v16  ;;  %v9570_v53 = vor.u32 %v11401_v60, %v9567_v62  ;;  %v11410_v21 = vld [vmem:[#allocation10 + $0x94] sm:$0xf0]  ;;  %v9543_v55 = vld [vmem:[#allocation10 + $0x28] sm:$0xf0]  ;;  %v11452_v60 = vld [vmem:[#allocation10 + $0x1e4] sm:$0xf0] }
 0x2a5   :  { %4641 = vmatpush.bf16.msra.mxu1 %v9646_v58  ;;  %4119 = vmatpush.bf16.msrb.mxu3 %v9298_v50  ;;  %v9130_v58 = vor.u32 %v11285_v38, %v9127_v52  ;;  %v11412_v50 = vld [vmem:[#allocation10 + $0xa4] sm:$0xf0]  ;;  %v9598_v28 = vor.u32 %v11410_v21, %v9597_v13  ;;  %v4139_v62 = vperm.slane %v12205_v18, 1 }
 0x2a7   :  { %4630 = vmatpush.bf16.msra.mxu0 %v9566_v9  ;;  %4108 = vmatpush.bf16.msrb.mxu2 %v8738_v12  ;;  %v9605_v9 = vld [vmem:[#allocation10 + $0xa0] sm:$0xf]  ;;  %v11438_v12 = vld [vmem:[#allocation10 + $0x174] sm:$0xf0] }
 0x2a8   :  { %v9606_v4 = vor.u32 %v11412_v50, %v9605_v9  ;;  %v9710_v49 = vor.u32 %v11438_v12, %v9709_v59  ;;  %v11393_v9 = vld [vmem:[#allocation10 + $0x14] sm:$0xf]  ;;  %v9757_v12 = vld [vmem:[#allocation10 + $0x1d0] sm:$0xf] }
 0x2a9   :  { %4642 = vmatpush.bf16.msra.mxu1 %v9638_v3  ;;  %4120 = vmatpush.bf16.msrb.mxu3 %v9242_v15  ;;  %v3892_v2 = vpop.f32.mrf.mxu1  ;;  %v9525_v3 = vld [vmem:[#allocation10] sm:$0xf]  ;;  %v9631_v15 = vld [vmem:[#allocation10 + $0xd8] sm:$0xf0] }
 0x2aa   :  { %v9526_v16 = vor.u32 %v11392_v5, %v9525_v3  ;;  %v11432_v2 = vld [vmem:[#allocation10 + $0x144] sm:$0xf0]  ;;  %v11411_v5 = vld [vmem:[#allocation10 + $0xa4] sm:$0xf] }
 0x2ab   :  { %4631 = vmatpush.bf16.msra.mxu0 %v9558_v14  ;;  %4109 = vmatpush.bf16.msrb.mxu2 %v8682_v7  ;;  %v11417_v14 = vld [vmem:[#allocation10 + $0xd4] sm:$0xf]  ;;  %v11436_v7 = vld [vmem:[#allocation10 + $0x164] sm:$0xf0] }
 0x2ac   :  { %v9634_v29 = vor.u32 %v11417_v14, %v9631_v15  ;;  %v9702_v38 = vor.u32 %v11436_v7, %v9701_v30  ;;  %v11391_v15 = vld [vmem:[#allocation10 + $0x4] sm:$0xf]  ;;  %v9711_v30 = vld [vmem:[#allocation10 + $0x178] sm:$0xf0]  ;;  %v11409_v7 = vld [vmem:[#allocation10 + $0x94] sm:$0xf] }
 0x2ad   :  { %4643 = vmatpush.bf16.msra.mxu1 %v9630_v19  ;;  %4121 = vmatpush.bf16.msrb.mxu3 %v9186_v32  ;;  %v9562_v19 = vor.u32 %v11399_v27, %v9559_v11  ;;  %v12207_v32 = vpack.c.b16 %v4462_v17, %v4462_v17  ;;  %v9607_v27 = vld [vmem:[#allocation10 + $0xa8] sm:$0xf0] }
 0x2ae   :  { %4110 = vmatmul.bf16.vlgmr.msrb.gmra.mxu2 %v12071_v45  ;;  %v9642_v45 = vor.u32 %v11419_v63, %v9639_v1  ;;  %v9535_v1 = vld [vmem:[#allocation10 + $0x18] sm:$0xf0] }
 0x2af   :  { %4632 = vmatpush.bf16.msra.mxu0 %v9550_v33  ;;  %4654 = vmatpush.bf16.msra.mxu2 %v9586_v34  ;;  %v9589_v33 = vld [vmem:[#allocation10 + $0x80] sm:$0xf]  ;;  %v11408_v34 = vld [vmem:[#allocation10 + $0x84] sm:$0xf0]  ;;  %v9538_v13 = vor.u32 %v11393_v9, %v9535_v1  ;;  %v9661_v1 = vld [vmem:[#allocation10 + $0x110] sm:$0xf] }
 0x2b0   :  { %v9590_v52 = vor.u32 %v11408_v34, %v9589_v33  ;;  %v9599_v34 = vld [vmem:[#allocation10 + $0x98] sm:$0xf0] }
 0x2b1   :  { %4644 = vmatpush.bf16.msra.mxu1 %v9622_v47  ;;  %4122 = vmatpush.bf16.msrb.mxu3 %v9130_v58  ;;  %v4138_v47 = vperm.slane %v12205_v18, 0  ;;  %v3903_v25 = vpop.f32.mrf.mxu2  ;;  %v11434_v58 = vld [vmem:[#allocation10 + $0x154] sm:$0xf0] }
 0x2b2   :  { %v3904_v51 = vadd.f32 %v3903_v25, %v12200_v23  ;;  %v9546_v23 = vor.u32 %v11395_v26, %v9543_v55  ;;  %v9602_v26 = vor.u32 %v11409_v7, %v9599_v34  ;;  %v11429_v34 = vld [vmem:[#allocation10 + $0x134] sm:$0xf] }
 0x2b3   :  { %4633 = vmatpush.bf16.msra.mxu0 %v9542_v57  ;;  %4655 = vmatpush.bf16.msra.mxu2 %v9578_v40  ;;  %v4463_v57 = vunpack.c.h.b16 %v12120_v37  ;;  %v9774_v40 = vor.u32 %v11454_v43, %v9773_v42  ;;  %v4166_v50 = vmul.f32 %v4138_v47, %v12197_v10  ;;  %v9694_v37 = vor.u32 %v11434_v58, %v9693_v56  ;;  %v11450_v10 = vld [vmem:[#allocation10 + $0x1d4] sm:$0xf0]  ;;  %v11407_v58 = vld [vmem:[#allocation10 + $0x84] sm:$0xf] }
 0x2b4   :  { %4123 = vmatmul.bf16.vlgmr.msrb.gmra.mxu3 %v12075_v8  ;;  %v11415_v8 = vld [vmem:[#allocation10 + $0xc4] sm:$0xf] }
 0x2b5   :  { %4645 = vmatpush.bf16.msra.mxu1 %v9614_v39  ;;  %4667 = vmatpush.bf16.msra.mxu3 %v9650_v61  ;;  %v9626_v36 = vor.u32 %v11415_v8, %v9623_v41  ;;  %v11413_v39 = vld [vmem:[#allocation10 + $0xb4] sm:$0xf]  ;;  %v4182_v61 = vperm.slane %v12209_v44, 0  ;;  %v12218_v3 = vpack.c.b16 %v4463_v57, %v4463_v57  ;;  %v9749_v8 = vld [vmem:[#allocation10 + $0x1c0] sm:$0xf] }
 0x2b6   :  { %v9618_v63 = vor.u32 %v11413_v39, %v9615_v35  ;;  %v11448_v41 = vld [vmem:[#allocation10 + $0x1c4] sm:$0xf0]  ;;  %v11435_v57 = vld [vmem:[#allocation10 + $0x164] sm:$0xf] }
 0x2b7   :  { %4634 = vmatpush.bf16.msra.mxu0 %v9534_v0  ;;  %4656 = vmatpush.bf16.msra.mxu2 %v9570_v53  ;;  %v9685_v0 = vld [vmem:[#allocation10 + $0x140] sm:$0xf]  ;;  %v3916_v53 = vpop.f32.mrf.mxu3  ;;  %v9750_v56 = vor.u32 %v11448_v41, %v9749_v8  ;;  %v9679_v8 = vld [vmem:[#allocation10 + $0x138] sm:$0xf0] }
 0x2b8   :  { %v3917_v11 = vadd.f32 %v3916_v53, %v3904_v51  ;;  %v9686_v14 = vor.u32 %v11432_v2, %v9685_v0  ;;  %v9669_v51 = vld [vmem:[#allocation10 + $0x120] sm:$0xf]  ;;  %v11426_v0 = vld [vmem:[#allocation10 + $0x114] sm:$0xf0]  ;;  %v11433_v2 = vld [vmem:[#allocation10 + $0x154] sm:$0xf] }
 0x2b9   :  { %4646 = vmatpush.bf16.msra.mxu1 %v9606_v4  ;;  %4668 = vmatpush.bf16.msra.mxu3 %v9642_v45  ;;  %v9766_v4 = vor.u32 %v11452_v60, %v9765_v22  ;;  %v4183_v45 = vperm.slane %v12209_v44, 1  ;;  %v3905_v21 = vpop.f32.mrf.mxu2  ;;  %v9591_v22 = vld [vmem:[#allocation10 + $0x88] sm:$0xf0]  ;;  %v9741_v60 = vld [vmem:[#allocation10 + $0x1b0] sm:$0xf] }
 0x2ba   :  { %v4167_v17 = vmul.f32 %v4139_v62, %v3917_v11  ;;  %v9775_v62 = vld [vmem:[#allocation10 + $0x1f8] sm:$0xf0]  ;;  %v11451_v11 = vld [vmem:[#allocation10 + $0x1e4] sm:$0xf] }
 0x2bb   :  { %4635 = vmatpush.bf16.msra.mxu0 %v9526_v16  ;;  %4657 = vmatpush.bf16.msra.mxu2 %v9562_v19  ;;  %v3929_v59 = vpop.f32.mrf.mxu0  ;;  %v4210_v16 = vadd.f32 %v4182_v61, %v4166_v50  ;;  %v9610_v19 = vor.u32 %v11411_v5, %v9607_v27  ;;  %v11446_v61 = vld [vmem:[#allocation10 + $0x1b4] sm:$0xf0]  ;;  %v9733_v5 = vld [vmem:[#allocation10 + $0x1a0] sm:$0xf]  ;;  %v11444_v27 = vld [vmem:[#allocation10 + $0x1a4] sm:$0xf0] }
 0x2bc   :  { %v4211_v33 = vadd.f32 %v4183_v45, %v4167_v17  ;;  %v9767_v45 = vld [vmem:[#allocation10 + $0x1e8] sm:$0xf0]  ;;  %v9734_v21 = vor.u32 %v11444_v27, %v9733_v5  ;;  %v9837_v17 = vld [vmem:[#allocation10 + $0x270] sm:$0xf]  ;;  %v9813_v5 = vld [vmem:[#allocation10 + $0x240] sm:$0xf] }
 0x2bd   :  { %4647 = vmatpush.bf16.msra.mxu1 %v9598_v28  ;;  %4669 = vmatpush.bf16.msra.mxu3 %v9634_v29  ;;  %v9758_v28 = vor.u32 %v11450_v10, %v9757_v12  ;;  %v11437_v29 = vld [vmem:[#allocation10 + $0x174] sm:$0xf]  ;;  %v4224_v43 = vmax.f32 %v4210_v16, 0.0  ;;  %v9653_v10 = vld [vmem:[#allocation10 + $0x100] sm:$0xf] }
 0x2be   :  { %4636 = vmatmul.bf16.vlgmr.msra.gmra.mxu0 %v12207_v32  ;;  %v4225_v47 = vmax.f32 %v4211_v33, 0.0  ;;  %v9714_v25 = vor.u32 %v11437_v29, %v9711_v30  ;;  %v9687_v16 = vld [vmem:[#allocation10 + $0x148] sm:$0xf0]  ;;  %v4681_v30 = vunpack.c.l.b16 %v12141_v31 }
 0x2bf   :  { %4847 = vmatpush.bf16.msrb.mxu0 %v9710_v49  ;;  %4658 = vmatpush.bf16.msra.mxu2 %v9554_v48  ;;  %v9527_v49 = vld [vmem:[#allocation10 + $0x8] sm:$0xf0]  ;;  %v9678_v48 = vor.u32 %v11430_v24, %v9677_v20  ;;  %v3918_v55 = vpop.f32.mrf.mxu3  ;;  %v11442_v20 = vld [vmem:[#allocation10 + $0x194] sm:$0xf0]  ;;  %v11449_v24 = vld [vmem:[#allocation10 + $0x1d4] sm:$0xf] }
 0x2c0   :  { %v9530_v42 = vor.u32 %v11391_v15, %v9527_v49  ;;  %v12224_v39 = vpack.c.bf16 %v4225_v47, %v4224_v43  ;;  %v11431_v15 = vld [vmem:[#allocation10 + $0x144] sm:$0xf]  ;;  %v9725_v49 = vld [vmem:[#allocation10 + $0x190] sm:$0xf]  ;;  %v9829_v43 = vld [vmem:[#allocation10 + $0x260] sm:$0xf]  ;;  %v9682_v55 = vor.u32 %v11429_v34, %v9679_v8 }
 0x2c1   :  { %4648 = vmatpush.bf16.msra.mxu1 %v9590_v52  ;;  %4670 = vmatpush.bf16.msra.mxu3 %v9626_v36  ;;  %v11428_v52 = vld [vmem:[#allocation10 + $0x124] sm:$0xf0]  ;;  %v9690_v7 = vor.u32 %v11431_v15, %v9687_v16  ;;  %v9726_v41 = vor.u32 %v11442_v20, %v9725_v49  ;;  %v9655_v49 = vld [vmem:[#allocation10 + $0x108] sm:$0xf0]  ;;  %v9805_v20 = vld [vmem:[#allocation10 + $0x230] sm:$0xf] }
 0x2c2   :  { %v9670_v9 = vor.u32 %v11428_v52, %v9669_v51  ;;  %v11468_v47 = vld [vmem:[#allocation10 + $0x264] sm:$0xf0]  ;;  %v9751_v51 = vld [vmem:[#allocation10 + $0x1c8] sm:$0xf0]  ;;  %v11486_v52 = vld [vmem:[#allocation10 + $0x2f4] sm:$0xf0] }
 0x2c3   :  { %4848 = vmatpush.bf16.msrb.mxu0 %v9702_v38  ;;  %4659 = vmatpush.bf16.msra.mxu2 %v9546_v23  ;;  %v3942_v38 = vpop.f32.mrf.mxu1  ;;  %v3931_v35 = vpop.f32.mrf.mxu0  ;;  %v11453_v23 = vld [vmem:[#allocation10 + $0x1f4] sm:$0xf]  ;;  %v9877_v34 = vld [vmem:[#allocation10 + $0x2c0] sm:$0xf]  ;;  %v11480_v8 = vld [vmem:[#allocation10 + $0x2c4] sm:$0xf0] }
 0x2c4   :  { %4649 = vmatmul.bf16.vlgmr.msra.gmra.mxu1 %v12218_v3  ;;  %v12222_v36 = vadd.f32 %v3942_v38, %v3929_v59  ;;  %v9778_v53 = vor.u32 %v11453_v23, %v9775_v62  ;;  %v9662_v59 = vor.u32 %v11426_v0, %v9661_v1  ;;  %v11447_v38 = vld [vmem:[#allocation10 + $0x1c4] sm:$0xf]  ;;  %v4682_v23 = vunpack.c.h.b16 %v12141_v31  ;;  %v11484_v1 = vld [vmem:[#allocation10 + $0x2e4] sm:$0xf0] }
 0x2c5   :  { %4860 = vmatpush.bf16.msrb.mxu1 %v9774_v40  ;;  %4671 = vmatpush.bf16.msra.mxu3 %v9618_v63  ;;  %v9703_v40 = vld [vmem:[#allocation10 + $0x168] sm:$0xf0]  ;;  %v9742_v63 = vor.u32 %v11446_v61, %v9741_v60  ;;  %v9754_v35 = vor.u32 %v11447_v38, %v9751_v51  ;;  %v9821_v61 = vld [vmem:[#allocation10 + $0x250] sm:$0xf] }
 0x2c6   :  { %v9706_v50 = vor.u32 %v11435_v57, %v9703_v40  ;;  %v9830_v57 = vor.u32 %v11468_v47, %v9829_v43  ;;  %v9671_v60 = vld [vmem:[#allocation10 + $0x128] sm:$0xf0]  ;;  %v12234_v27 = vpack.c.b16 %v4682_v23, %v4682_v23 }
 0x2c7   :  { %4849 = vmatpush.bf16.msrb.mxu0 %v9694_v37  ;;  %4660 = vmatpush.bf16.msra.mxu2 %v9538_v13  ;;  %v9594_v37 = vor.u32 %v11407_v58, %v9591_v22  ;;  %v11427_v22 = vld [vmem:[#allocation10 + $0x124] sm:$0xf] }
 0x2c8   :  { %v9674_v0 = vor.u32 %v11427_v22, %v9671_v60  ;;  %v11478_v22 = vld [vmem:[#allocation10 + $0x2b4] sm:$0xf0]  ;;  %v11485_v60 = vld [vmem:[#allocation10 + $0x2f4] sm:$0xf] }
 0x2c9   :  { %4861 = vmatpush.bf16.msrb.mxu1 %v9766_v4  ;;  %4672 = vmatpush.bf16.msra.mxu3 %v9610_v19  ;;  %v9695_v4 = vld [vmem:[#allocation10 + $0x158] sm:$0xf0]  ;;  %v11470_v19 = vld [vmem:[#allocation10 + $0x274] sm:$0xf0] }
 0x2ca   :  { %v9698_v13 = vor.u32 %v11433_v2, %v9695_v4  ;;  %v9838_v33 = vor.u32 %v11470_v19, %v9837_v17  ;;  %v9663_v4 = vld [vmem:[#allocation10 + $0x118] sm:$0xf0] }
 0x2cb   :  { %4850 = vmatpush.bf16.msrb.mxu0 %v9686_v14  ;;  %4661 = vmatpush.bf16.msra.mxu2 %v9530_v42  ;;  %v3944_v12 = vpop.f32.mrf.mxu1  ;;  %v11424_v14 = vld [vmem:[#allocation10 + $0x104] sm:$0xf0] }
 0x2cc   :  { %v9654_v29 = vor.u32 %v11424_v14, %v9653_v10  ;;  %v9735_v12 = vld [vmem:[#allocation10 + $0x1a8] sm:$0xf0]  ;;  %v11482_v14 = vld [vmem:[#allocation10 + $0x2d4] sm:$0xf0] }
 0x2cd   :  { %4862 = vmatpush.bf16.msrb.mxu1 %v9758_v28  ;;  %4673 = vmatpush.bf16.msra.mxu3 %v9602_v26  ;;  %v9759_v28 = vld [vmem:[#allocation10 + $0x1d8] sm:$0xf0]  ;;  %v12229_v26 = vpack.c.b16 %v4681_v30, %v4681_v30 }
 0x2ce   :  { %4662 = vmatmul.bf16.vlgmr.msra.gmra.mxu2 %v12207_v32  ;;  %v9770_v32 = vor.u32 %v11451_v11, %v9767_v45  ;;  %v9762_v42 = vor.u32 %v11449_v24, %v9759_v28  ;;  %v11464_v45 = vld [vmem:[#allocation10 + $0x244] sm:$0xf0]  ;;  %v11462_v24 = vld [vmem:[#allocation10 + $0x234] sm:$0xf0]  ;;  %v9839_v30 = vld [vmem:[#allocation10 + $0x278] sm:$0xf0] }
 0x2cf   :  { %4851 = vmatpush.bf16.msrb.mxu0 %v9678_v48  ;;  %4873 = vmatpush.bf16.msrb.mxu2 %v9714_v25  ;;  %v9717_v48 = vld [vmem:[#allocation10 + $0x180] sm:$0xf]  ;;  %v11440_v25 = vld [vmem:[#allocation10 + $0x184] sm:$0xf0]  ;;  %v9814_v17 = vor.u32 %v11464_v45, %v9813_v5  ;;  %v9895_v5 = vld [vmem:[#allocation10 + $0x2e8] sm:$0xf0] }
 0x2d0   :  { %v9718_v58 = vor.u32 %v11440_v25, %v9717_v48  ;;  %v9797_v48 = vld [vmem:[#allocation10 + $0x220] sm:$0xf]  ;;  %v11460_v25 = vld [vmem:[#allocation10 + $0x224] sm:$0xf0] }
 0x2d1   :  { %4863 = vmatpush.bf16.msrb.mxu1 %v9750_v56  ;;  %4674 = vmatpush.bf16.msra.mxu3 %v9594_v37  ;;  %v3955_v56 = vpop.f32.mrf.mxu2  ;;  %v9743_v37 = vld [vmem:[#allocation10 + $0x1b8] sm:$0xf0]  ;;  %v9798_v23 = vor.u32 %v11460_v25, %v9797_v48  ;;  %v9781_v45 = vld [vmem:[#allocation10 + $0x200] sm:$0xf]  ;;  %v9879_v48 = vld [vmem:[#allocation10 + $0x2c8] sm:$0xf0] }
 0x2d2   :  { %v3956_v40 = vadd.f32 %v3955_v56, %v12222_v36  ;;  %v9831_v56 = vld [vmem:[#allocation10 + $0x268] sm:$0xf0]  ;;  %v11518_v25 = vld [vmem:[#allocation10 + $0x3f4] sm:$0xf0] }
 0x2d3   :  { %4852 = vmatpush.bf16.msrb.mxu0 %v9670_v9  ;;  %4874 = vmatpush.bf16.msrb.mxu2 %v9706_v50  ;;  %v11466_v9 = vld [vmem:[#allocation10 + $0x254] sm:$0xf0]  ;;  %v11445_v50 = vld [vmem:[#allocation10 + $0x1b4] sm:$0xf] }
 0x2d4   :  { %4675 = vmatmul.bf16.vlgmr.msra.gmra.mxu3 %v12218_v3  ;;  %v9901_v3 = vld [vmem:[#allocation10 + $0x2f0] sm:$0xf]  ;;  %v9822_v36 = vor.u32 %v11466_v9, %v9821_v61  ;;  %v9746_v2 = vor.u32 %v11445_v50, %v9743_v37  ;;  %v9903_v61 = vld [vmem:[#allocation10 + $0x2f8] sm:$0xf0] }
 0x2d5   :  { %4864 = vmatpush.bf16.msrb.mxu1 %v9742_v63  ;;  %4886 = vmatpush.bf16.msrb.mxu3 %v9778_v53  ;;  %v9902_v62 = vor.u32 %v11486_v52, %v9901_v3  ;;  %v9893_v63 = vld [vmem:[#allocation10 + $0x2e0] sm:$0xf]  ;;  %v11425_v53 = vld [vmem:[#allocation10 + $0x114] sm:$0xf]  ;;  %v9878_v52 = vor.u32 %v11480_v8, %v9877_v34  ;;  %v9789_v37 = vld [vmem:[#allocation10 + $0x210] sm:$0xf] }
 0x2d6   :  { %v9894_v11 = vor.u32 %v11484_v1, %v9893_v63  ;;  %v9666_v15 = vor.u32 %v11425_v53, %v9663_v4  ;;  %v11458_v63 = vld [vmem:[#allocation10 + $0x214] sm:$0xf0]  ;;  %v11465_v1 = vld [vmem:[#allocation10 + $0x254] sm:$0xf]  ;;  %v11476_v53 = vld [vmem:[#allocation10 + $0x2a4] sm:$0xf0] }
 0x2d7   :  { %4853 = vmatpush.bf16.msrb.mxu0 %v9662_v59  ;;  %4875 = vmatpush.bf16.msrb.mxu2 %v9698_v13  ;;  %v3968_v31 = vpop.f32.mrf.mxu3  ;;  %v11443_v59 = vld [vmem:[#allocation10 + $0x1a4] sm:$0xf]  ;;  %v9957_v8 = vld [vmem:[#allocation10 + $0x360] sm:$0xf] }
 0x2d8   :  { %v12236_v10 = vadd.f32 %v3968_v31, %v3956_v40  ;;  %v9738_v19 = vor.u32 %v11443_v59, %v9735_v12  ;;  %v11483_v4 = vld [vmem:[#allocation10 + $0x2e4] sm:$0xf]  ;;  %v9790_v31 = vor.u32 %v11458_v63, %v9789_v37  ;;  %v10021_v37 = vld [vmem:[#allocation10 + $0x3e0] sm:$0xf]  ;;  %v11516_v63 = vld [vmem:[#allocation10 + $0x3e4] sm:$0xf0] }
 0x2d9   :  { %4865 = vmatpush.bf16.msrb.mxu1 %v9734_v21  ;;  %4887 = vmatpush.bf16.msrb.mxu3 %v9770_v32  ;;  %v9885_v21 = vld [vmem:[#allocation10 + $0x2d0] sm:$0xf]  ;;  %v3957_v16 = vpop.f32.mrf.mxu2  ;;  %v11423_v32 = vld [vmem:[#allocation10 + $0x104] sm:$0xf] }
 0x2da   :  { %v9886_v28 = vor.u32 %v11482_v14, %v9885_v21  ;;  %v11463_v21 = vld [vmem:[#allocation10 + $0x244] sm:$0xf]  ;;  %v9815_v14 = vld [vmem:[#allocation10 + $0x248] sm:$0xf0]  ;;  %v11502_v16 = vld [vmem:[#allocation10 + $0x374] sm:$0xf0] }
 0x2db   :  { %4854 = vmatpush.bf16.msrb.mxu0 %v9654_v29  ;;  %4876 = vmatpush.bf16.msrb.mxu2 %v9690_v7  ;;  %v3981_v13 = vpop.f32.mrf.mxu0  ;;  %v11469_v29 = vld [vmem:[#allocation10 + $0x274] sm:$0xf] }
 0x2dc   :  { %v11441_v7 = vld [vmem:[#allocation10 + $0x194] sm:$0xf]  ;;  %v9842_v43 = vor.u32 %v11469_v29, %v9839_v30 }
 0x2dd   :  { %4866 = vmatpush.bf16.msrb.mxu1 %v9726_v41  ;;  %4888 = vmatpush.bf16.msrb.mxu3 %v9762_v42  ;;  %v9658_v41 = vor.u32 %v11423_v32, %v9655_v49  ;;  %v9806_v42 = vor.u32 %v11462_v24, %v9805_v20  ;;  %v9853_v32 = vld [vmem:[#allocation10 + $0x290] sm:$0xf]  ;;  %v9887_v49 = vld [vmem:[#allocation10 + $0x2d8] sm:$0xf0]  ;;  %v4900_v24 = vunpack.c.l.b16 %v12168_v46  ;;  %v11461_v30 = vld [vmem:[#allocation10 + $0x234] sm:$0xf] }
 0x2de   :  { %4855 = vmatmul.bf16.vlgmr.msrb.gmra.mxu0 %v12229_v26 }
 0x2df   :  { %5066 = vmatpush.bf16.msra.mxu0 %v9838_v33  ;;  %4877 = vmatpush.bf16.msrb.mxu2 %v9682_v55  ;;  %v9727_v33 = vld [vmem:[#allocation10 + $0x198] sm:$0xf0]  ;;  %v3970_v3 = vpop.f32.mrf.mxu3  ;;  %v11467_v55 = vld [vmem:[#allocation10 + $0x264] sm:$0xf] }
 0x2e0   :  { %v9730_v51 = vor.u32 %v11441_v7, %v9727_v33  ;;  %v9807_v7 = vld [vmem:[#allocation10 + $0x238] sm:$0xf0]  ;;  %v4140_v3 = vperm.slane %v12205_v18, 2 }
 0x2e1   :  { %4867 = vmatpush.bf16.msrb.mxu1 %v9718_v58  ;;  %4889 = vmatpush.bf16.msrb.mxu3 %v9754_v35  ;;  %v3994_v47 = vpop.f32.mrf.mxu1  ;;  %v9719_v58 = vld [vmem:[#allocation10 + $0x188] sm:$0xf0]  ;;  %v9869_v35 = vld [vmem:[#allocation10 + $0x2b0] sm:$0xf] }
 0x2e2   :  { %v12239_v38 = vadd.f32 %v3994_v47, %v3981_v13  ;;  %v9870_v50 = vor.u32 %v11478_v22, %v9869_v35  ;;  %v11456_v13 = vld [vmem:[#allocation10 + $0x204] sm:$0xf0]  ;;  %v11479_v47 = vld [vmem:[#allocation10 + $0x2c4] sm:$0xf]  ;;  %v9799_v22 = vld [vmem:[#allocation10 + $0x228] sm:$0xf0] }
 0x2e3   :  { %5067 = vmatpush.bf16.msra.mxu0 %v9830_v57  ;;  %4878 = vmatpush.bf16.msrb.mxu2 %v9674_v0  ;;  %v11439_v57 = vld [vmem:[#allocation10 + $0x184] sm:$0xf]  ;;  %v3983_v40 = vpop.f32.mrf.mxu0  ;;  %v9906_v0 = vor.u32 %v11485_v60, %v9903_v61  ;;  %v9782_v20 = vor.u32 %v11456_v13, %v9781_v45  ;;  %v9949_v60 = vld [vmem:[#allocation10 + $0x350] sm:$0xf]  ;;  %v4901_v61 = vunpack.c.h.b16 %v12168_v46  ;;  %v9863_v13 = vld [vmem:[#allocation10 + $0x2a8] sm:$0xf0] }
 0x2e4   :  { %4868 = vmatmul.bf16.vlgmr.msrb.gmra.mxu1 %v12234_v27  ;;  %v9722_v9 = vor.u32 %v11439_v57, %v9719_v58  ;;  %v9882_v58 = vor.u32 %v11479_v47, %v9879_v48  ;;  %v11459_v35 = vld [vmem:[#allocation10 + $0x224] sm:$0xf] }
 0x2e5   :  { %5079 = vmatpush.bf16.msra.mxu1 %v9902_v62  ;;  %4890 = vmatpush.bf16.msrb.mxu3 %v9746_v2  ;;  %v9834_v62 = vor.u32 %v11467_v55, %v9831_v56  ;;  %v9861_v2 = vld [vmem:[#allocation10 + $0x2a0] sm:$0xf] }
 0x2e6   :  { %v9862_v12 = vor.u32 %v11476_v53, %v9861_v2  ;;  %v4168_v2 = vmul.f32 %v4140_v3, %v12236_v10  ;;  %v11514_v10 = vld [vmem:[#allocation10 + $0x3d4] sm:$0xf0] }
 0x2e7   :  { %5068 = vmatpush.bf16.msra.mxu0 %v9822_v36  ;;  %4879 = vmatpush.bf16.msrb.mxu2 %v9666_v15  ;;  %v9823_v36 = vld [vmem:[#allocation10 + $0x258] sm:$0xf0]  ;;  %v9965_v15 = vld [vmem:[#allocation10 + $0x370] sm:$0xf] }
 0x2e8   :  { %v9826_v59 = vor.u32 %v11465_v1, %v9823_v36  ;;  %v9966_v29 = vor.u32 %v11502_v16, %v9965_v15  ;;  %v4184_v1 = vperm.slane %v12209_v44, 2  ;;  %v11457_v36 = vld [vmem:[#allocation10 + $0x214] sm:$0xf] }
 0x2e9   :  { %5080 = vmatpush.bf16.msra.mxu1 %v9894_v11  ;;  %4891 = vmatpush.bf16.msrb.mxu3 %v9738_v19  ;;  %v3996_v11 = vpop.f32.mrf.mxu1  ;;  %v11481_v19 = vld [vmem:[#allocation10 + $0x2d4] sm:$0xf] }
 0x2ea   :  { %v9890_v34 = vor.u32 %v11481_v19, %v9887_v49  ;;  %v12253_v11 = vpack.c.b16 %v4901_v61, %v4901_v61  ;;  %v4212_v19 = vadd.f32 %v4184_v1, %v4168_v2  ;;  %v9917_v2 = vld [vmem:[#allocation10 + $0x310] sm:$0xf] }
 0x2eb   :  { %5069 = vmatpush.bf16.msra.mxu0 %v9814_v17  ;;  %4880 = vmatpush.bf16.msrb.mxu2 %v9658_v41  ;;  %v11474_v17 = vld [vmem:[#allocation10 + $0x294] sm:$0xf0]  ;;  %v11500_v41 = vld [vmem:[#allocation10 + $0x364] sm:$0xf0] }
 0x2ec   :  { %v9854_v33 = vor.u32 %v11474_v17, %v9853_v32  ;;  %v9958_v56 = vor.u32 %v11500_v41, %v9957_v8  ;;  %v11455_v17 = vld [vmem:[#allocation10 + $0x204] sm:$0xf]  ;;  %v9855_v8 = vld [vmem:[#allocation10 + $0x298] sm:$0xf0]  ;;  %v10005_v41 = vld [vmem:[#allocation10 + $0x3c0] sm:$0xf] }
 0x2ed   :  { %5081 = vmatpush.bf16.msra.mxu1 %v9886_v28  ;;  %4892 = vmatpush.bf16.msrb.mxu3 %v9730_v51  ;;  %v9818_v28 = vor.u32 %v11463_v21, %v9815_v14  ;;  %v12244_v51 = vpack.c.b16 %v4900_v24, %v4900_v24  ;;  %v9783_v24 = vld [vmem:[#allocation10 + $0x208] sm:$0xf0]  ;;  %v4226_v47 = vmax.f32 %v4212_v19, 0.0  ;;  %v9981_v19 = vld [vmem:[#allocation10 + $0x390] sm:$0xf] }
 0x2ee   :  { %4881 = vmatmul.bf16.vlgmr.msrb.gmra.mxu2 %v12229_v26  ;;  %v9898_v26 = vor.u32 %v11483_v4, %v9895_v5  ;;  %v9791_v4 = vld [vmem:[#allocation10 + $0x218] sm:$0xf0]  ;;  %v9941_v5 = vld [vmem:[#allocation10 + $0x340] sm:$0xf] }
 0x2ef   :  { %5070 = vmatpush.bf16.msra.mxu0 %v9806_v42  ;;  %5092 = vmatpush.bf16.msra.mxu2 %v9842_v43  ;;  %v9845_v42 = vld [vmem:[#allocation10 + $0x280] sm:$0xf]  ;;  %v11472_v43 = vld [vmem:[#allocation10 + $0x284] sm:$0xf0]  ;;  %v9794_v15 = vor.u32 %v11457_v36, %v9791_v4 }
 0x2f0   :  { %v9846_v40 = vor.u32 %v11472_v43, %v9845_v42  ;;  %v11512_v42 = vld [vmem:[#allocation10 + $0x3c4] sm:$0xf0]  ;;  %v9786_v43 = vor.u32 %v11455_v17, %v9783_v24  ;;  %v11534_v17 = vld [vmem:[#allocation10 + $0x474] sm:$0xf0]  ;;  %v10015_v24 = vld [vmem:[#allocation10 + $0x3d8] sm:$0xf0] }
 0x2f1   :  { %5082 = vmatpush.bf16.msra.mxu1 %v9878_v52  ;;  %4893 = vmatpush.bf16.msrb.mxu3 %v9722_v9  ;;  %v9810_v52 = vor.u32 %v11461_v30, %v9807_v7  ;;  %v4007_v55 = vpop.f32.mrf.mxu2  ;;  %v11477_v9 = vld [vmem:[#allocation10 + $0x2b4] sm:$0xf]  ;;  %v9967_v7 = vld [vmem:[#allocation10 + $0x378] sm:$0xf0] }
 0x2f2   :  { %v4008_v57 = vadd.f32 %v4007_v55, %v12239_v38  ;;  %v9802_v38 = vor.u32 %v11459_v35, %v9799_v22  ;;  %v11501_v30 = vld [vmem:[#allocation10 + $0x374] sm:$0xf]  ;;  %v11492_v55 = vld [vmem:[#allocation10 + $0x324] sm:$0xf0]  ;;  %v11499_v35 = vld [vmem:[#allocation10 + $0x364] sm:$0xf] }
 0x2f3   :  { %5071 = vmatpush.bf16.msra.mxu0 %v9798_v23  ;;  %5093 = vmatpush.bf16.msra.mxu2 %v9834_v62  ;;  %v11498_v62 = vld [vmem:[#allocation10 + $0x354] sm:$0xf0]  ;;  %v9959_v22 = vld [vmem:[#allocation10 + $0x368] sm:$0xf0] }
 0x2f4   :  { %4894 = vmatmul.bf16.vlgmr.msrb.gmra.mxu3 %v12234_v27  ;;  %v10029_v27 = vld [vmem:[#allocation10 + $0x3f0] sm:$0xf]  ;;  %v9950_v46 = vor.u32 %v11498_v62, %v9949_v60  ;;  %v11471_v60 = vld [vmem:[#allocation10 + $0x284] sm:$0xf]  ;;  %v9847_v62 = vld [vmem:[#allocation10 + $0x288] sm:$0xf0] }
 0x2f5   :  { %5083 = vmatpush.bf16.msra.mxu1 %v9870_v50  ;;  %5105 = vmatpush.bf16.msra.mxu3 %v9906_v0  ;;  %v10030_v23 = vor.u32 %v11518_v25, %v10029_v27  ;;  %v9871_v50 = vld [vmem:[#allocation10 + $0x2b8] sm:$0xf0]  ;;  %v4141_v0 = vperm.slane %v12205_v18, 3  ;;  %v4185_v18 = vperm.slane %v12209_v44, 3  ;;  %v9970_v25 = vor.u32 %v11501_v30, %v9967_v7  ;;  %v11493_v7 = vld [vmem:[#allocation10 + $0x334] sm:$0xf] }
 0x2f6   :  { %v9874_v53 = vor.u32 %v11477_v9, %v9871_v50  ;;  %v9997_v9 = vld [vmem:[#allocation10 + $0x3b0] sm:$0xf]  ;;  %v11510_v50 = vld [vmem:[#allocation10 + $0x3b4] sm:$0xf0] }
 0x2f7   :  { %5072 = vmatpush.bf16.msra.mxu0 %v9790_v31  ;;  %5094 = vmatpush.bf16.msra.mxu2 %v9826_v59  ;;  %v11496_v31 = vld [vmem:[#allocation10 + $0x344] sm:$0xf0]  ;;  %v4020_v45 = vpop.f32.mrf.mxu3  ;;  %v10022_v59 = vor.u32 %v11516_v63, %v10021_v37  ;;  %v11517_v37 = vld [vmem:[#allocation10 + $0x3f4] sm:$0xf]  ;;  %v10031_v63 = vld [vmem:[#allocation10 + $0x3f8] sm:$0xf0]  ;;  %v9998_v36 = vor.u32 %v11510_v50, %v9997_v9 }
 0x2f8   :  { %v4021_v21 = vadd.f32 %v4020_v45, %v4008_v57  ;;  %v9942_v32 = vor.u32 %v11496_v31, %v9941_v5  ;;  %v10034_v4 = vor.u32 %v11517_v37, %v10031_v63  ;;  %v9951_v5 = vld [vmem:[#allocation10 + $0x358] sm:$0xf0]  ;;  %v9989_v31 = vld [vmem:[#allocation10 + $0x3a0] sm:$0xf]  ;;  %v11508_v45 = vld [vmem:[#allocation10 + $0x3a4] sm:$0xf0] }
 0x2f9   :  { %5084 = vmatpush.bf16.msra.mxu1 %v9862_v12  ;;  %5106 = vmatpush.bf16.msra.mxu3 %v9898_v26  ;;  %v11475_v12 = vld [vmem:[#allocation10 + $0x2a4] sm:$0xf]  ;;  %v10013_v26 = vld [vmem:[#allocation10 + $0x3d0] sm:$0xf]  ;;  %v4009_v16 = vpop.f32.mrf.mxu2  ;;  %v11530_v50 = vld [vmem:[#allocation10 + $0x454] sm:$0xf0] }
 0x2fa   :  { %v4169_v49 = vmul.f32 %v4141_v0, %v4021_v21  ;;  %v10014_v44 = vor.u32 %v11514_v10, %v10013_v26  ;;  %v9850_v0 = vor.u32 %v11471_v60, %v9847_v62  ;;  %v9990_v26 = vor.u32 %v11508_v45, %v9989_v31  ;;  %v11488_v10 = vld [vmem:[#allocation10 + $0x304] sm:$0xf0]  ;;  %v9943_v16 = vld [vmem:[#allocation10 + $0x348] sm:$0xf0]  ;;  %v11509_v37 = vld [vmem:[#allocation10 + $0x3b4] sm:$0xf] }
 0x2fb   :  { %5073 = vmatpush.bf16.msra.mxu0 %v9782_v20  ;;  %5095 = vmatpush.bf16.msra.mxu2 %v9818_v28  ;;  %v4033_v14 = vpop.f32.mrf.mxu0  ;;  %v9866_v20 = vor.u32 %v11475_v12, %v9863_v13  ;;  %v9933_v28 = vld [vmem:[#allocation10 + $0x330] sm:$0xf]  ;;  %v10023_v12 = vld [vmem:[#allocation10 + $0x3e8] sm:$0xf0]  ;;  %v5120_v62 = vunpack.c.h.b16 %v12191_v54  ;;  %v9999_v63 = vld [vmem:[#allocation10 + $0x3b8] sm:$0xf0] }
 0x2fc   :  { %v9927_v60 = vld [vmem:[#allocation10 + $0x328] sm:$0xf0]  ;;  %v11528_v31 = vld [vmem:[#allocation10 + $0x444] sm:$0xf0]  ;;  %v11507_v45 = vld [vmem:[#allocation10 + $0x3a4] sm:$0xf] }
 0x2fd   :  { %5085 = vmatpush.bf16.msra.mxu1 %v9854_v33  ;;  %5107 = vmatpush.bf16.msra.mxu3 %v9890_v34  ;;  %v11473_v33 = vld [vmem:[#allocation10 + $0x294] sm:$0xf]  ;;  %v4213_v34 = vadd.f32 %v4185_v18, %v4169_v49  ;;  %v9909_v18 = vld [vmem:[#allocation10 + $0x300] sm:$0xf]  ;;  %v11506_v49 = vld [vmem:[#allocation10 + $0x394] sm:$0xf0] }
 0x2fe   :  { %5074 = vmatmul.bf16.vlgmr.msra.gmra.mxu0 %v12244_v51  ;;  %v9858_v57 = vor.u32 %v11473_v33, %v9855_v8  ;;  %v9935_v33 = vld [vmem:[#allocation10 + $0x338] sm:$0xf0] }
 0x2ff   :  { %5285 = vmatpush.bf16.msrb.mxu0 %v9966_v29  ;;  %5096 = vmatpush.bf16.msra.mxu2 %v9810_v52  ;;  %v11494_v29 = vld [vmem:[#allocation10 + $0x334] sm:$0xf0]  ;;  %v4227_v48 = vmax.f32 %v4213_v34, 0.0  ;;  %v9925_v52 = vld [vmem:[#allocation10 + $0x320] sm:$0xf]  ;;  %v9982_v34 = vor.u32 %v11506_v49, %v9981_v19 }
 0x300   :  { %v9934_v27 = vor.u32 %v11494_v29, %v9933_v28  ;;  %v9926_v1 = vor.u32 %v11492_v55, %v9925_v52  ;;  %v9910_v28 = vor.u32 %v11488_v10, %v9909_v18  ;;  %v5119_v29 = vunpack.c.l.b16 %v12191_v54  ;;  %v11546_v18 = vld [vmem:[#allocation10 + $0x4d4] sm:$0xf0]  ;;  %v11487_v10 = vld [vmem:[#allocation10 + $0x304] sm:$0xf]  ;;  %v11533_v49 = vld [vmem:[#allocation10 + $0x474] sm:$0xf] }
 0x301   :  { %5086 = vmatpush.bf16.msra.mxu1 %v9846_v40  ;;  %5108 = vmatpush.bf16.msra.mxu3 %v9882_v58  ;;  %v4046_v3 = vpop.f32.mrf.mxu1  ;;  %v4022_v40 = vpop.f32.mrf.mxu3  ;;  %v10006_v58 = vor.u32 %v11512_v42, %v10005_v41  ;;  %v12259_v61 = vpack.c.bf16 %v4227_v48, %v4226_v47  ;;  %v10085_v41 = vld [vmem:[#allocation10 + $0x460] sm:$0xf]  ;;  %v11532_v42 = vld [vmem:[#allocation10 + $0x464] sm:$0xf0]  ;;  %v11511_v48 = vld [vmem:[#allocation10 + $0x3c4] sm:$0xf]  ;;  %v9938_v52 = vor.u32 %v11493_v7, %v9935_v33 }
 0x302   :  { %v11504_v47 = vld [vmem:[#allocation10 + $0x384] sm:$0xf0] }
 0x303   :  { %5286 = vmatpush.bf16.msrb.mxu0 %v9958_v56  ;;  %5097 = vmatpush.bf16.msra.mxu2 %v9802_v38  ;;  %v12257_v56 = vadd.f32 %v4046_v3, %v4033_v14  ;;  %v9962_v38 = vor.u32 %v11499_v35, %v9959_v22  ;;  %v12264_v3 = vpack.c.b16 %v5119_v29, %v5119_v29  ;;  %v11491_v22 = vld [vmem:[#allocation10 + $0x324] sm:$0xf]  ;;  %v10133_v29 = vld [vmem:[#allocation10 + $0x4c0] sm:$0xf] }
 0x304   :  { %5087 = vmatmul.bf16.vlgmr.msra.gmra.mxu1 %v12253_v11 }
 0x305   :  { %5298 = vmatpush.bf16.msrb.mxu1 %v10030_v23  ;;  %5109 = vmatpush.bf16.msra.mxu3 %v9874_v53  ;;  %v4035_v23 = vpop.f32.mrf.mxu0  ;;  %v11497_v53 = vld [vmem:[#allocation10 + $0x354] sm:$0xf] }
 0x306   :  { %v9954_v14 = vor.u32 %v11497_v53, %v9951_v5  ;;  %v10077_v23 = vld [vmem:[#allocation10 + $0x450] sm:$0xf]  ;;  %v10069_v53 = vld [vmem:[#allocation10 + $0x440] sm:$0xf] }
 0x307   :  { %5287 = vmatpush.bf16.msrb.mxu0 %v9950_v46  ;;  %5098 = vmatpush.bf16.msra.mxu2 %v9794_v15  ;;  %v11490_v46 = vld [vmem:[#allocation10 + $0x314] sm:$0xf0]  ;;  %v11495_v15 = vld [vmem:[#allocation10 + $0x344] sm:$0xf] }
 0x308   :  { %v9918_v13 = vor.u32 %v11490_v46, %v9917_v2  ;;  %v11489_v2 = vld [vmem:[#allocation10 + $0x314] sm:$0xf]  ;;  %v9919_v46 = vld [vmem:[#allocation10 + $0x318] sm:$0xf0] }
 0x309   :  { %5299 = vmatpush.bf16.msrb.mxu1 %v10022_v59  ;;  %5110 = vmatpush.bf16.msra.mxu3 %v9866_v20  ;;  %v11515_v59 = vld [vmem:[#allocation10 + $0x3e4] sm:$0xf]  ;;  %v4048_v21 = vpop.f32.mrf.mxu1  ;;  %v11513_v20 = vld [vmem:[#allocation10 + $0x3d4] sm:$0xf] }
 0x30a   :  { %v10018_v8 = vor.u32 %v11513_v20, %v10015_v24  ;;  %v10141_v21 = vld [vmem:[#allocation10 + $0x4d0] sm:$0xf]  ;;  %v10095_v20 = vld [vmem:[#allocation10 + $0x478] sm:$0xf0]  ;;  %v11505_v24 = vld [vmem:[#allocation10 + $0x394] sm:$0xf] }
 0x30b   :  { %5288 = vmatpush.bf16.msrb.mxu0 %v9942_v32  ;;  %5099 = vmatpush.bf16.msra.mxu2 %v9786_v43  ;;  %v10093_v32 = vld [vmem:[#allocation10 + $0x470] sm:$0xf]  ;;  %v9973_v43 = vld [vmem:[#allocation10 + $0x380] sm:$0xf]  ;;  %v10142_v19 = vor.u32 %v11546_v18, %v10141_v21  ;;  %v10098_v33 = vor.u32 %v11533_v49, %v10095_v20  ;;  %v11566_v21 = vld [vmem:[#allocation10 + $0x574] sm:$0xf0] }
 0x30c   :  { %v10094_v30 = vor.u32 %v11534_v17, %v10093_v32  ;;  %v10061_v32 = vld [vmem:[#allocation10 + $0x430] sm:$0xf]  ;;  %v11526_v17 = vld [vmem:[#allocation10 + $0x434] sm:$0xf0] }
 0x30d   :  { %5300 = vmatpush.bf16.msrb.mxu1 %v10014_v44  ;;  %5111 = vmatpush.bf16.msra.mxu3 %v9858_v57  ;;  %v9946_v44 = vor.u32 %v11495_v15, %v9943_v16  ;;  %v10086_v57 = vor.u32 %v11532_v42, %v10085_v41  ;;  %v10070_v15 = vor.u32 %v11528_v31, %v10069_v53  ;;  %v11524_v41 = vld [vmem:[#allocation10 + $0x424] sm:$0xf0]  ;;  %v11527_v31 = vld [vmem:[#allocation10 + $0x444] sm:$0xf]  ;;  %v10109_v18 = vld [vmem:[#allocation10 + $0x490] sm:$0xf] }
 0x30e   :  { %5100 = vmatmul.bf16.vlgmr.msra.gmra.mxu2 %v12244_v51  ;;  %v10026_v51 = vor.u32 %v11515_v59, %v10023_v12  ;;  %v9991_v59 = vld [vmem:[#allocation10 + $0x3a8] sm:$0xf0]  ;;  %v10062_v7 = vor.u32 %v11526_v17, %v10061_v32  ;;  %v11525_v17 = vld [vmem:[#allocation10 + $0x434] sm:$0xf] }
 0x30f   :  { %5289 = vmatpush.bf16.msrb.mxu0 %v9934_v27  ;;  %5311 = vmatpush.bf16.msrb.mxu2 %v9970_v25  ;;  %v10007_v27 = vld [vmem:[#allocation10 + $0x3c8] sm:$0xf0]  ;;  %v11550_v25 = vld [vmem:[#allocation10 + $0x4f4] sm:$0xf0]  ;;  %v9994_v16 = vor.u32 %v11507_v45, %v9991_v59  ;;  %v10221_v59 = vld [vmem:[#allocation10 + $0x570] sm:$0xf] }
 0x310   :  { %v10010_v35 = vor.u32 %v11511_v48, %v10007_v27  ;;  %v11531_v48 = vld [vmem:[#allocation10 + $0x464] sm:$0xf]  ;;  %v10087_v27 = vld [vmem:[#allocation10 + $0x468] sm:$0xf0]  ;;  %v10222_v32 = vor.u32 %v11566_v21, %v10221_v59  ;;  %v10269_v59 = vld [vmem:[#allocation10 + $0x5d0] sm:$0xf] }
 0x311   :  { %5301 = vmatpush.bf16.msrb.mxu1 %v10006_v58  ;;  %5112 = vmatpush.bf16.msra.mxu3 %v9850_v0  ;;  %v4059_v55 = vpop.f32.mrf.mxu2  ;;  %v9974_v58 = vor.u32 %v11504_v47, %v9973_v43  ;;  %v9930_v0 = vor.u32 %v11491_v22, %v9927_v60  ;;  %v10090_v22 = vor.u32 %v11531_v48, %v10087_v27  ;;  %v10071_v45 = vld [vmem:[#allocation10 + $0x448] sm:$0xf0]  ;;  %v11523_v27 = vld [vmem:[#allocation10 + $0x424] sm:$0xf]  ;;  %v11578_v21 = vld [vmem:[#allocation10 + $0x5d4] sm:$0xf0] }
 0x312   :  { %v4060_v40 = vadd.f32 %v4059_v55, %v12257_v56  ;;  %v10078_v56 = vor.u32 %v11530_v50, %v10077_v23  ;;  %v10125_v55 = vld [vmem:[#allocation10 + $0x4b0] sm:$0xf]  ;;  %v11529_v50 = vld [vmem:[#allocation10 + $0x454] sm:$0xf] }
 0x313   :  { %5290 = vmatpush.bf16.msrb.mxu0 %v9926_v1  ;;  %5312 = vmatpush.bf16.msrb.mxu2 %v9962_v38  ;;  %v10149_v1 = vld [vmem:[#allocation10 + $0x4e0] sm:$0xf]  ;;  %v11548_v38 = vld [vmem:[#allocation10 + $0x4e4] sm:$0xf0] }
 0x314   :  { %5113 = vmatmul.bf16.vlgmr.msra.gmra.mxu3 %v12253_v11  ;;  %v10157_v11 = vld [vmem:[#allocation10 + $0x4f0] sm:$0xf]  ;;  %v10150_v5 = vor.u32 %v11548_v38, %v10149_v1  ;;  %v10117_v1 = vld [vmem:[#allocation10 + $0x4a0] sm:$0xf]  ;;  %v11540_v38 = vld [vmem:[#allocation10 + $0x4a4] sm:$0xf0] }
 0x315   :  { %5302 = vmatpush.bf16.msrb.mxu1 %v9998_v36  ;;  %5324 = vmatpush.bf16.msrb.mxu3 %v10034_v4  ;;  %v10158_v9 = vor.u32 %v11550_v25, %v10157_v11  ;;  %v10002_v36 = vor.u32 %v11509_v37, %v9999_v63  ;;  %v12269_v4 = vpack.c.b16 %v5120_v62, %v5120_v62  ;;  %v11503_v11 = vld [vmem:[#allocation10 + $0x384] sm:$0xf]  ;;  %v10045_v62 = vld [vmem:[#allocation10 + $0x410] sm:$0xf]  ;;  %v10079_v63 = vld [vmem:[#allocation10 + $0x458] sm:$0xf0] }
 0x316   :  { %v10082_v53 = vor.u32 %v11529_v50, %v10079_v63 }
 0x317   :  { %5291 = vmatpush.bf16.msrb.mxu0 %v9918_v13  ;;  %5313 = vmatpush.bf16.msrb.mxu2 %v9954_v14  ;;  %v4072_v54 = vpop.f32.mrf.mxu3  ;;  %v9922_v14 = vor.u32 %v11489_v2, %v9919_v46  ;;  %v10037_v46 = vld [vmem:[#allocation10 + $0x400] sm:$0xf] }
 0x318   :  { %v12271_v12 = vadd.f32 %v4072_v54, %v4060_v40  ;;  %v11549_v40 = vld [vmem:[#allocation10 + $0x4f4] sm:$0xf]  ;;  %v10118_v54 = vor.u32 %v11540_v38, %v10117_v1 }
 0x319   :  { %5303 = vmatpush.bf16.msrb.mxu1 %v9990_v26  ;;  %5325 = vmatpush.bf16.msrb.mxu3 %v10026_v51  ;;  %v4061_v26 = vpop.f32.mrf.mxu2  ;;  %v9911_v51 = vld [vmem:[#allocation10 + $0x308] sm:$0xf0]  ;;  %v11521_v38 = vld [vmem:[#allocation10 + $0x414] sm:$0xf] }
 0x31a   :  { %v11545_v26 = vld [vmem:[#allocation10 + $0x4d4] sm:$0xf] }
 0x31b   :  { %5292 = vmatpush.bf16.msrb.mxu0 %v9910_v28  ;;  %5314 = vmatpush.bf16.msrb.mxu2 %v9946_v44  ;;  %v12273_v13 = vpop.f32.mrf.mxu0  ;;  %v9983_v28 = vld [vmem:[#allocation10 + $0x398] sm:$0xf0]  ;;  %v11544_v44 = vld [vmem:[#allocation10 + $0x4c4] sm:$0xf0] }
 0x31c   :  { %v9986_v42 = vor.u32 %v11505_v24, %v9983_v28  ;;  %v10134_v47 = vor.u32 %v11544_v44, %v10133_v29  ;;  %v10213_v24 = vld [vmem:[#allocation10 + $0x560] sm:$0xf]  ;;  %v11564_v28 = vld [vmem:[#allocation10 + $0x564] sm:$0xf0] }
 0x31d   :  { %5304 = vmatpush.bf16.msrb.mxu1 %v9982_v34  ;;  %5326 = vmatpush.bf16.msrb.mxu3 %v10018_v8  ;;  %v10053_v8 = vld [vmem:[#allocation10 + $0x420] sm:$0xf]  ;;  %v11536_v44 = vld [vmem:[#allocation10 + $0x484] sm:$0xf0]  ;;  %v10214_v48 = vor.u32 %v11564_v28, %v10213_v24  ;;  %v11537_v24 = vld [vmem:[#allocation10 + $0x494] sm:$0xf] }
 0x31e   :  { %5293 = vmatmul.bf16.vlgmr.msrb.gmra.mxu0 %v12264_v3  ;;  %v10101_v29 = vld [vmem:[#allocation10 + $0x480] sm:$0xf] }
 0x31f   :  { %5504 = vmatpush.bf16.msra.mxu0 %v10094_v30  ;;  %5315 = vmatpush.bf16.msrb.mxu2 %v9938_v52  ;;  %v9914_v30 = vor.u32 %v11487_v10, %v9911_v51  ;;  %v4074_v43 = vpop.f32.mrf.mxu3  ;;  %v9975_v52 = vld [vmem:[#allocation10 + $0x388] sm:$0xf0]  ;;  %v10143_v10 = vld [vmem:[#allocation10 + $0x4d8] sm:$0xf0]  ;;  %v10074_v51 = vor.u32 %v11527_v31, %v10071_v45 }
 0x320   :  { %v9978_v60 = vor.u32 %v11503_v11, %v9975_v52  ;;  %v10146_v20 = vor.u32 %v11545_v26, %v10143_v10  ;;  %v10102_v11 = vor.u32 %v11536_v44, %v10101_v29  ;;  %v10055_v52 = vld [vmem:[#allocation10 + $0x428] sm:$0xf0]  ;;  %v11519_v26 = vld [vmem:[#allocation10 + $0x404] sm:$0xf]  ;;  %v10111_v29 = vld [vmem:[#allocation10 + $0x498] sm:$0xf0] }
 0x321   :  { %5305 = vmatpush.bf16.msrb.mxu1 %v9974_v58  ;;  %5327 = vmatpush.bf16.msrb.mxu3 %v10010_v35  ;;  %v12276_v34 = vpop.f32.mrf.mxu1  ;;  %v10159_v58 = vld [vmem:[#allocation10 + $0x4f8] sm:$0xf0]  ;;  %v10054_v35 = vor.u32 %v11524_v41, %v10053_v8  ;;  %v10261_v44 = vld [vmem:[#allocation10 + $0x5c0] sm:$0xf] }
 0x322   :  { %v10162_v37 = vor.u32 %v11549_v40, %v10159_v58  ;;  %v11796_v41 = vld [vmem:[#allocation5 + $0x22] sm:$0x3f]  ;;  %v5339_v40 = vunpack.c.h.b16 %v12224_v39 }
 0x323   :  { %5505 = vmatpush.bf16.msra.mxu0 %v10086_v57  ;;  %5316 = vmatpush.bf16.msrb.mxu2 %v9930_v0  ;;  %v4087_v25 = vpop.f32.mrf.mxu0  ;;  %v11542_v57 = vld [vmem:[#allocation10 + $0x4b4] sm:$0xf0]  ;;  %v11547_v0 = vld [vmem:[#allocation10 + $0x4e4] sm:$0xf]  ;;  %v4143_v1 = vperm.slane %v11796_v41, 5 }
 0x324   :  { %5306 = vmatmul.bf16.vlgmr.msrb.gmra.mxu1 %v12269_v4  ;;  %v10126_v23 = vor.u32 %v11542_v57, %v10125_v55  ;;  %v10205_v55 = vld [vmem:[#allocation10 + $0x550] sm:$0xf]  ;;  %v11562_v57 = vld [vmem:[#allocation10 + $0x554] sm:$0xf0] }
 0x325   :  { %5517 = vmatpush.bf16.msra.mxu1 %v10158_v9  ;;  %5328 = vmatpush.bf16.msrb.mxu3 %v10002_v36  ;;  %v11522_v9 = vld [vmem:[#allocation10 + $0x414] sm:$0xf0]  ;;  %v10206_v63 = vor.u32 %v11562_v57, %v10205_v55  ;;  %v11563_v55 = vld [vmem:[#allocation10 + $0x564] sm:$0xf]  ;;  %v10215_v57 = vld [vmem:[#allocation10 + $0x568] sm:$0xf0] }
 0x326   :  { %v10046_v36 = vor.u32 %v11522_v9, %v10045_v62  ;;  %v11580_v62 = vld [vmem:[#allocation10 + $0x5e4] sm:$0xf0] }
 0x327   :  { %5506 = vmatpush.bf16.msra.mxu0 %v10078_v56  ;;  %5317 = vmatpush.bf16.msrb.mxu2 %v9922_v14  ;;  %v10151_v56 = vld [vmem:[#allocation10 + $0x4e8] sm:$0xf0]  ;;  %v11538_v14 = vld [vmem:[#allocation10 + $0x494] sm:$0xf0] }
 0x328   :  { %v10110_v49 = vor.u32 %v11538_v14, %v10109_v18  ;;  %v11797_v9 = vld [vmem:[#allocation5 + $0x14] sm:$0x3f] }
 0x329   :  { %5518 = vmatpush.bf16.msra.mxu1 %v10150_v5  ;;  %5329 = vmatpush.bf16.msrb.mxu3 %v9994_v16  ;;  %v4100_v2 = vpop.f32.mrf.mxu1  ;;  %v11520_v5 = vld [vmem:[#allocation10 + $0x404] sm:$0xf0]  ;;  %v5338_v16 = vunpack.c.l.b16 %v12224_v39  ;;  %v4186_v50 = vperm.slane %v11797_v9, 4  ;;  %v4187_v45 = vperm.slane %v11797_v9, 5  ;;  %v10287_v9 = vld [vmem:[#allocation10 + $0x5f8] sm:$0xf0] }
 0x32a   :  { %v10197_v2 = vld [vmem:[#allocation10 + $0x540] sm:$0xf] }
 0x32b   :  { %5507 = vmatpush.bf16.msra.mxu0 %v10070_v15  ;;  %5318 = vmatpush.bf16.msrb.mxu2 %v9914_v30  ;;  %v10038_v15 = vor.u32 %v11520_v5, %v10037_v46  ;;  %v11543_v30 = vld [vmem:[#allocation10 + $0x4c4] sm:$0xf]  ;;  %v12281_v8 = vpack.c.b16 %v5338_v16, %v5338_v16  ;;  %v11560_v46 = vld [vmem:[#allocation10 + $0x544] sm:$0xf0]  ;;  %v10119_v5 = vld [vmem:[#allocation10 + $0x4a8] sm:$0xf0] }
 0x32c   :  { %v10198_v14 = vor.u32 %v11560_v46, %v10197_v2  ;;  %v10245_v2 = vld [vmem:[#allocation10 + $0x5a0] sm:$0xf]  ;;  %v11572_v46 = vld [vmem:[#allocation10 + $0x5a4] sm:$0xf0] }
 0x32d   :  { %5519 = vmatpush.bf16.msra.mxu1 %v10142_v19  ;;  %5330 = vmatpush.bf16.msrb.mxu3 %v9986_v42  ;;  %v10063_v19 = vld [vmem:[#allocation10 + $0x438] sm:$0xf0]  ;;  %v4142_v42 = vperm.slane %v11796_v41, 4 }
 0x32e   :  { %5319 = vmatmul.bf16.vlgmr.msrb.gmra.mxu2 %v12264_v3  ;;  %v10154_v3 = vor.u32 %v11547_v0, %v10151_v56  ;;  %v10066_v43 = vor.u32 %v11525_v17, %v10063_v19  ;;  %v11558_v17 = vld [vmem:[#allocation10 + $0x534] sm:$0xf0]  ;;  %v10270_v19 = vor.u32 %v11578_v21, %v10269_v59  ;;  %v11552_v59 = vld [vmem:[#allocation10 + $0x504] sm:$0xf0]  ;;  %v11559_v21 = vld [vmem:[#allocation10 + $0x544] sm:$0xf] }
 0x32f   :  { %5508 = vmatpush.bf16.msra.mxu0 %v10062_v7  ;;  %5530 = vmatpush.bf16.msra.mxu2 %v10098_v33  ;;  %v10135_v7 = vld [vmem:[#allocation10 + $0x4c8] sm:$0xf0]  ;;  %v11582_v33 = vld [vmem:[#allocation10 + $0x5f4] sm:$0xf0]  ;;  %v4170_v39 = vmul.f32 %v4142_v42, %v12271_v12 }
 0x330   :  { %v10138_v25 = vor.u32 %v11543_v30, %v10135_v7  ;;  %v11576_v30 = vld [vmem:[#allocation10 + $0x5c4] sm:$0xf0] }
 0x331   :  { %5520 = vmatpush.bf16.msra.mxu1 %v10134_v47  ;;  %5331 = vmatpush.bf16.msrb.mxu3 %v9978_v60  ;;  %v4111_v47 = vpop.f32.mrf.mxu2  ;;  %v4099_v60 = vadd.f32 %v12276_v34, %v12273_v13  ;;  %v12288_v13 = vpack.c.b16 %v5339_v40, %v5339_v40  ;;  %v4214_v10 = vadd.f32 %v4186_v50, %v4170_v39  ;;  %v11535_v40 = vld [vmem:[#allocation10 + $0x484] sm:$0xf]  ;;  %v11554_v39 = vld [vmem:[#allocation10 + $0x514] sm:$0xf0] }
 0x333   :  { %5509 = vmatpush.bf16.msra.mxu0 %v10054_v35  ;;  %5531 = vmatpush.bf16.msra.mxu2 %v10090_v22  ;;  %v11541_v35 = vld [vmem:[#allocation10 + $0x4b4] sm:$0xf]  ;;  %v10127_v22 = vld [vmem:[#allocation10 + $0x4b8] sm:$0xf0]  ;;  %v4112_v0 = vadd.f32 %v4111_v47, %v4099_v60  ;;  %v10181_v47 = vld [vmem:[#allocation10 + $0x520] sm:$0xf] }
 0x334   :  { %5332 = vmatmul.bf16.vlgmr.msrb.gmra.mxu3 %v12269_v4  ;;  %v10285_v4 = vld [vmem:[#allocation10 + $0x5f0] sm:$0xf]  ;;  %v10130_v56 = vor.u32 %v11541_v35, %v10127_v22  ;;  %v10103_v22 = vld [vmem:[#allocation10 + $0x488] sm:$0xf0] }
 0x335   :  { %5521 = vmatpush.bf16.msra.mxu1 %v10126_v23  ;;  %5543 = vmatpush.bf16.msra.mxu3 %v10162_v37  ;;  %v10286_v58 = vor.u32 %v11582_v33, %v10285_v4  ;;  %v10277_v23 = vld [vmem:[#allocation10 + $0x5e0] sm:$0xf]  ;;  %v10058_v37 = vor.u32 %v11523_v27, %v10055_v52  ;;  %v4228_v4 = vmax.f32 %v4214_v10, 0.0  ;;  %v10262_v52 = vor.u32 %v11576_v30, %v10261_v44  ;;  %v10253_v60 = vld [vmem:[#allocation10 + $0x5b0] sm:$0xf] }
 0x336   :  { %v11570_v10 = vld [vmem:[#allocation10 + $0x594] sm:$0xf0]  ;;  %v11596_v44 = vld [vmem:[#allocation10 + $0x664] sm:$0xf0]  ;;  %v10229_v30 = vld [vmem:[#allocation10 + $0x580] sm:$0xf] }
 0x337   :  { %5510 = vmatpush.bf16.msra.mxu0 %v10046_v36  ;;  %5532 = vmatpush.bf16.msra.mxu2 %v10082_v53  ;;  %v10047_v36 = vld [vmem:[#allocation10 + $0x418] sm:$0xf0]  ;;  %v4124_v34 = vpop.f32.mrf.mxu3  ;;  %v10278_v53 = vor.u32 %v11580_v62, %v10277_v23  ;;  %v11574_v23 = vld [vmem:[#allocation10 + $0x5b4] sm:$0xf0]  ;;  %v11581_v62 = vld [vmem:[#allocation10 + $0x5f4] sm:$0xf] }
 0x338   :  { %v4125_v31 = vadd.f32 %v4124_v34, %v4112_v0  ;;  %v10050_v12 = vor.u32 %v11521_v38, %v10047_v36  ;;  %v10173_v38 = vld [vmem:[#allocation10 + $0x510] sm:$0xf]  ;;  %v11561_v0 = vld [vmem:[#allocation10 + $0x554] sm:$0xf]  ;;  %v10207_v36 = vld [vmem:[#allocation10 + $0x558] sm:$0xf0] }
 0x339   :  { %5522 = vmatpush.bf16.msra.mxu1 %v10118_v54  ;;  %5544 = vmatpush.bf16.msra.mxu3 %v10154_v3  ;;  %v11539_v54 = vld [vmem:[#allocation10 + $0x4a4] sm:$0xf]  ;;  %v4113_v18 = vpop.f32.mrf.mxu2 }
 0x33a   :  { %v10122_v16 = vor.u32 %v11539_v54, %v10119_v5  ;;  %v11579_v34 = vld [vmem:[#allocation10 + $0x5e4] sm:$0xf]  ;;  %v10174_v54 = vor.u32 %v11554_v39, %v10173_v38  ;;  %v10349_v18 = vld [vmem:[#allocation10 + $0x670] sm:$0xf]  ;;  %v10175_v38 = vld [vmem:[#allocation10 + $0x518] sm:$0xf0] }
 0x33b   :  { %5511 = vmatpush.bf16.msra.mxu0 %v10038_v15  ;;  %5533 = vmatpush.bf16.msra.mxu2 %v10074_v51  ;;  %v4637_v3 = vpop.f32.mrf.mxu0  ;;  %v4171_v15 = vmul.f32 %v4143_v1, %v4125_v31  ;;  %v10039_v51 = vld [vmem:[#allocation10 + $0x408] sm:$0xf0]  ;;  %v10254_v1 = vor.u32 %v11574_v23, %v10253_v60  ;;  %v10165_v31 = vld [vmem:[#allocation10 + $0x500] sm:$0xf]  ;;  %v11573_v60 = vld [vmem:[#allocation10 + $0x5b4] sm:$0xf] }
 0x33c   :  { %v10042_v7 = vor.u32 %v11519_v26, %v10039_v51  ;;  %v10237_v26 = vld [vmem:[#allocation10 + $0x590] sm:$0xf]  ;;  %v10166_v51 = vor.u32 %v11552_v59, %v10165_v31  ;;  %v10255_v23 = vld [vmem:[#allocation10 + $0x5b8] sm:$0xf0]  ;;  %v10325_v39 = vld [vmem:[#allocation10 + $0x640] sm:$0xf] }
 0x33d   :  { %5523 = vmatpush.bf16.msra.mxu1 %v10110_v49  ;;  %5545 = vmatpush.bf16.msra.mxu3 %v10146_v20  ;;  %v11565_v49 = vld [vmem:[#allocation10 + $0x574] sm:$0xf]  ;;  %v10223_v20 = vld [vmem:[#allocation10 + $0x578] sm:$0xf0]  ;;  %v4215_v28 = vadd.f32 %v4187_v45, %v4171_v15  ;;  %v10210_v45 = vor.u32 %v11561_v0, %v10207_v36  ;;  %v11592_v36 = vld [vmem:[#allocation10 + $0x644] sm:$0xf0] }
 0x33e   :  { %5512 = vmatmul.bf16.vlgmr.msra.gmra.mxu0 %v12281_v8  ;;  %v10226_v42 = vor.u32 %v11565_v49, %v10223_v20  ;;  %v11577_v15 = vld [vmem:[#allocation10 + $0x5d4] sm:$0xf]  ;;  %v10191_v20 = vld [vmem:[#allocation10 + $0x538] sm:$0xf0] }
 0x33f   :  { %5723 = vmatpush.bf16.msrb.mxu0 %v10222_v32  ;;  %5534 = vmatpush.bf16.msra.mxu2 %v10066_v43  ;;  %v10189_v32 = vld [vmem:[#allocation10 + $0x530] sm:$0xf]  ;;  %v4229_v33 = vmax.f32 %v4215_v28, 0.0  ;;  %v11557_v49 = vld [vmem:[#allocation10 + $0x534] sm:$0xf] }
 0x340   :  { %v10190_v41 = vor.u32 %v11558_v17, %v10189_v32  ;;  %v5557_v32 = vunpack.c.l.b16 %v12259_v61 }
 0x341   :  { %5524 = vmatpush.bf16.msra.mxu1 %v10102_v11  ;;  %5546 = vmatpush.bf16.msra.mxu3 %v10138_v25  ;;  %v4650_v43 = vpop.f32.mrf.mxu1  ;;  %v10114_v11 = vor.u32 %v11537_v24, %v10111_v29  ;;  %v4126_v25 = vpop.f32.mrf.mxu3  ;;  %v10238_v24 = vor.u32 %v11570_v10, %v10237_v26  ;;  %v10341_v29 = vld [vmem:[#allocation10 + $0x660] sm:$0xf]  ;;  %v10351_v26 = vld [vmem:[#allocation10 + $0x678] sm:$0xf0]  ;;  %v11569_v10 = vld [vmem:[#allocation10 + $0x594] sm:$0xf] }
 0x342   :  { %v12291_v27 = vadd.f32 %v4650_v43, %v4637_v3  ;;  %v10246_v3 = vor.u32 %v11572_v46, %v10245_v2  ;;  %v10194_v43 = vor.u32 %v11557_v49, %v10191_v20  ;;  %v11571_v2 = vld [vmem:[#allocation10 + $0x5a4] sm:$0xf]  ;;  %v10247_v46 = vld [vmem:[#allocation10 + $0x5a8] sm:$0xf0]  ;;  %v10309_v20 = vld [vmem:[#allocation10 + $0x620] sm:$0xf] }
 0x343   :  { %5724 = vmatpush.bf16.msrb.mxu0 %v10214_v48  ;;  %5535 = vmatpush.bf16.msra.mxu2 %v10058_v37  ;;  %v11556_v48 = vld [vmem:[#allocation10 + $0x524] sm:$0xf0]  ;;  %v4639_v35 = vpop.f32.mrf.mxu0  ;;  %v10218_v37 = vor.u32 %v11563_v55, %v10215_v57  ;;  %v10183_v55 = vld [vmem:[#allocation10 + $0x528] sm:$0xf0]  ;;  %v10333_v57 = vld [vmem:[#allocation10 + $0x650] sm:$0xf]  ;;  %v10250_v59 = vor.u32 %v11571_v2, %v10247_v46 }
 0x344   :  { %5525 = vmatmul.bf16.vlgmr.msra.gmra.mxu1 %v12288_v13  ;;  %v10182_v50 = vor.u32 %v11556_v48, %v10181_v47  ;;  %v10342_v48 = vor.u32 %v11596_v44, %v10341_v29  ;;  %v11591_v46 = vld [vmem:[#allocation10 + $0x644] sm:$0xf] }
 0x345   :  { %5736 = vmatpush.bf16.msrb.mxu1 %v10286_v58  ;;  %5547 = vmatpush.bf16.msra.mxu3 %v10130_v56  ;;  %v12293_v58 = vpack.c.bf16 %v4229_v33, %v4228_v4  ;;  %v10290_v56 = vor.u32 %v11581_v62, %v10287_v9  ;;  %v11575_v4 = vld [vmem:[#allocation10 + $0x5c4] sm:$0xf]  ;;  %v10263_v33 = vld [vmem:[#allocation10 + $0x5c8] sm:$0xf0]  ;;  %v10405_v62 = vld [vmem:[#allocation10 + $0x6e0] sm:$0xf] }
 0x346   :  { %v10266_v25 = vor.u32 %v11575_v4, %v10263_v33  ;;  %v11612_v9 = vld [vmem:[#allocation10 + $0x6e4] sm:$0xf0]  ;;  %v11567_v4 = vld [vmem:[#allocation10 + $0x584] sm:$0xf] }
 0x347   :  { %5725 = vmatpush.bf16.msrb.mxu0 %v10206_v63  ;;  %5536 = vmatpush.bf16.msra.mxu2 %v10050_v12  ;;  %v10106_v63 = vor.u32 %v11535_v40, %v10103_v22  ;;  %v10199_v12 = vld [vmem:[#allocation10 + $0x548] sm:$0xf0]  ;;  %v5558_v40 = vunpack.c.h.b16 %v12259_v61  ;;  %v11594_v22 = vld [vmem:[#allocation10 + $0x654] sm:$0xf0] }
 0x348   :  { %v10202_v17 = vor.u32 %v11559_v21, %v10199_v12  ;;  %v10167_v21 = vld [vmem:[#allocation10 + $0x508] sm:$0xf0]  ;;  %v10317_v12 = vld [vmem:[#allocation10 + $0x630] sm:$0xf] }
 0x349   :  { %5737 = vmatpush.bf16.msrb.mxu1 %v10278_v53  ;;  %5548 = vmatpush.bf16.msra.mxu3 %v10122_v16  ;;  %v10279_v53 = vld [vmem:[#allocation10 + $0x5e8] sm:$0xf0]  ;;  %v4652_v5 = vpop.f32.mrf.mxu1  ;;  %v10271_v16 = vld [vmem:[#allocation10 + $0x5d8] sm:$0xf0]  ;;  %v12304_v0 = vpack.c.b16 %v5558_v40, %v5558_v40  ;;  %v10301_v40 = vld [vmem:[#allocation10 + $0x610] sm:$0xf] }
 0x34a   :  { %v10274_v28 = vor.u32 %v11577_v15, %v10271_v16  ;;  %v10239_v15 = vld [vmem:[#allocation10 + $0x598] sm:$0xf0]  ;;  %v10389_v16 = vld [vmem:[#allocation10 + $0x6c0] sm:$0xf] }
 0x34b   :  { %5726 = vmatpush.bf16.msrb.mxu0 %v10198_v14  ;;  %5537 = vmatpush.bf16.msra.mxu2 %v10042_v7  ;;  %v11598_v14 = vld [vmem:[#allocation10 + $0x674] sm:$0xf0]  ;;  %v11568_v7 = vld [vmem:[#allocation10 + $0x584] sm:$0xf0] }
 0x34d   :  { %5738 = vmatpush.bf16.msrb.mxu1 %v10270_v19  ;;  %5549 = vmatpush.bf16.msra.mxu3 %v10114_v11  ;;  %v10350_v19 = vor.u32 %v11598_v14, %v10349_v18  ;;  %v10230_v11 = vor.u32 %v11568_v7, %v10229_v30  ;;  %v11597_v14 = vld [vmem:[#allocation10 + $0x674] sm:$0xf]  ;;  %v11595_v30 = vld [vmem:[#allocation10 + $0x664] sm:$0xf]  ;;  %v10343_v7 = vld [vmem:[#allocation10 + $0x668] sm:$0xf0] }
 0x34e   :  { %5538 = vmatmul.bf16.vlgmr.msra.gmra.mxu2 %v12281_v8  ;;  %v10282_v8 = vor.u32 %v11579_v34, %v10279_v53  ;;  %v10397_v53 = vld [vmem:[#allocation10 + $0x6d0] sm:$0xf] }
 0x34f   :  { %5727 = vmatpush.bf16.msrb.mxu0 %v10190_v41  ;;  %5749 = vmatpush.bf16.msrb.mxu2 %v10226_v42  ;;  %v11614_v41 = vld [vmem:[#allocation10 + $0x6f4] sm:$0xf0]  ;;  %v12298_v42 = vpack.c.b16 %v5557_v32, %v5557_v32 }
 0x351   :  { %5739 = vmatpush.bf16.msrb.mxu1 %v10262_v52  ;;  %5550 = vmatpush.bf16.msra.mxu3 %v10106_v63  ;;  %v12300_v47 = vpop.f32.mrf.mxu2  ;;  %v11555_v52 = vld [vmem:[#allocation10 + $0x524] sm:$0xf]  ;;  %v10258_v63 = vor.u32 %v11573_v60, %v10255_v23  ;;  %v10335_v23 = vld [vmem:[#allocation10 + $0x658] sm:$0xf0] }
 0x353   :  { %5728 = vmatpush.bf16.msrb.mxu0 %v10182_v50  ;;  %5750 = vmatpush.bf16.msrb.mxu2 %v10218_v37  ;;  %v10186_v50 = vor.u32 %v11555_v52, %v10183_v55  ;;  %v10334_v37 = vor.u32 %v11594_v22, %v10333_v57  ;;  %v10346_v52 = vor.u32 %v11595_v30, %v10343_v7  ;;  %v11593_v22 = vld [vmem:[#allocation10 + $0x654] sm:$0xf]  ;;  %v10383_v7 = vld [vmem:[#allocation10 + $0x6b8] sm:$0xf0] }
 0x354   :  { %5551 = vmatmul.bf16.vlgmr.msra.gmra.mxu3 %v12288_v13  ;;  %v10413_v13 = vld [vmem:[#allocation10 + $0x6f0] sm:$0xf]  ;;  %v11605_v30 = vld [vmem:[#allocation10 + $0x6b4] sm:$0xf] }
 0x355   :  { %5740 = vmatpush.bf16.msrb.mxu1 %v10254_v1  ;;  %5762 = vmatpush.bf16.msrb.mxu3 %v10290_v56  ;;  %v10414_v35 = vor.u32 %v11614_v41, %v10413_v13  ;;  %v11553_v1 = vld [vmem:[#allocation10 + $0x514] sm:$0xf]  ;;  %v10406_v56 = vor.u32 %v11612_v9, %v10405_v62  ;;  %v10231_v13 = vld [vmem:[#allocation10 + $0x588] sm:$0xf0]  ;;  %v10381_v41 = vld [vmem:[#allocation10 + $0x6b0] sm:$0xf] }
 0x356   :  { %v10178_v5 = vor.u32 %v11553_v1, %v10175_v38  ;;  %v10234_v55 = vor.u32 %v11567_v4, %v10231_v13  ;;  %v10373_v62 = vld [vmem:[#allocation10 + $0x6a0] sm:$0xf]  ;;  %v11604_v9 = vld [vmem:[#allocation10 + $0x6a4] sm:$0xf0]  ;;  %v10338_v38 = vor.u32 %v11593_v22, %v10335_v23  ;;  %v10386_v13 = vor.u32 %v11605_v30, %v10383_v7  ;;  %v11619_v23 = vld [vmem:[%s12778_s8 + $0x20] sm:$0xff] }
 0x357   :  { %5729 = vmatpush.bf16.msrb.mxu0 %v10174_v54  ;;  %5751 = vmatpush.bf16.msrb.mxu2 %v10210_v45  ;;  %v12306_v61 = vpop.f32.mrf.mxu3  ;;  %v11610_v54 = vld [vmem:[#allocation10 + $0x6d4] sm:$0xf0]  ;;  %v11551_v45 = vld [vmem:[#allocation10 + $0x504] sm:$0xf] }
 0x358   :  { %v10398_v18 = vor.u32 %v11610_v54, %v10397_v53  ;;  %v10170_v32 = vor.u32 %v11551_v45, %v10167_v21  ;;  %v10365_v53 = vld [vmem:[#allocation10 + $0x690] sm:$0xf]  ;;  %v11602_v54 = vld [vmem:[#allocation10 + $0x694] sm:$0xf0] }
 0x359   :  { %5741 = vmatpush.bf16.msrb.mxu1 %v10246_v3  ;;  %5763 = vmatpush.bf16.msrb.mxu3 %v10282_v8  ;;  %v4665_v31 = vpop.f32.mrf.mxu2  ;;  %v10326_v3 = vor.u32 %v11592_v36, %v10325_v39  ;;  %v11590_v8 = vld [vmem:[#allocation10 + $0x634] sm:$0xf0]  ;;  %v10374_v39 = vor.u32 %v11604_v9, %v10373_v62  ;;  %v11584_v36 = vld [vmem:[#allocation10 + $0x604] sm:$0xf0]  ;;  %v11622_v21 = vld [vmem:[%s12778_s8 + $0x38] sm:$0xff] }
 0x35a   :  { %v10399_v31 = vld [vmem:[#allocation10 + $0x6d8] sm:$0xf0]  ;;  %v133_v22 = vld [vmem:[%s12774_s4] ss:$4 sm:$0x3] }
 0x35b   :  { %5730 = vmatpush.bf16.msrb.mxu0 %v10166_v51  ;;  %5752 = vmatpush.bf16.msrb.mxu2 %v10202_v17  ;;  %v12308_v34 = vpop.f32.mrf.mxu0  ;;  %v11608_v51 = vld [vmem:[#allocation10 + $0x6c4] sm:$0xf0]  ;;  %v10318_v17 = vor.u32 %v11590_v8, %v10317_v12  ;;  %v10366_v12 = vor.u32 %v11602_v54, %v10365_v53  ;;  %v7468_v4 = vld [vmem:[%s12774_s4 + $0x2] ss:$4 sm:$0x3] }
 0x35c   :  { %v10390_v44 = vor.u32 %v11608_v51, %v10389_v16  ;;  %v11583_v9 = vld [vmem:[#allocation10 + $0x604] sm:$0xf]  ;;  %v11615_v7 = vld [vmem:[%s12778_s8] sm:$0xff] }
 0x35d   :  { %5742 = vmatpush.bf16.msrb.mxu1 %v10238_v24  ;;  %5764 = vmatpush.bf16.msrb.mxu3 %v10274_v28  ;;  %v11588_v24 = vld [vmem:[#allocation10 + $0x624] sm:$0xf0]  ;;  %v10242_v28 = vor.u32 %v11569_v10, %v10239_v15  ;;  %v11607_v15 = vld [vmem:[#allocation10 + $0x6c4] sm:$0xf] }
 0x35e   :  { %5731 = vmatmul.bf16.vlgmr.msrb.gmra.mxu0 %v12298_v42  ;;  %v11600_v10 = vld [vmem:[#allocation10 + $0x684] sm:$0xf0] }
 0x35f   :  { %5942 = vmatpush.bf16.msra.mxu0 %v10350_v19  ;;  %5753 = vmatpush.bf16.msrb.mxu2 %v10194_v43  ;;  %v10354_v19 = vor.u32 %v11597_v14, %v10351_v26  ;;  %v4678_v29 = vpop.f32.mrf.mxu3  ;;  %v11606_v43 = vld [vmem:[#allocation10 + $0x6b4] sm:$0xf0]  ;;  %v10319_v14 = vld [vmem:[#allocation10 + $0x638] sm:$0xf0]  ;;  %v10357_v26 = vld [vmem:[#allocation10 + $0x680] sm:$0xf] }
 0x360   :  { %v10382_v57 = vor.u32 %v11606_v43, %v10381_v41  ;;  %v5777_v29 = vunpack.c.h.b16 %v12293_v58  ;;  %v11585_v41 = vld [vmem:[#allocation10 + $0x614] sm:$0xf]  ;;  %v10303_v43 = vld [vmem:[#allocation10 + $0x618] sm:$0xf0] }
 0x361   :  { %5743 = vmatpush.bf16.msrb.mxu1 %v10230_v11  ;;  %5765 = vmatpush.bf16.msrb.mxu3 %v10266_v25  ;;  %v12311_v49 = vpop.f32.mrf.mxu1  ;;  %v10415_v11 = vld [vmem:[#allocation10 + $0x6f8] sm:$0xf0]  ;;  %v10310_v25 = vor.u32 %v11588_v24, %v10309_v20  ;;  %v11587_v24 = vld [vmem:[#allocation10 + $0x624] sm:$0xf] }
 0x363   :  { %5943 = vmatpush.bf16.msra.mxu0 %v10342_v48  ;;  %5754 = vmatpush.bf16.msrb.mxu2 %v10186_v50  ;;  %v4858_v33 = vpop.f32.mrf.mxu0  ;;  %v11613_v48 = vld [vmem:[#allocation10 + $0x6f4] sm:$0xf]  ;;  %v11611_v50 = vld [vmem:[#allocation10 + $0x6e4] sm:$0xf] }
 0x364   :  { %5744 = vmatmul.bf16.vlgmr.msrb.gmra.mxu1 %v12304_v0  ;;  %v10418_v60 = vor.u32 %v11613_v48, %v10415_v11  ;;  %v12337_v48 = vpack.c.b16 %v5777_v29, %v5777_v29  ;;  %v4677_v11 = vadd.f32 %v12306_v61, %v12300_v47  ;;  %v10306_v47 = vor.u32 %v11585_v41, %v10303_v43  ;;  %v11645_v29 = vld [vmem:[%s12778_s8 + $0xf0] sm:$0xff]  ;;  %v11644_v41 = vld [vmem:[%s12778_s8 + $0xe8] sm:$0xff] }
 0x365   :  { %5955 = vmatpush.bf16.msra.mxu1 %v10414_v35  ;;  %5766 = vmatpush.bf16.msrb.mxu3 %v10258_v63  ;;  %v11586_v35 = vld [vmem:[#allocation10 + $0x614] sm:$0xf0] }
 0x366   :  { %v10302_v63 = vor.u32 %v11586_v35, %v10301_v40  ;;  %v10375_v40 = vld [vmem:[#allocation10 + $0x6a8] sm:$0xf0] }
 0x367   :  { %5944 = vmatpush.bf16.msra.mxu0 %v10334_v37  ;;  %5755 = vmatpush.bf16.msrb.mxu2 %v10178_v5  ;;  %v10407_v37 = vld [vmem:[#allocation10 + $0x6e8] sm:$0xf0]  ;;  %v11609_v5 = vld [vmem:[#allocation10 + $0x6d4] sm:$0xf] }
 0x368   :  { %v10410_v2 = vor.u32 %v11611_v50, %v10407_v37  ;;  %v10402_v8 = vor.u32 %v11609_v5, %v10399_v31  ;;  %v10295_v50 = vld [vmem:[#allocation10 + $0x608] sm:$0xf0] }
 0x369   :  { %5956 = vmatpush.bf16.msra.mxu1 %v10406_v56  ;;  %5767 = vmatpush.bf16.msrb.mxu3 %v10250_v59  ;;  %v4871_v1 = vpop.f32.mrf.mxu1  ;;  %v10293_v56 = vld [vmem:[#allocation10 + $0x600] sm:$0xf] }
 0x36a   :  { %v10294_v45 = vor.u32 %v11584_v36, %v10293_v56  ;;  %v11628_v1 = vld [vmem:[%s12778_s8 + $0x68] sm:$0xff]  ;;  %v6050_v36 = vperm.slane %v133_v22, 0 }
 0x36b   :  { %5945 = vmatpush.bf16.msra.mxu0 %v10326_v3  ;;  %5756 = vmatpush.bf16.msrb.mxu2 %v10170_v32  ;;  %v5776_v3 = vunpack.c.l.b16 %v12293_v58  ;;  %v11620_v58 = vld [vmem:[%s12778_s8 + $0x28] sm:$0xff] }
 0x36d   :  { %5957 = vmatpush.bf16.msra.mxu1 %v10398_v18  ;;  %5768 = vmatpush.bf16.msrb.mxu3 %v10242_v28  ;;  %v11589_v18 = vld [vmem:[#allocation10 + $0x634] sm:$0xf]  ;;  %v12319_v16 = vpack.c.b16 %v5776_v3, %v5776_v3  ;;  %v10311_v28 = vld [vmem:[#allocation10 + $0x628] sm:$0xf0]  ;;  %v11599_v3 = vld [vmem:[#allocation10 + $0x684] sm:$0xf] }
 0x36e   :  { %5757 = vmatmul.bf16.vlgmr.msrb.gmra.mxu2 %v12298_v42  ;;  %v10327_v42 = vld [vmem:[#allocation10 + $0x648] sm:$0xf0]  ;;  %v10322_v51 = vor.u32 %v11589_v18, %v10319_v14  ;;  %v10314_v33 = vor.u32 %v11587_v24, %v10311_v28 }
 0x36f   :  { %5946 = vmatpush.bf16.msra.mxu0 %v10318_v17  ;;  %5968 = vmatpush.bf16.msra.mxu2 %v10354_v19  ;;  %v10330_v59 = vor.u32 %v11591_v46, %v10327_v42  ;;  %v11621_v17 = vld [vmem:[%s12778_s8 + $0x30] sm:$0xff]  ;;  %v10358_v19 = vor.u32 %v11600_v10, %v10357_v26  ;;  %v11618_v46 = vld [vmem:[%s12778_s8 + $0x18] sm:$0xff] }
 0x370   :  { %v11638_v42 = vld [vmem:[%s12778_s8 + $0xb8] sm:$0xff] }
 0x371   :  { %5958 = vmatpush.bf16.msra.mxu1 %v10390_v44  ;;  %5769 = vmatpush.bf16.msrb.mxu3 %v10234_v55  ;;  %v12321_v32 = vpop.f32.mrf.mxu2  ;;  %v11630_v44 = vld [vmem:[%s12778_s8 + $0x78] sm:$0xff]  ;;  %v11629_v55 = vld [vmem:[%s12778_s8 + $0x70] sm:$0xff] }
 0x372   :  { %v11626_v26 = vld [vmem:[%s12778_s8 + $0x58] sm:$0xff] }
 0x373   :  { %5947 = vmatpush.bf16.msra.mxu0 %v10310_v25  ;;  %5969 = vmatpush.bf16.msra.mxu2 %v10346_v52  ;;  %v6002_v25 = vperm.slane %v7468_v4, 1  ;;  %v11646_v10 = vld [vmem:[%s12778_s8 + $0xf8] sm:$0xff] }
 0x374   :  { %5770 = vmatmul.bf16.vlgmr.msrb.gmra.mxu3 %v12304_v0  ;;  %v10391_v0 = vld [vmem:[#allocation10 + $0x6c8] sm:$0xf0] }
 0x375   :  { %5959 = vmatpush.bf16.msra.mxu1 %v10382_v57  ;;  %5981 = vmatpush.bf16.msra.mxu3 %v10418_v60  ;;  %v10394_v20 = vor.u32 %v11607_v15, %v10391_v0  ;;  %v11603_v57 = vld [vmem:[#allocation10 + $0x6a4] sm:$0xf]  ;;  %v6001_v60 = vperm.slane %v7468_v4, 0  ;;  %v6030_v37 = vmul.f32 %v6002_v25, %v4677_v11  ;;  %v11634_v25 = vld [vmem:[%s12778_s8 + $0x98] sm:$0xff] }
 0x376   :  { %v10378_v62 = vor.u32 %v11603_v57, %v10375_v40  ;;  %v11616_v0 = vld [vmem:[%s12778_s8 + $0x8] sm:$0xff]  ;;  %v11623_v40 = vld [vmem:[%s12778_s8 + $0x40] sm:$0xff] }
 0x377   :  { %5948 = vmatpush.bf16.msra.mxu0 %v10302_v63  ;;  %5970 = vmatpush.bf16.msra.mxu2 %v10338_v38  ;;  %v12341_v52 = vpop.f32.mrf.mxu3  ;;  %v6051_v63 = vperm.slane %v133_v22, 1  ;;  %v11601_v38 = vld [vmem:[#allocation10 + $0x694] sm:$0xf]  ;;  %v6029_v56 = vmul.f32 %v6001_v60, %v12291_v27 }
 0x378   :  { %v11627_v27 = vld [vmem:[%s12778_s8 + $0x60] sm:$0xff]  ;;  %v4896_v24 = vadd.f32 %v12341_v52, %v12321_v32  ;;  %v7462_v32 = vld [vmem:[%s12774_s4 + $0x8] ss:$4 sm:$0x3] }
 0x379   :  { %5960 = vmatpush.bf16.msra.mxu1 %v10374_v39  ;;  %5982 = vmatpush.bf16.msra.mxu3 %v10410_v2  ;;  %v4884_v61 = vpop.f32.mrf.mxu2  ;;  %v10367_v39 = vld [vmem:[#allocation10 + $0x698] sm:$0xf0]  ;;  %v10298_v2 = vor.u32 %v11583_v9, %v10295_v50  ;;  %v6079_v54 = vadd.f32 %v6051_v63, %v6030_v37  ;;  %v7470_v9 = vld [vmem:[%s12774_s4 + $0x12] ss:$4 sm:$0x3]  ;;  %v11642_v37 = vld [vmem:[%s12778_s8 + $0xd8] sm:$0xff] }
 0x37a   :  { %v10370_v5 = vor.u32 %v11601_v38, %v10367_v39  ;;  %v11643_v22 = vld [vmem:[%s12778_s8 + $0xe0] sm:$0xff]  ;;  %v11652_v50 = vld [vmem:[%s12778_s8 + $0x128] sm:$0xff]  ;;  %v6006_v38 = vperm.slane %v7470_v9, 1  ;;  %v11661_v39 = vld [vmem:[%s12778_s8 + $0x170] sm:$0xff] }
 0x37b   :  { %5949 = vmatpush.bf16.msra.mxu0 %v10294_v45  ;;  %5971 = vmatpush.bf16.msra.mxu2 %v10330_v59  ;;  %v12346_v35 = vpop.f32.mrf.mxu0  ;;  %v10359_v59 = vld [vmem:[#allocation10 + $0x688] sm:$0xf0]  ;;  %v6093_v18 = vmax.f32 %v6079_v54, 0.0  ;;  %v11632_v54 = vld [vmem:[%s12778_s8 + $0x88] sm:$0xff] }
 0x37c   :  { %v10362_v14 = vor.u32 %v11599_v3, %v10359_v59  ;;  %v11660_v59 = vld [vmem:[%s12778_s8 + $0x168] sm:$0xff] }
 0x37d   :  { %5961 = vmatpush.bf16.msra.mxu1 %v10366_v12  ;;  %5983 = vmatpush.bf16.msra.mxu3 %v10402_v8  ;;  %v11617_v12 = vld [vmem:[%s12778_s8 + $0x10] sm:$0xff] }
 0x37e   :  { %5950 = vmatmul.bf16.vlgmr.msra.gmra.mxu0 %v12319_v16  ;;  %v11637_v8 = vld [vmem:[%s12778_s8 + $0xb0] sm:$0xff] }
 0x37f   :  { %6447 = vmatpush.bf16.msrb.mxu0 %v11622_v21  ;;  %5972 = vmatpush.bf16.msra.mxu2 %v10322_v51  ;;  %v4897_v31 = vpop.f32.mrf.mxu3  ;;  %v6078_v21 = vadd.f32 %v6050_v36, %v6029_v56 }
 0x381   :  { %5962 = vmatpush.bf16.msra.mxu1 %v10358_v19  ;;  %5984 = vmatpush.bf16.msra.mxu3 %v10394_v20  ;;  %v12365_v53 = vpop.f32.mrf.mxu1  ;;  %v6092_v15 = vmax.f32 %v6078_v21, 0.0  ;;  %v7469_v19 = vld [vmem:[%s12774_s4 + $0xa] ss:$4 sm:$0x3]  ;;  %v11625_v20 = vld [vmem:[%s12778_s8 + $0x50] sm:$0xff] }
 0x382   :  { %v6004_v28 = vperm.slane %v7469_v19, 1  ;;  %v6003_v30 = vperm.slane %v7469_v19, 0 }
 0x383   :  { %6448 = vmatpush.bf16.msrb.mxu0 %v11621_v17  ;;  %5973 = vmatpush.bf16.msra.mxu2 %v10314_v33  ;;  %v5077_v45 = vpop.f32.mrf.mxu0  ;;  %v6106_v17 = vpack.c.bf16 %v6093_v18, %v6092_v15  ;;  %v11635_v33 = vld [vmem:[%s12778_s8 + $0xa0] sm:$0xff] }
 0x384   :  { %5963 = vmatmul.bf16.vlgmr.msra.gmra.mxu1 %v12337_v48  ;;  %v11651_v45 = vld [vmem:[%s12778_s8 + $0x120] sm:$0xff] }
 0x385   :  { %6460 = vmatpush.bf16.msrb.mxu1 %v11630_v44  ;;  %5985 = vmatpush.bf16.msra.mxu3 %v10386_v13  ;;  %v4870_v44 = vadd.f32 %v12311_v49, %v12308_v34  ;;  %v6345_v4 = vunpack.c.l.b16 %v6106_v17  ;;  %v11654_v34 = vld [vmem:[%s12778_s8 + $0x138] sm:$0xff]  ;;  %v6032_v49 = vmul.f32 %v6004_v28, %v4896_v24  ;;  %v11624_v13 = vld [vmem:[%s12778_s8 + $0x48] sm:$0xff]  ;;  %v6346_v60 = vunpack.c.h.b16 %v6106_v17  ;;  %v11649_v24 = vld [vmem:[%s12778_s8 + $0x110] sm:$0xff] }
 0x386   :  { %v11670_v17 = vld [vmem:[%s12778_s8 + $0x1b8] sm:$0xff]  ;;  %v11639_v28 = vld [vmem:[%s12778_s8 + $0xc0] sm:$0xff] }
 0x387   :  { %6449 = vmatpush.bf16.msrb.mxu0 %v11620_v58  ;;  %5974 = vmatpush.bf16.msra.mxu2 %v10306_v47  ;;  %v6053_v58 = vperm.slane %v7462_v32, 1  ;;  %v6031_v43 = vmul.f32 %v6003_v30, %v4870_v44  ;;  %v6347_v11 = vpack.c.b16 %v6345_v4, %v6345_v4  ;;  %v11662_v47 = vld [vmem:[%s12778_s8 + $0x178] sm:$0xff]  ;;  %v6348_v63 = vpack.c.b16 %v6346_v60, %v6346_v60  ;;  %v11669_v4 = vld [vmem:[%s12778_s8 + $0x1b0] sm:$0xff] }
 0x388   :  { %v11658_v30 = vld [vmem:[%s12778_s8 + $0x158] sm:$0xff] }
 0x389   :  { %6461 = vmatpush.bf16.msrb.mxu1 %v11629_v55  ;;  %5986 = vmatpush.bf16.msra.mxu3 %v10378_v62  ;;  %v5090_v51 = vpop.f32.mrf.mxu1  ;;  %v11653_v55 = vld [vmem:[%s12778_s8 + $0x130] sm:$0xff]  ;;  %v6081_v57 = vadd.f32 %v6053_v58, %v6032_v49 }
 0x38a   :  { %v11659_v51 = vld [vmem:[%s12778_s8 + $0x160] sm:$0xff] }
 0x38b   :  { %6450 = vmatpush.bf16.msrb.mxu0 %v11619_v23  ;;  %5975 = vmatpush.bf16.msra.mxu2 %v10298_v2  ;;  %v11633_v23 = vld [vmem:[%s12778_s8 + $0x90] sm:$0xff]  ;;  %v6095_v62 = vmax.f32 %v6081_v57, 0.0  ;;  %v11686_v57 = vld [vmem:[%s12778_s8 + $0x238] sm:$0xff] }
 0x38d   :  { %6462 = vmatpush.bf16.msrb.mxu1 %v11628_v1  ;;  %5987 = vmatpush.bf16.msra.mxu3 %v10370_v5 }
 0x38e   :  { %5976 = vmatmul.bf16.vlgmr.msra.gmra.mxu2 %v12319_v16  ;;  %v11636_v16 = vld [vmem:[%s12778_s8 + $0xa8] sm:$0xff] }
 0x38f   :  { %6451 = vmatpush.bf16.msrb.mxu0 %v11618_v46  ;;  %6576 = vmatpush.bf16.msrb.mxu2 %v11638_v42  ;;  %v5089_v46 = vadd.f32 %v12365_v53, %v12346_v35  ;;  %v6005_v42 = vperm.slane %v7470_v9, 0  ;;  %v11641_v35 = vld [vmem:[%s12778_s8 + $0xd0] sm:$0xff] }
 0x391   :  { %6463 = vmatpush.bf16.msrb.mxu1 %v11627_v27  ;;  %5988 = vmatpush.bf16.msra.mxu3 %v10362_v14  ;;  %v5101_v52 = vpop.f32.mrf.mxu2  ;;  %v7463_v27 = vld [vmem:[%s12774_s4 + $0x10] ss:$4 sm:$0x3]  ;;  %v6033_v21 = vmul.f32 %v6005_v42, %v5089_v46  ;;  %v11650_v14 = vld [vmem:[%s12778_s8 + $0x118] sm:$0xff] }
 0x392   :  { %v6055_v3 = vperm.slane %v7463_v27, 1  ;;  %v11665_v46 = vld [vmem:[%s12778_s8 + $0x190] sm:$0xff] }
 0x393   :  { %6452 = vmatpush.bf16.msrb.mxu0 %v11617_v12  ;;  %6577 = vmatpush.bf16.msrb.mxu2 %v11637_v8  ;;  %v6054_v12 = vperm.slane %v7463_v27, 0  ;;  %v11631_v8 = vld [vmem:[%s12778_s8 + $0x80] sm:$0xff]  ;;  %v11693_v42 = vld [vmem:[%s12778_s8 + $0x270] sm:$0xff] }
 0x394   :  { %5989 = vmatmul.bf16.vlgmr.msra.gmra.mxu3 %v12337_v48  ;;  %v6052_v48 = vperm.slane %v7462_v32, 0 }
 0x395   :  { %6464 = vmatpush.bf16.msrb.mxu1 %v11626_v26  ;;  %6589 = vmatpush.bf16.msrb.mxu3 %v11646_v10  ;;  %v11640_v10 = vld [vmem:[%s12778_s8 + $0xc8] sm:$0xff] }
 0x396   :  { %v6080_v61 = vadd.f32 %v6052_v48, %v6031_v43  ;;  %v11668_v43 = vld [vmem:[%s12778_s8 + $0x1a8] sm:$0xff]  ;;  %v11647_v48 = vld [vmem:[%s12778_s8 + $0x100] sm:$0xff] }
 0x397   :  { %6453 = vmatpush.bf16.msrb.mxu0 %v11616_v0  ;;  %6578 = vmatpush.bf16.msrb.mxu2 %v11636_v16  ;;  %v5114_v1 = vpop.f32.mrf.mxu3  ;;  %v6082_v16 = vadd.f32 %v6054_v12, %v6033_v21  ;;  %v11664_v21 = vld [vmem:[%s12778_s8 + $0x188] sm:$0xff] }
 0x398   :  { %v6094_v56 = vmax.f32 %v6080_v61, 0.0  ;;  %v5115_v36 = vadd.f32 %v5114_v1, %v5101_v52  ;;  %v11676_v52 = vld [vmem:[%s12778_s8 + $0x1e8] sm:$0xff]  ;;  %v11675_v61 = vld [vmem:[%s12778_s8 + $0x1e0] sm:$0xff]  ;;  %v11685_v1 = vld [vmem:[%s12778_s8 + $0x230] sm:$0xff] }
 0x399   :  { %6465 = vmatpush.bf16.msrb.mxu1 %v11625_v20  ;;  %6590 = vmatpush.bf16.msrb.mxu3 %v11645_v29  ;;  %v5103_v5 = vpop.f32.mrf.mxu2  ;;  %v6096_v32 = vmax.f32 %v6082_v16, 0.0  ;;  %v11692_v12 = vld [vmem:[%s12778_s8 + $0x268] sm:$0xff]  ;;  %v11691_v16 = vld [vmem:[%s12778_s8 + $0x260] sm:$0xff] }
 0x39a   :  { %v6107_v31 = vpack.c.bf16 %v6095_v62, %v6094_v56  ;;  %v6034_v53 = vmul.f32 %v6006_v38, %v5115_v36  ;;  %v11674_v38 = vld [vmem:[%s12778_s8 + $0x1d8] sm:$0xff]  ;;  %v11684_v5 = vld [vmem:[%s12778_s8 + $0x228] sm:$0xff] }
 0x39b   :  { %6454 = vmatpush.bf16.msrb.mxu0 %v11615_v7  ;;  %6579 = vmatpush.bf16.msrb.mxu2 %v11635_v33  ;;  %v12451_v2 = vpop.f32.mrf.mxu0  ;;  %v11678_v7 = vld [vmem:[%s12778_s8 + $0x1f8] sm:$0xff]  ;;  %v11648_v33 = vld [vmem:[%s12778_s8 + $0x108] sm:$0xff] }
 0x39c   :  { %v6474_v18 = vunpack.c.l.b16 %v6107_v31  ;;  %v6083_v15 = vadd.f32 %v6055_v3, %v6034_v53  ;;  %v6475_v29 = vunpack.c.h.b16 %v6107_v31  ;;  %v11673_v53 = vld [vmem:[%s12778_s8 + $0x1d0] sm:$0xff] }
 0x39d   :  { %6466 = vmatpush.bf16.msrb.mxu1 %v11624_v13  ;;  %6591 = vmatpush.bf16.msrb.mxu3 %v11644_v41  ;;  %v11657_v13 = vld [vmem:[%s12778_s8 + $0x150] sm:$0xff] }
 0x39e   :  { %6455 = vmatmul.bf16.vlgmr.msrb.gmra.mxu0 %v6347_v11  ;;  %v6476_v20 = vpack.c.b16 %v6474_v18, %v6474_v18  ;;  %v6097_v44 = vmax.f32 %v6083_v15, 0.0  ;;  %v6477_v49 = vpack.c.b16 %v6475_v29, %v6475_v29  ;;  %v11677_v41 = vld [vmem:[%s12778_s8 + $0x1f0] sm:$0xff] }
 0x39f   :  { %6705 = vmatpush.bf16.msra.mxu0 %v11654_v34  ;;  %6580 = vmatpush.bf16.msrb.mxu2 %v11634_v25  ;;  %v5116_v0 = vpop.f32.mrf.mxu3  ;;  %v11656_v25 = vld [vmem:[%s12778_s8 + $0x148] sm:$0xff] }
 0x3a0   :  { %v6108_v58 = vpack.c.bf16 %v6097_v44, %v6096_v32  ;;  %v11690_v32 = vld [vmem:[%s12778_s8 + $0x258] sm:$0xff] }
 0x3a1   :  { %6467 = vmatpush.bf16.msrb.mxu1 %v11623_v40  ;;  %6592 = vmatpush.bf16.msrb.mxu3 %v11643_v22  ;;  %v5307_v26 = vpop.f32.mrf.mxu1  ;;  %v7471_v40 = vld [vmem:[%s12774_s4 + $0x1a] ss:$4 sm:$0x3] }
 0x3a2   :  { %v6603_v11 = vunpack.c.l.b16 %v6108_v58  ;;  %v5308_v62 = vadd.f32 %v5307_v26, %v12451_v2  ;;  %v6007_v9 = vperm.slane %v7471_v40, 0  ;;  %v6008_v2 = vperm.slane %v7471_v40, 1  ;;  %v11672_v26 = vld [vmem:[%s12778_s8 + $0x1c8] sm:$0xff] }
 0x3a3   :  { %6706 = vmatpush.bf16.msra.mxu0 %v11653_v55  ;;  %6581 = vmatpush.bf16.msrb.mxu2 %v11633_v23  ;;  %v5296_v19 = vpop.f32.mrf.mxu0  ;;  %v11667_v55 = vld [vmem:[%s12778_s8 + $0x1a0] sm:$0xff]  ;;  %v6604_v23 = vunpack.c.h.b16 %v6108_v58  ;;  %v11708_v40 = vld [vmem:[%s12778_s8 + $0x2e8] sm:$0xff] }
 0x3a4   :  { %6468 = vmatmul.bf16.vlgmr.msrb.gmra.mxu1 %v6348_v63  ;;  %v6605_v22 = vpack.c.b16 %v6603_v11, %v6603_v11  ;;  %v7464_v63 = vld [vmem:[%s12774_s4 + $0x18] ss:$4 sm:$0x3]  ;;  %v6035_v56 = vmul.f32 %v6007_v9, %v5308_v62  ;;  %v11663_v19 = vld [vmem:[%s12778_s8 + $0x180] sm:$0xff]  ;;  %v11680_v11 = vld [vmem:[%s12778_s8 + $0x208] sm:$0xff] }
 0x3a5   :  { %6718 = vmatpush.bf16.msra.mxu1 %v11662_v47  ;;  %6593 = vmatpush.bf16.msrb.mxu3 %v11642_v37  ;;  %v11655_v47 = vld [vmem:[%s12778_s8 + $0x140] sm:$0xff]  ;;  %v11694_v37 = vld [vmem:[%s12778_s8 + $0x278] sm:$0xff]  ;;  %v6056_v36 = vperm.slane %v7464_v63, 0  ;;  %v6057_v27 = vperm.slane %v7464_v63, 1 }
 0x3a6   :  { %v11706_v63 = vld [vmem:[%s12778_s8 + $0x2d8] sm:$0xff] }
 0x3a7   :  { %6707 = vmatpush.bf16.msra.mxu0 %v11652_v50  ;;  %6582 = vmatpush.bf16.msrb.mxu2 %v11632_v54  ;;  %v11666_v50 = vld [vmem:[%s12778_s8 + $0x198] sm:$0xff]  ;;  %v6084_v3 = vadd.f32 %v6056_v36, %v6035_v56 }
 0x3a9   :  { %6719 = vmatpush.bf16.msra.mxu1 %v11661_v39  ;;  %6594 = vmatpush.bf16.msrb.mxu3 %v11641_v35  ;;  %v5309_v34 = vpop.f32.mrf.mxu1  ;;  %v6606_v39 = vpack.c.b16 %v6604_v23, %v6604_v23  ;;  %v6098_v0 = vmax.f32 %v6084_v3, 0.0  ;;  %v11707_v23 = vld [vmem:[%s12778_s8 + $0x2e0] sm:$0xff] }
 0x3aa   :  { %v11702_v34 = vld [vmem:[%s12778_s8 + $0x2b8] sm:$0xff] }
 0x3ab   :  { %6708 = vmatpush.bf16.msra.mxu0 %v11651_v45  ;;  %6583 = vmatpush.bf16.msrb.mxu2 %v11631_v8  ;;  %v11683_v8 = vld [vmem:[%s12778_s8 + $0x220] sm:$0xff] }
 0x3ad   :  { %6720 = vmatpush.bf16.msra.mxu1 %v11660_v59  ;;  %6595 = vmatpush.bf16.msrb.mxu3 %v11640_v10 }
 0x3ae   :  { %6584 = vmatmul.bf16.vlgmr.msrb.gmra.mxu2 %v6476_v20 }
 0x3af   :  { %6709 = vmatpush.bf16.msra.mxu0 %v11650_v14  ;;  %6834 = vmatpush.bf16.msra.mxu2 %v11670_v17  ;;  %v12578_v14 = vld [vmem:[%s12771_s1] sm:$0xff] }
 0x3b0   :  { %vm7249_vm2 = vcmp.eq.s32.totalorder %v12578_v14, 3  ;;  %vm7250_vm3 = vcmp.eq.s32.totalorder %v12578_v14, 4  ;;  %vm7251_vm4 = vcmp.eq.s32.totalorder %v12578_v14, 5  ;;  %vm7252_vm5 = vcmp.eq.s32.totalorder %v12578_v14, 6  ;;  %v11722_v14 = vld [vmem:[%s12778_s8 + $0x358] sm:$0xff] }
 0x3b1   :  { %6721 = vmatpush.bf16.msra.mxu1 %v11659_v51  ;;  %6596 = vmatpush.bf16.msrb.mxu3 %v11639_v28  ;;  %v5320_v60 = vpop.f32.mrf.mxu2  ;;  %v10869_v10 = vsel %vm7249_vm2, 1.0, %v11965_v6  ;;  %v10870_v15 = vsel %vm7250_vm3, 1.0, %v11965_v6  ;;  %v11682_v28 = vld [vmem:[%s12778_s8 + $0x218] sm:$0xff] }
 0x3b2   :  { %v11751_v20 = vpack.i.bf16 %v10870_v15, %v10869_v10  ;;  %v11703_v10 = vld [vmem:[%s12778_s8 + $0x2c0] sm:$0xff] }
 0x3b3   :  { %6710 = vmatpush.bf16.msra.mxu0 %v11649_v24  ;;  %6835 = vmatpush.bf16.msra.mxu2 %v11669_v4 }
 0x3b4   :  { %6597 = vmatmul.bf16.vlgmr.msrb.gmra.mxu3 %v6477_v49  ;;  %11752 = vperm.xlu1 %11750, %v11751_v20   ;;  %v11710_v49 = vld [vmem:[%s12778_s8 + $0x2f8] sm:$0xff]  ;;  %v11717_v20 = vld [vmem:[%s12778_s8 + $0x330] sm:$0xff] }
 0x3b5   :  { %6722 = vmatpush.bf16.msra.mxu1 %v11658_v30  ;;  %6847 = vmatpush.bf16.msra.mxu3 %v11678_v7  ;;  %v11671_v30 = vld [vmem:[%s12778_s8 + $0x1c0] sm:$0xff] }
 0x3b7   :  { %6711 = vmatpush.bf16.msra.mxu0 %v11648_v33  ;;  %6836 = vmatpush.bf16.msra.mxu2 %v11668_v43  ;;  %v5333_v54 = vpop.f32.mrf.mxu3  ;;  %v11681_v33 = vld [vmem:[%s12778_s8 + $0x210] sm:$0xff] }
 0x3b8   :  { %v5334_v31 = vadd.f32 %v5333_v54, %v5320_v60  ;;  %v11699_v60 = vld [vmem:[%s12778_s8 + $0x2a0] sm:$0xff]  ;;  %v11697_v54 = vld [vmem:[%s12778_s8 + $0x290] sm:$0xff] }
 0x3b9   :  { %6723 = vmatpush.bf16.msra.mxu1 %v11657_v13  ;;  %6848 = vmatpush.bf16.msra.mxu3 %v11677_v41  ;;  %v5322_v35 = vpop.f32.mrf.mxu2  ;;  %v11701_v41 = vld [vmem:[%s12778_s8 + $0x2b0] sm:$0xff] }
 0x3ba   :  { %v6036_v59 = vmul.f32 %v6008_v2, %v5334_v31  ;;  %v11696_v35 = vld [vmem:[%s12778_s8 + $0x288] sm:$0xff] }
 0x3bb   :  { %6712 = vmatpush.bf16.msra.mxu0 %v11647_v48  ;;  %6837 = vmatpush.bf16.msra.mxu2 %v11667_v55  ;;  %v12561_v45 = vpop.f32.mrf.mxu0  ;;  %v11689_v48 = vld [vmem:[%s12778_s8 + $0x250] sm:$0xff]  ;;  %v11688_v55 = vld [vmem:[%s12778_s8 + $0x248] sm:$0xff] }
 0x3bc   :  { %v6085_v18 = vadd.f32 %v6057_v27, %v6036_v59 }
 0x3bd   :  { %6724 = vmatpush.bf16.msra.mxu1 %v11656_v25  ;;  %6849 = vmatpush.bf16.msra.mxu3 %v11676_v52  ;;  %v11709_v25 = vld [vmem:[%s12778_s8 + $0x2f0] sm:$0xff]  ;;  %v11700_v52 = vld [vmem:[%s12778_s8 + $0x2a8] sm:$0xff] }
 0x3be   :  { %6713 = vmatmul.bf16.vlgmr.msra.gmra.mxu0 %v6605_v22  ;;  %v6099_v51 = vmax.f32 %v6085_v18, 0.0  ;;  %v7472_v22 = vld [vmem:[%s12774_s4 + $0x22] ss:$4 sm:$0x3] }
 0x3bf   :  { %6963 = vmatpush.bf16.msrb.mxu0 %v11686_v57  ;;  %6838 = vmatpush.bf16.msra.mxu2 %v11666_v50  ;;  %v5335_v24 = vpop.f32.mrf.mxu3  ;;  %v11679_v57 = vld [vmem:[%s12778_s8 + $0x200] sm:$0xff]  ;;  %v6009_v9 = vperm.slane %v7472_v22, 0 }
 0x3c0   :  { %v6109_v29 = vpack.c.bf16 %v6099_v51, %v6098_v0  ;;  %v7465_v50 = vld [vmem:[%s12774_s4 + $0x20] ss:$4 sm:$0x3]  ;;  %v11718_v51 = vld [vmem:[%s12778_s8 + $0x338] sm:$0xff]  ;;  %v11725_v24 = vld [vmem:[%s12778_s8 + $0x370] sm:$0xff] }
 0x3c1   :  { %6725 = vmatpush.bf16.msra.mxu1 %v11655_v47  ;;  %6850 = vmatpush.bf16.msra.mxu3 %v11675_v61  ;;  %v5526_v17 = vpop.f32.mrf.mxu1  ;;  %v11687_v47 = vld [vmem:[%s12778_s8 + $0x240] sm:$0xff]  ;;  %v6059_v2 = vperm.slane %v7465_v50, 1 }
 0x3c2   :  { %v6732_v7 = vunpack.c.l.b16 %v6109_v29  ;;  %v6733_v4 = vunpack.c.h.b16 %v6109_v29  ;;  %v5527_v62 = vadd.f32 %v5526_v17, %v12561_v45  ;;  %v11726_v17 = vld [vmem:[%s12778_s8 + $0x378] sm:$0xff]  ;;  %v11716_v29 = vld [vmem:[%s12778_s8 + $0x328] sm:$0xff] }
 0x3c3   :  { %6964 = vmatpush.bf16.msrb.mxu0 %v11685_v1  ;;  %6839 = vmatpush.bf16.msra.mxu2 %v11665_v46  ;;  %v5515_v44 = vpop.f32.mrf.mxu0 }
 0x3c4   :  { %6726 = vmatmul.bf16.vlgmr.msra.gmra.mxu1 %v6606_v39  ;;  %v6734_v58 = vpack.c.b16 %v6732_v7, %v6732_v7  ;;  %v6735_v13 = vpack.c.b16 %v6733_v4, %v6733_v4  ;;  %v6037_v1 = vmul.f32 %v6009_v9, %v5527_v62  ;;  %v6010_v39 = vperm.slane %v7472_v22, 1  ;;  %v11724_v44 = vld [vmem:[%s12778_s8 + $0x368] sm:$0xff]  ;;  %v11715_v7 = vld [vmem:[%s12778_s8 + $0x320] sm:$0xff]  ;;  %v11721_v22 = vld [vmem:[%s12778_s8 + $0x350] sm:$0xff] }
 0x3c5   :  { %6976 = vmatpush.bf16.msrb.mxu1 %v11694_v37  ;;  %6851 = vmatpush.bf16.msra.mxu3 %v11674_v38  ;;  %v11698_v37 = vld [vmem:[%s12778_s8 + $0x298] sm:$0xff]  ;;  %v6058_v38 = vperm.slane %v7465_v50, 0  ;;  %v11723_v4 = vld [vmem:[%s12778_s8 + $0x360] sm:$0xff]  ;;  %v11712_v62 = vld [vmem:[%s12778_s8 + $0x308] sm:$0xff] }
 0x3c6   :  { %v11720_v9 = vld [vmem:[%s12778_s8 + $0x348] sm:$0xff] }
 0x3c7   :  { %6965 = vmatpush.bf16.msrb.mxu0 %v11684_v5  ;;  %6840 = vmatpush.bf16.msra.mxu2 %v11664_v21  ;;  %v11705_v5 = vld [vmem:[%s12778_s8 + $0x2d0] sm:$0xff]  ;;  %v6086_v31 = vadd.f32 %v6058_v38, %v6037_v1 }
 0x3c9   :  { %6977 = vmatpush.bf16.msrb.mxu1 %v11693_v42  ;;  %6852 = vmatpush.bf16.msra.mxu3 %v11673_v53  ;;  %v5528_v43 = vpop.f32.mrf.mxu1  ;;  %v11704_v53 = vld [vmem:[%s12778_s8 + $0x2c8] sm:$0xff]  ;;  %v6100_v3 = vmax.f32 %v6086_v31, 0.0  ;;  %v7474_v31 = vld [vmem:[%s12774_s4 + $0x32] ss:$4 sm:$0x3] }
 0x3ca   :  { %v11714_v43 = vld [vmem:[%s12778_s8 + $0x318] sm:$0xff] }
 0x3cb   :  { %6966 = vmatpush.bf16.msrb.mxu0 %v11683_v8  ;;  %6841 = vmatpush.bf16.msra.mxu2 %v11663_v19 }
 0x3cd   :  { %6978 = vmatpush.bf16.msrb.mxu1 %v11692_v12  ;;  %6853 = vmatpush.bf16.msra.mxu3 %v11672_v26  ;;  %v11695_v26 = vld [vmem:[%s12778_s8 + $0x280] sm:$0xff] }
 0x3ce   :  { %6842 = vmatmul.bf16.vlgmr.msra.gmra.mxu2 %v6734_v58 }
 0x3cf   :  { %6967 = vmatpush.bf16.msrb.mxu0 %v11682_v28  ;;  %7092 = vmatpush.bf16.msrb.mxu2 %v11702_v34 }
 0x3d1   :  { %6979 = vmatpush.bf16.msrb.mxu1 %v11691_v16  ;;  %6854 = vmatpush.bf16.msra.mxu3 %v11671_v30  ;;  %v5539_v61 = vpop.f32.mrf.mxu2  ;;  %v7473_v30 = vld [vmem:[%s12774_s4 + $0x2a] ss:$4 sm:$0x3] }
 0x3d3   :  { %6968 = vmatpush.bf16.msrb.mxu0 %v11681_v33  ;;  %7093 = vmatpush.bf16.msrb.mxu2 %v11701_v41  ;;  %v10872_v33 = vsel %vm7252_vm5, 1.0, %v11965_v6  ;;  %v7466_v41 = vld [vmem:[%s12774_s4 + $0x28] ss:$4 sm:$0x3] }
 0x3d4   :  { %6855 = vmatmul.bf16.vlgmr.msra.gmra.mxu3 %v6735_v13  ;;  %v6011_v13 = vperm.slane %v7473_v30, 0 }
 0x3d5   :  { %6980 = vmatpush.bf16.msrb.mxu1 %v11690_v32  ;;  %7105 = vmatpush.bf16.msrb.mxu3 %v11710_v49  ;;  %v10871_v32 = vsel %vm7251_vm4, 1.0, %v11965_v6 }
 0x3d6   :  { %v11756_v49 = vpack.i.bf16 %v10872_v33, %v10871_v32 }
 0x3d7   :  { %6969 = vmatpush.bf16.msrb.mxu0 %v11680_v11  ;;  %7094 = vmatpush.bf16.msrb.mxu2 %v11700_v52  ;;  %v5552_v56 = vpop.f32.mrf.mxu3  ;;  %v6012_v11 = vperm.slane %v7473_v30, 1 }
 0x3d8   :  { %v5553_v36 = vadd.f32 %v5552_v56, %v5539_v61  ;;  %11757 = vperm.xlu1 %11750, %v11756_v49   ;;  %v11711_v56 = vld [vmem:[%s12778_s8 + $0x300] sm:$0xff] }
 0x3d9   :  { %6981 = vmatpush.bf16.msrb.mxu1 %v11689_v48  ;;  %7106 = vmatpush.bf16.msrb.mxu3 %v11709_v25  ;;  %v5541_v42 = vpop.f32.mrf.mxu2  ;;  %v6060_v48 = vperm.slane %v7466_v41, 0 }
 0x3da   :  { %v6038_v27 = vmul.f32 %v6010_v39, %v5553_v36  ;;  %v11719_v36 = vld [vmem:[%s12778_s8 + $0x340] sm:$0xff] }
 0x3db   :  { %6970 = vmatpush.bf16.msrb.mxu0 %v11679_v57  ;;  %7095 = vmatpush.bf16.msrb.mxu2 %v11699_v60  ;;  %v5732_v46 = vpop.f32.mrf.mxu0 }
 0x3dc   :  { %v6087_v45 = vadd.f32 %v6059_v2, %v6038_v27 }
 0x3dd   :  { %6982 = vmatpush.bf16.msrb.mxu1 %v11688_v55  ;;  %7107 = vmatpush.bf16.msrb.mxu3 %v11708_v40  ;;  %v6061_v55 = vperm.slane %v7466_v41, 1  ;;  %v11713_v40 = vld [vmem:[%s12778_s8 + $0x310] sm:$0xff]  ;;  %v11762_v41 = vld [vmem:[%s12774_s4 + $0x9] ss:$0 sm:$0xff] }
 0x3de   :  { %v6101_v59 = vmax.f32 %v6087_v45, 0.0 }
 0x3df   :  { %7096 = vmatpush.bf16.msrb.mxu2 %v11698_v37  ;;  %v5554_v12 = vpop.f32.mrf.mxu3  ;;  %7221 = vmatpush.bf16.msra.mxu0 %v11718_v51 }
 0x3e0   :  { %v6110_v8 = vpack.c.bf16 %v6101_v59, %v6100_v3 }
 0x3e1   :  { %6983 = vmatpush.bf16.msrb.mxu1 %v11687_v47  ;;  %7108 = vmatpush.bf16.msrb.mxu3 %v11707_v23  ;;  %v5745_v21 = vpop.f32.mrf.mxu1 }
 0x3e2   :  { %v6861_v15 = vunpack.c.l.b16 %v6110_v8  ;;  %v6862_v0 = vunpack.c.h.b16 %v6110_v8  ;;  %v5746_v58 = vadd.f32 %v5745_v21, %v5732_v46  ;;  %v6014_v21 = vperm.slane %v7474_v31, 1 }
 0x3e3   :  { %7097 = vmatpush.bf16.msrb.mxu2 %v11697_v54  ;;  %v5734_v18 = vpop.f32.mrf.mxu0  ;;  %7222 = vmatpush.bf16.msra.mxu0 %v11717_v20 }
 0x3e4   :  { %v6863_v19 = vpack.c.b16 %v6861_v15, %v6861_v15  ;;  %v6864_v16 = vpack.c.b16 %v6862_v0, %v6862_v0  ;;  %v6039_v6 = vmul.f32 %v6011_v13, %v5746_v58 }
 0x3e5   :  { %7109 = vmatpush.bf16.msrb.mxu3 %v11706_v63  ;;  %7234 = vmatpush.bf16.msra.mxu1 %v11726_v17 }
 0x3e6   :  { %6971 = vmatmul.bf16.vlgmr.msrb.gmra.mxu0 %v6863_v19  ;;  %6984 = vmatmul.bf16.vlgmr.msrb.gmra.mxu1 %v6864_v16  ;;  %v6088_v47 = vadd.f32 %v6060_v48, %v6039_v6 }
 0x3e7   :  { %7098 = vmatpush.bf16.msrb.mxu2 %v11696_v35  ;;  %7223 = vmatpush.bf16.msra.mxu0 %v11716_v29  ;;  %v6013_v35 = vperm.slane %v7474_v31, 0  ;;  %v11747_v31 = vpop.permute.xlu0 %11746 }
 0x3e8   :  { %v6102_v50 = vmax.f32 %v6088_v47, 0.0 }
 0x3e9   :  { %7110 = vmatpush.bf16.msrb.mxu3 %v11705_v5  ;;  %v5747_v28 = vpop.f32.mrf.mxu1  ;;  %7235 = vmatpush.bf16.msra.mxu1 %v11725_v24 }
 0x3eb   :  { %7099 = vmatpush.bf16.msrb.mxu2 %v11695_v26  ;;  %7224 = vmatpush.bf16.msra.mxu0 %v11715_v7 }
 0x3ed   :  { %7111 = vmatpush.bf16.msrb.mxu3 %v11704_v53  ;;  %7236 = vmatpush.bf16.msra.mxu1 %v11724_v44  ;;  %v7467_v53 = vld [vmem:[%s12774_s4 + $0x30] ss:$4 sm:$0x3] }
 0x3ee   :  { %v6062_v59 = vperm.slane %v7467_v53, 0  ;;  %v6063_v18 = vperm.slane %v7467_v53, 1 }
 0x3ef   :  { %7225 = vmatpush.bf16.msra.mxu0 %v11714_v43 }
 0x3f1   :  { %7112 = vmatpush.bf16.msrb.mxu3 %v11703_v10  ;;  %v5758_v34 = vpop.f32.mrf.mxu2  ;;  %7237 = vmatpush.bf16.msra.mxu1 %v11723_v4  ;;  %v11761_v10 = vld [vmem:[%s12774_s4 + $0x1] ss:$0 sm:$0xff] }
 0x3f3   :  { %7226 = vmatpush.bf16.msra.mxu0 %v11713_v40 }
 0x3f5   :  { %7238 = vmatpush.bf16.msra.mxu1 %v11722_v14 }
 0x3f7   :  { %v5771_v25 = vpop.f32.mrf.mxu3  ;;  %7227 = vmatpush.bf16.msra.mxu0 %v11712_v62 }
 0x3f8   :  { %v5772_v52 = vadd.f32 %v5771_v25, %v5758_v34 }
 0x3f9   :  { %v5760_v60 = vpop.f32.mrf.mxu2  ;;  %7239 = vmatpush.bf16.msra.mxu1 %v11721_v22 }
 0x3fa   :  { %v6040_v61 = vmul.f32 %v6012_v11, %v5772_v52  ;;  %v11763_v11 = vld [vmem:[%s12774_s4 + $0x11] ss:$0 sm:$0xff] }
 0x3fb   :  { %v5951_v57 = vpop.f32.mrf.mxu0  ;;  %7228 = vmatpush.bf16.msra.mxu0 %v11711_v56 }
 0x3fc   :  { %v6089_v23 = vadd.f32 %v6061_v55, %v6040_v61 }
 0x3fd   :  { %7240 = vmatpush.bf16.msra.mxu1 %v11720_v9 }
 0x3fe   :  { %v6103_v37 = vmax.f32 %v6089_v23, 0.0 }
 0x3ff   :  { %v5773_v1 = vpop.f32.mrf.mxu3 }
 0x400   :  { %v6111_v38 = vpack.c.bf16 %v6103_v37, %v6102_v50 }
 0x401   :  { %v5964_v63 = vpop.f32.mrf.mxu1  ;;  %7241 = vmatpush.bf16.msra.mxu1 %v11719_v36 }
 0x402   :  { %v6990_v2 = vunpack.c.l.b16 %v6111_v38  ;;  %v6991_v46 = vunpack.c.h.b16 %v6111_v38  ;;  %v5965_v45 = vadd.f32 %v5964_v63, %v5951_v57 }
 0x403   :  { %v5953_v39 = vpop.f32.mrf.mxu0 }
 0x404   :  { %v6992_v42 = vpack.c.b16 %v6990_v2, %v6990_v2  ;;  %v6993_v54 = vpack.c.b16 %v6991_v46, %v6991_v46  ;;  %v6041_v3 = vmul.f32 %v6013_v35, %v5965_v45  ;;  %v11764_v35 = vld [vmem:[%s12774_s4 + $0x19] ss:$0 sm:$0xff] }
 0x406   :  { %7100 = vmatmul.bf16.vlgmr.msrb.gmra.mxu2 %v6992_v42  ;;  %7113 = vmatmul.bf16.vlgmr.msrb.gmra.mxu3 %v6993_v54  ;;  %v6090_v0 = vadd.f32 %v6062_v59, %v6041_v3 }
 0x408   :  { %v6104_v16 = vmax.f32 %v6090_v0, 0.0  ;;  %v11749_v0 = vunpack.i.h.bf16 %v11747_v31 }
 0x409   :  { %v5966_v5 = vpop.f32.mrf.mxu1 }
 0x411   :  { %v5977_v27 = vpop.f32.mrf.mxu2 }
 0x417   :  { %v5990_v12 = vpop.f32.mrf.mxu3 }
 0x418   :  { %v5991_v8 = vadd.f32 %v5990_v12, %v5977_v27  ;;  %v11748_v12 = vunpack.i.l.bf16 %v11747_v31 }
 0x419   :  { %v5979_v15 = vpop.f32.mrf.mxu2 }
 0x41a   :  { %v6042_v51 = vmul.f32 %v6014_v21, %v5991_v8 }
 0x41b   :  { %v6456_v26 = vpop.f32.mrf.mxu0 }
 0x41c   :  { %v6091_v17 = vadd.f32 %v6063_v18, %v6042_v51  ;;  %v6457_v19 = vadd.f32 %v11761_v10, %v6456_v26 }
 0x41e   :  { %v6105_v20 = vmax.f32 %v6091_v17, 0.0 }
 0x41f   :  { %v5992_v29 = vpop.f32.mrf.mxu3 }
 0x420   :  { %v6112_v44 = vpack.c.bf16 %v6105_v20, %v6104_v16 }
 0x421   :  { %v6469_v24 = vpop.f32.mrf.mxu1 }
 0x422   :  { %v6470_v28 = vadd.f32 %v6469_v24, %v6457_v19  ;;  %v7119_v4 = vunpack.c.l.b16 %v6112_v44  ;;  %v7120_v32 = vunpack.c.h.b16 %v6112_v44 }
 0x423   :  { %v6458_v30 = vpop.f32.mrf.mxu0 }
 0x424   :  { %v10873_v7 = vmul.f32 -1.442695, %v6470_v28  ;;  %v7121_v33 = vpack.c.b16 %v7119_v4, %v7119_v4  ;;  %v7122_v34 = vpack.c.b16 %v7120_v32, %v7120_v32 }
 0x426   :  { %11770 = vpow2.f32 %v10873_v7  ;;  %7229 = vmatmul.bf16.vlgmr.msra.gmra.mxu0 %v7121_v33  ;;  %7242 = vmatmul.bf16.vlgmr.msra.gmra.mxu1 %v7122_v34  ;;  %v11753_v20 = vpop.permute.xlu1 %11752 }
 0x427   :  { %v11754_v32 = vunpack.i.l.bf16 %v11753_v20 }
 0x429   :  { %v6471_v49 = vpop.f32.mrf.mxu1 }
 0x42c   :  { %v11771_v58 = vpop.eup %11770 }
 0x42d   :  { %v7283_v13 = vadd.f32 1.0, %v11771_v58 }
 0x42f   :  { %11772 = vrcp.f32 %v7283_v13  ;;  %v7300_v2 = vand.u32 2147483648, %v7283_v13  ;;  %vm7294_vm7 = vweird.f32 %v7283_v13  ;;  %v7298_v42 = vand.u32 2147483647, %v7283_v13 }
 0x431   :  { %v6585_v43 = vpop.f32.mrf.mxu2  ;;  %v7301_v27 = vor.u32 1.1754944e-38, %v7300_v2  ;;  %vm7299_vm10 = vcmp.eq.f32.partialorder %v7298_v42, 8.507059e+37 }
 0x432   :  { %v6586_v14 = vadd.f32 %v11762_v41, %v6585_v43 }
 0x435   :  { %v11773_v57 = vpop.eup %11772 }
 0x436   :  { %v7290_v22 = vmul.f32 %v11773_v57, %v7283_v13  ;;  %vm7295_vm6 = vweird.f32 %v11773_v57 }
 0x437   :  { %v6598_v6 = vpop.f32.mrf.mxu3  ;;  %vm7296_vm8 = vmor %vm7294_vm7, %vm7295_vm6 }
 0x438   :  { %v6599_v48 = vadd.f32 %v6598_v6, %v6586_v14  ;;  %v7291_v50 = vsub.f32 1.0, %v7290_v22 }
 0x439   :  { %v6587_v55 = vpop.f32.mrf.mxu2 }
 0x43a   :  { %v10874_v52 = vmul.f32 -1.442695, %v6599_v48  ;;  %v7292_v63 = vmul.f32 %v11773_v57, %v7291_v50 }
 0x43b   :  { %v6714_v25 = vpop.f32.mrf.mxu0 }
 0x43c   :  { %11774 = vpow2.f32 %v10874_v52  ;;  %v6715_v40 = vadd.f32 %v11763_v11, %v6714_v25  ;;  %v7293_v56 = vadd.f32 %v11773_v57, %v7292_v63  ;;  %v11755_v63 = vunpack.i.h.bf16 %v11753_v20 }
 0x43e   :  { %v7297_v5 = vsel %vm7296_vm8, %v11773_v57, %v7293_v56  ;;  %v11765_v57 = vld [vmem:[%s12774_s4 + $0x21] ss:$0 sm:$0xff] }
 0x43f   :  { %v6600_v61 = vpop.f32.mrf.mxu3  ;;  %v7302_v59 = vsel %vm7299_vm10, %v7301_v27, %v7297_v5 }
 0x440   :  { %v7409_v19 = vmul.f32 %v11748_v12, %v7302_v59 }
 0x441   :  { %v6727_v60 = vpop.f32.mrf.mxu1 }
 0x442   :  { %v6728_v47 = vadd.f32 %v6727_v60, %v6715_v40  ;;  %v11775_v9 = vpop.eup %11774  ;;  %v7416_v33 = vsel %vm7415_vm14, %v7409_v19, 0.0 }
 0x443   :  { %v6716_v62 = vpop.f32.mrf.mxu0  ;;  %v7284_v37 = vadd.f32 1.0, %v11775_v9 }
 0x444   :  { %v10875_v23 = vmul.f32 -1.442695, %v6728_v47 }
 0x445   :  { %v7315_v45 = vand.u32 2147483648, %v7284_v37  ;;  %v7313_v3 = vand.u32 2147483647, %v7284_v37  ;;  %vm7309_vm11 = vweird.f32 %v7284_v37 }
 0x446   :  { %11776 = vpow2.f32 %v10875_v23 }
 0x447   :  { %11778 = vrcp.f32 %v7284_v37  ;;  %v7316_v26 = vor.u32 1.1754944e-38, %v7315_v45  ;;  %vm7314_vm13 = vcmp.eq.f32.partialorder %v7313_v3, 8.507059e+37 }
 0x449   :  { %v6729_v1 = vpop.f32.mrf.mxu1 }
 0x44a   :  { %v11758_v3 = vpop.permute.xlu1 %11757 }
 0x44c   :  { %v11777_v38 = vpop.eup %11776 }
 0x44d   :  { %v7285_v39 = vadd.f32 1.0, %v11777_v38  ;;  %v11779_v36 = vpop.eup %11778 }
 0x44e   :  { %v7305_v46 = vmul.f32 %v11779_v36, %v7284_v37  ;;  %vm7310_vm9 = vweird.f32 %v11779_v36 }
 0x44f   :  { %11780 = vrcp.f32 %v7285_v39  ;;  %vm7311_vm12 = vmor %vm7309_vm11, %vm7310_vm9  ;;  %v7330_v29 = vand.u32 2147483648, %v7285_v39  ;;  %v7328_v4 = vand.u32 2147483647, %v7285_v39  ;;  %vm7324_vm0 = vweird.f32 %v7285_v39 }
 0x450   :  { %v7306_v54 = vsub.f32 1.0, %v7305_v46 }
 0x451   :  { %v6843_v8 = vpop.f32.mrf.mxu2  ;;  %v7331_v13 = vor.u32 1.1754944e-38, %v7330_v29  ;;  %vm7329_vm2 = vcmp.eq.f32.partialorder %v7328_v4, 8.507059e+37 }
 0x452   :  { %v7307_v53 = vmul.f32 %v11779_v36, %v7306_v54  ;;  %v6844_v15 = vadd.f32 %v11764_v35, %v6843_v8  ;;  %v11759_v8 = vunpack.i.l.bf16 %v11758_v3 }
 0x454   :  { %v7308_v18 = vadd.f32 %v11779_v36, %v7307_v53 }
 0x455   :  { %v11781_v21 = vpop.eup %11780 }
 0x456   :  { %v7320_v10 = vmul.f32 %v11781_v21, %v7285_v39  ;;  %v7312_v17 = vsel %vm7311_vm12, %v11779_v36, %v7308_v18  ;;  %vm7325_vm15 = vweird.f32 %v11781_v21 }
 0x457   :  { %v6856_v51 = vpop.f32.mrf.mxu3  ;;  %v7317_v24 = vsel %vm7314_vm13, %v7316_v26, %v7312_v17  ;;  %vm7326_vm1 = vmor %vm7324_vm0, %vm7325_vm15  ;;  %vm7431_vm0 = vcmask 23552  }
 0x458   :  { %v6857_v16 = vadd.f32 %v6856_v51, %v6844_v15  ;;  %v7321_v28 = vsub.f32 1.0, %v7320_v10  ;;  %v7410_v44 = vmul.f32 %v11749_v0, %v7317_v24  ;;  %v11766_v51 = vld [vmem:[%s12774_s4 + $0x29] ss:$0 sm:$0xff] }
 0x459   :  { %v6845_v41 = vpop.f32.mrf.mxu2 }
 0x45a   :  { %v10876_v30 = vmul.f32 -1.442695, %v6857_v16  ;;  %v7322_v7 = vmul.f32 %v11781_v21, %v7321_v28  ;;  %v7417_v34 = vsel %vm7415_vm14, %v7410_v44, 0.0 }
 0x45b   :  { %v7418_v58 = vadd.f32 %v7417_v34, %v7416_v33 }
 0x45c   :  { %11782 = vpow2.f32 %v10876_v30  ;;  %v7323_v49 = vadd.f32 %v11781_v21, %v7322_v7 }
 0x45e   :  { %v7327_v43 = vsel %vm7326_vm1, %v11781_v21, %v7323_v49 }
 0x45f   :  { %v7332_v14 = vsel %vm7329_vm2, %v7331_v13, %v7327_v43  ;;  %v6858_v6 = vpop.f32.mrf.mxu3 }
 0x460   :  { %v7411_v48 = vmul.f32 %v11754_v32, %v7332_v14  ;;  %v11767_v32 = vld [vmem:[%s12774_s4 + $0x31] ss:$0 sm:$0xff]  ;;  %s11967_s4 = smov [#allocation11]  }
 0x461   :  { %s7448_s16 = sshll.u32 %s11967_s4, 4  ;;  %s7449_s16 = int_to_ptr.vmem [resolvable:$true] %s7448_s16 }
 0x462   :  { %v11783_v11 = vpop.eup %11782  ;;  %v7419_v25 = vsel %vm7415_vm14, %v7411_v48, 0.0 }
 0x463   :  { %v7286_v52 = vadd.f32 1.0, %v11783_v11  ;;  %v7420_v55 = vadd.f32 %v7419_v25, %v7418_v58  ;;  %v6972_v60 = vpop.f32.mrf.mxu0  ;;  %v6985_v47 = vpop.f32.mrf.mxu1  ;;  %v11760_v11 = vunpack.i.h.bf16 %v11758_v3 }
 0x464   :  { %v6973_v23 = vadd.f32 %v11765_v57, %v6972_v60 }
 0x465   :  { %11784 = vrcp.f32 %v7286_v52  ;;  %v7345_v62 = vand.u32 2147483648, %v7286_v52  ;;  %v7343_v50 = vand.u32 2147483647, %v7286_v52  ;;  %vm7339_vm4 = vweird.f32 %v7286_v52 }
 0x466   :  { %v6986_v37 = vadd.f32 %v6985_v47, %v6973_v23  ;;  %v11768_v23 = vld [vmem:[#allocation5 + $0x28] ss:$0 sm:$0xff] }
 0x467   :  { %v7346_v39 = vor.u32 1.1754944e-38, %v7345_v62  ;;  %vm7344_vm6 = vcmp.eq.f32.partialorder %v7343_v50, 8.507059e+37  ;;  %v11769_v50 = vld [vmem:[#allocation5 + $0x29] ss:$0 sm:$0xff] }
 0x468   :  { %v10877_v38 = vmul.f32 -1.442695, %v6986_v37 }
 0x46a   :  { %11786 = vpow2.f32 %v10877_v38 }
 0x46b   :  { %v11785_v40 = vpop.eup %11784  ;;  %v6974_v2 = vpop.f32.mrf.mxu0 }
 0x46c   :  { %v7335_v22 = vmul.f32 %v11785_v40, %v7286_v52  ;;  %vm7340_vm3 = vweird.f32 %v11785_v40  ;;  %v6987_v46 = vpop.f32.mrf.mxu1 }
 0x46d   :  { %vm7341_vm5 = vmor %vm7339_vm4, %vm7340_vm3 }
 0x46e   :  { %v7336_v61 = vsub.f32 1.0, %v7335_v22 }
 0x470   :  { %v7337_v9 = vmul.f32 %v11785_v40, %v7336_v61  ;;  %v11787_v31 = vpop.eup %11786 }
 0x471   :  { %v7287_v27 = vadd.f32 1.0, %v11787_v31 }
 0x472   :  { %v7338_v1 = vadd.f32 %v11785_v40, %v7337_v9 }
 0x473   :  { %11788 = vrcp.f32 %v7287_v27  ;;  %v7360_v59 = vand.u32 2147483648, %v7287_v27  ;;  %v7358_v12 = vand.u32 2147483647, %v7287_v27  ;;  %vm7354_vm8 = vweird.f32 %v7287_v27 }
 0x474   :  { %v7342_v56 = vsel %vm7341_vm5, %v11785_v40, %v7338_v1 }
 0x475   :  { %v7347_v36 = vsel %vm7344_vm6, %v7346_v39, %v7342_v56  ;;  %v7361_v26 = vor.u32 1.1754944e-38, %v7360_v59  ;;  %vm7359_vm10 = vcmp.eq.f32.partialorder %v7358_v12, 8.507059e+37 }
 0x476   :  { %v7412_v42 = vmul.f32 %v11755_v63, %v7347_v36 }
 0x478   :  { %v7421_v54 = vsel %vm7415_vm14, %v7412_v42, 0.0 }
 0x479   :  { %v7422_v5 = vadd.f32 %v7421_v54, %v7420_v55  ;;  %v11789_v45 = vpop.eup %11788 }
 0x47a   :  { %v7350_v35 = vmul.f32 %v11789_v45, %v7287_v27  ;;  %vm7355_vm7 = vweird.f32 %v11789_v45 }
 0x47b   :  { %vm7356_vm9 = vmor %vm7354_vm8, %vm7355_vm7 }
 0x47c   :  { %v7351_v53 = vsub.f32 1.0, %v7350_v35 }
 0x47e   :  { %v7352_v21 = vmul.f32 %v11789_v45, %v7351_v53 }
 0x480   :  { %v7353_v18 = vadd.f32 %v11789_v45, %v7352_v21 }
 0x482   :  { %v7357_v10 = vsel %vm7356_vm9, %v11789_v45, %v7353_v18 }
 0x483   :  { %v7362_v15 = vsel %vm7359_vm10, %v7361_v26, %v7357_v10 }
 0x484   :  { %v7413_v0 = vmul.f32 %v11759_v8, %v7362_v15 }
 0x486   :  { %v7423_v17 = vsel %vm7415_vm14, %v7413_v0, 0.0 }
 0x487   :  { %v7424_v19 = vadd.f32 %v7423_v17, %v7422_v5 }
 0x489   :  { %v7101_v16 = vpop.f32.mrf.mxu2  ;;  %v7114_v20 = vpop.f32.mrf.mxu3 }
 0x48a   :  { %v7102_v24 = vadd.f32 %v11766_v51, %v7101_v16 }
 0x48c   :  { %v7115_v28 = vadd.f32 %v7114_v20, %v7102_v24 }
 0x48e   :  { %v10878_v29 = vmul.f32 -1.442695, %v7115_v28 }
 0x490   :  { %11790 = vpow2.f32 %v10878_v29 }
 0x491   :  { %v7103_v44 = vpop.f32.mrf.mxu2  ;;  %v7116_v30 = vpop.f32.mrf.mxu3 }
 0x496   :  { %v11791_v7 = vpop.eup %11790 }
 0x497   :  { %v7288_v4 = vadd.f32 1.0, %v11791_v7 }
 0x499   :  { %11792 = vrcp.f32 %v7288_v4  ;;  %v7375_v43 = vand.u32 2147483648, %v7288_v4  ;;  %v7373_v48 = vand.u32 2147483647, %v7288_v4  ;;  %vm7369_vm12 = vweird.f32 %v7288_v4 }
 0x49b   :  { %v7376_v52 = vor.u32 1.1754944e-38, %v7375_v43  ;;  %vm7374_vm15 = vcmp.eq.f32.partialorder %v7373_v48, 8.507059e+37 }
 0x49f   :  { %v11793_v33 = vpop.eup %11792 }
 0x4a0   :  { %v7365_v34 = vmul.f32 %v11793_v33, %v7288_v4  ;;  %vm7370_vm11 = vweird.f32 %v11793_v33 }
 0x4a1   :  { %vm7371_vm13 = vmor %vm7369_vm12, %vm7370_vm11 }
 0x4a2   :  { %v7366_v13 = vsub.f32 1.0, %v7365_v34 }
 0x4a3   :  { %v7230_v49 = vpop.f32.mrf.mxu0  ;;  %v7243_v58 = vpop.f32.mrf.mxu1 }
 0x4a4   :  { %v7231_v41 = vadd.f32 %v11767_v32, %v7230_v49  ;;  %v7367_v14 = vmul.f32 %v11793_v33, %v7366_v13 }
 0x4a6   :  { %v7244_v6 = vadd.f32 %v7243_v58, %v7231_v41  ;;  %v7368_v25 = vadd.f32 %v11793_v33, %v7367_v14 }
 0x4a8   :  { %7428 = vrot.lane.b32.xlu2 %v7244_v6, %s11966_s15  ;;  %v7372_v55 = vsel %vm7371_vm13, %v11793_v33, %v7368_v25 }
 0x4a9   :  { %v7377_v22 = vsel %vm7374_vm15, %v7376_v52, %v7372_v55 }
 0x4aa   :  { %v7414_v60 = vmul.f32 %v11760_v11, %v7377_v22 }
 0x4ab   :  { %v7232_v57 = vpop.f32.mrf.mxu0  ;;  %v7245_v40 = vpop.f32.mrf.mxu1 }
 0x4ac   :  { %v7425_v47 = vsel %vm7415_vm14, %v7414_v60, 0.0 }
 0x4ad   :  { %v7426_v61 = vadd.f32 %v7425_v47, %v7424_v19 }
 0x502   :  { %v7429_v62 = vpop.permute.xlu2 %7428 }
 0x503   :  { %v7432_v9 = vsel %vm7431_vm0, %v7426_v61, %v7429_v62 }
 0x504   :  { %v7433_v37 = vsel %vm7415_vm14, %v7432_v9, 0.0 }
 0x505   :  { %v7437_v63 = vmul.f32 %v11768_v23, %v7433_v37 }
 0x507   :  { %v7441_v1 = vadd.f32 %v11769_v50, %v7437_v63 }
 0x509   :  { %7442 = vst [vmem:[#allocation11] sm:$0xff] %v7441_v1 }
 0x50a   :  { %7453 = dma.vmem_to_hbm [thread:$0]  %s7449_s16, 128, %s7451_s17, [#allocation4]  }
 0x50b   :  { %11949 = dma.done.wait [#allocation4], 128  }
 0x50c   :  { %11950 = vsyncadd [#allocation4], 4294967168 }
 0x50d   :  { %7458 = vsyncpa [#allocation3], 1 }
 0x50e   :  { %7459 = vsyncpa [#allocation6], 1 }
 0x50f   :  { %7460 = vsyncpa [#allocation9], 1 }
 0x510   :  { %7461 = vsyncpa [#allocation4], 1 }

</bundles_post_ra>
